<compile_context>
chip_gen: v7x
topology: tpu7x:2x2x1
jax: 0.10.0
libtpu: 0.0.40
codegen_flags: <defaults>
</compile_context>

<pallas_src>
import jax
import jax.numpy as jnp
from jax.experimental import pallas as pl
from jax.experimental.pallas import tpu as pltpu


def _round_up(n, m):
    return ((n + m - 1) // m) * m


def _tile_rows(M, max_single=512, candidates=(512, 448, 384, 320, 256, 192, 128)):
    """Pick a row tile (mult. of 8) minimizing pad waste; single step if small."""
    Mp16 = _round_up(M, 16)
    if Mp16 <= max_single:
        return Mp16, Mp16                      # one grid step, no extra padding
    best_tm, best_mp, best_waste = None, None, None
    for tm in candidates:
        Mp = _round_up(M, tm)
        waste = Mp - M
        if best_waste is None or waste < best_waste:
            best_tm, best_mp, best_waste = tm, Mp, waste
    return best_tm, best_mp


# ---------------------------------------------------------------------------
# Fused Conv3x3(valid, no bias) + BatchNorm(eval, scale folded into W) + ReLU
#   one (TM, 9*Ci) x (9*Ci, Co) matmul per grid step
# ---------------------------------------------------------------------------
def _conv_bn_relu_kernel(p_ref, w_ref, b_ref, o_ref):
    # p_ref: (TM, K) bf16   im2col patches (K = 9*Ci)
    # w_ref: (K, Co) bf16   conv weights with BN scale folded in
    # b_ref: (1, Co) f32    folded BN bias
    # o_ref: (TM, Co) bf16
    acc = jnp.dot(p_ref[...], w_ref[...], preferred_element_type=jnp.float32)
    o_ref[...] = jnp.maximum(acc + b_ref[...], 0.0).astype(o_ref.dtype)


def _im2col(x):
    """x: (B, H, W, Ci) -> patches (B*Ho*Wo, 9*Ci); tap order k = dy*3 + dx."""
    B, H, W, Ci = x.shape
    Ho, Wo = H - 2, W - 2
    cols = []
    for dy in range(3):
        for dx in range(3):
            cols.append(x[:, dy:dy + Ho, dx:dx + Wo, :])
    p = jnp.concatenate(cols, axis=-1)              # (B, Ho, Wo, 9*Ci)
    return p.reshape(B * Ho * Wo, 9 * Ci), (Ho, Wo)


def conv_bn_relu(x, w, bias):
    """x: (B, H, W, Ci) bf16 NHWC -> (B, H-2, W-2, Co) bf16."""
    B = x.shape[0]
    K, Co = w.shape
    p, (Ho, Wo) = _im2col(x)                        # (M, K) bf16
    M = B * Ho * Wo

    tm, Mp = _tile_rows(M)
    if Mp != M:
        p = jnp.pad(p, ((0, Mp - M), (0, 0)))

    out = pl.pallas_call(
        _conv_bn_relu_kernel,
        out_shape=jax.ShapeDtypeStruct((Mp, Co), jnp.bfloat16),
        grid_spec=pltpu.PrefetchScalarGridSpec(
            num_scalar_prefetch=0,
            grid=(Mp // tm,),
            in_specs=[
                pl.BlockSpec((tm, K), lambda i: (i, 0)),   # patches (row-tiled)
                pl.BlockSpec((K, Co), lambda i: (0, 0)),   # weights (resident)
                pl.BlockSpec((1, Co), lambda i: (0, 0)),   # BN bias (resident)
            ],
            out_specs=pl.BlockSpec((tm, Co), lambda i: (i, 0)),
        ),
        compiler_params=pltpu.CompilerParams(
            dimension_semantics=("parallel",)),
    )(p, w, bias)
    return out[:M].reshape(B, Ho, Wo, Co)


# ---------------------------------------------------------------------------
# MaxPool2d(2, 2) — pure data-movement reduction, kept in plain JAX (glue).
# ---------------------------------------------------------------------------
def maxpool2(x):
    B, H, W, C = x.shape
    return x.reshape(B, H // 2, 2, W // 2, 2, C).max(axis=(2, 4))


# ---------------------------------------------------------------------------
# fc1 -> fc2 (no activation in between, matching the module), row-tiled,
# weights resident, fc2 N padded to 128 for lane-dense stores.
# ---------------------------------------------------------------------------
def _mlp_kernel(x_ref, w1_ref, b1_ref, w2_ref, b2_ref, o_ref):
    h = jnp.dot(x_ref[...], w1_ref[...],
                preferred_element_type=jnp.float32) + b1_ref[...]
    o_ref[...] = (jnp.dot(h.astype(w2_ref.dtype), w2_ref[...],
                          preferred_element_type=jnp.float32)
                  + b2_ref[...]).astype(o_ref.dtype)


def mlp(x, w1t, b1, w2t, b2):
    M, K = x.shape
    H = w1t.shape[1]
    N = w2t.shape[1]

    tm, Mp = _tile_rows(M)
    if Mp != M:
        x = jnp.pad(x, ((0, Mp - M), (0, 0)))

    out = pl.pallas_call(
        _mlp_kernel,
        out_shape=jax.ShapeDtypeStruct((Mp, N), jnp.float32),
        grid_spec=pltpu.PrefetchScalarGridSpec(
            num_scalar_prefetch=0,
            grid=(Mp // tm,),
            in_specs=[
                pl.BlockSpec((tm, K), lambda i: (i, 0)),   # features (row-tiled)
                pl.BlockSpec((K, H), lambda i: (0, 0)),    # w1 (resident, 4 MiB bf16)
                pl.BlockSpec((1, H), lambda i: (0, 0)),    # b1
                pl.BlockSpec((H, N), lambda i: (0, 0)),    # w2 (padded N=128)
                pl.BlockSpec((1, N), lambda i: (0, 0)),    # b2 (padded)
            ],
            out_specs=pl.BlockSpec((tm, N), lambda i: (i, 0)),
        ),
        compiler_params=pltpu.CompilerParams(
            dimension_semantics=("parallel",),
            vmem_limit_bytes=32 * 1024 * 1024),   # headroom for resident fc1 weight
    )(x, w1t, b1, w2t, b2)
    return out[:M]


# ---------------------------------------------------------------------------
# Deterministic parameter init (PyTorch layouts, converted for the kernels)
# ---------------------------------------------------------------------------
def init_params(key):
    keys = iter(jax.random.split(key, 24))

    def conv_bn_layer(co, ci):
        kw = next(keys)
        kg, kb, km, kv = next(keys), next(keys), next(keys), next(keys)
        # PyTorch conv layout (Co, Ci, 3, 3)
        w = jax.random.normal(kw, (co, ci, 3, 3), jnp.float32) * (1.0 / (9.0 * ci) ** 0.5)
        gamma = 1.0 + 0.1 * jax.random.normal(kg, (co,), jnp.float32)
        beta = 0.1 * jax.random.normal(kb, (co,), jnp.float32)
        mean = 0.05 * jax.random.normal(km, (co,), jnp.float32)
        var = 0.5 + jax.random.uniform(kv, (co,), jnp.float32)
        scale = gamma / jnp.sqrt(var + 1e-5)
        bias = beta - mean * scale
        # Fold BN scale into the conv weight: y = P @ (W * s) + b, then ReLU.
        w = w * scale[:, None, None, None]
        # (Co, Ci, 3, 3) -> (9*Ci, Co), row index = (dy*3 + dx)*Ci + ci
        w_mat = jnp.transpose(w, (2, 3, 1, 0)).reshape(9 * ci, co).astype(jnp.bfloat16)
        return w_mat, bias.reshape(1, co).astype(jnp.float32)

    p = {}
    p["c1_w"], p["c1_b"] = conv_bn_layer(16, 3)
    p["c2_w"], p["c2_b"] = conv_bn_layer(32, 16)
    p["c3_w"], p["c3_b"] = conv_bn_layer(128, 32)
    p["c4_w"], p["c4_b"] = conv_bn_layer(256, 128)

    k1, k2, k3, k4 = next(keys), next(keys), next(keys), next(keys)
    # fc1: PyTorch weight (512, 4096) indexed by NCHW flatten (c*16 + h*4 + w).
    # Fold the NCHW permutation into the weight so the kernel consumes the
    # NHWC-flattened activation directly (no runtime transpose).
    w1 = jax.random.normal(k1, (512, 4096), jnp.float32) * (1.0 / 4096.0 ** 0.5)
    w1t_nhwc = jnp.transpose(w1.reshape(512, 256, 4, 4), (2, 3, 1, 0)).reshape(4096, 512)
    p["w1t"] = w1t_nhwc.astype(jnp.bfloat16)
    p["b1"] = (0.01 * jax.random.normal(k2, (512,), jnp.float32)).reshape(1, 512)

    # fc2: pad N 10 -> 128 for lane-dense (unmasked) stores; slice outside.
    w2 = jax.random.normal(k3, (10, 512), jnp.float32) * (1.0 / 512.0 ** 0.5)
    b2 = 0.01 * jax.random.normal(k4, (10,), jnp.float32)
    p["w2t"] = jnp.zeros((512, 128), jnp.float32).at[:, :10].set(w2.T).astype(jnp.bfloat16)
    p["b2"] = jnp.zeros((1, 128), jnp.float32).at[0, :10].set(b2)
    return p


# ---------------------------------------------------------------------------
# Full forward pass (input is NCHW like the PyTorch module)
# ---------------------------------------------------------------------------
@jax.jit
def forward(params, x_nchw):
    x = jnp.transpose(x_nchw, (0, 2, 3, 1)).astype(jnp.bfloat16)   # NCHW -> NHWC
    x = conv_bn_relu(x, params["c1_w"], params["c1_b"])            # (B,30,30,16)
    x = conv_bn_relu(x, params["c2_w"], params["c2_b"])            # (B,28,28,32)
    x = maxpool2(x)                                                # (B,14,14,32)
    x = conv_bn_relu(x, params["c3_w"], params["c3_b"])            # (B,12,12,128)
    x = maxpool2(x)                                                # (B,6,6,128)
    x = conv_bn_relu(x, params["c4_w"], params["c4_b"])            # (B,4,4,256)
    B = x.shape[0]
    feat = x.reshape(B, -1)      # NHWC flatten; NCHW permutation folded into w1t
    logits = mlp(feat, params["w1t"], params["b1"], params["w2t"], params["b2"])
    return logits[:, :10]


if __name__ == "__main__":
    key = jax.random.PRNGKey(0)
    kx, kp = jax.random.split(key)
    # fc1 hardwires 256*4*4 features, which forces a 32x32 spatial input.
    x = jax.random.normal(kx, (2, 3, 32, 32), jnp.float32)  # NCHW, batch=2
    params = init_params(kp)
    out = forward(params, x)
    jax.block_until_ready(out)
    assert out.shape == (2, 10) and out.dtype == jnp.float32
    print("KERNEL_OK")
</pallas_src>

<mosaic_0001>
module attributes {stable_mosaic.version = 11 : i64} {
  func.func @_conv_bn_relu_kernel(%arg0: i32, %arg1: memref<384x27xbf16, #tpu.memory_space<vmem>>, %arg2: memref<27x16xbf16, #tpu.memory_space<vmem>>, %arg3: memref<1x16xf32, #tpu.memory_space<vmem>>, %arg4: memref<384x16xbf16, #tpu.memory_space<vmem>>) attributes {dimension_semantics = [#tpu.dimension_semantics<parallel>], iteration_bounds = array<i64: 5>, scalar_prefetch = 0 : i64, scratch_operands = 0 : i64, tpu.core_type = #tpu.core_type<tc>, window_params = [{transform_indices = @transform_0, window_bounds = array<i64: 384, 27>}, {pipeline_mode = #tpu.pipeline_mode<synchronous>, transform_indices = @transform_1, window_bounds = array<i64: 27, 16>}, {pipeline_mode = #tpu.pipeline_mode<synchronous>, transform_indices = @transform_2, window_bounds = array<i64: 1, 16>}, {transform_indices = @transform_3, window_bounds = array<i64: 384, 16>}]} {
    %c0 = arith.constant 0 : index
    %c0_0 = arith.constant 0 : index
    %0 = vector.load %arg1[%c0, %c0_0] : memref<384x27xbf16, #tpu.memory_space<vmem>>, vector<384x27xbf16>
    %c0_1 = arith.constant 0 : index
    %c0_2 = arith.constant 0 : index
    %1 = vector.load %arg2[%c0_1, %c0_2] : memref<27x16xbf16, #tpu.memory_space<vmem>>, vector<27x16xbf16>
    %cst = arith.constant dense<0.000000e+00> : vector<384x16xf32>
    %2 = tpu.matmul %0, %1, %cst {dimension_numbers = #tpu.dot_dimension_numbers<[1], [0], [0], [1], [0, 0, 1, 1], [], []>} : vector<384x27xbf16>, vector<27x16xbf16>, vector<384x16xf32> -> vector<384x16xf32>
    %c0_3 = arith.constant 0 : index
    %c0_4 = arith.constant 0 : index
    %3 = vector.load %arg3[%c0_3, %c0_4] : memref<1x16xf32, #tpu.memory_space<vmem>>, vector<1x16xf32>
    %4 = vector.broadcast %3 : vector<1x16xf32> to vector<384x16xf32>
    %5 = arith.addf %2, %4 : vector<384x16xf32>
    %cst_5 = arith.constant 0.000000e+00 : f32
    %6 = vector.broadcast %cst_5 : f32 to vector<384x16xf32>
    %7 = arith.maximumf %5, %6 : vector<384x16xf32>
    %8 = arith.truncf %7 : vector<384x16xf32> to vector<384x16xbf16>
    %c0_6 = arith.constant 0 : index
    %c0_7 = arith.constant 0 : index
    %9 = vector.load %arg4[%c0_6, %c0_7] : memref<384x16xbf16, #tpu.memory_space<vmem>>, vector<384x16xbf16>
    tpu.vector_store %arg4[%c0_6, %c0_7], %8 {strides = array<i32>} : memref<384x16xbf16, #tpu.memory_space<vmem>>, vector<384x16xbf16>,
    return
  }
  func.func @transform_0(%arg0: i32) -> (i32, i32) {
    %c0_i32 = arith.constant 0 : i32
    %c0_i32_0 = arith.constant 0 : i32
    return %arg0, %c0_i32 : i32, i32
  }
  func.func @transform_1(%arg0: i32) -> (i32, i32) {
    %c0_i32 = arith.constant 0 : i32
    %c0_i32_0 = arith.constant 0 : i32
    %c0_i32_1 = arith.constant 0 : i32
    return %c0_i32, %c0_i32_0 : i32, i32
  }
  func.func @transform_2(%arg0: i32) -> (i32, i32) {
    %c0_i32 = arith.constant 0 : i32
    %c0_i32_0 = arith.constant 0 : i32
    %c0_i32_1 = arith.constant 0 : i32
    return %c0_i32, %c0_i32_0 : i32, i32
  }
  func.func @transform_3(%arg0: i32) -> (i32, i32) {
    %c0_i32 = arith.constant 0 : i32
    %c0_i32_0 = arith.constant 0 : i32
    return %arg0, %c0_i32 : i32, i32
  }
}

module attributes {stable_mosaic.version = 11 : i64} {
  func.func @_conv_bn_relu_kernel(%arg0: i32, %arg1: memref<320x144xbf16, #tpu.memory_space<vmem>>, %arg2: memref<144x32xbf16, #tpu.memory_space<vmem>>, %arg3: memref<1x32xf32, #tpu.memory_space<vmem>>, %arg4: memref<320x32xbf16, #tpu.memory_space<vmem>>) attributes {dimension_semantics = [#tpu.dimension_semantics<parallel>], iteration_bounds = array<i64: 5>, scalar_prefetch = 0 : i64, scratch_operands = 0 : i64, tpu.core_type = #tpu.core_type<tc>, window_params = [{transform_indices = @transform_0, window_bounds = array<i64: 320, 144>}, {pipeline_mode = #tpu.pipeline_mode<synchronous>, transform_indices = @transform_1, window_bounds = array<i64: 144, 32>}, {pipeline_mode = #tpu.pipeline_mode<synchronous>, transform_indices = @transform_2, window_bounds = array<i64: 1, 32>}, {transform_indices = @transform_3, window_bounds = array<i64: 320, 32>}]} {
    %c0 = arith.constant 0 : index
    %c0_0 = arith.constant 0 : index
    %0 = vector.load %arg1[%c0, %c0_0] : memref<320x144xbf16, #tpu.memory_space<vmem>>, vector<320x144xbf16>
    %c0_1 = arith.constant 0 : index
    %c0_2 = arith.constant 0 : index
    %1 = vector.load %arg2[%c0_1, %c0_2] : memref<144x32xbf16, #tpu.memory_space<vmem>>, vector<144x32xbf16>
    %cst = arith.constant dense<0.000000e+00> : vector<320x32xf32>
    %2 = tpu.matmul %0, %1, %cst {dimension_numbers = #tpu.dot_dimension_numbers<[1], [0], [0], [1], [0, 0, 1, 1], [], []>} : vector<320x144xbf16>, vector<144x32xbf16>, vector<320x32xf32> -> vector<320x32xf32>
    %c0_3 = arith.constant 0 : index
    %c0_4 = arith.constant 0 : index
    %3 = vector.load %arg3[%c0_3, %c0_4] : memref<1x32xf32, #tpu.memory_space<vmem>>, vector<1x32xf32>
    %4 = vector.broadcast %3 : vector<1x32xf32> to vector<320x32xf32>
    %5 = arith.addf %2, %4 : vector<320x32xf32>
    %cst_5 = arith.constant 0.000000e+00 : f32
    %6 = vector.broadcast %cst_5 : f32 to vector<320x32xf32>
    %7 = arith.maximumf %5, %6 : vector<320x32xf32>
    %8 = arith.truncf %7 : vector<320x32xf32> to vector<320x32xbf16>
    %c0_6 = arith.constant 0 : index
    %c0_7 = arith.constant 0 : index
    %9 = vector.load %arg4[%c0_6, %c0_7] : memref<320x32xbf16, #tpu.memory_space<vmem>>, vector<320x32xbf16>
    tpu.vector_store %arg4[%c0_6, %c0_7], %8 {strides = array<i32>} : memref<320x32xbf16, #tpu.memory_space<vmem>>, vector<320x32xbf16>,
    return
  }
  func.func @transform_0(%arg0: i32) -> (i32, i32) {
    %c0_i32 = arith.constant 0 : i32
    %c0_i32_0 = arith.constant 0 : i32
    return %arg0, %c0_i32 : i32, i32
  }
  func.func @transform_1(%arg0: i32) -> (i32, i32) {
    %c0_i32 = arith.constant 0 : i32
    %c0_i32_0 = arith.constant 0 : i32
    %c0_i32_1 = arith.constant 0 : i32
    return %c0_i32, %c0_i32_0 : i32, i32
  }
  func.func @transform_2(%arg0: i32) -> (i32, i32) {
    %c0_i32 = arith.constant 0 : i32
    %c0_i32_0 = arith.constant 0 : i32
    %c0_i32_1 = arith.constant 0 : i32
    return %c0_i32, %c0_i32_0 : i32, i32
  }
  func.func @transform_3(%arg0: i32) -> (i32, i32) {
    %c0_i32 = arith.constant 0 : i32
    %c0_i32_0 = arith.constant 0 : i32
    return %arg0, %c0_i32 : i32, i32
  }
}

module attributes {stable_mosaic.version = 11 : i64} {
  func.func @_conv_bn_relu_kernel(%arg0: i32, %arg1: memref<288x288xbf16, #tpu.memory_space<vmem>>, %arg2: memref<288x128xbf16, #tpu.memory_space<vmem>>, %arg3: memref<1x128xf32, #tpu.memory_space<vmem>>, %arg4: memref<288x128xbf16, #tpu.memory_space<vmem>>) attributes {dimension_semantics = [#tpu.dimension_semantics<parallel>], iteration_bounds = array<i64: 1>, scalar_prefetch = 0 : i64, scratch_operands = 0 : i64, tpu.core_type = #tpu.core_type<tc>, window_params = [{transform_indices = @transform_0, window_bounds = array<i64: 288, 288>}, {pipeline_mode = #tpu.pipeline_mode<synchronous>, transform_indices = @transform_1, window_bounds = array<i64: 288, 128>}, {pipeline_mode = #tpu.pipeline_mode<synchronous>, transform_indices = @transform_2, window_bounds = array<i64: 1, 128>}, {transform_indices = @transform_3, window_bounds = array<i64: 288, 128>}]} {
    %c0 = arith.constant 0 : index
    %c0_0 = arith.constant 0 : index
    %0 = vector.load %arg1[%c0, %c0_0] : memref<288x288xbf16, #tpu.memory_space<vmem>>, vector<288x288xbf16>
    %c0_1 = arith.constant 0 : index
    %c0_2 = arith.constant 0 : index
    %1 = vector.load %arg2[%c0_1, %c0_2] : memref<288x128xbf16, #tpu.memory_space<vmem>>, vector<288x128xbf16>
    %cst = arith.constant dense<0.000000e+00> : vector<288x128xf32>
    %2 = tpu.matmul %0, %1, %cst {dimension_numbers = #tpu.dot_dimension_numbers<[1], [0], [0], [1], [0, 0, 1, 1], [], []>} : vector<288x288xbf16>, vector<288x128xbf16>, vector<288x128xf32> -> vector<288x128xf32>
    %c0_3 = arith.constant 0 : index
    %c0_4 = arith.constant 0 : index
    %3 = vector.load %arg3[%c0_3, %c0_4] : memref<1x128xf32, #tpu.memory_space<vmem>>, vector<1x128xf32>
    %4 = vector.broadcast %3 : vector<1x128xf32> to vector<288x128xf32>
    %5 = arith.addf %2, %4 : vector<288x128xf32>
    %cst_5 = arith.constant 0.000000e+00 : f32
    %6 = vector.broadcast %cst_5 : f32 to vector<288x128xf32>
    %7 = arith.maximumf %5, %6 : vector<288x128xf32>
    %8 = arith.truncf %7 : vector<288x128xf32> to vector<288x128xbf16>
    %c0_6 = arith.constant 0 : index
    %c0_7 = arith.constant 0 : index
    %9 = vector.load %arg4[%c0_6, %c0_7] : memref<288x128xbf16, #tpu.memory_space<vmem>>, vector<288x128xbf16>
    tpu.vector_store %arg4[%c0_6, %c0_7], %8 {strides = array<i32>} : memref<288x128xbf16, #tpu.memory_space<vmem>>, vector<288x128xbf16>,
    return
  }
  func.func @transform_0(%arg0: i32) -> (i32, i32) {
    %c0_i32 = arith.constant 0 : i32
    %c0_i32_0 = arith.constant 0 : i32
    return %arg0, %c0_i32 : i32, i32
  }
  func.func @transform_1(%arg0: i32) -> (i32, i32) {
    %c0_i32 = arith.constant 0 : i32
    %c0_i32_0 = arith.constant 0 : i32
    %c0_i32_1 = arith.constant 0 : i32
    return %c0_i32, %c0_i32_0 : i32, i32
  }
  func.func @transform_2(%arg0: i32) -> (i32, i32) {
    %c0_i32 = arith.constant 0 : i32
    %c0_i32_0 = arith.constant 0 : i32
    %c0_i32_1 = arith.constant 0 : i32
    return %c0_i32, %c0_i32_0 : i32, i32
  }
  func.func @transform_3(%arg0: i32) -> (i32, i32) {
    %c0_i32 = arith.constant 0 : i32
    %c0_i32_0 = arith.constant 0 : i32
    return %arg0, %c0_i32 : i32, i32
  }
}

module attributes {stable_mosaic.version = 11 : i64} {
  func.func @_conv_bn_relu_kernel(%arg0: i32, %arg1: memref<32x1152xbf16, #tpu.memory_space<vmem>>, %arg2: memref<1152x256xbf16, #tpu.memory_space<vmem>>, %arg3: memref<1x256xf32, #tpu.memory_space<vmem>>, %arg4: memref<32x256xbf16, #tpu.memory_space<vmem>>) attributes {dimension_semantics = [#tpu.dimension_semantics<parallel>], iteration_bounds = array<i64: 1>, scalar_prefetch = 0 : i64, scratch_operands = 0 : i64, tpu.core_type = #tpu.core_type<tc>, window_params = [{transform_indices = @transform_0, window_bounds = array<i64: 32, 1152>}, {pipeline_mode = #tpu.pipeline_mode<synchronous>, transform_indices = @transform_1, window_bounds = array<i64: 1152, 256>}, {pipeline_mode = #tpu.pipeline_mode<synchronous>, transform_indices = @transform_2, window_bounds = array<i64: 1, 256>}, {transform_indices = @transform_3, window_bounds = array<i64: 32, 256>}]} {
    %c0 = arith.constant 0 : index
    %c0_0 = arith.constant 0 : index
    %0 = vector.load %arg1[%c0, %c0_0] : memref<32x1152xbf16, #tpu.memory_space<vmem>>, vector<32x1152xbf16>
    %c0_1 = arith.constant 0 : index
    %c0_2 = arith.constant 0 : index
    %1 = vector.load %arg2[%c0_1, %c0_2] : memref<1152x256xbf16, #tpu.memory_space<vmem>>, vector<1152x256xbf16>
    %cst = arith.constant dense<0.000000e+00> : vector<32x256xf32>
    %2 = tpu.matmul %0, %1, %cst {dimension_numbers = #tpu.dot_dimension_numbers<[1], [0], [0], [1], [0, 0, 1, 1], [], []>} : vector<32x1152xbf16>, vector<1152x256xbf16>, vector<32x256xf32> -> vector<32x256xf32>
    %c0_3 = arith.constant 0 : index
    %c0_4 = arith.constant 0 : index
    %3 = vector.load %arg3[%c0_3, %c0_4] : memref<1x256xf32, #tpu.memory_space<vmem>>, vector<1x256xf32>
    %4 = vector.broadcast %3 : vector<1x256xf32> to vector<32x256xf32>
    %5 = arith.addf %2, %4 : vector<32x256xf32>
    %cst_5 = arith.constant 0.000000e+00 : f32
    %6 = vector.broadcast %cst_5 : f32 to vector<32x256xf32>
    %7 = arith.maximumf %5, %6 : vector<32x256xf32>
    %8 = arith.truncf %7 : vector<32x256xf32> to vector<32x256xbf16>
    %c0_6 = arith.constant 0 : index
    %c0_7 = arith.constant 0 : index
    %9 = vector.load %arg4[%c0_6, %c0_7] : memref<32x256xbf16, #tpu.memory_space<vmem>>, vector<32x256xbf16>
    tpu.vector_store %arg4[%c0_6, %c0_7], %8 {strides = array<i32>} : memref<32x256xbf16, #tpu.memory_space<vmem>>, vector<32x256xbf16>,
    return
  }
  func.func @transform_0(%arg0: i32) -> (i32, i32) {
    %c0_i32 = arith.constant 0 : i32
    %c0_i32_0 = arith.constant 0 : i32
    return %arg0, %c0_i32 : i32, i32
  }
  func.func @transform_1(%arg0: i32) -> (i32, i32) {
    %c0_i32 = arith.constant 0 : i32
    %c0_i32_0 = arith.constant 0 : i32
    %c0_i32_1 = arith.constant 0 : i32
    return %c0_i32, %c0_i32_0 : i32, i32
  }
  func.func @transform_2(%arg0: i32) -> (i32, i32) {
    %c0_i32 = arith.constant 0 : i32
    %c0_i32_0 = arith.constant 0 : i32
    %c0_i32_1 = arith.constant 0 : i32
    return %c0_i32, %c0_i32_0 : i32, i32
  }
  func.func @transform_3(%arg0: i32) -> (i32, i32) {
    %c0_i32 = arith.constant 0 : i32
    %c0_i32_0 = arith.constant 0 : i32
    return %arg0, %c0_i32 : i32, i32
  }
}

module attributes {stable_mosaic.version = 11 : i64} {
  func.func @_mlp_kernel(%arg0: i32, %arg1: memref<16x4096xbf16, #tpu.memory_space<vmem>>, %arg2: memref<4096x512xbf16, #tpu.memory_space<vmem>>, %arg3: memref<1x512xf32, #tpu.memory_space<vmem>>, %arg4: memref<512x128xbf16, #tpu.memory_space<vmem>>, %arg5: memref<1x128xf32, #tpu.memory_space<vmem>>, %arg6: memref<16x128xf32, #tpu.memory_space<vmem>>) attributes {dimension_semantics = [#tpu.dimension_semantics<parallel>], iteration_bounds = array<i64: 1>, scalar_prefetch = 0 : i64, scratch_operands = 0 : i64, tpu.core_type = #tpu.core_type<tc>, window_params = [{transform_indices = @transform_0, window_bounds = array<i64: 16, 4096>}, {pipeline_mode = #tpu.pipeline_mode<synchronous>, transform_indices = @transform_1, window_bounds = array<i64: 4096, 512>}, {pipeline_mode = #tpu.pipeline_mode<synchronous>, transform_indices = @transform_2, window_bounds = array<i64: 1, 512>}, {pipeline_mode = #tpu.pipeline_mode<synchronous>, transform_indices = @transform_3, window_bounds = array<i64: 512, 128>}, {pipeline_mode = #tpu.pipeline_mode<synchronous>, transform_indices = @transform_4, window_bounds = array<i64: 1, 128>}, {transform_indices = @transform_5, window_bounds = array<i64: 16, 128>}]} {
    %c0 = arith.constant 0 : index
    %c0_0 = arith.constant 0 : index
    %0 = vector.load %arg1[%c0, %c0_0] : memref<16x4096xbf16, #tpu.memory_space<vmem>>, vector<16x4096xbf16>
    %c0_1 = arith.constant 0 : index
    %c0_2 = arith.constant 0 : index
    %1 = vector.load %arg2[%c0_1, %c0_2] : memref<4096x512xbf16, #tpu.memory_space<vmem>>, vector<4096x512xbf16>
    %cst = arith.constant dense<0.000000e+00> : vector<16x512xf32>
    %2 = tpu.matmul %0, %1, %cst {dimension_numbers = #tpu.dot_dimension_numbers<[1], [0], [0], [1], [0, 0, 1, 1], [], []>} : vector<16x4096xbf16>, vector<4096x512xbf16>, vector<16x512xf32> -> vector<16x512xf32>
    %c0_3 = arith.constant 0 : index
    %c0_4 = arith.constant 0 : index
    %3 = vector.load %arg3[%c0_3, %c0_4] : memref<1x512xf32, #tpu.memory_space<vmem>>, vector<1x512xf32>
    %4 = vector.broadcast %3 : vector<1x512xf32> to vector<16x512xf32>
    %5 = arith.addf %2, %4 : vector<16x512xf32>
    %6 = arith.truncf %5 : vector<16x512xf32> to vector<16x512xbf16>
    %c0_5 = arith.constant 0 : index
    %c0_6 = arith.constant 0 : index
    %7 = vector.load %arg4[%c0_5, %c0_6] : memref<512x128xbf16, #tpu.memory_space<vmem>>, vector<512x128xbf16>
    %cst_7 = arith.constant dense<0.000000e+00> : vector<16x128xf32>
    %8 = tpu.matmul %6, %7, %cst_7 {dimension_numbers = #tpu.dot_dimension_numbers<[1], [0], [0], [1], [0, 0, 1, 1], [], []>} : vector<16x512xbf16>, vector<512x128xbf16>, vector<16x128xf32> -> vector<16x128xf32>
    %c0_8 = arith.constant 0 : index
    %c0_9 = arith.constant 0 : index
    %9 = vector.load %arg5[%c0_8, %c0_9] : memref<1x128xf32, #tpu.memory_space<vmem>>, vector<1x128xf32>
    %10 = vector.broadcast %9 : vector<1x128xf32> to vector<16x128xf32>
    %11 = arith.addf %8, %10 : vector<16x128xf32>
    %c0_10 = arith.constant 0 : index
    %c0_11 = arith.constant 0 : index
    %12 = vector.load %arg6[%c0_10, %c0_11] : memref<16x128xf32, #tpu.memory_space<vmem>>, vector<16x128xf32>
    tpu.vector_store %arg6[%c0_10, %c0_11], %11 {strides = array<i32>} : memref<16x128xf32, #tpu.memory_space<vmem>>, vector<16x128xf32>,
    return
  }
  func.func @transform_0(%arg0: i32) -> (i32, i32) {
    %c0_i32 = arith.constant 0 : i32
    %c0_i32_0 = arith.constant 0 : i32
    return %arg0, %c0_i32 : i32, i32
  }
  func.func @transform_1(%arg0: i32) -> (i32, i32) {
    %c0_i32 = arith.constant 0 : i32
    %c0_i32_0 = arith.constant 0 : i32
    %c0_i32_1 = arith.constant 0 : i32
    return %c0_i32, %c0_i32_0 : i32, i32
  }
  func.func @transform_2(%arg0: i32) -> (i32, i32) {
    %c0_i32 = arith.constant 0 : i32
    %c0_i32_0 = arith.constant 0 : i32
    %c0_i32_1 = arith.constant 0 : i32
    return %c0_i32, %c0_i32_0 : i32, i32
  }
  func.func @transform_3(%arg0: i32) -> (i32, i32) {
    %c0_i32 = arith.constant 0 : i32
    %c0_i32_0 = arith.constant 0 : i32
    %c0_i32_1 = arith.constant 0 : i32
    return %c0_i32, %c0_i32_0 : i32, i32
  }
  func.func @transform_4(%arg0: i32) -> (i32, i32) {
    %c0_i32 = arith.constant 0 : i32
    %c0_i32_0 = arith.constant 0 : i32
    %c0_i32_1 = arith.constant 0 : i32
    return %c0_i32, %c0_i32_0 : i32, i32
  }
  func.func @transform_5(%arg0: i32) -> (i32, i32) {
    %c0_i32 = arith.constant 0 : i32
    %c0_i32_0 = arith.constant 0 : i32
    return %arg0, %c0_i32 : i32, i32
  }
}

</mosaic_0001>

<bundles_post_ra>
// kernel: forward.5
= control target key start
LH: loop header
LB: loop body
LE: loop exit
PB: predicated region body
PF: predicated region fallthrough
CT: control target
= control target key end

     0   :  { %s1317_s12 = smov 0   ;;  %s1548_s0 = inlined_call_operand.vmem [shape: bf16[1920,27], index: 0, kind: input, shape index: {}]   ;;  %s1549_s1 = inlined_call_operand.vmem [shape: bf16[27,16], index: 1, kind: input, shape index: {}]   ;;  %s1550_s2 = inlined_call_operand.vmem [shape: f32[1,16], index: 2, kind: input, shape index: {}]   ;;  %s1551_s3 = inlined_call_operand.vmem [shape: bf16[1920,16], index: 3, kind: output, shape index: {}]  }
   0x1 LB: > { %s1015_s13 = sadd.s32 4294967295, %s1294_s12   ;;  %p1019_p0 = scmp.ge.s32.totalorder %s1294_s12, 1  ;;  %s1294_s12 = sphi %s1317_s12, %s13_s12  }
   0x2   : > { %p138_p1 = scmp.lt.s32.totalorder %s1294_s12, 6 }
   0x4   : > { %p139_p2 = pnand %p1019_p0, %p138_p1 }
   0x5   : > { %v1262_v0 = vld [vmem:[%s1549_s1] sm:$0xff] (!%p139_p2)   ;;  %vm438_vm0 = vcmask (!%p139_p2), 1044480   ;;  %v1263_v1 = vld [vmem:[%s1549_s1 + $0x8] sm:$0x3f] (!%p139_p2)   ;;  %vm439_vm1 = vcmask (!%p139_p2), 1045504   ;;  %s162_s18 = smul.u32 (!%p139_p2), 48, %s1015_s13 }
   0x6   : > { %142 = sbr.rel (%p139_p2) target bundleno = 281 (0x119), region = 32  ;;  %1197 = vmatprep.subr.bf16.mxu0 (!%p139_p2), %v1262_v0  ;;  %1249 = vmatprep.subr.bf16.mxu1 (!%p139_p2), %v1262_v0  ;;  %v1296_v2 = vmov (!%p139_p2), 65535   ;;  %vm365_vm2 = vcmask (!%p139_p2), 220160   ;;  %v1392_v30 = vld [vmem:[%s1550_s2] ss:$0 sm:$0xff] (!%p139_p2)  ;;  %vm910_vm3 = vcmask (!%p139_p2), 125952  }
   0x7   : > { %1198 = vmatpush3.bf16.msra.mxu0 (!%p139_p2), %v1262_v0  ;;  %1251 = vmatpush3.bf16.msra.mxu1 (!%p139_p2), %v1262_v0  ;;  %v440_v3 = vsel (!%p139_p2), %vm438_vm0, 4294967295, %v1296_v2  ;;  %p163_p3 = scmp.lt.s32.totalorder (!%p139_p2), %s162_s18, 239 }
   0x8   : > { %v441_v4 = vsel (!%p139_p2), %vm439_vm1, %v440_v3, 0 }
   0x9   : > { %v443_v5 = vand.u32 (!%p139_p2), %v1263_v1, %v441_v4 }
   0xb   : > { %1199 = vmatprep.subr.bf16.mxu0 (!%p139_p2), %v443_v5  ;;  %1250 = vmatprep.subr.bf16.mxu1 (!%p139_p2), %v443_v5 }
   0xc   : > { %1200 = vmatpush3.bf16.msra.mxu0 (!%p139_p2), %v443_v5  ;;  %1252 = vmatpush3.bf16.msra.mxu1 (!%p139_p2), %v443_v5 }
   0xd   : > { %s1553_s18 = smov (!%p163_p3, %s162_s18), 239 }
   0xe   : > { %s1020_s19 = sshll.u32 %s1553_s18, 2 }
   0xf   : > { %s1339_s22 = scalar_lea.vmem %s1548_s0, %s1020_s19  ;;  %s1404_s27 = scalar_lea.vmem %s1551_s3, %s1020_s19 }
  0x10   : > { %v1264_v6 = vld [vmem:[%s1339_s22] sm:$0xff]   ;;  %v1266_v8 = vld [vmem:[%s1339_s22 + $0x8] sm:$0xff]   ;;  %v1268_v10 = vld [vmem:[%s1339_s22 + $0x10] sm:$0xff]  }
  0x11   : > { %v1265_v7 = vld [vmem:[%s1339_s22 + $0x60] sm:$0xff]   ;;  %1201 = vmatprep.mubr.msk.bf16.mxu0 %vm365_vm2, %v1264_v6  ;;  %v1267_v9 = vld [vmem:[%s1339_s22 + $0x68] sm:$0xff]   ;;  %v1269_v11 = vld [vmem:[%s1339_s22 + $0x70] sm:$0xff]  }
  0x12   : > { %1225 = vmatprep.mubr.msk.bf16.mxu1 %vm365_vm2, %v1265_v7  ;;  %1202 = vmatmul.mubr.msk.bf16.vlgmr.msra.gmra.mrb[0].mxu0 %vm365_vm2, %v1266_v8  ;;  %v1270_v12 = vld [vmem:[%s1339_s22 + $0x18] sm:$0xff]   ;;  %v1272_v14 = vld [vmem:[%s1339_s22 + $0x20] sm:$0xff]   ;;  %v1274_v16 = vld [vmem:[%s1339_s22 + $0x28] sm:$0xff]  }
  0x13   : > { %1226 = vmatmul.mubr.msk.bf16.vlgmr.msra.gmra.mrb[0].mxu1 %vm365_vm2, %v1267_v9  ;;  %1205 = vmatprep.mubr.msk.bf16.mxu0 %vm365_vm2, %v1268_v10  ;;  %v1271_v13 = vld [vmem:[%s1339_s22 + $0x78] sm:$0xff]   ;;  %v1273_v15 = vld [vmem:[%s1339_s22 + $0x80] sm:$0xff]   ;;  %v1275_v17 = vld [vmem:[%s1339_s22 + $0x88] sm:$0xff]  }
  0x14   : > { %1229 = vmatprep.mubr.msk.bf16.mxu1 %vm365_vm2, %v1269_v11  ;;  %v1276_v18 = vld [vmem:[%s1339_s22 + $0x30] sm:$0xff]   ;;  %v1278_v20 = vld [vmem:[%s1339_s22 + $0x38] sm:$0xff]   ;;  %v1280_v22 = vld [vmem:[%s1339_s22 + $0x40] sm:$0xff]  }
  0x15   : > { %v1277_v19 = vld [vmem:[%s1339_s22 + $0x90] sm:$0xff]   ;;  %v1279_v21 = vld [vmem:[%s1339_s22 + $0x98] sm:$0xff]   ;;  %v1281_v23 = vld [vmem:[%s1339_s22 + $0xa0] sm:$0xff]  }
  0x16   : > { %v1282_v24 = vld [vmem:[%s1339_s22 + $0x48] sm:$0xff]   ;;  %v1284_v26 = vld [vmem:[%s1339_s22 + $0x50] sm:$0xff]   ;;  %v1286_v28 = vld [vmem:[%s1339_s22 + $0x58] sm:$0xff]  }
  0x17   : > { %v1283_v25 = vld [vmem:[%s1339_s22 + $0xa8] sm:$0xff]   ;;  %v1285_v27 = vld [vmem:[%s1339_s22 + $0xb0] sm:$0xff]   ;;  %v1287_v29 = vld [vmem:[%s1339_s22 + $0xb8] sm:$0xff]  }
  0x1a   : > { %1206 = vmatmul.mubr.msk.bf16.gmra.mrb[4].mxu0 %vm365_vm2, %v1270_v12 }
  0x1b   : > { %1230 = vmatmul.mubr.msk.bf16.gmra.mrb[4].mxu1 %vm365_vm2, %v1271_v13  ;;  %1209 = vmatprep.mubr.msk.bf16.mxu0 %vm365_vm2, %v1272_v14 }
  0x1c   : > { %1233 = vmatprep.mubr.msk.bf16.mxu1 %vm365_vm2, %v1273_v15 }
  0x22   : > { %1210 = vmatmul.mubr.msk.bf16.gmra.mrb[8].mxu0 %vm365_vm2, %v1274_v16 }
  0x23   : > { %1234 = vmatmul.mubr.msk.bf16.gmra.mrb[8].mxu1 %vm365_vm2, %v1275_v17  ;;  %1213 = vmatprep.mubr.msk.bf16.mxu0 %vm365_vm2, %v1276_v18 }
  0x24   : > { %1237 = vmatprep.mubr.msk.bf16.mxu1 %vm365_vm2, %v1277_v19 }
  0x2a   : > { %1214 = vmatmul.mubr.msk.bf16.gmra.mrb[12].mxu0 %vm365_vm2, %v1278_v20 }
  0x2b   : > { %1238 = vmatmul.mubr.msk.bf16.gmra.mrb[12].mxu1 %vm365_vm2, %v1279_v21  ;;  %1217 = vmatprep.mubr.msk.bf16.mxu0 %vm365_vm2, %v1280_v22 }
  0x2c   : > { %1241 = vmatprep.mubr.msk.bf16.mxu1 %vm365_vm2, %v1281_v23 }
  0x32   : > { %1218 = vmatmul.mubr.msk.bf16.gmra.mrb[16].mxu0 %vm365_vm2, %v1282_v24 }
  0x33   : > { %1242 = vmatmul.mubr.msk.bf16.gmra.mrb[16].mxu1 %vm365_vm2, %v1283_v25  ;;  %1221 = vmatprep.mubr.msk.bf16.mxu0 %vm365_vm2, %v1284_v26 }
  0x34   : > { %1245 = vmatprep.mubr.msk.bf16.mxu1 %vm365_vm2, %v1285_v27 }
  0x3a   : > { %1222 = vmatmul.mubr.msk.bf16.gmra.mrb[20].mxu0 %vm365_vm2, %v1286_v28 }
  0x3b   : > { %1246 = vmatmul.mubr.msk.bf16.gmra.mrb[20].mxu1 %vm365_vm2, %v1287_v29 }
  0xe5   : > { %v1203_v31 = vpop.f32.mrb[0].mxu0 }
  0xe6   : > { %v488_v32 = vadd.f32 %v1203_v31, %v1392_v30  ;;  %v1227_v33 = vpop.f32.mrb[0].mxu1  ;;  %v479_v34 = vpop.f32.mrb[1].mxu0 }
  0xe7   : > { %v584_v35 = vadd.f32 %v1227_v33, %v1392_v30  ;;  %v480_v36 = vadd.f32 %v1392_v30, %v479_v34  ;;  %v575_v37 = vpop.f32.mrb[1].mxu1  ;;  %v1204_v38 = vpop.f32.mrb[2].mxu0 }
  0xe8   : > { %v672_v39 = vmax.f32 %v488_v32, 0.0  ;;  %v576_v40 = vadd.f32 %v1392_v30, %v575_v37  ;;  %v491_v41 = vadd.f32 %v1204_v38, %v1392_v30  ;;  %v1228_v42 = vpop.f32.mrb[2].mxu1  ;;  %v482_v43 = vpop.f32.mrb[3].mxu0 }
  0xe9   : > { %v696_v44 = vmax.f32 %v584_v35, 0.0  ;;  %v670_v45 = vmax.f32 %v480_v36, 0.0  ;;  %v587_v46 = vadd.f32 %v1228_v42, %v1392_v30  ;;  %v483_v47 = vadd.f32 %v1392_v30, %v482_v43  ;;  %v578_v48 = vpop.f32.mrb[3].mxu1 }
  0xea   : > { %v1125_v49 = vpack.c.bf16 %v672_v39, %v672_v39  ;;  %v694_v50 = vmax.f32 %v576_v40, 0.0  ;;  %v673_v51 = vmax.f32 %v491_v41, 0.0  ;;  %v579_v52 = vadd.f32 %v1392_v30, %v578_v48 }
  0xeb   : > { %v1149_v53 = vpack.c.bf16 %v696_v44, %v696_v44  ;;  %v1123_v54 = vpack.c.bf16 %v670_v45, %v670_v45  ;;  %v697_v55 = vmax.f32 %v587_v46, 0.0  ;;  %v671_v56 = vmax.f32 %v483_v47, 0.0 }
  0xec   : > { %913 = vst.msk [vmem:[%s1404_s27 + $0x8] sm:$0xf] %vm910_vm3, %v1125_v49  ;;  %v1147_v57 = vpack.c.bf16 %v694_v50, %v694_v50  ;;  %v1126_v58 = vpack.c.bf16 %v673_v51, %v673_v51  ;;  %v695_v59 = vmax.f32 %v579_v52, 0.0 }
  0xed   : > { %937 = vst.msk [vmem:[%s1404_s27 + $0x68] sm:$0xf] %vm910_vm3, %v1149_v53  ;;  %911 = vst.msk [vmem:[%s1404_s27] sm:$0xf] %vm910_vm3, %v1123_v54  ;;  %v1150_v60 = vpack.c.bf16 %v697_v55, %v697_v55  ;;  %v1124_v61 = vpack.c.bf16 %v671_v56, %v671_v56  ;;  %v1207_v62 = vpop.f32.mrb[4].mxu0 }
  0xee   : > { %935 = vst.msk [vmem:[%s1404_s27 + $0x60] sm:$0xf] %vm910_vm3, %v1147_v57  ;;  %914 = vst.msk [vmem:[%s1404_s27 + $0xc] sm:$0xf] %vm910_vm3, %v1126_v58  ;;  %v1148_v63 = vpack.c.bf16 %v695_v59, %v695_v59  ;;  %v504_v0 = vadd.f32 %v1207_v62, %v1392_v30  ;;  %v1231_v1 = vpop.f32.mrb[4].mxu1  ;;  %v495_v2 = vpop.f32.mrb[5].mxu0 }
  0xef   : > { %938 = vst.msk [vmem:[%s1404_s27 + $0x6c] sm:$0xf] %vm910_vm3, %v1150_v60  ;;  %912 = vst.msk [vmem:[%s1404_s27 + $0x4] sm:$0xf] %vm910_vm3, %v1124_v61  ;;  %v600_v3 = vadd.f32 %v1231_v1, %v1392_v30  ;;  %v496_v4 = vadd.f32 %v1392_v30, %v495_v2  ;;  %v591_v5 = vpop.f32.mrb[5].mxu1  ;;  %v1208_v6 = vpop.f32.mrb[6].mxu0 }
  0xf0   : > { %936 = vst.msk [vmem:[%s1404_s27 + $0x64] sm:$0xf] %vm910_vm3, %v1148_v63  ;;  %v676_v7 = vmax.f32 %v504_v0, 0.0  ;;  %v592_v8 = vadd.f32 %v1392_v30, %v591_v5  ;;  %v507_v9 = vadd.f32 %v1208_v6, %v1392_v30  ;;  %v1232_v10 = vpop.f32.mrb[6].mxu1  ;;  %v498_v11 = vpop.f32.mrb[7].mxu0 }
  0xf1   : > { %v700_v12 = vmax.f32 %v600_v3, 0.0  ;;  %v674_v13 = vmax.f32 %v496_v4, 0.0  ;;  %v603_v14 = vadd.f32 %v1232_v10, %v1392_v30  ;;  %v499_v15 = vadd.f32 %v1392_v30, %v498_v11  ;;  %v594_v16 = vpop.f32.mrb[7].mxu1 }
  0xf2   : > { %v1129_v17 = vpack.c.bf16 %v676_v7, %v676_v7  ;;  %v698_v18 = vmax.f32 %v592_v8, 0.0  ;;  %v677_v19 = vmax.f32 %v507_v9, 0.0  ;;  %v595_v20 = vadd.f32 %v1392_v30, %v594_v16 }
  0xf3   : > { %v1153_v21 = vpack.c.bf16 %v700_v12, %v700_v12  ;;  %v1127_v22 = vpack.c.bf16 %v674_v13, %v674_v13  ;;  %v701_v23 = vmax.f32 %v603_v14, 0.0  ;;  %v675_v24 = vmax.f32 %v499_v15, 0.0 }
  0xf4   : > { %917 = vst.msk [vmem:[%s1404_s27 + $0x18] sm:$0xf] %vm910_vm3, %v1129_v17  ;;  %v1151_v25 = vpack.c.bf16 %v698_v18, %v698_v18  ;;  %v1130_v26 = vpack.c.bf16 %v677_v19, %v677_v19  ;;  %v699_v27 = vmax.f32 %v595_v20, 0.0 }
  0xf5   : > { %941 = vst.msk [vmem:[%s1404_s27 + $0x78] sm:$0xf] %vm910_vm3, %v1153_v21  ;;  %915 = vst.msk [vmem:[%s1404_s27 + $0x10] sm:$0xf] %vm910_vm3, %v1127_v22  ;;  %v1154_v28 = vpack.c.bf16 %v701_v23, %v701_v23  ;;  %v1128_v29 = vpack.c.bf16 %v675_v24, %v675_v24  ;;  %v1211_v31 = vpop.f32.mrb[8].mxu0 }
  0xf6   : > { %939 = vst.msk [vmem:[%s1404_s27 + $0x70] sm:$0xf] %vm910_vm3, %v1151_v25  ;;  %918 = vst.msk [vmem:[%s1404_s27 + $0x1c] sm:$0xf] %vm910_vm3, %v1130_v26  ;;  %v1152_v32 = vpack.c.bf16 %v699_v27, %v699_v27  ;;  %v520_v33 = vadd.f32 %v1211_v31, %v1392_v30  ;;  %v1235_v34 = vpop.f32.mrb[8].mxu1  ;;  %v511_v35 = vpop.f32.mrb[9].mxu0 }
  0xf7   : > { %942 = vst.msk [vmem:[%s1404_s27 + $0x7c] sm:$0xf] %vm910_vm3, %v1154_v28  ;;  %916 = vst.msk [vmem:[%s1404_s27 + $0x14] sm:$0xf] %vm910_vm3, %v1128_v29  ;;  %v616_v36 = vadd.f32 %v1235_v34, %v1392_v30  ;;  %v512_v37 = vadd.f32 %v1392_v30, %v511_v35  ;;  %v607_v38 = vpop.f32.mrb[9].mxu1  ;;  %v1212_v39 = vpop.f32.mrb[10].mxu0 }
  0xf8   : > { %940 = vst.msk [vmem:[%s1404_s27 + $0x74] sm:$0xf] %vm910_vm3, %v1152_v32  ;;  %v680_v40 = vmax.f32 %v520_v33, 0.0  ;;  %v608_v41 = vadd.f32 %v1392_v30, %v607_v38  ;;  %v523_v42 = vadd.f32 %v1212_v39, %v1392_v30  ;;  %v1236_v43 = vpop.f32.mrb[10].mxu1  ;;  %v514_v44 = vpop.f32.mrb[11].mxu0 }
  0xf9   : > { %v704_v45 = vmax.f32 %v616_v36, 0.0  ;;  %v678_v46 = vmax.f32 %v512_v37, 0.0  ;;  %v619_v47 = vadd.f32 %v1236_v43, %v1392_v30  ;;  %v515_v48 = vadd.f32 %v1392_v30, %v514_v44  ;;  %v610_v49 = vpop.f32.mrb[11].mxu1 }
  0xfa   : > { %v1133_v50 = vpack.c.bf16 %v680_v40, %v680_v40  ;;  %v702_v51 = vmax.f32 %v608_v41, 0.0  ;;  %v681_v52 = vmax.f32 %v523_v42, 0.0  ;;  %v611_v53 = vadd.f32 %v1392_v30, %v610_v49 }
  0xfb   : > { %v1157_v54 = vpack.c.bf16 %v704_v45, %v704_v45  ;;  %v1131_v55 = vpack.c.bf16 %v678_v46, %v678_v46  ;;  %v705_v56 = vmax.f32 %v619_v47, 0.0  ;;  %v679_v57 = vmax.f32 %v515_v48, 0.0 }
  0xfc   : > { %921 = vst.msk [vmem:[%s1404_s27 + $0x28] sm:$0xf] %vm910_vm3, %v1133_v50  ;;  %v1155_v58 = vpack.c.bf16 %v702_v51, %v702_v51  ;;  %v1134_v59 = vpack.c.bf16 %v681_v52, %v681_v52  ;;  %v703_v60 = vmax.f32 %v611_v53, 0.0 }
  0xfd   : > { %945 = vst.msk [vmem:[%s1404_s27 + $0x88] sm:$0xf] %vm910_vm3, %v1157_v54  ;;  %919 = vst.msk [vmem:[%s1404_s27 + $0x20] sm:$0xf] %vm910_vm3, %v1131_v55  ;;  %v1158_v61 = vpack.c.bf16 %v705_v56, %v705_v56  ;;  %v1132_v62 = vpack.c.bf16 %v679_v57, %v679_v57  ;;  %v1215_v63 = vpop.f32.mrb[12].mxu0 }
  0xfe   : > { %943 = vst.msk [vmem:[%s1404_s27 + $0x80] sm:$0xf] %vm910_vm3, %v1155_v58  ;;  %922 = vst.msk [vmem:[%s1404_s27 + $0x2c] sm:$0xf] %vm910_vm3, %v1134_v59  ;;  %v1156_v0 = vpack.c.bf16 %v703_v60, %v703_v60  ;;  %v536_v1 = vadd.f32 %v1215_v63, %v1392_v30  ;;  %v1239_v2 = vpop.f32.mrb[12].mxu1  ;;  %v527_v3 = vpop.f32.mrb[13].mxu0 }
  0xff   : > { %946 = vst.msk [vmem:[%s1404_s27 + $0x8c] sm:$0xf] %vm910_vm3, %v1158_v61  ;;  %920 = vst.msk [vmem:[%s1404_s27 + $0x24] sm:$0xf] %vm910_vm3, %v1132_v62  ;;  %v632_v4 = vadd.f32 %v1239_v2, %v1392_v30  ;;  %v528_v5 = vadd.f32 %v1392_v30, %v527_v3  ;;  %v623_v6 = vpop.f32.mrb[13].mxu1  ;;  %v1216_v7 = vpop.f32.mrb[14].mxu0 }
 0x100   : > { %944 = vst.msk [vmem:[%s1404_s27 + $0x84] sm:$0xf] %vm910_vm3, %v1156_v0  ;;  %v684_v8 = vmax.f32 %v536_v1, 0.0  ;;  %v624_v9 = vadd.f32 %v1392_v30, %v623_v6  ;;  %v539_v10 = vadd.f32 %v1216_v7, %v1392_v30  ;;  %v1240_v11 = vpop.f32.mrb[14].mxu1  ;;  %v530_v12 = vpop.f32.mrb[15].mxu0 }
 0x101   : > { %v708_v13 = vmax.f32 %v632_v4, 0.0  ;;  %v682_v14 = vmax.f32 %v528_v5, 0.0  ;;  %v635_v15 = vadd.f32 %v1240_v11, %v1392_v30  ;;  %v531_v16 = vadd.f32 %v1392_v30, %v530_v12  ;;  %v626_v17 = vpop.f32.mrb[15].mxu1 }
 0x102   : > { %v1137_v18 = vpack.c.bf16 %v684_v8, %v684_v8  ;;  %v706_v19 = vmax.f32 %v624_v9, 0.0  ;;  %v685_v20 = vmax.f32 %v539_v10, 0.0  ;;  %v627_v21 = vadd.f32 %v1392_v30, %v626_v17 }
 0x103   : > { %v1161_v22 = vpack.c.bf16 %v708_v13, %v708_v13  ;;  %v1135_v23 = vpack.c.bf16 %v682_v14, %v682_v14  ;;  %v709_v24 = vmax.f32 %v635_v15, 0.0  ;;  %v683_v25 = vmax.f32 %v531_v16, 0.0 }
 0x104   : > { %925 = vst.msk [vmem:[%s1404_s27 + $0x38] sm:$0xf] %vm910_vm3, %v1137_v18  ;;  %v1159_v26 = vpack.c.bf16 %v706_v19, %v706_v19  ;;  %v1138_v27 = vpack.c.bf16 %v685_v20, %v685_v20  ;;  %v707_v28 = vmax.f32 %v627_v21, 0.0 }
 0x105   : > { %949 = vst.msk [vmem:[%s1404_s27 + $0x98] sm:$0xf] %vm910_vm3, %v1161_v22  ;;  %923 = vst.msk [vmem:[%s1404_s27 + $0x30] sm:$0xf] %vm910_vm3, %v1135_v23  ;;  %v1162_v29 = vpack.c.bf16 %v709_v24, %v709_v24  ;;  %v1136_v31 = vpack.c.bf16 %v683_v25, %v683_v25  ;;  %v1219_v32 = vpop.f32.mrb[16].mxu0 }
 0x106   : > { %947 = vst.msk [vmem:[%s1404_s27 + $0x90] sm:$0xf] %vm910_vm3, %v1159_v26  ;;  %926 = vst.msk [vmem:[%s1404_s27 + $0x3c] sm:$0xf] %vm910_vm3, %v1138_v27  ;;  %v1160_v33 = vpack.c.bf16 %v707_v28, %v707_v28  ;;  %v552_v34 = vadd.f32 %v1219_v32, %v1392_v30  ;;  %v1243_v35 = vpop.f32.mrb[16].mxu1  ;;  %v543_v36 = vpop.f32.mrb[17].mxu0 }
 0x107   : > { %950 = vst.msk [vmem:[%s1404_s27 + $0x9c] sm:$0xf] %vm910_vm3, %v1162_v29  ;;  %924 = vst.msk [vmem:[%s1404_s27 + $0x34] sm:$0xf] %vm910_vm3, %v1136_v31  ;;  %v648_v37 = vadd.f32 %v1243_v35, %v1392_v30  ;;  %v544_v38 = vadd.f32 %v1392_v30, %v543_v36  ;;  %v639_v39 = vpop.f32.mrb[17].mxu1  ;;  %v1220_v40 = vpop.f32.mrb[18].mxu0 }
 0x108   : > { %948 = vst.msk [vmem:[%s1404_s27 + $0x94] sm:$0xf] %vm910_vm3, %v1160_v33  ;;  %v688_v41 = vmax.f32 %v552_v34, 0.0  ;;  %v640_v42 = vadd.f32 %v1392_v30, %v639_v39  ;;  %v555_v43 = vadd.f32 %v1220_v40, %v1392_v30  ;;  %v1244_v44 = vpop.f32.mrb[18].mxu1  ;;  %v546_v45 = vpop.f32.mrb[19].mxu0 }
 0x109   : > { %v712_v46 = vmax.f32 %v648_v37, 0.0  ;;  %v686_v47 = vmax.f32 %v544_v38, 0.0  ;;  %v651_v48 = vadd.f32 %v1244_v44, %v1392_v30  ;;  %v547_v49 = vadd.f32 %v1392_v30, %v546_v45  ;;  %v642_v50 = vpop.f32.mrb[19].mxu1 }
 0x10a   : > { %v1141_v51 = vpack.c.bf16 %v688_v41, %v688_v41  ;;  %v710_v52 = vmax.f32 %v640_v42, 0.0  ;;  %v689_v53 = vmax.f32 %v555_v43, 0.0  ;;  %v643_v54 = vadd.f32 %v1392_v30, %v642_v50 }
 0x10b   : > { %v1165_v55 = vpack.c.bf16 %v712_v46, %v712_v46  ;;  %v1139_v56 = vpack.c.bf16 %v686_v47, %v686_v47  ;;  %v713_v57 = vmax.f32 %v651_v48, 0.0  ;;  %v687_v58 = vmax.f32 %v547_v49, 0.0 }
 0x10c   : > { %929 = vst.msk [vmem:[%s1404_s27 + $0x48] sm:$0xf] %vm910_vm3, %v1141_v51  ;;  %v1163_v59 = vpack.c.bf16 %v710_v52, %v710_v52  ;;  %v1142_v60 = vpack.c.bf16 %v689_v53, %v689_v53  ;;  %v711_v61 = vmax.f32 %v643_v54, 0.0 }
 0x10d   : > { %953 = vst.msk [vmem:[%s1404_s27 + $0xa8] sm:$0xf] %vm910_vm3, %v1165_v55  ;;  %927 = vst.msk [vmem:[%s1404_s27 + $0x40] sm:$0xf] %vm910_vm3, %v1139_v56  ;;  %v1166_v62 = vpack.c.bf16 %v713_v57, %v713_v57  ;;  %v1140_v63 = vpack.c.bf16 %v687_v58, %v687_v58  ;;  %v1223_v0 = vpop.f32.mrb[20].mxu0 }
 0x10e   : > { %951 = vst.msk [vmem:[%s1404_s27 + $0xa0] sm:$0xf] %vm910_vm3, %v1163_v59  ;;  %930 = vst.msk [vmem:[%s1404_s27 + $0x4c] sm:$0xf] %vm910_vm3, %v1142_v60  ;;  %v1164_v1 = vpack.c.bf16 %v711_v61, %v711_v61  ;;  %v568_v2 = vadd.f32 %v1223_v0, %v1392_v30  ;;  %v1247_v3 = vpop.f32.mrb[20].mxu1  ;;  %v559_v4 = vpop.f32.mrb[21].mxu0 }
 0x10f   : > { %954 = vst.msk [vmem:[%s1404_s27 + $0xac] sm:$0xf] %vm910_vm3, %v1166_v62  ;;  %928 = vst.msk [vmem:[%s1404_s27 + $0x44] sm:$0xf] %vm910_vm3, %v1140_v63  ;;  %v664_v5 = vadd.f32 %v1247_v3, %v1392_v30  ;;  %v560_v6 = vadd.f32 %v1392_v30, %v559_v4  ;;  %v655_v7 = vpop.f32.mrb[21].mxu1  ;;  %v1224_v8 = vpop.f32.mrb[22].mxu0 }
 0x110   : > { %952 = vst.msk [vmem:[%s1404_s27 + $0xa4] sm:$0xf] %vm910_vm3, %v1164_v1  ;;  %v692_v9 = vmax.f32 %v568_v2, 0.0  ;;  %v656_v10 = vadd.f32 %v1392_v30, %v655_v7  ;;  %v571_v11 = vadd.f32 %v1224_v8, %v1392_v30  ;;  %v1248_v12 = vpop.f32.mrb[22].mxu1  ;;  %v562_v13 = vpop.f32.mrb[23].mxu0 }
 0x111   : > { %v716_v14 = vmax.f32 %v664_v5, 0.0  ;;  %v690_v15 = vmax.f32 %v560_v6, 0.0  ;;  %v667_v16 = vadd.f32 %v1248_v12, %v1392_v30  ;;  %v563_v17 = vadd.f32 %v1392_v30, %v562_v13  ;;  %v658_v18 = vpop.f32.mrb[23].mxu1 }
 0x112   : > { %v1145_v19 = vpack.c.bf16 %v692_v9, %v692_v9  ;;  %v714_v20 = vmax.f32 %v656_v10, 0.0  ;;  %v693_v21 = vmax.f32 %v571_v11, 0.0  ;;  %v659_v22 = vadd.f32 %v1392_v30, %v658_v18 }
 0x113   : > { %v1169_v23 = vpack.c.bf16 %v716_v14, %v716_v14  ;;  %v1143_v24 = vpack.c.bf16 %v690_v15, %v690_v15  ;;  %v717_v25 = vmax.f32 %v667_v16, 0.0  ;;  %v691_v26 = vmax.f32 %v563_v17, 0.0 }
 0x114   : > { %933 = vst.msk [vmem:[%s1404_s27 + $0x58] sm:$0xf] %vm910_vm3, %v1145_v19  ;;  %v1167_v27 = vpack.c.bf16 %v714_v20, %v714_v20  ;;  %v1146_v28 = vpack.c.bf16 %v693_v21, %v693_v21  ;;  %v715_v29 = vmax.f32 %v659_v22, 0.0 }
 0x115   : > { %957 = vst.msk [vmem:[%s1404_s27 + $0xb8] sm:$0xf] %vm910_vm3, %v1169_v23  ;;  %931 = vst.msk [vmem:[%s1404_s27 + $0x50] sm:$0xf] %vm910_vm3, %v1143_v24  ;;  %v1170_v31 = vpack.c.bf16 %v717_v25, %v717_v25  ;;  %v1144_v32 = vpack.c.bf16 %v691_v26, %v691_v26 }
 0x116   : > { %955 = vst.msk [vmem:[%s1404_s27 + $0xb0] sm:$0xf] %vm910_vm3, %v1167_v27  ;;  %934 = vst.msk [vmem:[%s1404_s27 + $0x5c] sm:$0xf] %vm910_vm3, %v1146_v28  ;;  %v1168_v30 = vpack.c.bf16 %v715_v29, %v715_v29 }
 0x117   : > { %958 = vst.msk [vmem:[%s1404_s27 + $0xbc] sm:$0xf] %vm910_vm3, %v1170_v31  ;;  %932 = vst.msk [vmem:[%s1404_s27 + $0x54] sm:$0xf] %vm910_vm3, %v1144_v32 }
 0x118   : > { %956 = vst.msk [vmem:[%s1404_s27 + $0xb4] sm:$0xf] %vm910_vm3, %v1168_v30 }
 0x119 PF: > { %s13_s12 = sadd.s32 1, %s1294_s12  }
 0x11a   : > { %p10_p4 = scmp.ge.s32.totalorder %s13_s12, 7  }
 0x11c   :  { %12 = sbr.rel (!%p10_p4) target bundleno = 1 (0x1), region = 62 }

// kernel: forward.6
= control target key start
LH: loop header
LB: loop body
LE: loop exit
PB: predicated region body
PF: predicated region fallthrough
CT: control target
= control target key end

     0   :  { %s1314_s12 = smov 0   ;;  %s1551_s0 = inlined_call_operand.vmem [shape: bf16[1600,144], index: 0, kind: input, shape index: {}]   ;;  %s1552_s1 = inlined_call_operand.vmem [shape: bf16[144,32], index: 1, kind: input, shape index: {}]   ;;  %s1553_s2 = inlined_call_operand.vmem [shape: f32[1,32], index: 2, kind: input, shape index: {}]   ;;  %s1554_s3 = inlined_call_operand.vmem [shape: bf16[1600,32], index: 3, kind: output, shape index: {}]  }
   0x1 LB: > { %s1028_s13 = sadd.s32 4294967295, %s1291_s12   ;;  %p1032_p0 = scmp.ge.s32.totalorder %s1291_s12, 1  ;;  %s1291_s12 = sphi %s1314_s12, %s13_s12  }
   0x2   : > { %p139_p1 = scmp.lt.s32.totalorder %s1291_s12, 6 }
   0x4   : > { %p140_p2 = pnand %p1032_p0, %p139_p1 }
   0x5   : > { %v1216_v0 = vld [vmem:[%s1552_s1] sm:$0xff] (!%p140_p2)   ;;  %v1293_v1 = vmov (!%p140_p2), 0   ;;  %s164_s16 = smul.u32 (!%p140_p2), 40, %s1028_s13  ;;  %v1217_v2 = vld [vmem:[%s1552_s1 + $0x8] sm:$0xff] (!%p140_p2)   ;;  %v1218_v3 = vld [vmem:[%s1552_s1 + $0x10] sm:$0xff] (!%p140_p2)   ;;  %vm477_vm0 = vcmask (!%p140_p2), 130048  }
   0x6   : > { %143 = sbr.rel (%p140_p2) target bundleno = 335 (0x14f), region = 32  ;;  %538 = vmatprep.subr.bf16.mxu0 (!%p140_p2), %v1293_v1  ;;  %1189 = vmatprep.subr.bf16.mxu1 (!%p140_p2), %v1293_v1  ;;  %v1219_v4 = vld [vmem:[%s1552_s1 + $0x18] sm:$0xff] (!%p140_p2)   ;;  %v1220_v7 = vld [vmem:[%s1552_s1 + $0x20] sm:$0xff] (!%p140_p2)   ;;  %v1221_v8 = vld [vmem:[%s1552_s1 + $0x28] sm:$0xff] (!%p140_p2)   ;;  %vm931_vm1 = vcmask (!%p140_p2), 257024  }
   0x7   : > { %539 = vmatpush1.bf16.msra.mxu0 (!%p140_p2), %v1216_v0  ;;  %1198 = vmatpush1.bf16.msra.mxu1 (!%p140_p2), %v1216_v0  ;;  %p165_p3 = scmp.lt.s32.totalorder (!%p140_p2), %s164_s16, 199  ;;  %v1222_v9 = vld [vmem:[%s1552_s1 + $0x30] sm:$0xff] (!%p140_p2)   ;;  %v1223_v10 = vld [vmem:[%s1552_s1 + $0x38] sm:$0xff] (!%p140_p2)   ;;  %v1224_v11 = vld [vmem:[%s1552_s1 + $0x40] sm:$0xff] (!%p140_p2)  }
   0x8   : > { %540 = vmatprep.subr.bf16.mxu0 (!%p140_p2), %v1293_v1  ;;  %1190 = vmatprep.subr.bf16.mxu1 (!%p140_p2), %v1293_v1  ;;  %v1420_v50 = vld [vmem:[%s1553_s2] ss:$0 sm:$0xff] (!%p140_p2) }
   0xb   : > { %541 = vmatpush1.bf16.msra.mxu0 (!%p140_p2), %v1217_v2  ;;  %1199 = vmatpush1.bf16.msra.mxu1 (!%p140_p2), %v1217_v2 }
   0xc   : > { %542 = vmatprep.subr.bf16.mxu0 (!%p140_p2), %v1293_v1  ;;  %1191 = vmatprep.subr.bf16.mxu1 (!%p140_p2), %v1293_v1 }
   0xd   : > { %s1556_s16 = smov (!%p165_p3, %s164_s16), 199 }
   0xe   : > { %s1148_s21 = sshll.u32 %s1556_s16, 3  ;;  %s1035_s13 = sshll.u32 %s1556_s16, 2 }
   0xf   : > { %s1337_s24 = scalar_lea.vmem %s1551_s0, %s1148_s21  ;;  %543 = vmatpush1.bf16.msra.mxu0 %v1218_v3  ;;  %1200 = vmatpush1.bf16.msra.mxu1 %v1218_v3  ;;  %s1430_s16 = scalar_lea.vmem %s1554_s3, %s1035_s13 }
  0x10   : > { %v1227_v5 = vld [vmem:[%s1337_s24 + $0x4] ss:$8 sps:$4 sm:$0xff]   ;;  %544 = vmatprep.subr.bf16.mxu0 %v1293_v1  ;;  %1192 = vmatprep.subr.bf16.mxu1 %v1293_v1  ;;  %v1225_v12 = vld [vmem:[%s1337_s24] ss:$8 sps:$4 sm:$0xff]   ;;  %v1231_v14 = vld [vmem:[%s1337_s24 + $0x14] ss:$8 sps:$4 sm:$0xff]  }
  0x11   : > { %v1230_v6 = vld [vmem:[%s1337_s24 + $0xa4] ss:$8 sps:$4 sm:$0xff]   ;;  %1086 = vmatprep.mubr.msk.bf16.mxu0 %vm477_vm0, %v1227_v5  ;;  %v1228_v13 = vld [vmem:[%s1337_s24 + $0xa0] ss:$8 sps:$4 sm:$0xff]   ;;  %v1233_v15 = vld [vmem:[%s1337_s24 + $0xb4] ss:$8 sps:$4 sm:$0xff]  }
  0x12   : > { %1096 = vmatprep.mubr.msk.bf16.mxu1 %vm477_vm0, %v1230_v6  ;;  %v1235_v16 = vld [vmem:[%s1337_s24 + $0x10] ss:$8 sps:$4 sm:$0xff]   ;;  %v1237_v18 = vld [vmem:[%s1337_s24 + $0x24] ss:$8 sps:$4 sm:$0xff]   ;;  %v1241_v20 = vld [vmem:[%s1337_s24 + $0x20] ss:$8 sps:$4 sm:$0xff]  }
  0x13   : > { %545 = vmatpush1.bf16.msra.mxu0 %v1219_v4  ;;  %1201 = vmatpush1.bf16.msra.mxu1 %v1219_v4  ;;  %v1236_v17 = vld [vmem:[%s1337_s24 + $0xb0] ss:$8 sps:$4 sm:$0xff]   ;;  %v1239_v19 = vld [vmem:[%s1337_s24 + $0xc4] ss:$8 sps:$4 sm:$0xff]   ;;  %v1242_v21 = vld [vmem:[%s1337_s24 + $0xc0] ss:$8 sps:$4 sm:$0xff]  }
  0x14   : > { %546 = vmatprep.subr.bf16.mxu0 %v1293_v1  ;;  %1193 = vmatprep.subr.bf16.mxu1 %v1293_v1  ;;  %v1243_v22 = vld [vmem:[%s1337_s24 + $0x34] ss:$8 sps:$4 sm:$0xff]   ;;  %v1247_v24 = vld [vmem:[%s1337_s24 + $0x30] ss:$8 sps:$4 sm:$0xff]   ;;  %v1249_v26 = vld [vmem:[%s1337_s24 + $0x44] ss:$8 sps:$4 sm:$0xff]  }
  0x15   : > { %v1245_v23 = vld [vmem:[%s1337_s24 + $0xd4] ss:$8 sps:$4 sm:$0xff]   ;;  %v1248_v25 = vld [vmem:[%s1337_s24 + $0xd0] ss:$8 sps:$4 sm:$0xff]   ;;  %v1251_v27 = vld [vmem:[%s1337_s24 + $0xe4] ss:$8 sps:$4 sm:$0xff]  }
  0x16   : > { %v1253_v28 = vld [vmem:[%s1337_s24 + $0x40] ss:$8 sps:$4 sm:$0xff]   ;;  %v1255_v30 = vld [vmem:[%s1337_s24 + $0x54] ss:$8 sps:$4 sm:$0xff]   ;;  %v1259_v32 = vld [vmem:[%s1337_s24 + $0x50] ss:$8 sps:$4 sm:$0xff]  }
  0x17   : > { %547 = vmatpush1.bf16.msra.mxu0 %v1220_v7  ;;  %1202 = vmatpush1.bf16.msra.mxu1 %v1220_v7  ;;  %v1254_v29 = vld [vmem:[%s1337_s24 + $0xe0] ss:$8 sps:$4 sm:$0xff]   ;;  %v1257_v31 = vld [vmem:[%s1337_s24 + $0xf4] ss:$8 sps:$4 sm:$0xff]   ;;  %v1260_v33 = vld [vmem:[%s1337_s24 + $0xf0] ss:$8 sps:$4 sm:$0xff]  }
  0x18   : > { %548 = vmatprep.subr.bf16.mxu0 %v1293_v1  ;;  %1194 = vmatprep.subr.bf16.mxu1 %v1293_v1  ;;  %v1261_v34 = vld [vmem:[%s1337_s24 + $0x64] ss:$8 sps:$4 sm:$0xff]   ;;  %v1265_v36 = vld [vmem:[%s1337_s24 + $0x60] ss:$8 sps:$4 sm:$0xff]   ;;  %v1267_v38 = vld [vmem:[%s1337_s24 + $0x74] ss:$8 sps:$4 sm:$0xff]  }
  0x19   : > { %v1263_v35 = vld [vmem:[%s1337_s24 + $0x104] ss:$8 sps:$4 sm:$0xff]   ;;  %v1266_v37 = vld [vmem:[%s1337_s24 + $0x100] ss:$8 sps:$4 sm:$0xff]   ;;  %v1269_v39 = vld [vmem:[%s1337_s24 + $0x114] ss:$8 sps:$4 sm:$0xff]  }
  0x1a   : > { %v1271_v40 = vld [vmem:[%s1337_s24 + $0x70] ss:$8 sps:$4 sm:$0xff]   ;;  %v1273_v42 = vld [vmem:[%s1337_s24 + $0x84] ss:$8 sps:$4 sm:$0xff]   ;;  %v1277_v44 = vld [vmem:[%s1337_s24 + $0x80] ss:$8 sps:$4 sm:$0xff]  }
  0x1b   : > { %549 = vmatpush1.bf16.msra.mxu0 %v1221_v8  ;;  %1203 = vmatpush1.bf16.msra.mxu1 %v1221_v8  ;;  %v1272_v41 = vld [vmem:[%s1337_s24 + $0x110] ss:$8 sps:$4 sm:$0xff]   ;;  %v1275_v43 = vld [vmem:[%s1337_s24 + $0x124] ss:$8 sps:$4 sm:$0xff]   ;;  %v1278_v45 = vld [vmem:[%s1337_s24 + $0x120] ss:$8 sps:$4 sm:$0xff]  }
  0x1c   : > { %550 = vmatprep.subr.bf16.mxu0 %v1293_v1  ;;  %1195 = vmatprep.subr.bf16.mxu1 %v1293_v1  ;;  %v1279_v46 = vld [vmem:[%s1337_s24 + $0x94] ss:$8 sps:$4 sm:$0xff]   ;;  %v1283_v48 = vld [vmem:[%s1337_s24 + $0x90] ss:$8 sps:$4 sm:$0xff]  }
  0x1d   : > { %v1281_v47 = vld [vmem:[%s1337_s24 + $0x134] ss:$8 sps:$4 sm:$0xff]   ;;  %v1284_v49 = vld [vmem:[%s1337_s24 + $0x130] ss:$8 sps:$4 sm:$0xff]  }
  0x1f   : > { %551 = vmatpush1.bf16.msra.mxu0 %v1222_v9  ;;  %1204 = vmatpush1.bf16.msra.mxu1 %v1222_v9 }
  0x20   : > { %552 = vmatprep.subr.bf16.mxu0 %v1293_v1  ;;  %1196 = vmatprep.subr.bf16.mxu1 %v1293_v1 }
  0x23   : > { %553 = vmatpush1.bf16.msra.mxu0 %v1223_v10  ;;  %1205 = vmatpush1.bf16.msra.mxu1 %v1223_v10 }
  0x24   : > { %554 = vmatprep.subr.bf16.mxu0 %v1293_v1  ;;  %1197 = vmatprep.subr.bf16.mxu1 %v1293_v1 }
  0x27   : > { %555 = vmatpush1.bf16.msra.mxu0 %v1224_v11  ;;  %1206 = vmatpush1.bf16.msra.mxu1 %v1224_v11 }
  0x2a   : > { %571 = vmatmul.mubr.bf16.vlgmr.msra.gmra.mrb[0].mxu0 %v1225_v12  ;;  %651 = vmatmul.mubr.bf16.vlgmr.msra.gmra.mrb[0].mxu1 %v1228_v13 }
  0x2b   : > { %1087 = vmatprep.mubr.msk.bf16.mxu0 %vm477_vm0, %v1231_v14  ;;  %1097 = vmatprep.mubr.msk.bf16.mxu1 %vm477_vm0, %v1233_v15 }
  0x32   : > { %579 = vmatmul.mubr.bf16.gmra.mrb[4].mxu0 %v1235_v16  ;;  %659 = vmatmul.mubr.bf16.gmra.mrb[4].mxu1 %v1236_v17 }
  0x33   : > { %1088 = vmatprep.mubr.msk.bf16.mxu0 %vm477_vm0, %v1237_v18  ;;  %1098 = vmatprep.mubr.msk.bf16.mxu1 %vm477_vm0, %v1239_v19 }
  0x3a   : > { %587 = vmatmul.mubr.bf16.gmra.mrb[8].mxu0 %v1241_v20  ;;  %667 = vmatmul.mubr.bf16.gmra.mrb[8].mxu1 %v1242_v21 }
  0x3b   : > { %1089 = vmatprep.mubr.msk.bf16.mxu0 %vm477_vm0, %v1243_v22  ;;  %1099 = vmatprep.mubr.msk.bf16.mxu1 %vm477_vm0, %v1245_v23 }
  0x42   : > { %595 = vmatmul.mubr.bf16.gmra.mrb[12].mxu0 %v1247_v24  ;;  %675 = vmatmul.mubr.bf16.gmra.mrb[12].mxu1 %v1248_v25 }
  0x43   : > { %1090 = vmatprep.mubr.msk.bf16.mxu0 %vm477_vm0, %v1249_v26  ;;  %1100 = vmatprep.mubr.msk.bf16.mxu1 %vm477_vm0, %v1251_v27 }
  0x4a   : > { %603 = vmatmul.mubr.bf16.gmra.mrb[16].mxu0 %v1253_v28  ;;  %683 = vmatmul.mubr.bf16.gmra.mrb[16].mxu1 %v1254_v29 }
  0x4b   : > { %1091 = vmatprep.mubr.msk.bf16.mxu0 %vm477_vm0, %v1255_v30  ;;  %1101 = vmatprep.mubr.msk.bf16.mxu1 %vm477_vm0, %v1257_v31 }
  0x52   : > { %611 = vmatmul.mubr.bf16.gmra.mrb[20].mxu0 %v1259_v32  ;;  %691 = vmatmul.mubr.bf16.gmra.mrb[20].mxu1 %v1260_v33 }
  0x53   : > { %1092 = vmatprep.mubr.msk.bf16.mxu0 %vm477_vm0, %v1261_v34  ;;  %1102 = vmatprep.mubr.msk.bf16.mxu1 %vm477_vm0, %v1263_v35 }
  0x5a   : > { %619 = vmatmul.mubr.bf16.gmra.mrb[24].mxu0 %v1265_v36  ;;  %699 = vmatmul.mubr.bf16.gmra.mrb[24].mxu1 %v1266_v37 }
  0x5b   : > { %1093 = vmatprep.mubr.msk.bf16.mxu0 %vm477_vm0, %v1267_v38  ;;  %1103 = vmatprep.mubr.msk.bf16.mxu1 %vm477_vm0, %v1269_v39 }
  0x62   : > { %627 = vmatmul.mubr.bf16.gmra.mrb[28].mxu0 %v1271_v40  ;;  %707 = vmatmul.mubr.bf16.gmra.mrb[28].mxu1 %v1272_v41 }
  0x63   : > { %1094 = vmatprep.mubr.msk.bf16.mxu0 %vm477_vm0, %v1273_v42  ;;  %1104 = vmatprep.mubr.msk.bf16.mxu1 %vm477_vm0, %v1275_v43 }
  0x6a   : > { %635 = vmatmul.mubr.bf16.gmra.mrb[32].mxu0 %v1277_v44  ;;  %715 = vmatmul.mubr.bf16.gmra.mrb[32].mxu1 %v1278_v45 }
  0x6b   : > { %1095 = vmatprep.mubr.msk.bf16.mxu0 %vm477_vm0, %v1279_v46  ;;  %1105 = vmatprep.mubr.msk.bf16.mxu1 %vm477_vm0, %v1281_v47 }
  0x72   : > { %643 = vmatmul.mubr.bf16.gmra.mrb[36].mxu0 %v1283_v48  ;;  %723 = vmatmul.mubr.bf16.gmra.mrb[36].mxu1 %v1284_v49 }
  0xfd   : > { %v572_v51 = vpop.f32.mrb[0].mxu0  ;;  %v652_v52 = vpop.f32.mrb[0].mxu1 }
  0xfe   : > { %v573_v53 = vadd.f32 %v1420_v50, %v572_v51  ;;  %v653_v54 = vadd.f32 %v1420_v50, %v652_v52  ;;  %v574_v55 = vpop.f32.mrb[1].mxu0  ;;  %v654_v56 = vpop.f32.mrb[1].mxu1 }
  0xff   : > { %v575_v57 = vpop.f32.mrb[2].mxu0  ;;  %v655_v58 = vpop.f32.mrb[2].mxu1 }
 0x100   : > { %v731_v59 = vmax.f32 %v573_v53, 0.0  ;;  %v751_v60 = vmax.f32 %v653_v54, 0.0  ;;  %v576_v61 = vadd.f32 %v1420_v50, %v575_v57  ;;  %v656_v62 = vadd.f32 %v1420_v50, %v655_v58  ;;  %v577_v63 = vpop.f32.mrb[3].mxu0  ;;  %v657_v0 = vpop.f32.mrb[3].mxu1 }
 0x102   : > { %v1149_v1 = vpack.c.bf16 %v731_v59, %v731_v59  ;;  %v1169_v2 = vpack.c.bf16 %v751_v60, %v751_v60  ;;  %v732_v3 = vmax.f32 %v576_v61, 0.0  ;;  %v752_v4 = vmax.f32 %v656_v62, 0.0 }
 0x104   : > { %932 = vst.msk [vmem:[%s1430_s16] sm:$0xf] %vm931_vm1, %v1149_v1  ;;  %952 = vst.msk [vmem:[%s1430_s16 + $0x50] sm:$0xf] %vm931_vm1, %v1169_v2  ;;  %v1150_v5 = vpack.c.bf16 %v732_v3, %v732_v3  ;;  %v1170_v6 = vpack.c.bf16 %v752_v4, %v752_v4 }
 0x105   : > { %v580_v7 = vpop.f32.mrb[4].mxu0  ;;  %v660_v8 = vpop.f32.mrb[4].mxu1 }
 0x106   : > { %933 = vst.msk [vmem:[%s1430_s16 + $0x4] sm:$0xf] %vm931_vm1, %v1150_v5  ;;  %953 = vst.msk [vmem:[%s1430_s16 + $0x54] sm:$0xf] %vm931_vm1, %v1170_v6  ;;  %v581_v9 = vadd.f32 %v1420_v50, %v580_v7  ;;  %v661_v10 = vadd.f32 %v1420_v50, %v660_v8  ;;  %v582_v11 = vpop.f32.mrb[5].mxu0  ;;  %v662_v12 = vpop.f32.mrb[5].mxu1 }
 0x107   : > { %v583_v13 = vpop.f32.mrb[6].mxu0  ;;  %v663_v14 = vpop.f32.mrb[6].mxu1 }
 0x108   : > { %v733_v15 = vmax.f32 %v581_v9, 0.0  ;;  %v753_v16 = vmax.f32 %v661_v10, 0.0  ;;  %v584_v17 = vadd.f32 %v1420_v50, %v583_v13  ;;  %v664_v18 = vadd.f32 %v1420_v50, %v663_v14  ;;  %v585_v19 = vpop.f32.mrb[7].mxu0  ;;  %v665_v20 = vpop.f32.mrb[7].mxu1 }
 0x10a   : > { %v1151_v21 = vpack.c.bf16 %v733_v15, %v733_v15  ;;  %v1171_v22 = vpack.c.bf16 %v753_v16, %v753_v16  ;;  %v734_v23 = vmax.f32 %v584_v17, 0.0  ;;  %v754_v24 = vmax.f32 %v664_v18, 0.0 }
 0x10c   : > { %934 = vst.msk [vmem:[%s1430_s16 + $0x8] sm:$0xf] %vm931_vm1, %v1151_v21  ;;  %954 = vst.msk [vmem:[%s1430_s16 + $0x58] sm:$0xf] %vm931_vm1, %v1171_v22  ;;  %v1152_v25 = vpack.c.bf16 %v734_v23, %v734_v23  ;;  %v1172_v26 = vpack.c.bf16 %v754_v24, %v754_v24 }
 0x10d   : > { %v588_v27 = vpop.f32.mrb[8].mxu0  ;;  %v668_v28 = vpop.f32.mrb[8].mxu1 }
 0x10e   : > { %935 = vst.msk [vmem:[%s1430_s16 + $0xc] sm:$0xf] %vm931_vm1, %v1152_v25  ;;  %955 = vst.msk [vmem:[%s1430_s16 + $0x5c] sm:$0xf] %vm931_vm1, %v1172_v26  ;;  %v589_v29 = vadd.f32 %v1420_v50, %v588_v27  ;;  %v669_v30 = vadd.f32 %v1420_v50, %v668_v28  ;;  %v590_v31 = vpop.f32.mrb[9].mxu0  ;;  %v670_v32 = vpop.f32.mrb[9].mxu1 }
 0x10f   : > { %v591_v33 = vpop.f32.mrb[10].mxu0  ;;  %v671_v34 = vpop.f32.mrb[10].mxu1 }
 0x110   : > { %v735_v35 = vmax.f32 %v589_v29, 0.0  ;;  %v755_v36 = vmax.f32 %v669_v30, 0.0  ;;  %v592_v37 = vadd.f32 %v1420_v50, %v591_v33  ;;  %v672_v38 = vadd.f32 %v1420_v50, %v671_v34  ;;  %v593_v39 = vpop.f32.mrb[11].mxu0  ;;  %v673_v40 = vpop.f32.mrb[11].mxu1 }
 0x112   : > { %v1153_v41 = vpack.c.bf16 %v735_v35, %v735_v35  ;;  %v1173_v42 = vpack.c.bf16 %v755_v36, %v755_v36  ;;  %v736_v43 = vmax.f32 %v592_v37, 0.0  ;;  %v756_v44 = vmax.f32 %v672_v38, 0.0 }
 0x114   : > { %936 = vst.msk [vmem:[%s1430_s16 + $0x10] sm:$0xf] %vm931_vm1, %v1153_v41  ;;  %956 = vst.msk [vmem:[%s1430_s16 + $0x60] sm:$0xf] %vm931_vm1, %v1173_v42  ;;  %v1154_v45 = vpack.c.bf16 %v736_v43, %v736_v43  ;;  %v1174_v46 = vpack.c.bf16 %v756_v44, %v756_v44 }
 0x115   : > { %v596_v47 = vpop.f32.mrb[12].mxu0  ;;  %v676_v48 = vpop.f32.mrb[12].mxu1 }
 0x116   : > { %937 = vst.msk [vmem:[%s1430_s16 + $0x14] sm:$0xf] %vm931_vm1, %v1154_v45  ;;  %957 = vst.msk [vmem:[%s1430_s16 + $0x64] sm:$0xf] %vm931_vm1, %v1174_v46  ;;  %v597_v49 = vadd.f32 %v1420_v50, %v596_v47  ;;  %v677_v51 = vadd.f32 %v1420_v50, %v676_v48  ;;  %v598_v52 = vpop.f32.mrb[13].mxu0  ;;  %v678_v53 = vpop.f32.mrb[13].mxu1 }
 0x117   : > { %v599_v54 = vpop.f32.mrb[14].mxu0  ;;  %v679_v55 = vpop.f32.mrb[14].mxu1 }
 0x118   : > { %v737_v56 = vmax.f32 %v597_v49, 0.0  ;;  %v757_v57 = vmax.f32 %v677_v51, 0.0  ;;  %v600_v58 = vadd.f32 %v1420_v50, %v599_v54  ;;  %v680_v59 = vadd.f32 %v1420_v50, %v679_v55  ;;  %v601_v60 = vpop.f32.mrb[15].mxu0  ;;  %v681_v61 = vpop.f32.mrb[15].mxu1 }
 0x11a   : > { %v1155_v62 = vpack.c.bf16 %v737_v56, %v737_v56  ;;  %v1175_v63 = vpack.c.bf16 %v757_v57, %v757_v57  ;;  %v738_v0 = vmax.f32 %v600_v58, 0.0  ;;  %v758_v1 = vmax.f32 %v680_v59, 0.0 }
 0x11c   : > { %938 = vst.msk [vmem:[%s1430_s16 + $0x18] sm:$0xf] %vm931_vm1, %v1155_v62  ;;  %958 = vst.msk [vmem:[%s1430_s16 + $0x68] sm:$0xf] %vm931_vm1, %v1175_v63  ;;  %v1156_v2 = vpack.c.bf16 %v738_v0, %v738_v0  ;;  %v1176_v3 = vpack.c.bf16 %v758_v1, %v758_v1 }
 0x11d   : > { %v604_v4 = vpop.f32.mrb[16].mxu0  ;;  %v684_v5 = vpop.f32.mrb[16].mxu1 }
 0x11e   : > { %939 = vst.msk [vmem:[%s1430_s16 + $0x1c] sm:$0xf] %vm931_vm1, %v1156_v2  ;;  %959 = vst.msk [vmem:[%s1430_s16 + $0x6c] sm:$0xf] %vm931_vm1, %v1176_v3  ;;  %v605_v6 = vadd.f32 %v1420_v50, %v604_v4  ;;  %v685_v7 = vadd.f32 %v1420_v50, %v684_v5  ;;  %v606_v8 = vpop.f32.mrb[17].mxu0  ;;  %v686_v9 = vpop.f32.mrb[17].mxu1 }
 0x11f   : > { %v607_v10 = vpop.f32.mrb[18].mxu0  ;;  %v687_v11 = vpop.f32.mrb[18].mxu1 }
 0x120   : > { %v739_v12 = vmax.f32 %v605_v6, 0.0  ;;  %v759_v13 = vmax.f32 %v685_v7, 0.0  ;;  %v608_v14 = vadd.f32 %v1420_v50, %v607_v10  ;;  %v688_v15 = vadd.f32 %v1420_v50, %v687_v11  ;;  %v609_v16 = vpop.f32.mrb[19].mxu0  ;;  %v689_v17 = vpop.f32.mrb[19].mxu1 }
 0x122   : > { %v1157_v18 = vpack.c.bf16 %v739_v12, %v739_v12  ;;  %v1177_v19 = vpack.c.bf16 %v759_v13, %v759_v13  ;;  %v740_v20 = vmax.f32 %v608_v14, 0.0  ;;  %v760_v21 = vmax.f32 %v688_v15, 0.0 }
 0x124   : > { %940 = vst.msk [vmem:[%s1430_s16 + $0x20] sm:$0xf] %vm931_vm1, %v1157_v18  ;;  %960 = vst.msk [vmem:[%s1430_s16 + $0x70] sm:$0xf] %vm931_vm1, %v1177_v19  ;;  %v1158_v22 = vpack.c.bf16 %v740_v20, %v740_v20  ;;  %v1178_v23 = vpack.c.bf16 %v760_v21, %v760_v21 }
 0x125   : > { %v612_v24 = vpop.f32.mrb[20].mxu0  ;;  %v692_v25 = vpop.f32.mrb[20].mxu1 }
 0x126   : > { %941 = vst.msk [vmem:[%s1430_s16 + $0x24] sm:$0xf] %vm931_vm1, %v1158_v22  ;;  %961 = vst.msk [vmem:[%s1430_s16 + $0x74] sm:$0xf] %vm931_vm1, %v1178_v23  ;;  %v613_v26 = vadd.f32 %v1420_v50, %v612_v24  ;;  %v693_v27 = vadd.f32 %v1420_v50, %v692_v25  ;;  %v614_v28 = vpop.f32.mrb[21].mxu0  ;;  %v694_v29 = vpop.f32.mrb[21].mxu1 }
 0x127   : > { %v615_v30 = vpop.f32.mrb[22].mxu0  ;;  %v695_v31 = vpop.f32.mrb[22].mxu1 }
 0x128   : > { %v741_v32 = vmax.f32 %v613_v26, 0.0  ;;  %v761_v33 = vmax.f32 %v693_v27, 0.0  ;;  %v616_v34 = vadd.f32 %v1420_v50, %v615_v30  ;;  %v696_v35 = vadd.f32 %v1420_v50, %v695_v31  ;;  %v617_v36 = vpop.f32.mrb[23].mxu0  ;;  %v697_v37 = vpop.f32.mrb[23].mxu1 }
 0x12a   : > { %v1159_v38 = vpack.c.bf16 %v741_v32, %v741_v32  ;;  %v1179_v39 = vpack.c.bf16 %v761_v33, %v761_v33  ;;  %v742_v40 = vmax.f32 %v616_v34, 0.0  ;;  %v762_v41 = vmax.f32 %v696_v35, 0.0 }
 0x12c   : > { %942 = vst.msk [vmem:[%s1430_s16 + $0x28] sm:$0xf] %vm931_vm1, %v1159_v38  ;;  %962 = vst.msk [vmem:[%s1430_s16 + $0x78] sm:$0xf] %vm931_vm1, %v1179_v39  ;;  %v1160_v42 = vpack.c.bf16 %v742_v40, %v742_v40  ;;  %v1180_v43 = vpack.c.bf16 %v762_v41, %v762_v41 }
 0x12d   : > { %v620_v44 = vpop.f32.mrb[24].mxu0  ;;  %v700_v45 = vpop.f32.mrb[24].mxu1 }
 0x12e   : > { %943 = vst.msk [vmem:[%s1430_s16 + $0x2c] sm:$0xf] %vm931_vm1, %v1160_v42  ;;  %963 = vst.msk [vmem:[%s1430_s16 + $0x7c] sm:$0xf] %vm931_vm1, %v1180_v43  ;;  %v621_v46 = vadd.f32 %v1420_v50, %v620_v44  ;;  %v701_v47 = vadd.f32 %v1420_v50, %v700_v45  ;;  %v622_v48 = vpop.f32.mrb[25].mxu0  ;;  %v702_v49 = vpop.f32.mrb[25].mxu1 }
 0x12f   : > { %v623_v51 = vpop.f32.mrb[26].mxu0  ;;  %v703_v52 = vpop.f32.mrb[26].mxu1 }
 0x130   : > { %v743_v53 = vmax.f32 %v621_v46, 0.0  ;;  %v763_v54 = vmax.f32 %v701_v47, 0.0  ;;  %v624_v55 = vadd.f32 %v1420_v50, %v623_v51  ;;  %v704_v56 = vadd.f32 %v1420_v50, %v703_v52  ;;  %v625_v57 = vpop.f32.mrb[27].mxu0  ;;  %v705_v58 = vpop.f32.mrb[27].mxu1 }
 0x132   : > { %v1161_v59 = vpack.c.bf16 %v743_v53, %v743_v53  ;;  %v1181_v60 = vpack.c.bf16 %v763_v54, %v763_v54  ;;  %v744_v61 = vmax.f32 %v624_v55, 0.0  ;;  %v764_v62 = vmax.f32 %v704_v56, 0.0 }
 0x134   : > { %944 = vst.msk [vmem:[%s1430_s16 + $0x30] sm:$0xf] %vm931_vm1, %v1161_v59  ;;  %964 = vst.msk [vmem:[%s1430_s16 + $0x80] sm:$0xf] %vm931_vm1, %v1181_v60  ;;  %v1162_v63 = vpack.c.bf16 %v744_v61, %v744_v61  ;;  %v1182_v0 = vpack.c.bf16 %v764_v62, %v764_v62 }
 0x135   : > { %v628_v1 = vpop.f32.mrb[28].mxu0  ;;  %v708_v2 = vpop.f32.mrb[28].mxu1 }
 0x136   : > { %945 = vst.msk [vmem:[%s1430_s16 + $0x34] sm:$0xf] %vm931_vm1, %v1162_v63  ;;  %965 = vst.msk [vmem:[%s1430_s16 + $0x84] sm:$0xf] %vm931_vm1, %v1182_v0  ;;  %v629_v3 = vadd.f32 %v1420_v50, %v628_v1  ;;  %v709_v4 = vadd.f32 %v1420_v50, %v708_v2  ;;  %v630_v5 = vpop.f32.mrb[29].mxu0  ;;  %v710_v6 = vpop.f32.mrb[29].mxu1 }
 0x137   : > { %v631_v7 = vpop.f32.mrb[30].mxu0  ;;  %v711_v8 = vpop.f32.mrb[30].mxu1 }
 0x138   : > { %v745_v9 = vmax.f32 %v629_v3, 0.0  ;;  %v765_v10 = vmax.f32 %v709_v4, 0.0  ;;  %v632_v11 = vadd.f32 %v1420_v50, %v631_v7  ;;  %v712_v12 = vadd.f32 %v1420_v50, %v711_v8  ;;  %v633_v13 = vpop.f32.mrb[31].mxu0  ;;  %v713_v14 = vpop.f32.mrb[31].mxu1 }
 0x13a   : > { %v1163_v15 = vpack.c.bf16 %v745_v9, %v745_v9  ;;  %v1183_v16 = vpack.c.bf16 %v765_v10, %v765_v10  ;;  %v746_v17 = vmax.f32 %v632_v11, 0.0  ;;  %v766_v18 = vmax.f32 %v712_v12, 0.0 }
 0x13c   : > { %946 = vst.msk [vmem:[%s1430_s16 + $0x38] sm:$0xf] %vm931_vm1, %v1163_v15  ;;  %966 = vst.msk [vmem:[%s1430_s16 + $0x88] sm:$0xf] %vm931_vm1, %v1183_v16  ;;  %v1164_v19 = vpack.c.bf16 %v746_v17, %v746_v17  ;;  %v1184_v20 = vpack.c.bf16 %v766_v18, %v766_v18 }
 0x13d   : > { %v636_v21 = vpop.f32.mrb[32].mxu0  ;;  %v716_v22 = vpop.f32.mrb[32].mxu1 }
 0x13e   : > { %947 = vst.msk [vmem:[%s1430_s16 + $0x3c] sm:$0xf] %vm931_vm1, %v1164_v19  ;;  %967 = vst.msk [vmem:[%s1430_s16 + $0x8c] sm:$0xf] %vm931_vm1, %v1184_v20  ;;  %v637_v23 = vadd.f32 %v1420_v50, %v636_v21  ;;  %v717_v24 = vadd.f32 %v1420_v50, %v716_v22  ;;  %v638_v25 = vpop.f32.mrb[33].mxu0  ;;  %v718_v26 = vpop.f32.mrb[33].mxu1 }
 0x13f   : > { %v639_v27 = vpop.f32.mrb[34].mxu0  ;;  %v719_v28 = vpop.f32.mrb[34].mxu1 }
 0x140   : > { %v747_v29 = vmax.f32 %v637_v23, 0.0  ;;  %v767_v30 = vmax.f32 %v717_v24, 0.0  ;;  %v640_v31 = vadd.f32 %v1420_v50, %v639_v27  ;;  %v720_v32 = vadd.f32 %v1420_v50, %v719_v28  ;;  %v641_v33 = vpop.f32.mrb[35].mxu0  ;;  %v721_v34 = vpop.f32.mrb[35].mxu1 }
 0x142   : > { %v1165_v35 = vpack.c.bf16 %v747_v29, %v747_v29  ;;  %v1185_v36 = vpack.c.bf16 %v767_v30, %v767_v30  ;;  %v748_v37 = vmax.f32 %v640_v31, 0.0  ;;  %v768_v38 = vmax.f32 %v720_v32, 0.0 }
 0x144   : > { %948 = vst.msk [vmem:[%s1430_s16 + $0x40] sm:$0xf] %vm931_vm1, %v1165_v35  ;;  %968 = vst.msk [vmem:[%s1430_s16 + $0x90] sm:$0xf] %vm931_vm1, %v1185_v36  ;;  %v1166_v39 = vpack.c.bf16 %v748_v37, %v748_v37  ;;  %v1186_v40 = vpack.c.bf16 %v768_v38, %v768_v38 }
 0x145   : > { %v644_v41 = vpop.f32.mrb[36].mxu0  ;;  %v724_v42 = vpop.f32.mrb[36].mxu1 }
 0x146   : > { %949 = vst.msk [vmem:[%s1430_s16 + $0x44] sm:$0xf] %vm931_vm1, %v1166_v39  ;;  %969 = vst.msk [vmem:[%s1430_s16 + $0x94] sm:$0xf] %vm931_vm1, %v1186_v40  ;;  %v645_v43 = vadd.f32 %v1420_v50, %v644_v41  ;;  %v725_v44 = vadd.f32 %v1420_v50, %v724_v42  ;;  %v646_v45 = vpop.f32.mrb[37].mxu0  ;;  %v726_v46 = vpop.f32.mrb[37].mxu1 }
 0x147   : > { %v647_v47 = vpop.f32.mrb[38].mxu0  ;;  %v727_v48 = vpop.f32.mrb[38].mxu1 }
 0x148   : > { %v749_v49 = vmax.f32 %v645_v43, 0.0  ;;  %v769_v51 = vmax.f32 %v725_v44, 0.0  ;;  %v648_v52 = vadd.f32 %v1420_v50, %v647_v47  ;;  %v728_v53 = vadd.f32 %v1420_v50, %v727_v48  ;;  %v649_v54 = vpop.f32.mrb[39].mxu0  ;;  %v729_v55 = vpop.f32.mrb[39].mxu1 }
 0x14a   : > { %v1167_v56 = vpack.c.bf16 %v749_v49, %v749_v49  ;;  %v1187_v57 = vpack.c.bf16 %v769_v51, %v769_v51  ;;  %v750_v58 = vmax.f32 %v648_v52, 0.0  ;;  %v770_v59 = vmax.f32 %v728_v53, 0.0 }
 0x14c   : > { %950 = vst.msk [vmem:[%s1430_s16 + $0x48] sm:$0xf] %vm931_vm1, %v1167_v56  ;;  %970 = vst.msk [vmem:[%s1430_s16 + $0x98] sm:$0xf] %vm931_vm1, %v1187_v57  ;;  %v1168_v60 = vpack.c.bf16 %v750_v58, %v750_v58  ;;  %v1188_v61 = vpack.c.bf16 %v770_v59, %v770_v59 }
 0x14e   : > { %951 = vst.msk [vmem:[%s1430_s16 + $0x4c] sm:$0xf] %vm931_vm1, %v1168_v60  ;;  %971 = vst.msk [vmem:[%s1430_s16 + $0x9c] sm:$0xf] %vm931_vm1, %v1188_v61 }
 0x14f PF: > { %s13_s12 = sadd.s32 1, %s1291_s12  }
 0x150   : > { %p10_p4 = scmp.ge.s32.totalorder %s13_s12, 7  }
 0x152   :  { %12 = sbr.rel (!%p10_p4) target bundleno = 1 (0x1), region = 62 }

// kernel: forward.7
= control target key start
LH: loop header
LB: loop body
LE: loop exit
PB: predicated region body
PF: predicated region fallthrough
CT: control target
= control target key end

     0   :  { %v1590_v0 = vmov 0   ;;  %vm508_vm0 = vcmask 261120   ;;  %s2002_s1 = inlined_call_operand.vmem [shape: bf16[288,128], index: 1, kind: input, shape index: {}]   ;;  %s2003_s0 = inlined_call_operand.vmem [shape: bf16[288,288], index: 0, kind: input, shape index: {}]   ;;  %s2004_s2 = inlined_call_operand.vmem [shape: f32[1,128], index: 2, kind: input, shape index: {}]   ;;  %s2005_s3 = inlined_call_operand.vmem [shape: bf16[288,128], index: 3, kind: output, shape index: {}]  }
   0x1   :  { %563 = vmatprep.subr.bf16.mxu0 %v1590_v0  ;;  %1467 = vmatprep.subr.bf16.mxu1 %v1590_v0  ;;  %v1500_v1 = vld [vmem:[%s2002_s1] sm:$0xff]   ;;  %v1501_v2 = vld [vmem:[%s2002_s1 + $0x8] sm:$0xff]   ;;  %v1502_v3 = vld [vmem:[%s2002_s1 + $0x10] sm:$0xff]  }
   0x2   :  { %564 = vmatpush1.bf16.msra.mxu0 %v1500_v1  ;;  %1483 = vmatpush1.bf16.msra.mxu1 %v1500_v1  ;;  %v1503_v4 = vld [vmem:[%s2002_s1 + $0x18] sm:$0xff]   ;;  %v1504_v5 = vld [vmem:[%s2002_s1 + $0x20] sm:$0xff]   ;;  %v1505_v7 = vld [vmem:[%s2002_s1 + $0x28] sm:$0xff]  }
   0x3   :  { %565 = vmatprep.subr.bf16.mxu0 %v1590_v0  ;;  %1468 = vmatprep.subr.bf16.mxu1 %v1590_v0  ;;  %v1518_v6 = vld [vmem:[%s2003_s0 + $0x4] ss:$12 sps:$4 sm:$0xff]   ;;  %v1521_v8 = vld [vmem:[%s2003_s0 + $0x154] ss:$12 sps:$4 sm:$0xff]   ;;  %v1507_v10 = vld [vmem:[%s2002_s1 + $0x38] sm:$0xff]  }
   0x4   :  { %595 = vmatprep.mubr.bf16.mxu0 %v1518_v6  ;;  %707 = vmatprep.mubr.bf16.mxu1 %v1521_v8  ;;  %v1506_v9 = vld [vmem:[%s2002_s1 + $0x30] sm:$0xff]   ;;  %v1508_v11 = vld [vmem:[%s2002_s1 + $0x40] sm:$0xff]   ;;  %v1509_v12 = vld [vmem:[%s2002_s1 + $0x48] sm:$0xff]  }
   0x5   :  { %v1510_v13 = vld [vmem:[%s2002_s1 + $0x50] sm:$0xff]   ;;  %v1511_v14 = vld [vmem:[%s2002_s1 + $0x58] sm:$0xff]   ;;  %v1512_v15 = vld [vmem:[%s2002_s1 + $0x60] sm:$0xff]  }
   0x6   :  { %566 = vmatpush1.bf16.msra.mxu0 %v1501_v2  ;;  %1484 = vmatpush1.bf16.msra.mxu1 %v1501_v2  ;;  %v1513_v16 = vld [vmem:[%s2002_s1 + $0x68] sm:$0xff]   ;;  %v1514_v17 = vld [vmem:[%s2002_s1 + $0x70] sm:$0xff]   ;;  %v1515_v18 = vld [vmem:[%s2002_s1 + $0x78] sm:$0xff]  }
   0x7   :  { %567 = vmatprep.subr.bf16.mxu0 %v1590_v0  ;;  %1469 = vmatprep.subr.bf16.mxu1 %v1590_v0  ;;  %v1528_v19 = vld [vmem:[%s2002_s1 + $0x80] sm:$0xff]   ;;  %v1519_v21 = vld [vmem:[%s2003_s0 + $0x150] ss:$12 sps:$4 sm:$0xff]   ;;  %v1524_v23 = vld [vmem:[%s2003_s0 + $0x16c] ss:$12 sps:$4 sm:$0xff]  }
   0x8   :  { %v1516_v20 = vld [vmem:[%s2003_s0] ss:$12 sps:$4 sm:$0xff]   ;;  %v1522_v22 = vld [vmem:[%s2003_s0 + $0x1c] ss:$12 sps:$4 sm:$0xff]   ;;  %v1526_v25 = vld [vmem:[%s2003_s0 + $0x18] ss:$12 sps:$4 sm:$0xff]  }
   0x9   :  { %v1541_v24 = vld [vmem:[%s2002_s1 + $0x88] sm:$0xff]   ;;  %v1529_v27 = vld [vmem:[%s2003_s0 + $0x34] ss:$12 sps:$4 sm:$0xff]   ;;  %v1531_v28 = vld [vmem:[%s2003_s0 + $0x184] ss:$12 sps:$4 sm:$0xff]  }
   0xa   :  { %568 = vmatpush1.bf16.msra.mxu0 %v1502_v3  ;;  %1485 = vmatpush1.bf16.msra.mxu1 %v1502_v3  ;;  %v1527_v26 = vld [vmem:[%s2003_s0 + $0x168] ss:$12 sps:$4 sm:$0xff]   ;;  %v1533_v29 = vld [vmem:[%s2003_s0 + $0x30] ss:$12 sps:$4 sm:$0xff]   ;;  %v1534_v30 = vld [vmem:[%s2003_s0 + $0x180] ss:$12 sps:$4 sm:$0xff]  }
   0xb   :  { %569 = vmatprep.subr.bf16.mxu0 %v1590_v0  ;;  %1470 = vmatprep.subr.bf16.mxu1 %v1590_v0  ;;  %v1535_v31 = vld [vmem:[%s2003_s0 + $0x4c] ss:$12 sps:$4 sm:$0xff]   ;;  %v1537_v32 = vld [vmem:[%s2003_s0 + $0x19c] ss:$12 sps:$4 sm:$0xff]   ;;  %v1542_v35 = vld [vmem:[%s2003_s0 + $0x64] ss:$12 sps:$4 sm:$0xff]  }
   0xc   :  { %v1539_v33 = vld [vmem:[%s2003_s0 + $0x48] ss:$12 sps:$4 sm:$0xff]   ;;  %v1540_v34 = vld [vmem:[%s2003_s0 + $0x198] ss:$12 sps:$4 sm:$0xff]   ;;  %v1545_v37 = vld [vmem:[%s2003_s0 + $0x60] ss:$12 sps:$4 sm:$0xff]  }
   0xd   :  { %v1544_v36 = vld [vmem:[%s2003_s0 + $0x8] ss:$12 sps:$4 sm:$0xff]   ;;  %v1546_v38 = vld [vmem:[%s2003_s0 + $0x20] ss:$12 sps:$4 sm:$0xff]   ;;  %v1549_v40 = vld [vmem:[%s2003_s0 + $0x38] ss:$12 sps:$4 sm:$0xff]  }
   0xe   :  { %570 = vmatpush1.bf16.msra.mxu0 %v1503_v4  ;;  %1486 = vmatpush1.bf16.msra.mxu1 %v1503_v4  ;;  %v1547_v39 = vld [vmem:[%s2003_s0 + $0x7c] ss:$12 sps:$4 sm:$0xff]   ;;  %v1550_v41 = vld [vmem:[%s2003_s0 + $0x78] ss:$12 sps:$4 sm:$0xff]   ;;  %v1552_v43 = vld [vmem:[%s2003_s0 + $0x94] ss:$12 sps:$4 sm:$0xff]  }
   0xf   :  { %571 = vmatprep.subr.bf16.mxu0 %v1590_v0  ;;  %1471 = vmatprep.subr.bf16.mxu1 %v1590_v0  ;;  %v1551_v42 = vld [vmem:[%s2003_s0 + $0x50] ss:$12 sps:$4 sm:$0xff]   ;;  %v1554_v44 = vld [vmem:[%s2003_s0 + $0x68] ss:$12 sps:$4 sm:$0xff]   ;;  %v1556_v46 = vld [vmem:[%s2003_s0 + $0x80] ss:$12 sps:$4 sm:$0xff]  }
  0x10   :  { %v1555_v45 = vld [vmem:[%s2003_s0 + $0x90] ss:$12 sps:$4 sm:$0xff]   ;;  %v1557_v47 = vld [vmem:[%s2003_s0 + $0xac] ss:$12 sps:$4 sm:$0xff]   ;;  %v1560_v49 = vld [vmem:[%s2003_s0 + $0xa8] ss:$12 sps:$4 sm:$0xff]  }
  0x11   :  { %v1559_v48 = vld [vmem:[%s2003_s0 + $0x98] ss:$12 sps:$4 sm:$0xff]   ;;  %v1561_v50 = vld [vmem:[%s2003_s0 + $0xb0] ss:$12 sps:$4 sm:$0xff]   ;;  %v1564_v52 = vld [vmem:[%s2003_s0 + $0xc8] ss:$12 sps:$4 sm:$0xff]  }
  0x12   :  { %572 = vmatpush1.bf16.msra.mxu0 %v1504_v5  ;;  %1487 = vmatpush1.bf16.msra.mxu1 %v1504_v5  ;;  %v1562_v51 = vld [vmem:[%s2003_s0 + $0xc4] ss:$12 sps:$4 sm:$0xff]   ;;  %v1565_v53 = vld [vmem:[%s2003_s0 + $0xc0] ss:$12 sps:$4 sm:$0xff]   ;;  %v1567_v55 = vld [vmem:[%s2003_s0 + $0xdc] ss:$12 sps:$4 sm:$0xff]  }
  0x13   :  { %573 = vmatprep.subr.bf16.mxu0 %v1590_v0  ;;  %1472 = vmatprep.subr.bf16.mxu1 %v1590_v0  ;;  %v1566_v54 = vld [vmem:[%s2003_s0 + $0xe0] ss:$12 sps:$4 sm:$0xff]   ;;  %v1569_v56 = vld [vmem:[%s2003_s0 + $0xf8] ss:$12 sps:$4 sm:$0xff]   ;;  %v1571_v58 = vld [vmem:[%s2003_s0 + $0x110] ss:$12 sps:$4 sm:$0xff]  }
  0x14   :  { %v1570_v57 = vld [vmem:[%s2003_s0 + $0xd8] ss:$12 sps:$4 sm:$0xff]   ;;  %v1572_v59 = vld [vmem:[%s2003_s0 + $0xf4] ss:$12 sps:$4 sm:$0xff]   ;;  %v1575_v61 = vld [vmem:[%s2003_s0 + $0xf0] ss:$12 sps:$4 sm:$0xff]  }
  0x15   :  { %v1574_v60 = vld [vmem:[%s2003_s0 + $0x128] ss:$12 sps:$4 sm:$0xff]   ;;  %v1576_v62 = vld [vmem:[%s2003_s0 + $0x140] ss:$12 sps:$4 sm:$0xff]   ;;  %v1581_v2 = vld [vmem:[%s2003_s0 + $0x170] ss:$12 sps:$4 sm:$0xff]  }
  0x16   :  { %574 = vmatpush1.bf16.msra.mxu0 %v1505_v7  ;;  %1488 = vmatpush1.bf16.msra.mxu1 %v1505_v7  ;;  %v1577_v63 = vld [vmem:[%s2003_s0 + $0x10c] ss:$12 sps:$4 sm:$0xff]   ;;  %v1580_v1 = vld [vmem:[%s2003_s0 + $0x108] ss:$12 sps:$4 sm:$0xff]   ;;  %v1582_v3 = vld [vmem:[%s2003_s0 + $0x124] ss:$12 sps:$4 sm:$0xff]  }
  0x17   :  { %575 = vmatprep.subr.bf16.mxu0 %v1590_v0  ;;  %1473 = vmatprep.subr.bf16.mxu1 %v1590_v0  ;;  %v1584_v4 = vld [vmem:[%s2003_s0 + $0x188] ss:$12 sps:$4 sm:$0xff]   ;;  %v1585_v5 = vld [vmem:[%s2003_s0 + $0x120] ss:$12 sps:$4 sm:$0xff]   ;;  %v1589_v8 = vld [vmem:[%s2003_s0 + $0x138] ss:$12 sps:$4 sm:$0xff]  }
  0x18   :  { %v1586_v6 = vld [vmem:[%s2003_s0 + $0x1a0] ss:$12 sps:$4 sm:$0xff]   ;;  %v1587_v7 = vld [vmem:[%s2003_s0 + $0x13c] ss:$12 sps:$4 sm:$0xff]  }
  0x1a   :  { %576 = vmatpush1.bf16.msra.mxu0 %v1506_v9  ;;  %1489 = vmatpush1.bf16.msra.mxu1 %v1506_v9 }
  0x1b   :  { %577 = vmatprep.subr.bf16.mxu0 %v1590_v0  ;;  %1474 = vmatprep.subr.bf16.mxu1 %v1590_v0 }
  0x1e   :  { %578 = vmatpush1.bf16.msra.mxu0 %v1507_v10  ;;  %1490 = vmatpush1.bf16.msra.mxu1 %v1507_v10 }
  0x1f   :  { %579 = vmatprep.subr.bf16.mxu0 %v1590_v0  ;;  %1475 = vmatprep.subr.bf16.mxu1 %v1590_v0 }
  0x22   :  { %580 = vmatpush1.bf16.msra.mxu0 %v1508_v11  ;;  %1491 = vmatpush1.bf16.msra.mxu1 %v1508_v11 }
  0x23   :  { %581 = vmatprep.subr.bf16.mxu0 %v1590_v0  ;;  %1476 = vmatprep.subr.bf16.mxu1 %v1590_v0 }
  0x26   :  { %582 = vmatpush1.bf16.msra.mxu0 %v1509_v12  ;;  %1492 = vmatpush1.bf16.msra.mxu1 %v1509_v12 }
  0x27   :  { %583 = vmatprep.subr.bf16.mxu0 %v1590_v0  ;;  %1477 = vmatprep.subr.bf16.mxu1 %v1590_v0 }
  0x2a   :  { %584 = vmatpush1.bf16.msra.mxu0 %v1510_v13  ;;  %1493 = vmatpush1.bf16.msra.mxu1 %v1510_v13 }
  0x2b   :  { %585 = vmatprep.subr.bf16.mxu0 %v1590_v0  ;;  %1478 = vmatprep.subr.bf16.mxu1 %v1590_v0 }
  0x2e   :  { %586 = vmatpush1.bf16.msra.mxu0 %v1511_v14  ;;  %1494 = vmatpush1.bf16.msra.mxu1 %v1511_v14 }
  0x2f   :  { %587 = vmatprep.subr.bf16.mxu0 %v1590_v0  ;;  %1479 = vmatprep.subr.bf16.mxu1 %v1590_v0 }
  0x32   :  { %588 = vmatpush1.bf16.msra.mxu0 %v1512_v15  ;;  %1495 = vmatpush1.bf16.msra.mxu1 %v1512_v15 }
  0x33   :  { %589 = vmatprep.subr.bf16.mxu0 %v1590_v0  ;;  %1480 = vmatprep.subr.bf16.mxu1 %v1590_v0 }
  0x36   :  { %590 = vmatpush1.bf16.msra.mxu0 %v1513_v16  ;;  %1496 = vmatpush1.bf16.msra.mxu1 %v1513_v16 }
  0x37   :  { %591 = vmatprep.subr.bf16.mxu0 %v1590_v0  ;;  %1481 = vmatprep.subr.bf16.mxu1 %v1590_v0 }
  0x3a   :  { %592 = vmatpush1.bf16.msra.mxu0 %v1514_v17  ;;  %1497 = vmatpush1.bf16.msra.mxu1 %v1514_v17 }
  0x3b   :  { %593 = vmatprep.subr.bf16.mxu0 %v1590_v0  ;;  %1482 = vmatprep.subr.bf16.mxu1 %v1590_v0  ;;  %v1579_v0 = vld [vmem:[%s2003_s0 + $0x158] ss:$12 sps:$4 sm:$0xff]  }
  0x3e   :  { %594 = vmatpush1.bf16.msra.mxu0 %v1515_v18  ;;  %1498 = vmatpush1.bf16.msra.mxu1 %v1515_v18 }
  0x3f   :  { %1427 = vmatprep.subr.bf16.mxu1 %v1528_v19 }
  0x41   :  { %596 = vmatmul.mubr.bf16.vlgmr.msra.gmra.mrb[0].mxu0 %v1516_v20  ;;  %708 = vmatmul.mubr.bf16.vlgmr.msra.gmra.mrb[0].mxu1 %v1519_v21 }
  0x42   :  { %603 = vmatprep.mubr.bf16.mxu0 %v1522_v22  ;;  %715 = vmatprep.mubr.bf16.mxu1 %v1524_v23 }
  0x43   :  { %1428 = vmatpush3.bf16.msra.mxu1 %v1528_v19 }
  0x44   :  { %1429 = vmatprep.subr.bf16.mxu1 %v1541_v24 }
  0x47   :  { %1430 = vmatpush3.bf16.msra.mxu1 %v1541_v24 }
  0x49   :  { %604 = vmatmul.mubr.bf16.gmra.mrb[4].mxu0 %v1526_v25  ;;  %716 = vmatmul.mubr.bf16.gmra.mrb[4].mxu1 %v1527_v26 }
  0x4a   :  { %611 = vmatprep.mubr.bf16.mxu0 %v1529_v27  ;;  %723 = vmatprep.mubr.bf16.mxu1 %v1531_v28 }
  0x51   :  { %612 = vmatmul.mubr.bf16.gmra.mrb[8].mxu0 %v1533_v29  ;;  %724 = vmatmul.mubr.bf16.gmra.mrb[8].mxu1 %v1534_v30 }
  0x52   :  { %619 = vmatprep.mubr.bf16.mxu0 %v1535_v31  ;;  %731 = vmatprep.mubr.bf16.mxu1 %v1537_v32 }
  0x59   :  { %620 = vmatmul.mubr.bf16.gmra.mrb[12].mxu0 %v1539_v33  ;;  %732 = vmatmul.mubr.bf16.gmra.mrb[12].mxu1 %v1540_v34 }
  0x5a   :  { %627 = vmatprep.mubr.bf16.mxu0 %v1542_v35  ;;  %1431 = vmatprep.mubr.msk.bf16.mxu1 %vm508_vm0, %v1544_v36 }
  0x61   :  { %628 = vmatmul.mubr.bf16.gmra.mrb[16].mxu0 %v1545_v37  ;;  %1432 = vmatmul.mubr.msk.bf16.vlgmr.msra.gmra.mrb[16].mxu1 %vm508_vm0, %v1546_v38 }
  0x62   :  { %635 = vmatprep.mubr.bf16.mxu0 %v1547_v39  ;;  %1435 = vmatprep.mubr.msk.bf16.mxu1 %vm508_vm0, %v1549_v40 }
  0x69   :  { %636 = vmatmul.mubr.bf16.gmra.mrb[20].mxu0 %v1550_v41  ;;  %1436 = vmatmul.mubr.msk.bf16.gmra.mrb[20].mxu1 %vm508_vm0, %v1551_v42  ;;  %v1896_v41 = vld [vmem:[%s2004_s2] ss:$0 sm:$0xff] }
  0x6a   :  { %643 = vmatprep.mubr.bf16.mxu0 %v1552_v43  ;;  %1439 = vmatprep.mubr.msk.bf16.mxu1 %vm508_vm0, %v1554_v44 }
  0x71   :  { %644 = vmatmul.mubr.bf16.gmra.mrb[24].mxu0 %v1555_v45  ;;  %1440 = vmatmul.mubr.msk.bf16.gmra.mrb[24].mxu1 %vm508_vm0, %v1556_v46 }
  0x72   :  { %651 = vmatprep.mubr.bf16.mxu0 %v1557_v47  ;;  %1443 = vmatprep.mubr.msk.bf16.mxu1 %vm508_vm0, %v1559_v48 }
  0x79   :  { %652 = vmatmul.mubr.bf16.gmra.mrb[28].mxu0 %v1560_v49  ;;  %1444 = vmatmul.mubr.msk.bf16.gmra.mrb[28].mxu1 %vm508_vm0, %v1561_v50 }
  0x7a   :  { %659 = vmatprep.mubr.bf16.mxu0 %v1562_v51  ;;  %1447 = vmatprep.mubr.msk.bf16.mxu1 %vm508_vm0, %v1564_v52 }
  0x81   :  { %660 = vmatmul.mubr.bf16.gmra.mrb[32].mxu0 %v1565_v53  ;;  %1448 = vmatmul.mubr.msk.bf16.gmra.mrb[32].mxu1 %vm508_vm0, %v1566_v54 }
  0x82   :  { %667 = vmatprep.mubr.bf16.mxu0 %v1567_v55  ;;  %1451 = vmatprep.mubr.msk.bf16.mxu1 %vm508_vm0, %v1569_v56 }
  0x89   :  { %668 = vmatmul.mubr.bf16.gmra.mrb[36].mxu0 %v1570_v57  ;;  %1452 = vmatmul.mubr.msk.bf16.gmra.mrb[36].mxu1 %vm508_vm0, %v1571_v58 }
  0x8a   :  { %675 = vmatprep.mubr.bf16.mxu0 %v1572_v59  ;;  %1455 = vmatprep.mubr.msk.bf16.mxu1 %vm508_vm0, %v1574_v60 }
  0x91   :  { %676 = vmatmul.mubr.bf16.gmra.mrb[40].mxu0 %v1575_v61  ;;  %1456 = vmatmul.mubr.msk.bf16.gmra.mrb[40].mxu1 %vm508_vm0, %v1576_v62 }
  0x92   :  { %683 = vmatprep.mubr.bf16.mxu0 %v1577_v63  ;;  %1459 = vmatprep.mubr.msk.bf16.mxu1 %vm508_vm0, %v1579_v0 }
  0x99   :  { %684 = vmatmul.mubr.bf16.gmra.mrb[44].mxu0 %v1580_v1  ;;  %1460 = vmatmul.mubr.msk.bf16.gmra.mrb[44].mxu1 %vm508_vm0, %v1581_v2 }
  0x9a   :  { %691 = vmatprep.mubr.bf16.mxu0 %v1582_v3  ;;  %1463 = vmatprep.mubr.msk.bf16.mxu1 %vm508_vm0, %v1584_v4 }
  0xa1   :  { %692 = vmatmul.mubr.bf16.gmra.mrb[48].mxu0 %v1585_v5  ;;  %1464 = vmatmul.mubr.msk.bf16.gmra.mrb[48].mxu1 %vm508_vm0, %v1586_v6 }
  0xa2   :  { %699 = vmatprep.mubr.bf16.mxu0 %v1587_v7 }
  0xa9   :  { %700 = vmatmul.mubr.bf16.gmra.mrb[52].mxu0 %v1589_v8 }
 0x114   :  { %v597_v9 = vpop.f32.mrb[0].mxu0  ;;  %v1877_v10 = vpop.f32.mrb[0].mxu1 }
 0x115   :  { %v599_v11 = vpop.f32.mrb[1].mxu0  ;;  %v711_v12 = vpop.f32.mrb[1].mxu1  ;;  %v598_v43 = vadd.f32 %v1896_v41, %v597_v9 }
 0x116   :  { %v600_v13 = vpop.f32.mrb[2].mxu0  ;;  %v1879_v14 = vpop.f32.mrb[2].mxu1 }
 0x117   :  { %v602_v15 = vpop.f32.mrb[3].mxu0  ;;  %v714_v16 = vpop.f32.mrb[3].mxu1  ;;  %v601_v50 = vadd.f32 %v1896_v41, %v600_v13 }
 0x11c   :  { %v605_v17 = vpop.f32.mrb[4].mxu0  ;;  %v1881_v18 = vpop.f32.mrb[4].mxu1 }
 0x11d   :  { %v607_v19 = vpop.f32.mrb[5].mxu0  ;;  %v719_v20 = vpop.f32.mrb[5].mxu1  ;;  %v606_v42 = vadd.f32 %v1896_v41, %v605_v17 }
 0x11e   :  { %v608_v21 = vpop.f32.mrb[6].mxu0  ;;  %v1883_v22 = vpop.f32.mrb[6].mxu1 }
 0x11f   :  { %v610_v23 = vpop.f32.mrb[7].mxu0  ;;  %v722_v24 = vpop.f32.mrb[7].mxu1  ;;  %v609_v46 = vadd.f32 %v1896_v41, %v608_v21 }
 0x124   :  { %v613_v25 = vpop.f32.mrb[8].mxu0  ;;  %v1885_v26 = vpop.f32.mrb[8].mxu1 }
 0x125   :  { %v615_v27 = vpop.f32.mrb[9].mxu0  ;;  %v727_v28 = vpop.f32.mrb[9].mxu1  ;;  %v614_v0 = vadd.f32 %v1896_v41, %v613_v25 }
 0x126   :  { %v616_v29 = vpop.f32.mrb[10].mxu0  ;;  %v1887_v30 = vpop.f32.mrb[10].mxu1 }
 0x127   :  { %v618_v31 = vpop.f32.mrb[11].mxu0  ;;  %v730_v32 = vpop.f32.mrb[11].mxu1  ;;  %v617_v8 = vadd.f32 %v1896_v41, %v616_v29 }
 0x12c   :  { %v621_v33 = vpop.f32.mrb[12].mxu0  ;;  %v1889_v34 = vpop.f32.mrb[12].mxu1 }
 0x12d   :  { %v623_v35 = vpop.f32.mrb[13].mxu0  ;;  %v735_v36 = vpop.f32.mrb[13].mxu1  ;;  %v622_v62 = vadd.f32 %v1896_v41, %v621_v33 }
 0x12e   :  { %v624_v37 = vpop.f32.mrb[14].mxu0  ;;  %v1891_v38 = vpop.f32.mrb[14].mxu1 }
 0x12f   :  { %v626_v39 = vpop.f32.mrb[15].mxu0  ;;  %v738_v40 = vpop.f32.mrb[15].mxu1  ;;  %v625_v4 = vadd.f32 %v1896_v41, %v624_v37 }
 0x134   :  { %v629_v44 = vpop.f32.mrb[16].mxu0  ;;  %v1433_v45 = vpop.f32.mrb[16].mxu1 }
 0x135   :  { %v783_v47 = vadd.f32 %v1433_v45, %v606_v42  ;;  %v631_v48 = vpop.f32.mrb[17].mxu0  ;;  %v774_v49 = vpop.f32.mrb[17].mxu1  ;;  %v630_v27 = vadd.f32 %v1896_v41, %v629_v44 }
 0x136   :  { %v775_v51 = vadd.f32 %v774_v49, %v598_v43  ;;  %v632_v52 = vpop.f32.mrb[18].mxu0  ;;  %v1434_v53 = vpop.f32.mrb[18].mxu1 }
 0x137   :  { %v786_v54 = vadd.f32 %v1434_v53, %v609_v46  ;;  %v634_v55 = vpop.f32.mrb[19].mxu0  ;;  %v777_v56 = vpop.f32.mrb[19].mxu1  ;;  %v919_v58 = vmax.f32 %v783_v47, 0.0  ;;  %v633_v37 = vadd.f32 %v1896_v41, %v632_v52 }
 0x138   :  { %v778_v57 = vadd.f32 %v777_v56, %v601_v50  ;;  %v917_v60 = vmax.f32 %v775_v51, 0.0 }
 0x139   :  { %v920_v59 = vmax.f32 %v786_v54, 0.0 }
 0x13a   :  { %v918_v61 = vmax.f32 %v778_v57, 0.0 }
 0x13b   :  { %v1308_v63 = vpack.c.bf16 %v920_v59, %v919_v58 }
 0x13c   :  { %v1303_v1 = vpack.c.bf16 %v918_v61, %v917_v60  ;;  %v637_v2 = vpop.f32.mrb[20].mxu0  ;;  %v1437_v3 = vpop.f32.mrb[20].mxu1 }
 0x13d   :  { %1390 = vst [vmem:[%s2005_s3 + $0x8] sm:$0xff] %v1308_v63   ;;  %v799_v5 = vadd.f32 %v1437_v3, %v622_v62  ;;  %v639_v6 = vpop.f32.mrb[21].mxu0  ;;  %v790_v7 = vpop.f32.mrb[21].mxu1  ;;  %v638_v24 = vadd.f32 %v1896_v41, %v637_v2 }
 0x13e   :  { %1304 = vst [vmem:[%s2005_s3] sm:$0xff] %v1303_v1   ;;  %v791_v9 = vadd.f32 %v790_v7, %v614_v0  ;;  %v640_v11 = vpop.f32.mrb[22].mxu0  ;;  %v1438_v12 = vpop.f32.mrb[22].mxu1 }
 0x13f   :  { %v802_v13 = vadd.f32 %v1438_v12, %v625_v4  ;;  %v642_v15 = vpop.f32.mrb[23].mxu0  ;;  %v793_v16 = vpop.f32.mrb[23].mxu1  ;;  %v923_v19 = vmax.f32 %v799_v5, 0.0  ;;  %v641_v32 = vadd.f32 %v1896_v41, %v640_v11 }
 0x140   :  { %v794_v17 = vadd.f32 %v793_v16, %v617_v8  ;;  %v921_v21 = vmax.f32 %v791_v9, 0.0 }
 0x141   :  { %v924_v20 = vmax.f32 %v802_v13, 0.0 }
 0x142   :  { %v922_v23 = vmax.f32 %v794_v17, 0.0 }
 0x143   :  { %v1318_v25 = vpack.c.bf16 %v924_v20, %v923_v19 }
 0x144   :  { %v1313_v28 = vpack.c.bf16 %v922_v23, %v921_v21  ;;  %v645_v29 = vpop.f32.mrb[24].mxu0  ;;  %v1441_v31 = vpop.f32.mrb[24].mxu1 }
 0x145   :  { %1392 = vst [vmem:[%s2005_s3 + $0x18] sm:$0xff] %v1318_v25   ;;  %v815_v33 = vadd.f32 %v1441_v31, %v638_v24  ;;  %v647_v35 = vpop.f32.mrb[25].mxu0  ;;  %v806_v36 = vpop.f32.mrb[25].mxu1  ;;  %v646_v53 = vadd.f32 %v1896_v41, %v645_v29 }
 0x146   :  { %1391 = vst [vmem:[%s2005_s3 + $0x10] sm:$0xff] %v1313_v28   ;;  %v807_v39 = vadd.f32 %v806_v36, %v630_v27  ;;  %v648_v40 = vpop.f32.mrb[26].mxu0  ;;  %v1442_v42 = vpop.f32.mrb[26].mxu1 }
 0x147   :  { %v818_v43 = vadd.f32 %v1442_v42, %v641_v32  ;;  %v650_v44 = vpop.f32.mrb[27].mxu0  ;;  %v809_v45 = vpop.f32.mrb[27].mxu1  ;;  %v927_v47 = vmax.f32 %v815_v33, 0.0  ;;  %v649_v59 = vadd.f32 %v1896_v41, %v648_v40 }
 0x148   :  { %v810_v46 = vadd.f32 %v809_v45, %v633_v37  ;;  %v925_v49 = vmax.f32 %v807_v39, 0.0 }
 0x149   :  { %v928_v48 = vmax.f32 %v818_v43, 0.0 }
 0x14a   :  { %v926_v50 = vmax.f32 %v810_v46, 0.0 }
 0x14b   :  { %v1328_v51 = vpack.c.bf16 %v928_v48, %v927_v47 }
 0x14c   :  { %v1323_v54 = vpack.c.bf16 %v926_v50, %v925_v49  ;;  %v653_v52 = vpop.f32.mrb[28].mxu0  ;;  %v1445_v55 = vpop.f32.mrb[28].mxu1 }
 0x14d   :  { %1394 = vst [vmem:[%s2005_s3 + $0x28] sm:$0xff] %v1328_v51   ;;  %v654_v56 = vadd.f32 %v1896_v41, %v653_v52  ;;  %v655_v57 = vpop.f32.mrb[29].mxu0  ;;  %v822_v58 = vpop.f32.mrb[29].mxu1 }
 0x14e   :  { %1393 = vst [vmem:[%s2005_s3 + $0x20] sm:$0xff] %v1323_v54   ;;  %v823_v60 = vadd.f32 %v822_v58, %v646_v53  ;;  %v656_v61 = vpop.f32.mrb[30].mxu0  ;;  %v1446_v62 = vpop.f32.mrb[30].mxu1 }
 0x14f   :  { %v831_v63 = vadd.f32 %v1445_v55, %v654_v56  ;;  %v657_v0 = vadd.f32 %v1896_v41, %v656_v61  ;;  %v658_v1 = vpop.f32.mrb[31].mxu0  ;;  %v825_v2 = vpop.f32.mrb[31].mxu1 }
 0x150   :  { %v826_v3 = vadd.f32 %v825_v2, %v649_v59  ;;  %v929_v5 = vmax.f32 %v823_v60, 0.0  ;;  %v710_v1 = vadd.f32 %v1896_v41, %v1877_v10 }
 0x151   :  { %v834_v4 = vadd.f32 %v1446_v62, %v657_v0  ;;  %v931_v7 = vmax.f32 %v831_v63, 0.0  ;;  %v718_v62 = vadd.f32 %v1896_v41, %v1881_v18 }
 0x152   :  { %v930_v6 = vmax.f32 %v826_v3, 0.0 }
 0x153   :  { %v932_v8 = vmax.f32 %v834_v4, 0.0  ;;  %v721_v4 = vadd.f32 %v1896_v41, %v1883_v22 }
 0x154   :  { %v1333_v9 = vpack.c.bf16 %v930_v6, %v929_v5  ;;  %v661_v11 = vpop.f32.mrb[32].mxu0  ;;  %v1449_v12 = vpop.f32.mrb[32].mxu1 }
 0x155   :  { %v1338_v13 = vpack.c.bf16 %v932_v8, %v931_v7  ;;  %v662_v15 = vadd.f32 %v1896_v41, %v661_v11  ;;  %v663_v16 = vpop.f32.mrb[33].mxu0  ;;  %v838_v17 = vpop.f32.mrb[33].mxu1  ;;  %v713_v11 = vadd.f32 %v1896_v41, %v1879_v14  ;;  %v734_v14 = vadd.f32 %v1896_v41, %v1889_v34 }
 0x156   :  { %1395 = vst [vmem:[%s2005_s3 + $0x30] sm:$0xff] %v1333_v9   ;;  %v664_v19 = vpop.f32.mrb[34].mxu0  ;;  %v1450_v20 = vpop.f32.mrb[34].mxu1 }
 0x157   :  { %1396 = vst [vmem:[%s2005_s3 + $0x38] sm:$0xff] %v1338_v13   ;;  %v665_v21 = vadd.f32 %v1896_v41, %v664_v19  ;;  %v839_v23 = vadd.f32 %v838_v17, %v662_v15  ;;  %v666_v24 = vpop.f32.mrb[35].mxu0  ;;  %v841_v25 = vpop.f32.mrb[35].mxu1 }
 0x159   :  { %v842_v27 = vadd.f32 %v841_v25, %v665_v21  ;;  %v933_v28 = vmax.f32 %v839_v23, 0.0 }
 0x15b   :  { %v934_v29 = vmax.f32 %v842_v27, 0.0 }
 0x15c   :  { %v669_v31 = vpop.f32.mrb[36].mxu0  ;;  %v1453_v32 = vpop.f32.mrb[36].mxu1 }
 0x15d   :  { %v1343_v33 = vpack.c.bf16 %v934_v29, %v933_v28  ;;  %v670_v35 = vadd.f32 %v1896_v41, %v669_v31  ;;  %v671_v36 = vpop.f32.mrb[37].mxu0  ;;  %v854_v37 = vpop.f32.mrb[37].mxu1  ;;  %v726_v31 = vadd.f32 %v1896_v41, %v1885_v26 }
 0x15e   :  { %v672_v39 = vpop.f32.mrb[38].mxu0  ;;  %v1454_v40 = vpop.f32.mrb[38].mxu1  ;;  %v737_v36 = vadd.f32 %v1896_v41, %v1891_v38 }
 0x15f   :  { %1397 = vst [vmem:[%s2005_s3 + $0x40] sm:$0xff] %v1343_v33   ;;  %v847_v42 = vadd.f32 %v1449_v12, %v670_v35  ;;  %v673_v43 = vadd.f32 %v1896_v41, %v672_v39  ;;  %v674_v44 = vpop.f32.mrb[39].mxu0  ;;  %v857_v45 = vpop.f32.mrb[39].mxu1 }
 0x161   :  { %v850_v46 = vadd.f32 %v1450_v20, %v673_v43  ;;  %v935_v47 = vmax.f32 %v847_v42, 0.0  ;;  %v729_v43 = vadd.f32 %v1896_v41, %v1887_v30 }
 0x163   :  { %v936_v48 = vmax.f32 %v850_v46, 0.0 }
 0x164   :  { %v677_v49 = vpop.f32.mrb[40].mxu0  ;;  %v1945_v50 = vpop.f32.mrb[40].mxu1 }
 0x165   :  { %v1348_v51 = vpack.c.bf16 %v936_v48, %v935_v47  ;;  %v678_v53 = vadd.f32 %v1896_v41, %v677_v49  ;;  %v679_v54 = vpop.f32.mrb[41].mxu0  ;;  %v870_v52 = vpop.f32.mrb[41].mxu1 }
 0x166   :  { %v680_v55 = vpop.f32.mrb[42].mxu0  ;;  %v1948_v56 = vpop.f32.mrb[42].mxu1 }
 0x167   :  { %1398 = vst [vmem:[%s2005_s3 + $0x48] sm:$0xff] %v1348_v51   ;;  %v855_v57 = vadd.f32 %v854_v37, %v678_v53  ;;  %v681_v58 = vadd.f32 %v1896_v41, %v680_v55  ;;  %v682_v59 = vpop.f32.mrb[43].mxu0  ;;  %v873_v60 = vpop.f32.mrb[43].mxu1 }
 0x169   :  { %v858_v61 = vadd.f32 %v857_v45, %v681_v58  ;;  %v937_v63 = vmax.f32 %v855_v57, 0.0 }
 0x16b   :  { %v938_v0 = vmax.f32 %v858_v61, 0.0 }
 0x16c   :  { %v685_v2 = vpop.f32.mrb[44].mxu0  ;;  %v1461_v3 = vpop.f32.mrb[44].mxu1 }
 0x16d   :  { %v1353_v5 = vpack.c.bf16 %v938_v0, %v937_v63  ;;  %v686_v6 = vadd.f32 %v1896_v41, %v685_v2  ;;  %v895_v7 = vadd.f32 %v1461_v3, %v718_v62  ;;  %v687_v8 = vpop.f32.mrb[45].mxu0  ;;  %v886_v9 = vpop.f32.mrb[45].mxu1 }
 0x16e   :  { %v887_v18 = vadd.f32 %v886_v9, %v710_v1  ;;  %v688_v12 = vpop.f32.mrb[46].mxu0  ;;  %v1462_v13 = vpop.f32.mrb[46].mxu1 }
 0x16f   :  { %1399 = vst [vmem:[%s2005_s3 + $0x50] sm:$0xff] %v1353_v5   ;;  %v863_v10 = vadd.f32 %v1453_v32, %v686_v6  ;;  %v689_v15 = vadd.f32 %v1896_v41, %v688_v12  ;;  %v898_v22 = vadd.f32 %v1462_v13, %v721_v4  ;;  %v690_v16 = vpop.f32.mrb[47].mxu0  ;;  %v889_v17 = vpop.f32.mrb[47].mxu1  ;;  %v947_v20 = vmax.f32 %v895_v7, 0.0 }
 0x170   :  { %v890_v19 = vadd.f32 %v889_v17, %v713_v11  ;;  %v945_v24 = vmax.f32 %v887_v18, 0.0 }
 0x171   :  { %v866_v21 = vadd.f32 %v1454_v40, %v689_v15  ;;  %v948_v23 = vmax.f32 %v898_v22, 0.0  ;;  %v939_v27 = vmax.f32 %v863_v10, 0.0 }
 0x172   :  { %v946_v25 = vmax.f32 %v890_v19, 0.0 }
 0x173   :  { %v940_v28 = vmax.f32 %v866_v21, 0.0  ;;  %v1378_v29 = vpack.c.bf16 %v948_v23, %v947_v20 }
 0x174   :  { %v1373_v32 = vpack.c.bf16 %v946_v25, %v945_v24  ;;  %v693_v33 = vpop.f32.mrb[48].mxu0  ;;  %v1465_v35 = vpop.f32.mrb[48].mxu1 }
 0x175   :  { %v1358_v37 = vpack.c.bf16 %v940_v28, %v939_v27  ;;  %1404 = vst [vmem:[%s2005_s3 + $0x78] sm:$0xff] %v1378_v29   ;;  %v694_v39 = vadd.f32 %v1896_v41, %v693_v33  ;;  %v911_v34 = vadd.f32 %v1465_v35, %v734_v14  ;;  %v695_v40 = vpop.f32.mrb[49].mxu0  ;;  %v902_v42 = vpop.f32.mrb[49].mxu1 }
 0x176   :  { %1403 = vst [vmem:[%s2005_s3 + $0x70] sm:$0xff] %v1373_v32   ;;  %v903_v26 = vadd.f32 %v902_v42, %v726_v31  ;;  %v696_v44 = vpop.f32.mrb[50].mxu0  ;;  %v1466_v38 = vpop.f32.mrb[50].mxu1 }
 0x177   :  { %1400 = vst [vmem:[%s2005_s3 + $0x58] sm:$0xff] %v1358_v37   ;;  %v871_v45 = vadd.f32 %v870_v52, %v694_v39  ;;  %v697_v46 = vadd.f32 %v1896_v41, %v696_v44  ;;  %v914_v47 = vadd.f32 %v1466_v38, %v737_v36  ;;  %v698_v48 = vpop.f32.mrb[51].mxu0  ;;  %v905_v49 = vpop.f32.mrb[51].mxu1  ;;  %v951_v53 = vmax.f32 %v911_v34, 0.0 }
 0x178   :  { %v906_v51 = vadd.f32 %v905_v49, %v729_v43  ;;  %v949_v55 = vmax.f32 %v903_v26, 0.0 }
 0x179   :  { %v874_v30 = vadd.f32 %v873_v60, %v697_v46  ;;  %v952_v54 = vmax.f32 %v914_v47, 0.0  ;;  %v941_v58 = vmax.f32 %v871_v45, 0.0 }
 0x17a   :  { %v950_v57 = vmax.f32 %v906_v51, 0.0 }
 0x17b   :  { %v942_v59 = vmax.f32 %v874_v30, 0.0  ;;  %v1388_v61 = vpack.c.bf16 %v952_v54, %v951_v53 }
 0x17c   :  { %v1383_v62 = vpack.c.bf16 %v950_v57, %v949_v55  ;;  %v701_v63 = vpop.f32.mrb[52].mxu0 }
 0x17d   :  { %v1363_v0 = vpack.c.bf16 %v942_v59, %v941_v58  ;;  %1406 = vst [vmem:[%s2005_s3 + $0x88] sm:$0xff] %v1388_v61   ;;  %v702_v52 = vadd.f32 %v1896_v41, %v701_v63  ;;  %v703_v1 = vpop.f32.mrb[53].mxu0 }
 0x17e   :  { %1405 = vst [vmem:[%s2005_s3 + $0x80] sm:$0xff] %v1383_v62   ;;  %v704_v60 = vpop.f32.mrb[54].mxu0 }
 0x17f   :  { %1401 = vst [vmem:[%s2005_s3 + $0x60] sm:$0xff] %v1363_v0   ;;  %v879_v2 = vadd.f32 %v1945_v50, %v702_v52  ;;  %v705_v3 = vadd.f32 %v1896_v41, %v704_v60  ;;  %v706_v4 = vpop.f32.mrb[55].mxu0 }
 0x181   :  { %v882_v5 = vadd.f32 %v1948_v56, %v705_v3  ;;  %v943_v6 = vmax.f32 %v879_v2, 0.0 }
 0x183   :  { %v944_v7 = vmax.f32 %v882_v5, 0.0 }
 0x185   :  { %v1368_v8 = vpack.c.bf16 %v944_v7, %v943_v6 }
 0x187   :  { %1402 = vst [vmem:[%s2005_s3 + $0x68] sm:$0xff] %v1368_v8  }

// kernel: forward.8
= control target key start
LH: loop header
LB: loop body
LE: loop exit
PB: predicated region body
PF: predicated region fallthrough
CT: control target
= control target key end

     0   :  { %s2299_s1 = inlined_call_operand.vmem [shape: bf16[1152,256], index: 1, kind: input, shape index: {}]   ;;  %s2300_s0 = inlined_call_operand.vmem [shape: bf16[32,1152], index: 0, kind: input, shape index: {}]   ;;  %s2301_s2 = inlined_call_operand.vmem [shape: f32[1,256], index: 2, kind: input, shape index: {}]   ;;  %s2302_s3 = inlined_call_operand.vmem [shape: bf16[32,256], index: 3, kind: output, shape index: {}]  }
   0x1   :  { %v1535_v0 = vld [vmem:[%s2299_s1 + $0x4] ss:$8 sps:$4 sm:$0xff]   ;;  %v1539_v2 = vld [vmem:[%s2299_s1] ss:$8 sps:$4 sm:$0xff]   ;;  %v1541_v4 = vld [vmem:[%s2299_s1 + $0x14] ss:$8 sps:$4 sm:$0xff]  }
   0x2   :  { %v1537_v1 = vld [vmem:[%s2299_s1 + $0x204] ss:$8 sps:$4 sm:$0xff]   ;;  %1003 = vmatprep.subr.bf16.mxu1 %v1535_v0  ;;  %v1540_v3 = vld [vmem:[%s2299_s1 + $0x200] ss:$8 sps:$4 sm:$0xff]   ;;  %v1543_v5 = vld [vmem:[%s2299_s1 + $0x214] ss:$8 sps:$4 sm:$0xff]  }
   0x3   :  { %1109 = vmatprep.subr.bf16.mxu0 %v1537_v1  ;;  %1004 = vmatpush1.bf16.msra.mxu1 %v1539_v2  ;;  %v1545_v6 = vld [vmem:[%s2299_s1 + $0x10] ss:$8 sps:$4 sm:$0xff]   ;;  %v1547_v8 = vld [vmem:[%s2299_s1 + $0x24] ss:$8 sps:$4 sm:$0xff]   ;;  %v1551_v10 = vld [vmem:[%s2299_s1 + $0x20] ss:$8 sps:$4 sm:$0xff]  }
   0x4   :  { %1110 = vmatpush1.bf16.msra.mxu0 %v1540_v3  ;;  %1005 = vmatprep.subr.bf16.mxu1 %v1541_v4  ;;  %v1546_v7 = vld [vmem:[%s2299_s1 + $0x210] ss:$8 sps:$4 sm:$0xff]   ;;  %v1549_v9 = vld [vmem:[%s2299_s1 + $0x224] ss:$8 sps:$4 sm:$0xff]   ;;  %v1552_v11 = vld [vmem:[%s2299_s1 + $0x220] ss:$8 sps:$4 sm:$0xff]  }
   0x5   :  { %1111 = vmatprep.subr.bf16.mxu0 %v1543_v5  ;;  %v1553_v12 = vld [vmem:[%s2299_s1 + $0x34] ss:$8 sps:$4 sm:$0xff]   ;;  %v1557_v14 = vld [vmem:[%s2299_s1 + $0x30] ss:$8 sps:$4 sm:$0xff]   ;;  %v1559_v16 = vld [vmem:[%s2299_s1 + $0x44] ss:$8 sps:$4 sm:$0xff]  }
   0x6   :  { %v1555_v13 = vld [vmem:[%s2299_s1 + $0x234] ss:$8 sps:$4 sm:$0xff]   ;;  %v1558_v15 = vld [vmem:[%s2299_s1 + $0x230] ss:$8 sps:$4 sm:$0xff]   ;;  %v1561_v17 = vld [vmem:[%s2299_s1 + $0x244] ss:$8 sps:$4 sm:$0xff]  }
   0x7   :  { %1006 = vmatpush1.bf16.msra.mxu1 %v1545_v6  ;;  %v1563_v18 = vld [vmem:[%s2299_s1 + $0x40] ss:$8 sps:$4 sm:$0xff]   ;;  %v1565_v20 = vld [vmem:[%s2299_s1 + $0x54] ss:$8 sps:$4 sm:$0xff]   ;;  %v1569_v22 = vld [vmem:[%s2299_s1 + $0x50] ss:$8 sps:$4 sm:$0xff]  }
   0x8   :  { %1112 = vmatpush1.bf16.msra.mxu0 %v1546_v7  ;;  %1007 = vmatprep.subr.bf16.mxu1 %v1547_v8  ;;  %v1564_v19 = vld [vmem:[%s2299_s1 + $0x240] ss:$8 sps:$4 sm:$0xff]   ;;  %v1567_v21 = vld [vmem:[%s2299_s1 + $0x254] ss:$8 sps:$4 sm:$0xff]   ;;  %v1570_v23 = vld [vmem:[%s2299_s1 + $0x250] ss:$8 sps:$4 sm:$0xff]  }
   0x9   :  { %1113 = vmatprep.subr.bf16.mxu0 %v1549_v9  ;;  %v1571_v24 = vld [vmem:[%s2299_s1 + $0x64] ss:$8 sps:$4 sm:$0xff]   ;;  %v1575_v26 = vld [vmem:[%s2299_s1 + $0x60] ss:$8 sps:$4 sm:$0xff]   ;;  %v1577_v28 = vld [vmem:[%s2299_s1 + $0x74] ss:$8 sps:$4 sm:$0xff]  }
   0xa   :  { %v1573_v25 = vld [vmem:[%s2299_s1 + $0x264] ss:$8 sps:$4 sm:$0xff]   ;;  %v1576_v27 = vld [vmem:[%s2299_s1 + $0x260] ss:$8 sps:$4 sm:$0xff]   ;;  %v1579_v29 = vld [vmem:[%s2299_s1 + $0x274] ss:$8 sps:$4 sm:$0xff]  }
   0xb   :  { %1008 = vmatpush1.bf16.msra.mxu1 %v1551_v10  ;;  %v1581_v30 = vld [vmem:[%s2299_s1 + $0x70] ss:$8 sps:$4 sm:$0xff]   ;;  %v1583_v32 = vld [vmem:[%s2299_s1 + $0x84] ss:$8 sps:$4 sm:$0xff]   ;;  %v1587_v34 = vld [vmem:[%s2299_s1 + $0x80] ss:$8 sps:$4 sm:$0xff]  }
   0xc   :  { %1114 = vmatpush1.bf16.msra.mxu0 %v1552_v11  ;;  %1009 = vmatprep.subr.bf16.mxu1 %v1553_v12  ;;  %v1582_v31 = vld [vmem:[%s2299_s1 + $0x270] ss:$8 sps:$4 sm:$0xff]   ;;  %v1585_v33 = vld [vmem:[%s2299_s1 + $0x284] ss:$8 sps:$4 sm:$0xff]   ;;  %v1588_v35 = vld [vmem:[%s2299_s1 + $0x280] ss:$8 sps:$4 sm:$0xff]  }
   0xd   :  { %1115 = vmatprep.subr.bf16.mxu0 %v1555_v13  ;;  %v1589_v36 = vld [vmem:[%s2299_s1 + $0x94] ss:$8 sps:$4 sm:$0xff]   ;;  %v1593_v38 = vld [vmem:[%s2299_s1 + $0x90] ss:$8 sps:$4 sm:$0xff]   ;;  %v1595_v40 = vld [vmem:[%s2299_s1 + $0xa4] ss:$8 sps:$4 sm:$0xff]  }
   0xe   :  { %v1591_v37 = vld [vmem:[%s2299_s1 + $0x294] ss:$8 sps:$4 sm:$0xff]   ;;  %v1594_v39 = vld [vmem:[%s2299_s1 + $0x290] ss:$8 sps:$4 sm:$0xff]   ;;  %v1597_v41 = vld [vmem:[%s2299_s1 + $0x2a4] ss:$8 sps:$4 sm:$0xff]  }
   0xf   :  { %1010 = vmatpush1.bf16.msra.mxu1 %v1557_v14  ;;  %v1599_v42 = vld [vmem:[%s2299_s1 + $0xa0] ss:$8 sps:$4 sm:$0xff]   ;;  %v1601_v44 = vld [vmem:[%s2299_s1 + $0xb4] ss:$8 sps:$4 sm:$0xff]   ;;  %v1605_v46 = vld [vmem:[%s2299_s1 + $0xb0] ss:$8 sps:$4 sm:$0xff]  }
  0x10   :  { %1116 = vmatpush1.bf16.msra.mxu0 %v1558_v15  ;;  %1011 = vmatprep.subr.bf16.mxu1 %v1559_v16  ;;  %v1600_v43 = vld [vmem:[%s2299_s1 + $0x2a0] ss:$8 sps:$4 sm:$0xff]   ;;  %v1603_v45 = vld [vmem:[%s2299_s1 + $0x2b4] ss:$8 sps:$4 sm:$0xff]   ;;  %v1606_v47 = vld [vmem:[%s2299_s1 + $0x2b0] ss:$8 sps:$4 sm:$0xff]  }
  0x11   :  { %1117 = vmatprep.subr.bf16.mxu0 %v1561_v17  ;;  %v1633_v48 = vld [vmem:[%s2300_s0 + $0x4] ss:$36 sps:$4 sm:$0xff]   ;;  %v1639_v51 = vld [vmem:[%s2300_s0 + $0x14] ss:$36 sps:$4 sm:$0xff]  }
  0x12   :  { %v1607_v49 = vld [vmem:[%s2299_s1 + $0xc4] ss:$8 sps:$4 sm:$0xff]   ;;  %1035 = vmatprep.mubr.bf16.mxu1 %v1633_v48  ;;  %v1611_v52 = vld [vmem:[%s2299_s1 + $0xc0] ss:$8 sps:$4 sm:$0xff]   ;;  %v1613_v54 = vld [vmem:[%s2299_s1 + $0xd4] ss:$8 sps:$4 sm:$0xff]   ;;  %1141 = vmatprep.mubr.bf16.mxu0 %v1639_v51 }
  0x13   :  { %1012 = vmatpush1.bf16.msra.mxu1 %v1563_v18  ;;  %v1609_v50 = vld [vmem:[%s2299_s1 + $0x2c4] ss:$8 sps:$4 sm:$0xff]   ;;  %v1612_v53 = vld [vmem:[%s2299_s1 + $0x2c0] ss:$8 sps:$4 sm:$0xff]   ;;  %v1615_v55 = vld [vmem:[%s2299_s1 + $0x2d4] ss:$8 sps:$4 sm:$0xff]  }
  0x14   :  { %1118 = vmatpush1.bf16.msra.mxu0 %v1564_v19  ;;  %1013 = vmatprep.subr.bf16.mxu1 %v1565_v20  ;;  %v1617_v56 = vld [vmem:[%s2299_s1 + $0xd0] ss:$8 sps:$4 sm:$0xff]   ;;  %v1619_v58 = vld [vmem:[%s2299_s1 + $0xe4] ss:$8 sps:$4 sm:$0xff]   ;;  %v1623_v60 = vld [vmem:[%s2299_s1 + $0xe0] ss:$8 sps:$4 sm:$0xff]  }
  0x15   :  { %1119 = vmatprep.subr.bf16.mxu0 %v1567_v21  ;;  %v1618_v57 = vld [vmem:[%s2299_s1 + $0x2d0] ss:$8 sps:$4 sm:$0xff]   ;;  %v1621_v59 = vld [vmem:[%s2299_s1 + $0x2e4] ss:$8 sps:$4 sm:$0xff]   ;;  %v1624_v61 = vld [vmem:[%s2299_s1 + $0x2e0] ss:$8 sps:$4 sm:$0xff]  }
  0x16   :  { %v1625_v62 = vld [vmem:[%s2299_s1 + $0xf4] ss:$8 sps:$4 sm:$0xff]   ;;  %v1629_v0 = vld [vmem:[%s2299_s1 + $0xf0] ss:$8 sps:$4 sm:$0xff]   ;;  %v1636_v2 = vld [vmem:[%s2299_s1 + $0x104] ss:$8 sps:$4 sm:$0xff]  }
  0x17   :  { %1014 = vmatpush1.bf16.msra.mxu1 %v1569_v22  ;;  %v1627_v63 = vld [vmem:[%s2299_s1 + $0x2f4] ss:$8 sps:$4 sm:$0xff]   ;;  %v1630_v1 = vld [vmem:[%s2299_s1 + $0x2f0] ss:$8 sps:$4 sm:$0xff]   ;;  %v1642_v3 = vld [vmem:[%s2299_s1 + $0x304] ss:$8 sps:$4 sm:$0xff]  }
  0x18   :  { %1120 = vmatpush1.bf16.msra.mxu0 %v1570_v23  ;;  %1015 = vmatprep.subr.bf16.mxu1 %v1571_v24  ;;  %v1631_v4 = vld [vmem:[%s2300_s0] ss:$36 sps:$4 sm:$0xff]   ;;  %v1637_v6 = vld [vmem:[%s2300_s0 + $0x10] ss:$36 sps:$4 sm:$0xff]  }
  0x19   :  { %1121 = vmatprep.subr.bf16.mxu0 %v1573_v25  ;;  %v1634_v5 = vld [vmem:[%s2299_s1 + $0x100] ss:$8 sps:$4 sm:$0xff]   ;;  %v1645_v8 = vld [vmem:[%s2299_s1 + $0x114] ss:$8 sps:$4 sm:$0xff]   ;;  %v1643_v10 = vld [vmem:[%s2299_s1 + $0x110] ss:$8 sps:$4 sm:$0xff]  }
  0x1a   :  { %v1640_v7 = vld [vmem:[%s2299_s1 + $0x300] ss:$8 sps:$4 sm:$0xff]   ;;  %v1648_v9 = vld [vmem:[%s2299_s1 + $0x314] ss:$8 sps:$4 sm:$0xff]   ;;  %v1646_v11 = vld [vmem:[%s2299_s1 + $0x310] ss:$8 sps:$4 sm:$0xff]  }
  0x1b   :  { %1016 = vmatpush1.bf16.msra.mxu1 %v1575_v26  ;;  %v1651_v12 = vld [vmem:[%s2299_s1 + $0x124] ss:$8 sps:$4 sm:$0xff]   ;;  %v1649_v14 = vld [vmem:[%s2299_s1 + $0x120] ss:$8 sps:$4 sm:$0xff]   ;;  %v1657_v16 = vld [vmem:[%s2299_s1 + $0x134] ss:$8 sps:$4 sm:$0xff]  }
  0x1c   :  { %1122 = vmatpush1.bf16.msra.mxu0 %v1576_v27  ;;  %1017 = vmatprep.subr.bf16.mxu1 %v1577_v28  ;;  %v1654_v13 = vld [vmem:[%s2299_s1 + $0x324] ss:$8 sps:$4 sm:$0xff]   ;;  %v1652_v15 = vld [vmem:[%s2299_s1 + $0x320] ss:$8 sps:$4 sm:$0xff]   ;;  %v1660_v17 = vld [vmem:[%s2299_s1 + $0x334] ss:$8 sps:$4 sm:$0xff]  }
  0x1d   :  { %1123 = vmatprep.subr.bf16.mxu0 %v1579_v29  ;;  %v1655_v18 = vld [vmem:[%s2299_s1 + $0x130] ss:$8 sps:$4 sm:$0xff]   ;;  %v1663_v20 = vld [vmem:[%s2299_s1 + $0x144] ss:$8 sps:$4 sm:$0xff]   ;;  %v1661_v22 = vld [vmem:[%s2299_s1 + $0x140] ss:$8 sps:$4 sm:$0xff]  }
  0x1e   :  { %v1658_v19 = vld [vmem:[%s2299_s1 + $0x330] ss:$8 sps:$4 sm:$0xff]   ;;  %v1666_v21 = vld [vmem:[%s2299_s1 + $0x344] ss:$8 sps:$4 sm:$0xff]   ;;  %v1664_v23 = vld [vmem:[%s2299_s1 + $0x340] ss:$8 sps:$4 sm:$0xff]  }
  0x1f   :  { %1018 = vmatpush1.bf16.msra.mxu1 %v1581_v30  ;;  %v1669_v24 = vld [vmem:[%s2299_s1 + $0x154] ss:$8 sps:$4 sm:$0xff]   ;;  %v1667_v26 = vld [vmem:[%s2299_s1 + $0x150] ss:$8 sps:$4 sm:$0xff]   ;;  %v1675_v28 = vld [vmem:[%s2299_s1 + $0x164] ss:$8 sps:$4 sm:$0xff]  }
  0x20   :  { %1124 = vmatpush1.bf16.msra.mxu0 %v1582_v31  ;;  %1019 = vmatprep.subr.bf16.mxu1 %v1583_v32  ;;  %v1672_v25 = vld [vmem:[%s2299_s1 + $0x354] ss:$8 sps:$4 sm:$0xff]   ;;  %v1670_v27 = vld [vmem:[%s2299_s1 + $0x350] ss:$8 sps:$4 sm:$0xff]   ;;  %v1725_v31 = vld [vmem:[%s2300_s0 + $0x48] ss:$36 sps:$4 sm:$0xff]  }
  0x21   :  { %1125 = vmatprep.subr.bf16.mxu0 %v1585_v33  ;;  %v1721_v29 = vld [vmem:[%s2300_s0 + $0x4c] ss:$36 sps:$4 sm:$0xff]   ;;  %v1723_v30 = vld [vmem:[%s2300_s0 + $0x5c] ss:$36 sps:$4 sm:$0xff]  }
  0x22   :  { %v1678_v32 = vld [vmem:[%s2299_s1 + $0x364] ss:$8 sps:$4 sm:$0xff]   ;;  %v1729_v33 = vld [vmem:[%s2300_s0 + $0x58] ss:$36 sps:$4 sm:$0xff]  }
  0x23   :  { %1020 = vmatpush1.bf16.msra.mxu1 %v1587_v34  ;;  %v1673_v34 = vld [vmem:[%s2299_s1 + $0x160] ss:$8 sps:$4 sm:$0xff]   ;;  %v1691_v48 = vld [vmem:[%s2299_s1 + $0x190] ss:$8 sps:$4 sm:$0xff]   ;;  %v1702_v51 = vld [vmem:[%s2299_s1 + $0x3a4] ss:$8 sps:$4 sm:$0xff]  }
  0x24   :  { %1126 = vmatpush1.bf16.msra.mxu0 %v1588_v35  ;;  %1021 = vmatprep.subr.bf16.mxu1 %v1589_v36  ;;  %v1676_v35 = vld [vmem:[%s2299_s1 + $0x360] ss:$8 sps:$4 sm:$0xff]   ;;  %v1681_v36 = vld [vmem:[%s2299_s1 + $0x174] ss:$8 sps:$4 sm:$0xff]  }
  0x25   :  { %1127 = vmatprep.subr.bf16.mxu0 %v1591_v37  ;;  %v1684_v37 = vld [vmem:[%s2299_s1 + $0x374] ss:$8 sps:$4 sm:$0xff]  }
  0x27   :  { %1022 = vmatpush1.bf16.msra.mxu1 %v1593_v38  ;;  %v1679_v38 = vld [vmem:[%s2299_s1 + $0x170] ss:$8 sps:$4 sm:$0xff]  }
  0x28   :  { %1128 = vmatpush1.bf16.msra.mxu0 %v1594_v39  ;;  %1023 = vmatprep.subr.bf16.mxu1 %v1595_v40  ;;  %v1682_v39 = vld [vmem:[%s2299_s1 + $0x370] ss:$8 sps:$4 sm:$0xff]   ;;  %v1687_v40 = vld [vmem:[%s2299_s1 + $0x184] ss:$8 sps:$4 sm:$0xff]  }
  0x29   :  { %1129 = vmatprep.subr.bf16.mxu0 %v1597_v41  ;;  %v1741_v41 = vld [vmem:[%s2300_s0 + $0xc] ss:$36 sps:$4 sm:$0xff]  }
  0x2b   :  { %1024 = vmatpush1.bf16.msra.mxu1 %v1599_v42  ;;  %v1690_v42 = vld [vmem:[%s2299_s1 + $0x384] ss:$8 sps:$4 sm:$0xff]  }
  0x2c   :  { %1130 = vmatpush1.bf16.msra.mxu0 %v1600_v43  ;;  %1025 = vmatprep.subr.bf16.mxu1 %v1601_v44  ;;  %v1744_v43 = vld [vmem:[%s2300_s0 + $0x1c] ss:$36 sps:$4 sm:$0xff]  }
  0x2d   :  { %1131 = vmatprep.subr.bf16.mxu0 %v1603_v45  ;;  %v1685_v44 = vld [vmem:[%s2299_s1 + $0x180] ss:$8 sps:$4 sm:$0xff]  }
  0x2e   :  { %v1688_v45 = vld [vmem:[%s2299_s1 + $0x380] ss:$8 sps:$4 sm:$0xff]  }
  0x2f   :  { %1026 = vmatpush1.bf16.msra.mxu1 %v1605_v46  ;;  %v1693_v46 = vld [vmem:[%s2299_s1 + $0x194] ss:$8 sps:$4 sm:$0xff]  }
  0x30   :  { %1132 = vmatpush1.bf16.msra.mxu0 %v1606_v47  ;;  %1027 = vmatprep.subr.bf16.mxu1 %v1607_v49  ;;  %v1696_v47 = vld [vmem:[%s2299_s1 + $0x394] ss:$8 sps:$4 sm:$0xff]   ;;  %v1694_v49 = vld [vmem:[%s2299_s1 + $0x390] ss:$8 sps:$4 sm:$0xff]  }
  0x31   :  { %1133 = vmatprep.subr.bf16.mxu0 %v1609_v50  ;;  %v1699_v50 = vld [vmem:[%s2299_s1 + $0x1a4] ss:$8 sps:$4 sm:$0xff]  }
  0x33   :  { %1028 = vmatpush1.bf16.msra.mxu1 %v1611_v52  ;;  %v1697_v52 = vld [vmem:[%s2299_s1 + $0x1a0] ss:$8 sps:$4 sm:$0xff]  }
  0x34   :  { %1134 = vmatpush1.bf16.msra.mxu0 %v1612_v53  ;;  %1029 = vmatprep.subr.bf16.mxu1 %v1613_v54  ;;  %v1700_v53 = vld [vmem:[%s2299_s1 + $0x3a0] ss:$8 sps:$4 sm:$0xff]   ;;  %v1705_v54 = vld [vmem:[%s2299_s1 + $0x1b4] ss:$8 sps:$4 sm:$0xff]  }
  0x35   :  { %1135 = vmatprep.subr.bf16.mxu0 %v1615_v55  ;;  %v1708_v55 = vld [vmem:[%s2299_s1 + $0x3b4] ss:$8 sps:$4 sm:$0xff]  }
  0x37   :  { %1030 = vmatpush1.bf16.msra.mxu1 %v1617_v56  ;;  %v1703_v56 = vld [vmem:[%s2299_s1 + $0x1b0] ss:$8 sps:$4 sm:$0xff]  }
  0x38   :  { %1136 = vmatpush1.bf16.msra.mxu0 %v1618_v57  ;;  %1031 = vmatprep.subr.bf16.mxu1 %v1619_v58  ;;  %v1706_v57 = vld [vmem:[%s2299_s1 + $0x3b0] ss:$8 sps:$4 sm:$0xff]   ;;  %v1711_v58 = vld [vmem:[%s2299_s1 + $0x1c4] ss:$8 sps:$4 sm:$0xff]  }
  0x39   :  { %1137 = vmatprep.subr.bf16.mxu0 %v1621_v59  ;;  %v1714_v59 = vld [vmem:[%s2299_s1 + $0x3c4] ss:$8 sps:$4 sm:$0xff]  }
  0x3b   :  { %1032 = vmatpush1.bf16.msra.mxu1 %v1623_v60  ;;  %v1709_v60 = vld [vmem:[%s2299_s1 + $0x1c0] ss:$8 sps:$4 sm:$0xff]  }
  0x3c   :  { %1138 = vmatpush1.bf16.msra.mxu0 %v1624_v61  ;;  %1033 = vmatprep.subr.bf16.mxu1 %v1625_v62  ;;  %v1712_v61 = vld [vmem:[%s2299_s1 + $0x3c0] ss:$8 sps:$4 sm:$0xff]   ;;  %v1717_v62 = vld [vmem:[%s2299_s1 + $0x1d4] ss:$8 sps:$4 sm:$0xff]  }
  0x3d   :  { %1139 = vmatprep.subr.bf16.mxu0 %v1627_v63  ;;  %v1720_v63 = vld [vmem:[%s2299_s1 + $0x3d4] ss:$8 sps:$4 sm:$0xff]  }
  0x3f   :  { %1034 = vmatpush1.bf16.msra.mxu1 %v1629_v0  ;;  %v1715_v0 = vld [vmem:[%s2299_s1 + $0x1d0] ss:$8 sps:$4 sm:$0xff]  }
  0x40   :  { %1140 = vmatpush1.bf16.msra.mxu0 %v1630_v1  ;;  %1056 = vmatprep.subr.bf16.mxu1 %v1636_v2  ;;  %v1718_v1 = vld [vmem:[%s2299_s1 + $0x3d0] ss:$8 sps:$4 sm:$0xff]   ;;  %v1728_v2 = vld [vmem:[%s2299_s1 + $0x1e4] ss:$8 sps:$4 sm:$0xff]  }
  0x41   :  { %1162 = vmatprep.subr.bf16.mxu0 %v1642_v3  ;;  %v1732_v3 = vld [vmem:[%s2299_s1 + $0x3e4] ss:$8 sps:$4 sm:$0xff]  }
  0x42   :  { %1036 = vmatmul.mubr.bf16.vlgmr.msra.gmra.mrb[0].mxu1 %v1631_v4  ;;  %v1726_v4 = vld [vmem:[%s2299_s1 + $0x1e0] ss:$8 sps:$4 sm:$0xff]  }
  0x43   :  { %1142 = vmatmul.mubr.bf16.vlgmr.msra.gmra.mrb[0].mxu0 %v1637_v6  ;;  %1057 = vmatpush1.bf16.msra.mxu1 %v1634_v5  ;;  %v1730_v5 = vld [vmem:[%s2299_s1 + $0x3e0] ss:$8 sps:$4 sm:$0xff]   ;;  %v1735_v6 = vld [vmem:[%s2299_s1 + $0x1f4] ss:$8 sps:$4 sm:$0xff]  }
  0x44   :  { %1163 = vmatpush1.bf16.msra.mxu0 %v1640_v7  ;;  %1058 = vmatprep.subr.bf16.mxu1 %v1645_v8  ;;  %v1738_v7 = vld [vmem:[%s2299_s1 + $0x3f4] ss:$8 sps:$4 sm:$0xff]   ;;  %v1733_v8 = vld [vmem:[%s2299_s1 + $0x1f0] ss:$8 sps:$4 sm:$0xff]  }
  0x45   :  { %1164 = vmatprep.subr.bf16.mxu0 %v1648_v9  ;;  %1045 = vmatprep.mubr.bf16.mxu1 %v1721_v29  ;;  %v1736_v9 = vld [vmem:[%s2299_s1 + $0x3f0] ss:$8 sps:$4 sm:$0xff]   ;;  %v1771_v29 = vld [vmem:[%s2299_s1 + $0x464] ss:$8 sps:$4 sm:$0xff]  }
  0x46   :  { %1151 = vmatprep.mubr.bf16.mxu0 %v1723_v30  ;;  %v1769_v30 = vld [vmem:[%s2299_s1 + $0x460] ss:$8 sps:$4 sm:$0xff]  }
  0x47   :  { %1059 = vmatpush1.bf16.msra.mxu1 %v1643_v10  ;;  %v1747_v10 = vld [vmem:[%s2299_s1 + $0x404] ss:$8 sps:$4 sm:$0xff]  }
  0x48   :  { %1165 = vmatpush1.bf16.msra.mxu0 %v1646_v11  ;;  %1060 = vmatprep.subr.bf16.mxu1 %v1651_v12  ;;  %v1739_v11 = vld [vmem:[%s2300_s0 + $0x8] ss:$36 sps:$4 sm:$0xff]   ;;  %v1742_v12 = vld [vmem:[%s2300_s0 + $0x18] ss:$36 sps:$4 sm:$0xff]  }
  0x49   :  { %1166 = vmatprep.subr.bf16.mxu0 %v1654_v13  ;;  %v1745_v13 = vld [vmem:[%s2299_s1 + $0x400] ss:$8 sps:$4 sm:$0xff]  }
  0x4a   :  { %1046 = vmatmul.mubr.bf16.gmra.mrb[4].mxu1 %v1725_v31  ;;  %v1774_v31 = vld [vmem:[%s2299_s1 + $0x474] ss:$8 sps:$4 sm:$0xff]  }
  0x4b   :  { %1061 = vmatpush1.bf16.msra.mxu1 %v1649_v14  ;;  %1152 = vmatmul.mubr.bf16.gmra.mrb[4].mxu0 %v1729_v33  ;;  %v1750_v14 = vld [vmem:[%s2299_s1 + $0x414] ss:$8 sps:$4 sm:$0xff]   ;;  %v1775_v33 = vld [vmem:[%s2300_s0 + $0x20] ss:$36 sps:$4 sm:$0xff]  }
  0x4c   :  { %1167 = vmatpush1.bf16.msra.mxu0 %v1652_v15  ;;  %1062 = vmatprep.subr.bf16.mxu1 %v1657_v16  ;;  %v1751_v15 = vld [vmem:[%s2300_s0 + $0x54] ss:$36 sps:$4 sm:$0xff]   ;;  %v1753_v16 = vld [vmem:[%s2300_s0 + $0x64] ss:$36 sps:$4 sm:$0xff]  }
  0x4d   :  { %1168 = vmatprep.subr.bf16.mxu0 %v1660_v17  ;;  %1088 = vmatprep.mubr.bf16.mxu1 %v1741_v41  ;;  %v1748_v17 = vld [vmem:[%s2299_s1 + $0x410] ss:$8 sps:$4 sm:$0xff]  }
  0x4e   :  { %1194 = vmatprep.mubr.bf16.mxu0 %v1744_v43 }
  0x4f   :  { %1063 = vmatpush1.bf16.msra.mxu1 %v1655_v18  ;;  %v1759_v18 = vld [vmem:[%s2299_s1 + $0x424] ss:$8 sps:$4 sm:$0xff]  }
  0x50   :  { %1169 = vmatpush1.bf16.msra.mxu0 %v1658_v19  ;;  %1064 = vmatprep.subr.bf16.mxu1 %v1663_v20  ;;  %v1755_v19 = vld [vmem:[%s2300_s0 + $0x50] ss:$36 sps:$4 sm:$0xff]   ;;  %v1756_v20 = vld [vmem:[%s2300_s0 + $0x60] ss:$36 sps:$4 sm:$0xff]  }
  0x51   :  { %1170 = vmatprep.subr.bf16.mxu0 %v1666_v21  ;;  %v1757_v21 = vld [vmem:[%s2299_s1 + $0x420] ss:$8 sps:$4 sm:$0xff]  }
  0x53   :  { %1065 = vmatpush1.bf16.msra.mxu1 %v1661_v22  ;;  %v1762_v22 = vld [vmem:[%s2299_s1 + $0x434] ss:$8 sps:$4 sm:$0xff]  }
  0x54   :  { %1171 = vmatpush1.bf16.msra.mxu0 %v1664_v23  ;;  %1066 = vmatprep.subr.bf16.mxu1 %v1669_v24  ;;  %v1760_v23 = vld [vmem:[%s2299_s1 + $0x430] ss:$8 sps:$4 sm:$0xff]   ;;  %v1765_v24 = vld [vmem:[%s2299_s1 + $0x444] ss:$8 sps:$4 sm:$0xff]  }
  0x55   :  { %1172 = vmatprep.subr.bf16.mxu0 %v1672_v25  ;;  %v1777_v25 = vmov 0  }
  0x57   :  { %1067 = vmatpush1.bf16.msra.mxu1 %v1667_v26  ;;  %v1763_v26 = vld [vmem:[%s2299_s1 + $0x440] ss:$8 sps:$4 sm:$0xff]  }
  0x58   :  { %1173 = vmatpush1.bf16.msra.mxu0 %v1670_v27  ;;  %1068 = vmatprep.subr.bf16.mxu1 %v1675_v28  ;;  %v1768_v27 = vld [vmem:[%s2299_s1 + $0x454] ss:$8 sps:$4 sm:$0xff]   ;;  %v1766_v28 = vld [vmem:[%s2299_s1 + $0x450] ss:$8 sps:$4 sm:$0xff]  }
  0x59   :  { %1174 = vmatprep.subr.bf16.mxu0 %v1678_v32  ;;  %v1772_v32 = vld [vmem:[%s2299_s1 + $0x470] ss:$8 sps:$4 sm:$0xff]  }
  0x5b   :  { %1069 = vmatpush1.bf16.msra.mxu1 %v1673_v34  ;;  %v1776_v34 = vld [vmem:[%s2300_s0 + $0x68] ss:$36 sps:$4 sm:$0xff]  }
  0x5c   :  { %1175 = vmatpush1.bf16.msra.mxu0 %v1676_v35  ;;  %1070 = vmatprep.subr.bf16.mxu1 %v1681_v36  ;;  %v181_v35 = vlaneseq }
  0x5d   :  { %1176 = vmatprep.subr.bf16.mxu0 %v1684_v37 }
  0x5e   :  { %v182_v36 = vshrl.u32 %v181_v35, 7 }
  0x5f   :  { %1071 = vmatpush1.bf16.msra.mxu1 %v1679_v38 }
  0x60   :  { %1177 = vmatpush1.bf16.msra.mxu0 %v1682_v39  ;;  %1072 = vmatprep.subr.bf16.mxu1 %v1687_v40  ;;  %v183_v40 = vsub.s32 0, %v182_v36  ;;  %v187_v43 = vsub.s32 1, %v182_v36 }
  0x61   :  { %1178 = vmatprep.subr.bf16.mxu0 %v1690_v42  ;;  %v179_v42 = vld [vmem:[%s2301_s2] sm:$0x3] }
  0x63   :  { %1073 = vmatpush1.bf16.msra.mxu1 %v1685_v44  ;;  %v184_v44 = vrot.slane %v179_v42, %v183_v40 }
  0x64   :  { %1179 = vmatpush1.bf16.msra.mxu0 %v1688_v45  ;;  %1074 = vmatprep.subr.bf16.mxu1 %v1693_v46  ;;  %v188_v45 = vrot.slane %v179_v42, %v187_v43 }
  0x65   :  { %1180 = vmatprep.subr.bf16.mxu0 %v1696_v47 }
  0x67   :  { %1075 = vmatpush1.bf16.msra.mxu1 %v1691_v48 }
  0x68   :  { %1181 = vmatpush1.bf16.msra.mxu0 %v1694_v49  ;;  %1076 = vmatprep.subr.bf16.mxu1 %v1699_v50 }
  0x69   :  { %1182 = vmatprep.subr.bf16.mxu0 %v1702_v51 }
  0x6b   :  { %1077 = vmatpush1.bf16.msra.mxu1 %v1697_v52 }
  0x6c   :  { %1183 = vmatpush1.bf16.msra.mxu0 %v1700_v53  ;;  %1078 = vmatprep.subr.bf16.mxu1 %v1705_v54 }
  0x6d   :  { %1184 = vmatprep.subr.bf16.mxu0 %v1708_v55 }
  0x6f   :  { %1079 = vmatpush1.bf16.msra.mxu1 %v1703_v56 }
  0x70   :  { %1185 = vmatpush1.bf16.msra.mxu0 %v1706_v57  ;;  %1080 = vmatprep.subr.bf16.mxu1 %v1711_v58 }
  0x71   :  { %1186 = vmatprep.subr.bf16.mxu0 %v1714_v59 }
  0x73   :  { %1081 = vmatpush1.bf16.msra.mxu1 %v1709_v60 }
  0x74   :  { %1187 = vmatpush1.bf16.msra.mxu0 %v1712_v61  ;;  %1082 = vmatprep.subr.bf16.mxu1 %v1717_v62 }
  0x75   :  { %1188 = vmatprep.subr.bf16.mxu0 %v1720_v63 }
  0x77   :  { %1083 = vmatpush1.bf16.msra.mxu1 %v1715_v0 }
  0x78   :  { %1189 = vmatpush1.bf16.msra.mxu0 %v1718_v1  ;;  %1084 = vmatprep.subr.bf16.mxu1 %v1728_v2 }
  0x79   :  { %1190 = vmatprep.subr.bf16.mxu0 %v1732_v3 }
  0x7b   :  { %1085 = vmatpush1.bf16.msra.mxu1 %v1726_v4 }
  0x7c   :  { %1191 = vmatpush1.bf16.msra.mxu0 %v1730_v5  ;;  %1086 = vmatprep.subr.bf16.mxu1 %v1735_v6 }
  0x7d   :  { %1192 = vmatprep.subr.bf16.mxu0 %v1738_v7 }
  0x7f   :  { %1087 = vmatpush1.bf16.msra.mxu1 %v1733_v8 }
  0x80   :  { %1193 = vmatpush1.bf16.msra.mxu0 %v1736_v9  ;;  %1478 = vmatprep.subr.bf16.mxu1 %v1747_v10 }
  0x81   :  { %1215 = vmatprep.subr.bf16.mxu0 %v1747_v10 }
  0x82   :  { %1089 = vmatmul.mubr.bf16.vlgmr.msra.gmra.mrb[0].mxu1 %v1739_v11 }
  0x83   :  { %1195 = vmatmul.mubr.bf16.vlgmr.msra.gmra.mrb[0].mxu0 %v1742_v12  ;;  %1486 = vmatpush1.bf16.msra.mxu1 %v1745_v13 }
  0x84   :  { %1216 = vmatpush1.bf16.msra.mxu0 %v1745_v13  ;;  %1479 = vmatprep.subr.bf16.mxu1 %v1750_v14 }
  0x85   :  { %1217 = vmatprep.subr.bf16.mxu0 %v1750_v14  ;;  %1098 = vmatprep.mubr.bf16.mxu1 %v1751_v15 }
  0x86   :  { %1204 = vmatprep.mubr.bf16.mxu0 %v1753_v16 }
  0x87   :  { %1487 = vmatpush1.bf16.msra.mxu1 %v1748_v17 }
  0x88   :  { %1218 = vmatpush1.bf16.msra.mxu0 %v1748_v17  ;;  %1480 = vmatprep.subr.bf16.mxu1 %v1759_v18 }
  0x89   :  { %1219 = vmatprep.subr.bf16.mxu0 %v1759_v18 }
  0x8a   :  { %1099 = vmatmul.mubr.bf16.gmra.mrb[4].mxu1 %v1755_v19 }
  0x8b   :  { %1205 = vmatmul.mubr.bf16.gmra.mrb[4].mxu0 %v1756_v20  ;;  %1488 = vmatpush1.bf16.msra.mxu1 %v1757_v21 }
  0x8c   :  { %1220 = vmatpush1.bf16.msra.mxu0 %v1757_v21  ;;  %1481 = vmatprep.subr.bf16.mxu1 %v1762_v22 }
  0x8d   :  { %1221 = vmatprep.subr.bf16.mxu0 %v1762_v22  ;;  %1247 = vmatprep.mubr.bf16.mxu0 %v1777_v25 }
  0x8e   :  { %1257 = vmatprep.mubr.bf16.mxu1 %v1777_v25 }
  0x8f   :  { %1489 = vmatpush1.bf16.msra.mxu1 %v1760_v23 }
  0x90   :  { %1222 = vmatpush1.bf16.msra.mxu0 %v1760_v23  ;;  %1482 = vmatprep.subr.bf16.mxu1 %v1765_v24 }
  0x91   :  { %1223 = vmatprep.subr.bf16.mxu0 %v1765_v24 }
  0x93   :  { %1490 = vmatpush1.bf16.msra.mxu1 %v1763_v26 }
  0x94   :  { %1224 = vmatpush1.bf16.msra.mxu0 %v1763_v26  ;;  %1483 = vmatprep.subr.bf16.mxu1 %v1768_v27 }
  0x95   :  { %1225 = vmatprep.subr.bf16.mxu0 %v1768_v27 }
  0x97   :  { %1491 = vmatpush1.bf16.msra.mxu1 %v1766_v28 }
  0x98   :  { %1226 = vmatpush1.bf16.msra.mxu0 %v1766_v28  ;;  %1484 = vmatprep.subr.bf16.mxu1 %v1771_v29 }
  0x99   :  { %1227 = vmatprep.subr.bf16.mxu0 %v1771_v29 }
  0x9b   :  { %1492 = vmatpush1.bf16.msra.mxu1 %v1769_v30 }
  0x9c   :  { %1228 = vmatpush1.bf16.msra.mxu0 %v1769_v30  ;;  %1485 = vmatprep.subr.bf16.mxu1 %v1774_v31 }
  0x9d   :  { %1229 = vmatprep.subr.bf16.mxu0 %v1774_v31 }
  0x9f   :  { %1493 = vmatpush1.bf16.msra.mxu1 %v1772_v32 }
  0xa0   :  { %1230 = vmatpush1.bf16.msra.mxu0 %v1772_v32 }
  0xa2   :  { %1258 = vmatmul.mubr.bf16.vlgmr.msra.gmra.mrb[8].mxu1 %v1776_v34 }
  0xa3   :  { %1248 = vmatmul.mubr.bf16.vlgmr.msra.gmra.mrb[0].mxu0 %v1775_v33 }
 0x155   :  { %v1090_v37 = vpop.f32.mrb[0].mxu1 }
 0x156   :  { %v1092_v38 = vpop.f32.mrb[1].mxu1  ;;  %v1494_v62 = vadd.f32 %v1090_v37, %v184_v44 }
 0x157   :  { %v1094_v39 = vpop.f32.mrb[2].mxu1  ;;  %v1496_v63 = vadd.f32 %v1092_v38, %v188_v45 }
 0x158   :  { %v1096_v41 = vpop.f32.mrb[3].mxu1  ;;  %v1498_v2 = vadd.f32 %v1094_v39, %v184_v44 }
 0x159   :  { %v1500_v7 = vadd.f32 %v1096_v41, %v188_v45 }
 0x15d   :  { %v1100_v46 = vpop.f32.mrb[4].mxu1 }
 0x15e   :  { %v1206_v47 = vpop.f32.mrb[4].mxu0  ;;  %v1502_v48 = vadd.f32 %v1100_v46, %v184_v44  ;;  %v1102_v49 = vpop.f32.mrb[5].mxu1 }
 0x15f   :  { %v1208_v50 = vpop.f32.mrb[5].mxu0  ;;  %v1505_v51 = vadd.f32 %v1102_v49, %v188_v45  ;;  %v1104_v52 = vpop.f32.mrb[6].mxu1 }
 0x160   :  { %v1210_v53 = vpop.f32.mrb[6].mxu0  ;;  %v1503_v54 = vadd.f32 %v1502_v48, %v1206_v47  ;;  %v1508_v55 = vadd.f32 %v1104_v52, %v184_v44  ;;  %v1106_v56 = vpop.f32.mrb[7].mxu1 }
 0x161   :  { %v1212_v57 = vpop.f32.mrb[7].mxu0  ;;  %v1506_v58 = vadd.f32 %v1505_v51, %v1208_v50  ;;  %v1511_v59 = vadd.f32 %v1106_v56, %v188_v45 }
 0x162   :  { %v1509_v60 = vadd.f32 %v1508_v55, %v1210_v53 }
 0x163   :  { %v1512_v61 = vadd.f32 %v1511_v59, %v1212_v57 }
 0x175   :  { %v1259_v1 = vpop.f32.mrb[8].mxu1 }
 0x176   :  { %v1249_v0 = vpop.f32.mrb[0].mxu0  ;;  %v1504_v4 = vadd.f32 %v1503_v54, %v1259_v1  ;;  %v1261_v6 = vpop.f32.mrb[9].mxu1 }
 0x177   :  { %v1495_v3 = vadd.f32 %v1494_v62, %v1249_v0  ;;  %v1251_v5 = vpop.f32.mrb[1].mxu0  ;;  %v1507_v9 = vadd.f32 %v1506_v58, %v1261_v6  ;;  %v1263_v11 = vpop.f32.mrb[10].mxu1 }
 0x178   :  { %v1497_v8 = vadd.f32 %v1496_v63, %v1251_v5  ;;  %v1253_v10 = vpop.f32.mrb[2].mxu0  ;;  %v1272_v13 = vmax.f32 %v1504_v4, 0.0  ;;  %v1510_v15 = vadd.f32 %v1509_v60, %v1263_v11  ;;  %v1265_v17 = vpop.f32.mrb[11].mxu1 }
 0x179   :  { %v1268_v12 = vmax.f32 %v1495_v3, 0.0  ;;  %v1499_v14 = vadd.f32 %v1498_v2, %v1253_v10  ;;  %v1255_v16 = vpop.f32.mrb[3].mxu0  ;;  %v1273_v19 = vmax.f32 %v1507_v9, 0.0  ;;  %v1513_v21 = vadd.f32 %v1512_v61, %v1265_v17 }
 0x17a   :  { %v1269_v18 = vmax.f32 %v1497_v8, 0.0  ;;  %v1501_v20 = vadd.f32 %v1500_v7, %v1255_v16  ;;  %v1274_v23 = vmax.f32 %v1510_v15, 0.0 }
 0x17b   :  { %v1270_v22 = vmax.f32 %v1499_v14, 0.0  ;;  %v1476_v25 = vpack.c.bf16 %v1273_v19, %v1272_v13  ;;  %v1275_v27 = vmax.f32 %v1513_v21, 0.0 }
 0x17c   :  { %v1474_v24 = vpack.c.bf16 %v1269_v18, %v1268_v12  ;;  %v1271_v26 = vmax.f32 %v1501_v20, 0.0 }
 0x17d   :  { %1302 = vst [vmem:[%s2302_s3 + $0x10] sm:$0xff] %v1476_v25  ;;  %v1477_v29 = vpack.c.bf16 %v1275_v27, %v1274_v23 }
 0x17e   :  { %1300 = vst [vmem:[%s2302_s3] sm:$0xff] %v1474_v24  ;;  %v1475_v28 = vpack.c.bf16 %v1271_v26, %v1270_v22 }
 0x17f   :  { %1303 = vst [vmem:[%s2302_s3 + $0x18] sm:$0xff] %v1477_v29 }
 0x180   :  { %1301 = vst [vmem:[%s2302_s3 + $0x8] sm:$0xff] %v1475_v28 }

// kernel: forward.9
= control target key start
LH: loop header
LB: loop body
LE: loop exit
PB: predicated region body
PF: predicated region fallthrough
CT: control target
= control target key end

     0   :  { %s14365_s1 = inlined_call_operand.vmem [shape: bf16[4096,512], index: 1, kind: input, shape index: {}]   ;;  %s14366_s0 = inlined_call_operand.vmem [shape: bf16[16,4096], index: 0, kind: input, shape index: {}]   ;;  %s14367_s3 = inlined_call_operand.vmem [shape: bf16[512,128], index: 3, kind: input, shape index: {}]   ;;  %s14368_s2 = inlined_call_operand.vmem [shape: f32[1,512], index: 2, kind: input, shape index: {}]   ;;  %s14369_s4 = inlined_call_operand.vmem [shape: f32[1,128], index: 4, kind: input, shape index: {}]   ;;  %s14370_s5 = inlined_call_operand.vmem [shape: f32[16,128], index: 5, kind: output, shape index: {}]  }
   0x1   :  { %v9371_v0 = vld [vmem:[%s14365_s1 + $0x4] ss:$16 sps:$4 sm:$0xff]   ;;  %v9373_v1 = vld [vmem:[%s14365_s1 + $0xc] ss:$16 sps:$4 sm:$0xff]   ;;  %v9375_v2 = vld [vmem:[%s14365_s1] ss:$16 sps:$4 sm:$0xff]  }
   0x2   :  { %6379 = vmatprep.subr.bf16.mxu0 %v9371_v0  ;;  %v9376_v3 = vld [vmem:[%s14365_s1 + $0x8] ss:$16 sps:$4 sm:$0xff]   ;;  %7067 = vmatprep.subr.bf16.mxu1 %v9373_v1  ;;  %v9377_v4 = vld [vmem:[%s14365_s1 + $0x24] ss:$16 sps:$4 sm:$0xff]   ;;  %v9379_v5 = vld [vmem:[%s14365_s1 + $0x2c] ss:$16 sps:$4 sm:$0xff]  }
   0x3   :  { %6380 = vmatpush1.bf16.msra.mxu0 %v9375_v2  ;;  %7068 = vmatpush1.bf16.msra.mxu1 %v9376_v3  ;;  %v9381_v6 = vld [vmem:[%s14365_s1 + $0x20] ss:$16 sps:$4 sm:$0xff]   ;;  %v9382_v7 = vld [vmem:[%s14365_s1 + $0x28] ss:$16 sps:$4 sm:$0xff]   ;;  %v9383_v8 = vld [vmem:[%s14365_s1 + $0x44] ss:$16 sps:$4 sm:$0xff]  }
   0x4   :  { %6381 = vmatprep.subr.bf16.mxu0 %v9377_v4  ;;  %7069 = vmatprep.subr.bf16.mxu1 %v9379_v5  ;;  %v9385_v9 = vld [vmem:[%s14365_s1 + $0x4c] ss:$16 sps:$4 sm:$0xff]   ;;  %v9387_v10 = vld [vmem:[%s14365_s1 + $0x40] ss:$16 sps:$4 sm:$0xff]   ;;  %v9388_v11 = vld [vmem:[%s14365_s1 + $0x48] ss:$16 sps:$4 sm:$0xff]  }
   0x5   :  { %v9389_v12 = vld [vmem:[%s14365_s1 + $0x64] ss:$16 sps:$4 sm:$0xff]   ;;  %v9391_v13 = vld [vmem:[%s14365_s1 + $0x6c] ss:$16 sps:$4 sm:$0xff]   ;;  %v9393_v14 = vld [vmem:[%s14365_s1 + $0x60] ss:$16 sps:$4 sm:$0xff]  }
   0x6   :  { %v9394_v15 = vld [vmem:[%s14365_s1 + $0x68] ss:$16 sps:$4 sm:$0xff]   ;;  %v9395_v16 = vld [vmem:[%s14365_s1 + $0x84] ss:$16 sps:$4 sm:$0xff]   ;;  %v9397_v17 = vld [vmem:[%s14365_s1 + $0x8c] ss:$16 sps:$4 sm:$0xff]  }
   0x7   :  { %6382 = vmatpush1.bf16.msra.mxu0 %v9381_v6  ;;  %7070 = vmatpush1.bf16.msra.mxu1 %v9382_v7  ;;  %v9399_v18 = vld [vmem:[%s14365_s1 + $0x80] ss:$16 sps:$4 sm:$0xff]   ;;  %v9400_v19 = vld [vmem:[%s14365_s1 + $0x88] ss:$16 sps:$4 sm:$0xff]   ;;  %v9401_v20 = vld [vmem:[%s14365_s1 + $0xa4] ss:$16 sps:$4 sm:$0xff]  }
   0x8   :  { %6383 = vmatprep.subr.bf16.mxu0 %v9383_v8  ;;  %7071 = vmatprep.subr.bf16.mxu1 %v9385_v9  ;;  %v9403_v21 = vld [vmem:[%s14365_s1 + $0xac] ss:$16 sps:$4 sm:$0xff]   ;;  %v9405_v22 = vld [vmem:[%s14365_s1 + $0xa0] ss:$16 sps:$4 sm:$0xff]   ;;  %v9406_v23 = vld [vmem:[%s14365_s1 + $0xa8] ss:$16 sps:$4 sm:$0xff]  }
   0x9   :  { %v9407_v24 = vld [vmem:[%s14365_s1 + $0xc4] ss:$16 sps:$4 sm:$0xff]   ;;  %v9409_v25 = vld [vmem:[%s14365_s1 + $0xcc] ss:$16 sps:$4 sm:$0xff]   ;;  %v9411_v26 = vld [vmem:[%s14365_s1 + $0xc0] ss:$16 sps:$4 sm:$0xff]  }
   0xa   :  { %v9412_v27 = vld [vmem:[%s14365_s1 + $0xc8] ss:$16 sps:$4 sm:$0xff]   ;;  %v9413_v28 = vld [vmem:[%s14365_s1 + $0xe4] ss:$16 sps:$4 sm:$0xff]   ;;  %v9415_v29 = vld [vmem:[%s14365_s1 + $0xec] ss:$16 sps:$4 sm:$0xff]  }
   0xb   :  { %6384 = vmatpush1.bf16.msra.mxu0 %v9387_v10  ;;  %7072 = vmatpush1.bf16.msra.mxu1 %v9388_v11  ;;  %v9417_v30 = vld [vmem:[%s14365_s1 + $0xe0] ss:$16 sps:$4 sm:$0xff]   ;;  %v9418_v31 = vld [vmem:[%s14365_s1 + $0xe8] ss:$16 sps:$4 sm:$0xff]   ;;  %v9419_v32 = vld [vmem:[%s14365_s1 + $0x104] ss:$16 sps:$4 sm:$0xff]  }
   0xc   :  { %6385 = vmatprep.subr.bf16.mxu0 %v9389_v12  ;;  %7073 = vmatprep.subr.bf16.mxu1 %v9391_v13  ;;  %v9421_v33 = vld [vmem:[%s14365_s1 + $0x10c] ss:$16 sps:$4 sm:$0xff]   ;;  %v9423_v34 = vld [vmem:[%s14365_s1 + $0x100] ss:$16 sps:$4 sm:$0xff]   ;;  %v9424_v35 = vld [vmem:[%s14365_s1 + $0x108] ss:$16 sps:$4 sm:$0xff]  }
   0xd   :  { %v9425_v36 = vld [vmem:[%s14365_s1 + $0x124] ss:$16 sps:$4 sm:$0xff]   ;;  %v9427_v37 = vld [vmem:[%s14365_s1 + $0x12c] ss:$16 sps:$4 sm:$0xff]   ;;  %v9429_v38 = vld [vmem:[%s14365_s1 + $0x120] ss:$16 sps:$4 sm:$0xff]  }
   0xe   :  { %v9430_v39 = vld [vmem:[%s14365_s1 + $0x128] ss:$16 sps:$4 sm:$0xff]   ;;  %v9431_v40 = vld [vmem:[%s14365_s1 + $0x144] ss:$16 sps:$4 sm:$0xff]   ;;  %v9433_v41 = vld [vmem:[%s14365_s1 + $0x14c] ss:$16 sps:$4 sm:$0xff]  }
   0xf   :  { %6386 = vmatpush1.bf16.msra.mxu0 %v9393_v14  ;;  %7074 = vmatpush1.bf16.msra.mxu1 %v9394_v15  ;;  %v9435_v42 = vld [vmem:[%s14365_s1 + $0x140] ss:$16 sps:$4 sm:$0xff]   ;;  %v9436_v43 = vld [vmem:[%s14365_s1 + $0x148] ss:$16 sps:$4 sm:$0xff]   ;;  %v9437_v44 = vld [vmem:[%s14365_s1 + $0x164] ss:$16 sps:$4 sm:$0xff]  }
  0x10   :  { %6387 = vmatprep.subr.bf16.mxu0 %v9395_v16  ;;  %7075 = vmatprep.subr.bf16.mxu1 %v9397_v17  ;;  %v9439_v45 = vld [vmem:[%s14365_s1 + $0x16c] ss:$16 sps:$4 sm:$0xff]   ;;  %v21_v46 = vld [vmem:[%s14366_s0] sm:$0xff]  ;;  %v9442_v49 = vld [vmem:[%s14365_s1 + $0x168] ss:$16 sps:$4 sm:$0xff]  }
  0x11   :  { %v37_v47 = vld [vmem:[%s14366_s0 + $0x80] sm:$0xff]  ;;  %v9445_v52 = vld [vmem:[%s14365_s1 + $0x18c] ss:$16 sps:$4 sm:$0xff]   ;;  %v9448_v54 = vld [vmem:[%s14365_s1 + $0x188] ss:$16 sps:$4 sm:$0xff]  }
  0x12   :  { %v9441_v48 = vld [vmem:[%s14365_s1 + $0x160] ss:$16 sps:$4 sm:$0xff]   ;;  %v8111_v50 = vcombine.high %v21_v46, %v37_v47  ;;  %v9443_v51 = vld [vmem:[%s14365_s1 + $0x184] ss:$16 sps:$4 sm:$0xff]   ;;  %v9451_v56 = vld [vmem:[%s14365_s1 + $0x1ac] ss:$16 sps:$4 sm:$0xff]   ;;  %v8110_v5 = vcombine.low %v21_v46, %v37_v47 }
  0x13   :  { %6388 = vmatpush1.bf16.msra.mxu0 %v9399_v18  ;;  %7076 = vmatpush1.bf16.msra.mxu1 %v9400_v19  ;;  %v9447_v53 = vld [vmem:[%s14365_s1 + $0x180] ss:$16 sps:$4 sm:$0xff]   ;;  %v9449_v55 = vld [vmem:[%s14365_s1 + $0x1a4] ss:$16 sps:$4 sm:$0xff]   ;;  %v9454_v58 = vld [vmem:[%s14365_s1 + $0x1a8] ss:$16 sps:$4 sm:$0xff]  }
  0x14   :  { %6389 = vmatprep.subr.bf16.mxu0 %v9401_v20  ;;  %7077 = vmatprep.subr.bf16.mxu1 %v9403_v21  ;;  %v9453_v57 = vld [vmem:[%s14365_s1 + $0x1a0] ss:$16 sps:$4 sm:$0xff]   ;;  %v9455_v59 = vld [vmem:[%s14365_s1 + $0x1c4] ss:$16 sps:$4 sm:$0xff]   ;;  %v9457_v60 = vld [vmem:[%s14365_s1 + $0x1cc] ss:$16 sps:$4 sm:$0xff]  }
  0x15   :  { %6411 = vmatprep.mubr.bf16.mxu0 %v8111_v50  ;;  %7099 = vmatprep.mubr.bf16.mxu1 %v8111_v50  ;;  %v9459_v61 = vld [vmem:[%s14365_s1 + $0x1c0] ss:$16 sps:$4 sm:$0xff]   ;;  %v9460_v62 = vld [vmem:[%s14365_s1 + $0x1c8] ss:$16 sps:$4 sm:$0xff]   ;;  %v9461_v63 = vld [vmem:[%s14365_s1 + $0x1e4] ss:$16 sps:$4 sm:$0xff]  }
  0x16   :  { %v9463_v0 = vld [vmem:[%s14365_s1 + $0x1ec] ss:$16 sps:$4 sm:$0xff]   ;;  %v9465_v1 = vld [vmem:[%s14365_s1 + $0x1e0] ss:$16 sps:$4 sm:$0xff]   ;;  %v9466_v2 = vld [vmem:[%s14365_s1 + $0x1e8] ss:$16 sps:$4 sm:$0xff]  }
  0x17   :  { %6390 = vmatpush1.bf16.msra.mxu0 %v9405_v22  ;;  %7078 = vmatpush1.bf16.msra.mxu1 %v9406_v23  ;;  %v9469_v3 = vld [vmem:[%s14365_s1 + $0x204] ss:$16 sps:$4 sm:$0xff]   ;;  %v9472_v4 = vld [vmem:[%s14365_s1 + $0x20c] ss:$16 sps:$4 sm:$0xff]   ;;  %v9467_v6 = vld [vmem:[%s14365_s1 + $0x200] ss:$16 sps:$4 sm:$0xff]  }
  0x18   :  { %6391 = vmatprep.subr.bf16.mxu0 %v9407_v24  ;;  %7079 = vmatprep.subr.bf16.mxu1 %v9409_v25  ;;  %v9470_v7 = vld [vmem:[%s14365_s1 + $0x208] ss:$16 sps:$4 sm:$0xff]   ;;  %v9475_v8 = vld [vmem:[%s14365_s1 + $0x224] ss:$16 sps:$4 sm:$0xff]   ;;  %v9478_v9 = vld [vmem:[%s14365_s1 + $0x22c] ss:$16 sps:$4 sm:$0xff]  }
  0x19   :  { %v9473_v10 = vld [vmem:[%s14365_s1 + $0x220] ss:$16 sps:$4 sm:$0xff]   ;;  %v9476_v11 = vld [vmem:[%s14365_s1 + $0x228] ss:$16 sps:$4 sm:$0xff]   ;;  %v9481_v12 = vld [vmem:[%s14365_s1 + $0x244] ss:$16 sps:$4 sm:$0xff]  }
  0x1a   :  { %v9484_v13 = vld [vmem:[%s14365_s1 + $0x24c] ss:$16 sps:$4 sm:$0xff]   ;;  %v9479_v14 = vld [vmem:[%s14365_s1 + $0x240] ss:$16 sps:$4 sm:$0xff]   ;;  %v9482_v15 = vld [vmem:[%s14365_s1 + $0x248] ss:$16 sps:$4 sm:$0xff]  }
  0x1b   :  { %6392 = vmatpush1.bf16.msra.mxu0 %v9411_v26  ;;  %7080 = vmatpush1.bf16.msra.mxu1 %v9412_v27  ;;  %v9487_v16 = vld [vmem:[%s14365_s1 + $0x264] ss:$16 sps:$4 sm:$0xff]   ;;  %v9490_v17 = vld [vmem:[%s14365_s1 + $0x26c] ss:$16 sps:$4 sm:$0xff]   ;;  %v9485_v18 = vld [vmem:[%s14365_s1 + $0x260] ss:$16 sps:$4 sm:$0xff]  }
  0x1c   :  { %6393 = vmatprep.subr.bf16.mxu0 %v9413_v28  ;;  %7081 = vmatprep.subr.bf16.mxu1 %v9415_v29  ;;  %v9488_v19 = vld [vmem:[%s14365_s1 + $0x268] ss:$16 sps:$4 sm:$0xff]   ;;  %v9493_v20 = vld [vmem:[%s14365_s1 + $0x284] ss:$16 sps:$4 sm:$0xff]   ;;  %v9496_v21 = vld [vmem:[%s14365_s1 + $0x28c] ss:$16 sps:$4 sm:$0xff]  }
  0x1d   :  { %v9491_v22 = vld [vmem:[%s14365_s1 + $0x280] ss:$16 sps:$4 sm:$0xff]   ;;  %v9494_v23 = vld [vmem:[%s14365_s1 + $0x288] ss:$16 sps:$4 sm:$0xff]   ;;  %v9499_v24 = vld [vmem:[%s14365_s1 + $0x2a4] ss:$16 sps:$4 sm:$0xff]  }
  0x1e   :  { %v9502_v25 = vld [vmem:[%s14365_s1 + $0x2ac] ss:$16 sps:$4 sm:$0xff]   ;;  %v9497_v26 = vld [vmem:[%s14365_s1 + $0x2a0] ss:$16 sps:$4 sm:$0xff]   ;;  %v9500_v27 = vld [vmem:[%s14365_s1 + $0x2a8] ss:$16 sps:$4 sm:$0xff]  }
  0x1f   :  { %6394 = vmatpush1.bf16.msra.mxu0 %v9417_v30  ;;  %7082 = vmatpush1.bf16.msra.mxu1 %v9418_v31  ;;  %v9505_v28 = vld [vmem:[%s14365_s1 + $0x2c4] ss:$16 sps:$4 sm:$0xff]   ;;  %v9508_v29 = vld [vmem:[%s14365_s1 + $0x2cc] ss:$16 sps:$4 sm:$0xff]   ;;  %v9524_v46 = vld [vmem:[%s14365_s1 + $0x328] ss:$16 sps:$4 sm:$0xff]  }
  0x20   :  { %6395 = vmatprep.subr.bf16.mxu0 %v9419_v32  ;;  %7083 = vmatprep.subr.bf16.mxu1 %v9421_v33  ;;  %v11248_v30 = vld [vmem:[%s14366_s0 + $0x8] sm:$0xff]  ;;  %v9503_v32 = vld [vmem:[%s14365_s1 + $0x2c0] ss:$16 sps:$4 sm:$0xff]   ;;  %v9529_v47 = vld [vmem:[%s14365_s1 + $0x344] ss:$16 sps:$4 sm:$0xff]  }
  0x21   :  { %v11253_v31 = vld [vmem:[%s14366_s0 + $0x88] sm:$0xff] }
  0x22   :  { %v9506_v33 = vld [vmem:[%s14365_s1 + $0x2c8] ss:$16 sps:$4 sm:$0xff]  }
  0x23   :  { %6396 = vmatpush1.bf16.msra.mxu0 %v9423_v34  ;;  %7084 = vmatpush1.bf16.msra.mxu1 %v9424_v35  ;;  %v8113_v34 = vcombine.high %v11248_v30, %v11253_v31  ;;  %v9511_v35 = vld [vmem:[%s14365_s1 + $0x2e4] ss:$16 sps:$4 sm:$0xff]   ;;  %v9530_v50 = vld [vmem:[%s14365_s1 + $0x348] ss:$16 sps:$4 sm:$0xff]  }
  0x24   :  { %6397 = vmatprep.subr.bf16.mxu0 %v9425_v36  ;;  %7085 = vmatprep.subr.bf16.mxu1 %v9427_v37  ;;  %v9514_v36 = vld [vmem:[%s14365_s1 + $0x2ec] ss:$16 sps:$4 sm:$0xff]   ;;  %v9509_v37 = vld [vmem:[%s14365_s1 + $0x2e0] ss:$16 sps:$4 sm:$0xff]  }
  0x27   :  { %6398 = vmatpush1.bf16.msra.mxu0 %v9429_v38  ;;  %7086 = vmatpush1.bf16.msra.mxu1 %v9430_v39  ;;  %v9512_v38 = vld [vmem:[%s14365_s1 + $0x2e8] ss:$16 sps:$4 sm:$0xff]   ;;  %v9517_v39 = vld [vmem:[%s14365_s1 + $0x304] ss:$16 sps:$4 sm:$0xff]  }
  0x28   :  { %6399 = vmatprep.subr.bf16.mxu0 %v9431_v40  ;;  %7087 = vmatprep.subr.bf16.mxu1 %v9433_v41  ;;  %v9520_v40 = vld [vmem:[%s14365_s1 + $0x30c] ss:$16 sps:$4 sm:$0xff]   ;;  %v9515_v41 = vld [vmem:[%s14365_s1 + $0x300] ss:$16 sps:$4 sm:$0xff]  }
  0x2b   :  { %6400 = vmatpush1.bf16.msra.mxu0 %v9435_v42  ;;  %7088 = vmatpush1.bf16.msra.mxu1 %v9436_v43  ;;  %v9518_v42 = vld [vmem:[%s14365_s1 + $0x308] ss:$16 sps:$4 sm:$0xff]   ;;  %v9523_v43 = vld [vmem:[%s14365_s1 + $0x324] ss:$16 sps:$4 sm:$0xff]  }
  0x2c   :  { %6401 = vmatprep.subr.bf16.mxu0 %v9437_v44  ;;  %7089 = vmatprep.subr.bf16.mxu1 %v9439_v45  ;;  %v9526_v44 = vld [vmem:[%s14365_s1 + $0x32c] ss:$16 sps:$4 sm:$0xff]   ;;  %v9521_v45 = vld [vmem:[%s14365_s1 + $0x320] ss:$16 sps:$4 sm:$0xff]  }
  0x2f   :  { %6402 = vmatpush1.bf16.msra.mxu0 %v9441_v48  ;;  %7090 = vmatpush1.bf16.msra.mxu1 %v9442_v49  ;;  %v9532_v48 = vld [vmem:[%s14365_s1 + $0x34c] ss:$16 sps:$4 sm:$0xff]   ;;  %v9527_v49 = vld [vmem:[%s14365_s1 + $0x340] ss:$16 sps:$4 sm:$0xff]  }
  0x30   :  { %6403 = vmatprep.subr.bf16.mxu0 %v9443_v51  ;;  %7091 = vmatprep.subr.bf16.mxu1 %v9445_v52  ;;  %v9535_v51 = vld [vmem:[%s14365_s1 + $0x364] ss:$16 sps:$4 sm:$0xff]   ;;  %v9538_v52 = vld [vmem:[%s14365_s1 + $0x36c] ss:$16 sps:$4 sm:$0xff]  }
  0x33   :  { %6404 = vmatpush1.bf16.msra.mxu0 %v9447_v53  ;;  %7092 = vmatpush1.bf16.msra.mxu1 %v9448_v54  ;;  %v9533_v53 = vld [vmem:[%s14365_s1 + $0x360] ss:$16 sps:$4 sm:$0xff]   ;;  %v9536_v54 = vld [vmem:[%s14365_s1 + $0x368] ss:$16 sps:$4 sm:$0xff]  }
  0x34   :  { %6405 = vmatprep.subr.bf16.mxu0 %v9449_v55  ;;  %7093 = vmatprep.subr.bf16.mxu1 %v9451_v56  ;;  %v9541_v55 = vld [vmem:[%s14365_s1 + $0x384] ss:$16 sps:$4 sm:$0xff]   ;;  %v9544_v56 = vld [vmem:[%s14365_s1 + $0x38c] ss:$16 sps:$4 sm:$0xff]  }
  0x37   :  { %6406 = vmatpush1.bf16.msra.mxu0 %v9453_v57  ;;  %7094 = vmatpush1.bf16.msra.mxu1 %v9454_v58  ;;  %v9539_v57 = vld [vmem:[%s14365_s1 + $0x380] ss:$16 sps:$4 sm:$0xff]   ;;  %v9542_v58 = vld [vmem:[%s14365_s1 + $0x388] ss:$16 sps:$4 sm:$0xff]  }
  0x38   :  { %6407 = vmatprep.subr.bf16.mxu0 %v9455_v59  ;;  %7095 = vmatprep.subr.bf16.mxu1 %v9457_v60  ;;  %v9547_v59 = vld [vmem:[%s14365_s1 + $0x3a4] ss:$16 sps:$4 sm:$0xff]   ;;  %v9550_v60 = vld [vmem:[%s14365_s1 + $0x3ac] ss:$16 sps:$4 sm:$0xff]  }
  0x3b   :  { %6408 = vmatpush1.bf16.msra.mxu0 %v9459_v61  ;;  %7096 = vmatpush1.bf16.msra.mxu1 %v9460_v62  ;;  %v9545_v61 = vld [vmem:[%s14365_s1 + $0x3a0] ss:$16 sps:$4 sm:$0xff]   ;;  %v9548_v62 = vld [vmem:[%s14365_s1 + $0x3a8] ss:$16 sps:$4 sm:$0xff]  }
  0x3c   :  { %6409 = vmatprep.subr.bf16.mxu0 %v9461_v63  ;;  %7097 = vmatprep.subr.bf16.mxu1 %v9463_v0  ;;  %v9553_v63 = vld [vmem:[%s14365_s1 + $0x3c4] ss:$16 sps:$4 sm:$0xff]   ;;  %v9556_v0 = vld [vmem:[%s14365_s1 + $0x3cc] ss:$16 sps:$4 sm:$0xff]  }
  0x3f   :  { %6410 = vmatpush1.bf16.msra.mxu0 %v9465_v1  ;;  %7098 = vmatpush1.bf16.msra.mxu1 %v9466_v2  ;;  %v9551_v1 = vld [vmem:[%s14365_s1 + $0x3c0] ss:$16 sps:$4 sm:$0xff]   ;;  %v9554_v2 = vld [vmem:[%s14365_s1 + $0x3c8] ss:$16 sps:$4 sm:$0xff]  }
  0x40   :  { %6422 = vmatprep.subr.bf16.mxu0 %v9469_v3  ;;  %7110 = vmatprep.subr.bf16.mxu1 %v9472_v4  ;;  %v9559_v3 = vld [vmem:[%s14365_s1 + $0x3e4] ss:$16 sps:$4 sm:$0xff]   ;;  %v9562_v4 = vld [vmem:[%s14365_s1 + $0x3ec] ss:$16 sps:$4 sm:$0xff]  }
  0x42   :  { %6412 = vmatmul.mubr.bf16.vlgmr.msra.gmra.mrb[0].mxu0 %v8110_v5  ;;  %7100 = vmatmul.mubr.bf16.vlgmr.msra.gmra.mrb[0].mxu1 %v8110_v5  ;;  %v9557_v5 = vld [vmem:[%s14365_s1 + $0x3e0] ss:$16 sps:$4 sm:$0xff]  }
  0x43   :  { %6423 = vmatpush1.bf16.msra.mxu0 %v9467_v6  ;;  %7111 = vmatpush1.bf16.msra.mxu1 %v9470_v7  ;;  %v9560_v6 = vld [vmem:[%s14365_s1 + $0x3e8] ss:$16 sps:$4 sm:$0xff]   ;;  %v9565_v7 = vld [vmem:[%s14365_s1 + $0x404] ss:$16 sps:$4 sm:$0xff]  }
  0x44   :  { %6424 = vmatprep.subr.bf16.mxu0 %v9475_v8  ;;  %7112 = vmatprep.subr.bf16.mxu1 %v9478_v9  ;;  %v9568_v8 = vld [vmem:[%s14365_s1 + $0x40c] ss:$16 sps:$4 sm:$0xff]   ;;  %v8112_v9 = vcombine.low %v11248_v30, %v11253_v31  ;;  %v9590_v30 = vld [vmem:[%s14365_s1 + $0x488] ss:$16 sps:$4 sm:$0xff]   ;;  %v9595_v31 = vld [vmem:[%s14365_s1 + $0x4a4] ss:$16 sps:$4 sm:$0xff]  }
  0x45   :  { %6454 = vmatprep.mubr.bf16.mxu0 %v8113_v34  ;;  %7142 = vmatprep.mubr.bf16.mxu1 %v8113_v34  ;;  %v9596_v34 = vld [vmem:[%s14365_s1 + $0x4a8] ss:$16 sps:$4 sm:$0xff]  }
  0x47   :  { %6425 = vmatpush1.bf16.msra.mxu0 %v9473_v10  ;;  %7113 = vmatpush1.bf16.msra.mxu1 %v9476_v11  ;;  %v9563_v10 = vld [vmem:[%s14365_s1 + $0x400] ss:$16 sps:$4 sm:$0xff]   ;;  %v9566_v11 = vld [vmem:[%s14365_s1 + $0x408] ss:$16 sps:$4 sm:$0xff]  }
  0x48   :  { %6426 = vmatprep.subr.bf16.mxu0 %v9481_v12  ;;  %7114 = vmatprep.subr.bf16.mxu1 %v9484_v13  ;;  %v9571_v12 = vld [vmem:[%s14365_s1 + $0x424] ss:$16 sps:$4 sm:$0xff]   ;;  %v9574_v13 = vld [vmem:[%s14365_s1 + $0x42c] ss:$16 sps:$4 sm:$0xff]  }
  0x4b   :  { %6427 = vmatpush1.bf16.msra.mxu0 %v9479_v14  ;;  %7115 = vmatpush1.bf16.msra.mxu1 %v9482_v15  ;;  %v11394_v14 = vld [vmem:[%s14366_s0 + $0x10] sm:$0xff] }
  0x4c   :  { %6428 = vmatprep.subr.bf16.mxu0 %v9487_v16  ;;  %7116 = vmatprep.subr.bf16.mxu1 %v9490_v17  ;;  %v11399_v15 = vld [vmem:[%s14366_s0 + $0x90] sm:$0xff] }
  0x4d   :  { %v8115_v16 = vcombine.high %v11394_v14, %v11399_v15  ;;  %v9569_v17 = vld [vmem:[%s14365_s1 + $0x420] ss:$16 sps:$4 sm:$0xff]  }
  0x4f   :  { %6429 = vmatpush1.bf16.msra.mxu0 %v9485_v18  ;;  %7117 = vmatpush1.bf16.msra.mxu1 %v9488_v19  ;;  %v9572_v18 = vld [vmem:[%s14365_s1 + $0x428] ss:$16 sps:$4 sm:$0xff]   ;;  %v9577_v19 = vld [vmem:[%s14365_s1 + $0x444] ss:$16 sps:$4 sm:$0xff]  }
  0x50   :  { %6430 = vmatprep.subr.bf16.mxu0 %v9493_v20  ;;  %7118 = vmatprep.subr.bf16.mxu1 %v9496_v21  ;;  %v9580_v20 = vld [vmem:[%s14365_s1 + $0x44c] ss:$16 sps:$4 sm:$0xff]   ;;  %v9575_v21 = vld [vmem:[%s14365_s1 + $0x440] ss:$16 sps:$4 sm:$0xff]  }
  0x53   :  { %6431 = vmatpush1.bf16.msra.mxu0 %v9491_v22  ;;  %7119 = vmatpush1.bf16.msra.mxu1 %v9494_v23  ;;  %v9578_v22 = vld [vmem:[%s14365_s1 + $0x448] ss:$16 sps:$4 sm:$0xff]   ;;  %v9583_v23 = vld [vmem:[%s14365_s1 + $0x464] ss:$16 sps:$4 sm:$0xff]  }
  0x54   :  { %6432 = vmatprep.subr.bf16.mxu0 %v9499_v24  ;;  %7120 = vmatprep.subr.bf16.mxu1 %v9502_v25  ;;  %v9586_v24 = vld [vmem:[%s14365_s1 + $0x46c] ss:$16 sps:$4 sm:$0xff]   ;;  %v9581_v25 = vld [vmem:[%s14365_s1 + $0x460] ss:$16 sps:$4 sm:$0xff]  }
  0x57   :  { %6433 = vmatpush1.bf16.msra.mxu0 %v9497_v26  ;;  %7121 = vmatpush1.bf16.msra.mxu1 %v9500_v27  ;;  %v9584_v26 = vld [vmem:[%s14365_s1 + $0x468] ss:$16 sps:$4 sm:$0xff]   ;;  %v9589_v27 = vld [vmem:[%s14365_s1 + $0x484] ss:$16 sps:$4 sm:$0xff]  }
  0x58   :  { %6434 = vmatprep.subr.bf16.mxu0 %v9505_v28  ;;  %7122 = vmatprep.subr.bf16.mxu1 %v9508_v29  ;;  %v9592_v28 = vld [vmem:[%s14365_s1 + $0x48c] ss:$16 sps:$4 sm:$0xff]   ;;  %v9587_v29 = vld [vmem:[%s14365_s1 + $0x480] ss:$16 sps:$4 sm:$0xff]  }
  0x5b   :  { %6435 = vmatpush1.bf16.msra.mxu0 %v9503_v32  ;;  %7123 = vmatpush1.bf16.msra.mxu1 %v9506_v33  ;;  %v9598_v32 = vld [vmem:[%s14365_s1 + $0x4ac] ss:$16 sps:$4 sm:$0xff]   ;;  %v9593_v33 = vld [vmem:[%s14365_s1 + $0x4a0] ss:$16 sps:$4 sm:$0xff]  }
  0x5c   :  { %6436 = vmatprep.subr.bf16.mxu0 %v9511_v35  ;;  %7124 = vmatprep.subr.bf16.mxu1 %v9514_v36  ;;  %v9601_v35 = vld [vmem:[%s14365_s1 + $0x4c4] ss:$16 sps:$4 sm:$0xff]   ;;  %v9604_v36 = vld [vmem:[%s14365_s1 + $0x4cc] ss:$16 sps:$4 sm:$0xff]  }
  0x5f   :  { %6437 = vmatpush1.bf16.msra.mxu0 %v9509_v37  ;;  %7125 = vmatpush1.bf16.msra.mxu1 %v9512_v38  ;;  %v9599_v37 = vld [vmem:[%s14365_s1 + $0x4c0] ss:$16 sps:$4 sm:$0xff]   ;;  %v9602_v38 = vld [vmem:[%s14365_s1 + $0x4c8] ss:$16 sps:$4 sm:$0xff]  }
  0x60   :  { %6438 = vmatprep.subr.bf16.mxu0 %v9517_v39  ;;  %7126 = vmatprep.subr.bf16.mxu1 %v9520_v40  ;;  %v9607_v39 = vld [vmem:[%s14365_s1 + $0x4e4] ss:$16 sps:$4 sm:$0xff]   ;;  %v9610_v40 = vld [vmem:[%s14365_s1 + $0x4ec] ss:$16 sps:$4 sm:$0xff]  }
  0x63   :  { %6439 = vmatpush1.bf16.msra.mxu0 %v9515_v41  ;;  %7127 = vmatpush1.bf16.msra.mxu1 %v9518_v42  ;;  %v9605_v41 = vld [vmem:[%s14365_s1 + $0x4e0] ss:$16 sps:$4 sm:$0xff]   ;;  %v9608_v42 = vld [vmem:[%s14365_s1 + $0x4e8] ss:$16 sps:$4 sm:$0xff]  }
  0x64   :  { %6440 = vmatprep.subr.bf16.mxu0 %v9523_v43  ;;  %7128 = vmatprep.subr.bf16.mxu1 %v9526_v44  ;;  %v9613_v43 = vld [vmem:[%s14365_s1 + $0x504] ss:$16 sps:$4 sm:$0xff]   ;;  %v9616_v44 = vld [vmem:[%s14365_s1 + $0x50c] ss:$16 sps:$4 sm:$0xff]  }
  0x67   :  { %6441 = vmatpush1.bf16.msra.mxu0 %v9521_v45  ;;  %7129 = vmatpush1.bf16.msra.mxu1 %v9524_v46  ;;  %v9611_v45 = vld [vmem:[%s14365_s1 + $0x500] ss:$16 sps:$4 sm:$0xff]   ;;  %v9614_v46 = vld [vmem:[%s14365_s1 + $0x508] ss:$16 sps:$4 sm:$0xff]  }
  0x68   :  { %6442 = vmatprep.subr.bf16.mxu0 %v9529_v47  ;;  %7130 = vmatprep.subr.bf16.mxu1 %v9532_v48  ;;  %v9619_v47 = vld [vmem:[%s14365_s1 + $0x524] ss:$16 sps:$4 sm:$0xff]   ;;  %v9622_v48 = vld [vmem:[%s14365_s1 + $0x52c] ss:$16 sps:$4 sm:$0xff]  }
  0x6b   :  { %6443 = vmatpush1.bf16.msra.mxu0 %v9527_v49  ;;  %7131 = vmatpush1.bf16.msra.mxu1 %v9530_v50  ;;  %v9617_v49 = vld [vmem:[%s14365_s1 + $0x520] ss:$16 sps:$4 sm:$0xff]   ;;  %v9620_v50 = vld [vmem:[%s14365_s1 + $0x528] ss:$16 sps:$4 sm:$0xff]  }
  0x6c   :  { %6444 = vmatprep.subr.bf16.mxu0 %v9535_v51  ;;  %7132 = vmatprep.subr.bf16.mxu1 %v9538_v52  ;;  %v9625_v51 = vld [vmem:[%s14365_s1 + $0x544] ss:$16 sps:$4 sm:$0xff]   ;;  %v9628_v52 = vld [vmem:[%s14365_s1 + $0x54c] ss:$16 sps:$4 sm:$0xff]  }
  0x6f   :  { %6445 = vmatpush1.bf16.msra.mxu0 %v9533_v53  ;;  %7133 = vmatpush1.bf16.msra.mxu1 %v9536_v54  ;;  %v9623_v53 = vld [vmem:[%s14365_s1 + $0x540] ss:$16 sps:$4 sm:$0xff]   ;;  %v9626_v54 = vld [vmem:[%s14365_s1 + $0x548] ss:$16 sps:$4 sm:$0xff]  }
  0x70   :  { %6446 = vmatprep.subr.bf16.mxu0 %v9541_v55  ;;  %7134 = vmatprep.subr.bf16.mxu1 %v9544_v56  ;;  %v9631_v55 = vld [vmem:[%s14365_s1 + $0x564] ss:$16 sps:$4 sm:$0xff]   ;;  %v9634_v56 = vld [vmem:[%s14365_s1 + $0x56c] ss:$16 sps:$4 sm:$0xff]  }
  0x73   :  { %6447 = vmatpush1.bf16.msra.mxu0 %v9539_v57  ;;  %7135 = vmatpush1.bf16.msra.mxu1 %v9542_v58  ;;  %v9629_v57 = vld [vmem:[%s14365_s1 + $0x560] ss:$16 sps:$4 sm:$0xff]   ;;  %v9632_v58 = vld [vmem:[%s14365_s1 + $0x568] ss:$16 sps:$4 sm:$0xff]  }
  0x74   :  { %6448 = vmatprep.subr.bf16.mxu0 %v9547_v59  ;;  %7136 = vmatprep.subr.bf16.mxu1 %v9550_v60  ;;  %v9637_v59 = vld [vmem:[%s14365_s1 + $0x584] ss:$16 sps:$4 sm:$0xff]   ;;  %v9640_v60 = vld [vmem:[%s14365_s1 + $0x58c] ss:$16 sps:$4 sm:$0xff]  }
  0x77   :  { %6449 = vmatpush1.bf16.msra.mxu0 %v9545_v61  ;;  %7137 = vmatpush1.bf16.msra.mxu1 %v9548_v62  ;;  %v9635_v61 = vld [vmem:[%s14365_s1 + $0x580] ss:$16 sps:$4 sm:$0xff]   ;;  %v9638_v62 = vld [vmem:[%s14365_s1 + $0x588] ss:$16 sps:$4 sm:$0xff]  }
  0x78   :  { %6450 = vmatprep.subr.bf16.mxu0 %v9553_v63  ;;  %7138 = vmatprep.subr.bf16.mxu1 %v9556_v0  ;;  %v9643_v63 = vld [vmem:[%s14365_s1 + $0x5a4] ss:$16 sps:$4 sm:$0xff]   ;;  %v9646_v0 = vld [vmem:[%s14365_s1 + $0x5ac] ss:$16 sps:$4 sm:$0xff]  }
  0x7b   :  { %6451 = vmatpush1.bf16.msra.mxu0 %v9551_v1  ;;  %7139 = vmatpush1.bf16.msra.mxu1 %v9554_v2  ;;  %v9641_v1 = vld [vmem:[%s14365_s1 + $0x5a0] ss:$16 sps:$4 sm:$0xff]   ;;  %v9644_v2 = vld [vmem:[%s14365_s1 + $0x5a8] ss:$16 sps:$4 sm:$0xff]  }
  0x7c   :  { %6452 = vmatprep.subr.bf16.mxu0 %v9559_v3  ;;  %7140 = vmatprep.subr.bf16.mxu1 %v9562_v4  ;;  %v9649_v3 = vld [vmem:[%s14365_s1 + $0x5c4] ss:$16 sps:$4 sm:$0xff]   ;;  %v9652_v4 = vld [vmem:[%s14365_s1 + $0x5cc] ss:$16 sps:$4 sm:$0xff]  }
  0x7f   :  { %6453 = vmatpush1.bf16.msra.mxu0 %v9557_v5  ;;  %7141 = vmatpush1.bf16.msra.mxu1 %v9560_v6  ;;  %v9647_v5 = vld [vmem:[%s14365_s1 + $0x5c0] ss:$16 sps:$4 sm:$0xff]   ;;  %v9650_v6 = vld [vmem:[%s14365_s1 + $0x5c8] ss:$16 sps:$4 sm:$0xff]  }
  0x80   :  { %6465 = vmatprep.subr.bf16.mxu0 %v9565_v7  ;;  %7153 = vmatprep.subr.bf16.mxu1 %v9568_v8  ;;  %v9655_v7 = vld [vmem:[%s14365_s1 + $0x5e4] ss:$16 sps:$4 sm:$0xff]   ;;  %v9658_v8 = vld [vmem:[%s14365_s1 + $0x5ec] ss:$16 sps:$4 sm:$0xff]  }
  0x82   :  { %6455 = vmatmul.mubr.bf16.vlgmr.msra.gmra.mrb[0].mxu0 %v8112_v9  ;;  %7143 = vmatmul.mubr.bf16.vlgmr.msra.gmra.mrb[0].mxu1 %v8112_v9  ;;  %v9653_v9 = vld [vmem:[%s14365_s1 + $0x5e0] ss:$16 sps:$4 sm:$0xff]  }
  0x83   :  { %6466 = vmatpush1.bf16.msra.mxu0 %v9563_v10  ;;  %7154 = vmatpush1.bf16.msra.mxu1 %v9566_v11  ;;  %v9656_v10 = vld [vmem:[%s14365_s1 + $0x5e8] ss:$16 sps:$4 sm:$0xff]   ;;  %v9661_v11 = vld [vmem:[%s14365_s1 + $0x604] ss:$16 sps:$4 sm:$0xff]  }
  0x84   :  { %6467 = vmatprep.subr.bf16.mxu0 %v9571_v12  ;;  %7155 = vmatprep.subr.bf16.mxu1 %v9574_v13  ;;  %v9664_v12 = vld [vmem:[%s14365_s1 + $0x60c] ss:$16 sps:$4 sm:$0xff]   ;;  %v9659_v13 = vld [vmem:[%s14365_s1 + $0x600] ss:$16 sps:$4 sm:$0xff]  }
  0x85   :  { %6497 = vmatprep.mubr.bf16.mxu0 %v8115_v16  ;;  %7185 = vmatprep.mubr.bf16.mxu1 %v8115_v16  ;;  %v9662_v16 = vld [vmem:[%s14365_s1 + $0x608] ss:$16 sps:$4 sm:$0xff]  }
  0x87   :  { %6468 = vmatpush1.bf16.msra.mxu0 %v9569_v17  ;;  %7156 = vmatpush1.bf16.msra.mxu1 %v9572_v18  ;;  %v8114_v17 = vcombine.low %v11394_v14, %v11399_v15  ;;  %v11594_v18 = vld [vmem:[%s14366_s0 + $0x18] sm:$0xff] }
  0x88   :  { %6469 = vmatprep.subr.bf16.mxu0 %v9577_v19  ;;  %7157 = vmatprep.subr.bf16.mxu1 %v9580_v20  ;;  %v11599_v19 = vld [vmem:[%s14366_s0 + $0x98] sm:$0xff]  ;;  %v9667_v20 = vld [vmem:[%s14365_s1 + $0x624] ss:$16 sps:$4 sm:$0xff]  }
  0x89   :  { %v9670_v14 = vld [vmem:[%s14365_s1 + $0x62c] ss:$16 sps:$4 sm:$0xff]   ;;  %v8117_v15 = vcombine.high %v11594_v18, %v11599_v19 }
  0x8b   :  { %6470 = vmatpush1.bf16.msra.mxu0 %v9575_v21  ;;  %7158 = vmatpush1.bf16.msra.mxu1 %v9578_v22  ;;  %v9665_v21 = vld [vmem:[%s14365_s1 + $0x620] ss:$16 sps:$4 sm:$0xff]   ;;  %v9668_v22 = vld [vmem:[%s14365_s1 + $0x628] ss:$16 sps:$4 sm:$0xff]  }
  0x8c   :  { %6471 = vmatprep.subr.bf16.mxu0 %v9583_v23  ;;  %7159 = vmatprep.subr.bf16.mxu1 %v9586_v24  ;;  %v9673_v23 = vld [vmem:[%s14365_s1 + $0x644] ss:$16 sps:$4 sm:$0xff]   ;;  %v9676_v24 = vld [vmem:[%s14365_s1 + $0x64c] ss:$16 sps:$4 sm:$0xff]  }
  0x8f   :  { %6472 = vmatpush1.bf16.msra.mxu0 %v9581_v25  ;;  %7160 = vmatpush1.bf16.msra.mxu1 %v9584_v26  ;;  %v9671_v25 = vld [vmem:[%s14365_s1 + $0x640] ss:$16 sps:$4 sm:$0xff]   ;;  %v9674_v26 = vld [vmem:[%s14365_s1 + $0x648] ss:$16 sps:$4 sm:$0xff]  }
  0x90   :  { %6473 = vmatprep.subr.bf16.mxu0 %v9589_v27  ;;  %7161 = vmatprep.subr.bf16.mxu1 %v9592_v28  ;;  %v9679_v27 = vld [vmem:[%s14365_s1 + $0x664] ss:$16 sps:$4 sm:$0xff]   ;;  %v9682_v28 = vld [vmem:[%s14365_s1 + $0x66c] ss:$16 sps:$4 sm:$0xff]  }
  0x93   :  { %6474 = vmatpush1.bf16.msra.mxu0 %v9587_v29  ;;  %7162 = vmatpush1.bf16.msra.mxu1 %v9590_v30  ;;  %v9677_v29 = vld [vmem:[%s14365_s1 + $0x660] ss:$16 sps:$4 sm:$0xff]   ;;  %v9680_v30 = vld [vmem:[%s14365_s1 + $0x668] ss:$16 sps:$4 sm:$0xff]  }
  0x94   :  { %6475 = vmatprep.subr.bf16.mxu0 %v9595_v31  ;;  %7163 = vmatprep.subr.bf16.mxu1 %v9598_v32  ;;  %v9685_v31 = vld [vmem:[%s14365_s1 + $0x684] ss:$16 sps:$4 sm:$0xff]   ;;  %v9688_v32 = vld [vmem:[%s14365_s1 + $0x68c] ss:$16 sps:$4 sm:$0xff]  }
  0x97   :  { %6476 = vmatpush1.bf16.msra.mxu0 %v9593_v33  ;;  %7164 = vmatpush1.bf16.msra.mxu1 %v9596_v34  ;;  %v9683_v33 = vld [vmem:[%s14365_s1 + $0x680] ss:$16 sps:$4 sm:$0xff]   ;;  %v9686_v34 = vld [vmem:[%s14365_s1 + $0x688] ss:$16 sps:$4 sm:$0xff]  }
  0x98   :  { %6477 = vmatprep.subr.bf16.mxu0 %v9601_v35  ;;  %7165 = vmatprep.subr.bf16.mxu1 %v9604_v36  ;;  %v9691_v35 = vld [vmem:[%s14365_s1 + $0x6a4] ss:$16 sps:$4 sm:$0xff]   ;;  %v9694_v36 = vld [vmem:[%s14365_s1 + $0x6ac] ss:$16 sps:$4 sm:$0xff]  }
  0x9b   :  { %6478 = vmatpush1.bf16.msra.mxu0 %v9599_v37  ;;  %7166 = vmatpush1.bf16.msra.mxu1 %v9602_v38  ;;  %v9689_v37 = vld [vmem:[%s14365_s1 + $0x6a0] ss:$16 sps:$4 sm:$0xff]   ;;  %v9692_v38 = vld [vmem:[%s14365_s1 + $0x6a8] ss:$16 sps:$4 sm:$0xff]  }
  0x9c   :  { %6479 = vmatprep.subr.bf16.mxu0 %v9607_v39  ;;  %7167 = vmatprep.subr.bf16.mxu1 %v9610_v40  ;;  %v9697_v39 = vld [vmem:[%s14365_s1 + $0x6c4] ss:$16 sps:$4 sm:$0xff]   ;;  %v9700_v40 = vld [vmem:[%s14365_s1 + $0x6cc] ss:$16 sps:$4 sm:$0xff]  }
  0x9f   :  { %6480 = vmatpush1.bf16.msra.mxu0 %v9605_v41  ;;  %7168 = vmatpush1.bf16.msra.mxu1 %v9608_v42  ;;  %v9695_v41 = vld [vmem:[%s14365_s1 + $0x6c0] ss:$16 sps:$4 sm:$0xff]   ;;  %v9698_v42 = vld [vmem:[%s14365_s1 + $0x6c8] ss:$16 sps:$4 sm:$0xff]  }
  0xa0   :  { %6481 = vmatprep.subr.bf16.mxu0 %v9613_v43  ;;  %7169 = vmatprep.subr.bf16.mxu1 %v9616_v44  ;;  %v9703_v43 = vld [vmem:[%s14365_s1 + $0x6e4] ss:$16 sps:$4 sm:$0xff]   ;;  %v9706_v44 = vld [vmem:[%s14365_s1 + $0x6ec] ss:$16 sps:$4 sm:$0xff]  }
  0xa3   :  { %6482 = vmatpush1.bf16.msra.mxu0 %v9611_v45  ;;  %7170 = vmatpush1.bf16.msra.mxu1 %v9614_v46  ;;  %v9701_v45 = vld [vmem:[%s14365_s1 + $0x6e0] ss:$16 sps:$4 sm:$0xff]   ;;  %v9704_v46 = vld [vmem:[%s14365_s1 + $0x6e8] ss:$16 sps:$4 sm:$0xff]  }
  0xa4   :  { %6483 = vmatprep.subr.bf16.mxu0 %v9619_v47  ;;  %7171 = vmatprep.subr.bf16.mxu1 %v9622_v48  ;;  %v9709_v47 = vld [vmem:[%s14365_s1 + $0x704] ss:$16 sps:$4 sm:$0xff]   ;;  %v9712_v48 = vld [vmem:[%s14365_s1 + $0x70c] ss:$16 sps:$4 sm:$0xff]  }
  0xa7   :  { %6484 = vmatpush1.bf16.msra.mxu0 %v9617_v49  ;;  %7172 = vmatpush1.bf16.msra.mxu1 %v9620_v50  ;;  %v9707_v49 = vld [vmem:[%s14365_s1 + $0x700] ss:$16 sps:$4 sm:$0xff]   ;;  %v9710_v50 = vld [vmem:[%s14365_s1 + $0x708] ss:$16 sps:$4 sm:$0xff]  }
  0xa8   :  { %6485 = vmatprep.subr.bf16.mxu0 %v9625_v51  ;;  %7173 = vmatprep.subr.bf16.mxu1 %v9628_v52  ;;  %v9715_v51 = vld [vmem:[%s14365_s1 + $0x724] ss:$16 sps:$4 sm:$0xff]   ;;  %v9718_v52 = vld [vmem:[%s14365_s1 + $0x72c] ss:$16 sps:$4 sm:$0xff]  }
  0xab   :  { %6486 = vmatpush1.bf16.msra.mxu0 %v9623_v53  ;;  %7174 = vmatpush1.bf16.msra.mxu1 %v9626_v54  ;;  %v9713_v53 = vld [vmem:[%s14365_s1 + $0x720] ss:$16 sps:$4 sm:$0xff]   ;;  %v9716_v54 = vld [vmem:[%s14365_s1 + $0x728] ss:$16 sps:$4 sm:$0xff]  }
  0xac   :  { %6487 = vmatprep.subr.bf16.mxu0 %v9631_v55  ;;  %7175 = vmatprep.subr.bf16.mxu1 %v9634_v56  ;;  %v9721_v55 = vld [vmem:[%s14365_s1 + $0x744] ss:$16 sps:$4 sm:$0xff]   ;;  %v9724_v56 = vld [vmem:[%s14365_s1 + $0x74c] ss:$16 sps:$4 sm:$0xff]  }
  0xaf   :  { %6488 = vmatpush1.bf16.msra.mxu0 %v9629_v57  ;;  %7176 = vmatpush1.bf16.msra.mxu1 %v9632_v58  ;;  %v9719_v57 = vld [vmem:[%s14365_s1 + $0x740] ss:$16 sps:$4 sm:$0xff]   ;;  %v9722_v58 = vld [vmem:[%s14365_s1 + $0x748] ss:$16 sps:$4 sm:$0xff]  }
  0xb0   :  { %6489 = vmatprep.subr.bf16.mxu0 %v9637_v59  ;;  %7177 = vmatprep.subr.bf16.mxu1 %v9640_v60  ;;  %v9727_v59 = vld [vmem:[%s14365_s1 + $0x764] ss:$16 sps:$4 sm:$0xff]   ;;  %v9730_v60 = vld [vmem:[%s14365_s1 + $0x76c] ss:$16 sps:$4 sm:$0xff]  }
  0xb3   :  { %6490 = vmatpush1.bf16.msra.mxu0 %v9635_v61  ;;  %7178 = vmatpush1.bf16.msra.mxu1 %v9638_v62  ;;  %v9725_v61 = vld [vmem:[%s14365_s1 + $0x760] ss:$16 sps:$4 sm:$0xff]   ;;  %v9728_v62 = vld [vmem:[%s14365_s1 + $0x768] ss:$16 sps:$4 sm:$0xff]  }
  0xb4   :  { %6491 = vmatprep.subr.bf16.mxu0 %v9643_v63  ;;  %7179 = vmatprep.subr.bf16.mxu1 %v9646_v0  ;;  %v9733_v63 = vld [vmem:[%s14365_s1 + $0x784] ss:$16 sps:$4 sm:$0xff]   ;;  %v9736_v0 = vld [vmem:[%s14365_s1 + $0x78c] ss:$16 sps:$4 sm:$0xff]  }
  0xb7   :  { %6492 = vmatpush1.bf16.msra.mxu0 %v9641_v1  ;;  %7180 = vmatpush1.bf16.msra.mxu1 %v9644_v2  ;;  %v9731_v1 = vld [vmem:[%s14365_s1 + $0x780] ss:$16 sps:$4 sm:$0xff]   ;;  %v9734_v2 = vld [vmem:[%s14365_s1 + $0x788] ss:$16 sps:$4 sm:$0xff]  }
  0xb8   :  { %6493 = vmatprep.subr.bf16.mxu0 %v9649_v3  ;;  %7181 = vmatprep.subr.bf16.mxu1 %v9652_v4  ;;  %v9739_v3 = vld [vmem:[%s14365_s1 + $0x7a4] ss:$16 sps:$4 sm:$0xff]   ;;  %v9742_v4 = vld [vmem:[%s14365_s1 + $0x7ac] ss:$16 sps:$4 sm:$0xff]  }
  0xbb   :  { %6494 = vmatpush1.bf16.msra.mxu0 %v9647_v5  ;;  %7182 = vmatpush1.bf16.msra.mxu1 %v9650_v6  ;;  %v9737_v5 = vld [vmem:[%s14365_s1 + $0x7a0] ss:$16 sps:$4 sm:$0xff]   ;;  %v9740_v6 = vld [vmem:[%s14365_s1 + $0x7a8] ss:$16 sps:$4 sm:$0xff]  }
  0xbc   :  { %6495 = vmatprep.subr.bf16.mxu0 %v9655_v7  ;;  %7183 = vmatprep.subr.bf16.mxu1 %v9658_v8  ;;  %v9745_v7 = vld [vmem:[%s14365_s1 + $0x7c4] ss:$16 sps:$4 sm:$0xff]   ;;  %v9748_v8 = vld [vmem:[%s14365_s1 + $0x7cc] ss:$16 sps:$4 sm:$0xff]  }
  0xbf   :  { %6496 = vmatpush1.bf16.msra.mxu0 %v9653_v9  ;;  %7184 = vmatpush1.bf16.msra.mxu1 %v9656_v10  ;;  %v9743_v9 = vld [vmem:[%s14365_s1 + $0x7c0] ss:$16 sps:$4 sm:$0xff]   ;;  %v9746_v10 = vld [vmem:[%s14365_s1 + $0x7c8] ss:$16 sps:$4 sm:$0xff]  }
  0xc0   :  { %6508 = vmatprep.subr.bf16.mxu0 %v9661_v11  ;;  %7196 = vmatprep.subr.bf16.mxu1 %v9664_v12  ;;  %v9751_v11 = vld [vmem:[%s14365_s1 + $0x7e4] ss:$16 sps:$4 sm:$0xff]   ;;  %v9754_v12 = vld [vmem:[%s14365_s1 + $0x7ec] ss:$16 sps:$4 sm:$0xff]  }
  0xc2   :  { %6498 = vmatmul.mubr.bf16.vlgmr.msra.gmra.mrb[0].mxu0 %v8114_v17  ;;  %7186 = vmatmul.mubr.bf16.vlgmr.msra.gmra.mrb[0].mxu1 %v8114_v17  ;;  %v9757_v17 = vld [vmem:[%s14365_s1 + $0x804] ss:$16 sps:$4 sm:$0xff]  }
  0xc3   :  { %6509 = vmatpush1.bf16.msra.mxu0 %v9659_v13  ;;  %7197 = vmatpush1.bf16.msra.mxu1 %v9662_v16  ;;  %v9749_v13 = vld [vmem:[%s14365_s1 + $0x7e0] ss:$16 sps:$4 sm:$0xff]   ;;  %v9752_v16 = vld [vmem:[%s14365_s1 + $0x7e8] ss:$16 sps:$4 sm:$0xff]  }
  0xc4   :  { %6510 = vmatprep.subr.bf16.mxu0 %v9667_v20  ;;  %7198 = vmatprep.subr.bf16.mxu1 %v9670_v14  ;;  %v9760_v20 = vld [vmem:[%s14365_s1 + $0x80c] ss:$16 sps:$4 sm:$0xff]   ;;  %v11792_v14 = vld [vmem:[%s14366_s0 + $0x20] sm:$0xff] }
  0xc5   :  { %6540 = vmatprep.mubr.bf16.mxu0 %v8117_v15  ;;  %7228 = vmatprep.mubr.bf16.mxu1 %v8117_v15  ;;  %v8116_v15 = vcombine.low %v11594_v18, %v11599_v19  ;;  %v9763_v18 = vld [vmem:[%s14365_s1 + $0x824] ss:$16 sps:$4 sm:$0xff]   ;;  %v9766_v19 = vld [vmem:[%s14365_s1 + $0x82c] ss:$16 sps:$4 sm:$0xff]  }
  0xc7   :  { %6511 = vmatpush1.bf16.msra.mxu0 %v9665_v21  ;;  %7199 = vmatpush1.bf16.msra.mxu1 %v9668_v22  ;;  %v11799_v21 = vld [vmem:[%s14366_s0 + $0xa0] sm:$0xff] }
  0xc8   :  { %6512 = vmatprep.subr.bf16.mxu0 %v9673_v23  ;;  %7200 = vmatprep.subr.bf16.mxu1 %v9676_v24  ;;  %v9755_v22 = vld [vmem:[%s14365_s1 + $0x800] ss:$16 sps:$4 sm:$0xff]   ;;  %v9758_v23 = vld [vmem:[%s14365_s1 + $0x808] ss:$16 sps:$4 sm:$0xff]   ;;  %v8119_v24 = vcombine.high %v11792_v14, %v11799_v21 }
  0xcb   :  { %6513 = vmatpush1.bf16.msra.mxu0 %v9671_v25  ;;  %7201 = vmatpush1.bf16.msra.mxu1 %v9674_v26  ;;  %v9761_v25 = vld [vmem:[%s14365_s1 + $0x820] ss:$16 sps:$4 sm:$0xff]   ;;  %v9764_v26 = vld [vmem:[%s14365_s1 + $0x828] ss:$16 sps:$4 sm:$0xff]  }
  0xcc   :  { %6514 = vmatprep.subr.bf16.mxu0 %v9679_v27  ;;  %7202 = vmatprep.subr.bf16.mxu1 %v9682_v28  ;;  %v9769_v27 = vld [vmem:[%s14365_s1 + $0x844] ss:$16 sps:$4 sm:$0xff]   ;;  %v9772_v28 = vld [vmem:[%s14365_s1 + $0x84c] ss:$16 sps:$4 sm:$0xff]  }
  0xcf   :  { %6515 = vmatpush1.bf16.msra.mxu0 %v9677_v29  ;;  %7203 = vmatpush1.bf16.msra.mxu1 %v9680_v30  ;;  %v9767_v29 = vld [vmem:[%s14365_s1 + $0x840] ss:$16 sps:$4 sm:$0xff]   ;;  %v9770_v30 = vld [vmem:[%s14365_s1 + $0x848] ss:$16 sps:$4 sm:$0xff]  }
  0xd0   :  { %6516 = vmatprep.subr.bf16.mxu0 %v9685_v31  ;;  %7204 = vmatprep.subr.bf16.mxu1 %v9688_v32  ;;  %v9775_v31 = vld [vmem:[%s14365_s1 + $0x864] ss:$16 sps:$4 sm:$0xff]   ;;  %v9778_v32 = vld [vmem:[%s14365_s1 + $0x86c] ss:$16 sps:$4 sm:$0xff]  }
  0xd3   :  { %6517 = vmatpush1.bf16.msra.mxu0 %v9683_v33  ;;  %7205 = vmatpush1.bf16.msra.mxu1 %v9686_v34  ;;  %v9773_v33 = vld [vmem:[%s14365_s1 + $0x860] ss:$16 sps:$4 sm:$0xff]   ;;  %v9776_v34 = vld [vmem:[%s14365_s1 + $0x868] ss:$16 sps:$4 sm:$0xff]  }
  0xd4   :  { %6518 = vmatprep.subr.bf16.mxu0 %v9691_v35  ;;  %7206 = vmatprep.subr.bf16.mxu1 %v9694_v36  ;;  %v9781_v35 = vld [vmem:[%s14365_s1 + $0x884] ss:$16 sps:$4 sm:$0xff]   ;;  %v9784_v36 = vld [vmem:[%s14365_s1 + $0x88c] ss:$16 sps:$4 sm:$0xff]  }
  0xd7   :  { %6519 = vmatpush1.bf16.msra.mxu0 %v9689_v37  ;;  %7207 = vmatpush1.bf16.msra.mxu1 %v9692_v38  ;;  %v9779_v37 = vld [vmem:[%s14365_s1 + $0x880] ss:$16 sps:$4 sm:$0xff]   ;;  %v9782_v38 = vld [vmem:[%s14365_s1 + $0x888] ss:$16 sps:$4 sm:$0xff]  }
  0xd8   :  { %6520 = vmatprep.subr.bf16.mxu0 %v9697_v39  ;;  %7208 = vmatprep.subr.bf16.mxu1 %v9700_v40  ;;  %v9787_v39 = vld [vmem:[%s14365_s1 + $0x8a4] ss:$16 sps:$4 sm:$0xff]   ;;  %v9790_v40 = vld [vmem:[%s14365_s1 + $0x8ac] ss:$16 sps:$4 sm:$0xff]  }
  0xdb   :  { %6521 = vmatpush1.bf16.msra.mxu0 %v9695_v41  ;;  %7209 = vmatpush1.bf16.msra.mxu1 %v9698_v42  ;;  %v9785_v41 = vld [vmem:[%s14365_s1 + $0x8a0] ss:$16 sps:$4 sm:$0xff]   ;;  %v9788_v42 = vld [vmem:[%s14365_s1 + $0x8a8] ss:$16 sps:$4 sm:$0xff]  }
  0xdc   :  { %6522 = vmatprep.subr.bf16.mxu0 %v9703_v43  ;;  %7210 = vmatprep.subr.bf16.mxu1 %v9706_v44  ;;  %v9793_v43 = vld [vmem:[%s14365_s1 + $0x8c4] ss:$16 sps:$4 sm:$0xff]   ;;  %v9796_v44 = vld [vmem:[%s14365_s1 + $0x8cc] ss:$16 sps:$4 sm:$0xff]  }
  0xdf   :  { %6523 = vmatpush1.bf16.msra.mxu0 %v9701_v45  ;;  %7211 = vmatpush1.bf16.msra.mxu1 %v9704_v46  ;;  %v9791_v45 = vld [vmem:[%s14365_s1 + $0x8c0] ss:$16 sps:$4 sm:$0xff]   ;;  %v9794_v46 = vld [vmem:[%s14365_s1 + $0x8c8] ss:$16 sps:$4 sm:$0xff]  }
  0xe0   :  { %6524 = vmatprep.subr.bf16.mxu0 %v9709_v47  ;;  %7212 = vmatprep.subr.bf16.mxu1 %v9712_v48  ;;  %v9799_v47 = vld [vmem:[%s14365_s1 + $0x8e4] ss:$16 sps:$4 sm:$0xff]   ;;  %v9802_v48 = vld [vmem:[%s14365_s1 + $0x8ec] ss:$16 sps:$4 sm:$0xff]  }
  0xe3   :  { %6525 = vmatpush1.bf16.msra.mxu0 %v9707_v49  ;;  %7213 = vmatpush1.bf16.msra.mxu1 %v9710_v50  ;;  %v9797_v49 = vld [vmem:[%s14365_s1 + $0x8e0] ss:$16 sps:$4 sm:$0xff]   ;;  %v9800_v50 = vld [vmem:[%s14365_s1 + $0x8e8] ss:$16 sps:$4 sm:$0xff]  }
  0xe4   :  { %6526 = vmatprep.subr.bf16.mxu0 %v9715_v51  ;;  %7214 = vmatprep.subr.bf16.mxu1 %v9718_v52  ;;  %v9805_v51 = vld [vmem:[%s14365_s1 + $0x904] ss:$16 sps:$4 sm:$0xff]   ;;  %v9808_v52 = vld [vmem:[%s14365_s1 + $0x90c] ss:$16 sps:$4 sm:$0xff]  }
  0xe7   :  { %6527 = vmatpush1.bf16.msra.mxu0 %v9713_v53  ;;  %7215 = vmatpush1.bf16.msra.mxu1 %v9716_v54  ;;  %v9803_v53 = vld [vmem:[%s14365_s1 + $0x900] ss:$16 sps:$4 sm:$0xff]   ;;  %v9806_v54 = vld [vmem:[%s14365_s1 + $0x908] ss:$16 sps:$4 sm:$0xff]  }
  0xe8   :  { %6528 = vmatprep.subr.bf16.mxu0 %v9721_v55  ;;  %7216 = vmatprep.subr.bf16.mxu1 %v9724_v56  ;;  %v9811_v55 = vld [vmem:[%s14365_s1 + $0x924] ss:$16 sps:$4 sm:$0xff]   ;;  %v9814_v56 = vld [vmem:[%s14365_s1 + $0x92c] ss:$16 sps:$4 sm:$0xff]  }
  0xeb   :  { %6529 = vmatpush1.bf16.msra.mxu0 %v9719_v57  ;;  %7217 = vmatpush1.bf16.msra.mxu1 %v9722_v58  ;;  %v9809_v57 = vld [vmem:[%s14365_s1 + $0x920] ss:$16 sps:$4 sm:$0xff]   ;;  %v9812_v58 = vld [vmem:[%s14365_s1 + $0x928] ss:$16 sps:$4 sm:$0xff]  }
  0xec   :  { %6530 = vmatprep.subr.bf16.mxu0 %v9727_v59  ;;  %7218 = vmatprep.subr.bf16.mxu1 %v9730_v60  ;;  %v9817_v59 = vld [vmem:[%s14365_s1 + $0x944] ss:$16 sps:$4 sm:$0xff]   ;;  %v9820_v60 = vld [vmem:[%s14365_s1 + $0x94c] ss:$16 sps:$4 sm:$0xff]  }
  0xef   :  { %6531 = vmatpush1.bf16.msra.mxu0 %v9725_v61  ;;  %7219 = vmatpush1.bf16.msra.mxu1 %v9728_v62  ;;  %v9815_v61 = vld [vmem:[%s14365_s1 + $0x940] ss:$16 sps:$4 sm:$0xff]   ;;  %v9818_v62 = vld [vmem:[%s14365_s1 + $0x948] ss:$16 sps:$4 sm:$0xff]  }
  0xf0   :  { %6532 = vmatprep.subr.bf16.mxu0 %v9733_v63  ;;  %7220 = vmatprep.subr.bf16.mxu1 %v9736_v0  ;;  %v9823_v63 = vld [vmem:[%s14365_s1 + $0x964] ss:$16 sps:$4 sm:$0xff]   ;;  %v9826_v0 = vld [vmem:[%s14365_s1 + $0x96c] ss:$16 sps:$4 sm:$0xff]  }
  0xf3   :  { %6533 = vmatpush1.bf16.msra.mxu0 %v9731_v1  ;;  %7221 = vmatpush1.bf16.msra.mxu1 %v9734_v2  ;;  %v9821_v1 = vld [vmem:[%s14365_s1 + $0x960] ss:$16 sps:$4 sm:$0xff]   ;;  %v9824_v2 = vld [vmem:[%s14365_s1 + $0x968] ss:$16 sps:$4 sm:$0xff]  }
  0xf4   :  { %6534 = vmatprep.subr.bf16.mxu0 %v9739_v3  ;;  %7222 = vmatprep.subr.bf16.mxu1 %v9742_v4  ;;  %v9829_v3 = vld [vmem:[%s14365_s1 + $0x984] ss:$16 sps:$4 sm:$0xff]   ;;  %v9832_v4 = vld [vmem:[%s14365_s1 + $0x98c] ss:$16 sps:$4 sm:$0xff]  }
  0xf7   :  { %6535 = vmatpush1.bf16.msra.mxu0 %v9737_v5  ;;  %7223 = vmatpush1.bf16.msra.mxu1 %v9740_v6  ;;  %v9827_v5 = vld [vmem:[%s14365_s1 + $0x980] ss:$16 sps:$4 sm:$0xff]   ;;  %v9830_v6 = vld [vmem:[%s14365_s1 + $0x988] ss:$16 sps:$4 sm:$0xff]  }
  0xf8   :  { %6536 = vmatprep.subr.bf16.mxu0 %v9745_v7  ;;  %7224 = vmatprep.subr.bf16.mxu1 %v9748_v8  ;;  %v9835_v7 = vld [vmem:[%s14365_s1 + $0x9a4] ss:$16 sps:$4 sm:$0xff]   ;;  %v9838_v8 = vld [vmem:[%s14365_s1 + $0x9ac] ss:$16 sps:$4 sm:$0xff]  }
  0xfb   :  { %6537 = vmatpush1.bf16.msra.mxu0 %v9743_v9  ;;  %7225 = vmatpush1.bf16.msra.mxu1 %v9746_v10  ;;  %v9833_v9 = vld [vmem:[%s14365_s1 + $0x9a0] ss:$16 sps:$4 sm:$0xff]   ;;  %v9836_v10 = vld [vmem:[%s14365_s1 + $0x9a8] ss:$16 sps:$4 sm:$0xff]  }
  0xfc   :  { %6538 = vmatprep.subr.bf16.mxu0 %v9751_v11  ;;  %7226 = vmatprep.subr.bf16.mxu1 %v9754_v12  ;;  %v9841_v11 = vld [vmem:[%s14365_s1 + $0x9c4] ss:$16 sps:$4 sm:$0xff]   ;;  %v9844_v12 = vld [vmem:[%s14365_s1 + $0x9cc] ss:$16 sps:$4 sm:$0xff]  }
  0xff   :  { %6539 = vmatpush1.bf16.msra.mxu0 %v9749_v13  ;;  %7227 = vmatpush1.bf16.msra.mxu1 %v9752_v16  ;;  %v9839_v13 = vld [vmem:[%s14365_s1 + $0x9c0] ss:$16 sps:$4 sm:$0xff]   ;;  %v9842_v16 = vld [vmem:[%s14365_s1 + $0x9c8] ss:$16 sps:$4 sm:$0xff]  }
 0x100   :  { %6551 = vmatprep.subr.bf16.mxu0 %v9757_v17  ;;  %7239 = vmatprep.subr.bf16.mxu1 %v9760_v20  ;;  %v9847_v17 = vld [vmem:[%s14365_s1 + $0x9e4] ss:$16 sps:$4 sm:$0xff]   ;;  %v9850_v20 = vld [vmem:[%s14365_s1 + $0x9ec] ss:$16 sps:$4 sm:$0xff]  }
 0x102   :  { %6541 = vmatmul.mubr.bf16.vlgmr.msra.gmra.mrb[0].mxu0 %v8116_v15  ;;  %7229 = vmatmul.mubr.bf16.vlgmr.msra.gmra.mrb[0].mxu1 %v8116_v15  ;;  %v9845_v15 = vld [vmem:[%s14365_s1 + $0x9e0] ss:$16 sps:$4 sm:$0xff]  }
 0x103   :  { %6552 = vmatpush1.bf16.msra.mxu0 %v9755_v22  ;;  %7240 = vmatpush1.bf16.msra.mxu1 %v9758_v23  ;;  %v9848_v22 = vld [vmem:[%s14365_s1 + $0x9e8] ss:$16 sps:$4 sm:$0xff]   ;;  %v9853_v23 = vld [vmem:[%s14365_s1 + $0xa04] ss:$16 sps:$4 sm:$0xff]  }
 0x104   :  { %6553 = vmatprep.subr.bf16.mxu0 %v9763_v18  ;;  %7241 = vmatprep.subr.bf16.mxu1 %v9766_v19  ;;  %v9856_v18 = vld [vmem:[%s14365_s1 + $0xa0c] ss:$16 sps:$4 sm:$0xff]  }
 0x105   :  { %6583 = vmatprep.mubr.bf16.mxu0 %v8119_v24  ;;  %7271 = vmatprep.mubr.bf16.mxu1 %v8119_v24  ;;  %v11998_v19 = vld [vmem:[%s14366_s0 + $0x28] sm:$0xff] }
 0x106   :  { %v12003_v24 = vld [vmem:[%s14366_s0 + $0xa8] sm:$0xff] }
 0x107   :  { %6554 = vmatpush1.bf16.msra.mxu0 %v9761_v25  ;;  %7242 = vmatpush1.bf16.msra.mxu1 %v9764_v26  ;;  %v8118_v25 = vcombine.low %v11792_v14, %v11799_v21  ;;  %v9851_v26 = vld [vmem:[%s14365_s1 + $0xa00] ss:$16 sps:$4 sm:$0xff]   ;;  %v9862_v14 = vld [vmem:[%s14365_s1 + $0xa2c] ss:$16 sps:$4 sm:$0xff]   ;;  %v8121_v21 = vcombine.high %v11998_v19, %v12003_v24 }
 0x108   :  { %6555 = vmatprep.subr.bf16.mxu0 %v9769_v27  ;;  %7243 = vmatprep.subr.bf16.mxu1 %v9772_v28  ;;  %v9854_v27 = vld [vmem:[%s14365_s1 + $0xa08] ss:$16 sps:$4 sm:$0xff]   ;;  %v9859_v28 = vld [vmem:[%s14365_s1 + $0xa24] ss:$16 sps:$4 sm:$0xff]  }
 0x10b   :  { %6556 = vmatpush1.bf16.msra.mxu0 %v9767_v29  ;;  %7244 = vmatpush1.bf16.msra.mxu1 %v9770_v30  ;;  %v9857_v29 = vld [vmem:[%s14365_s1 + $0xa20] ss:$16 sps:$4 sm:$0xff]   ;;  %v9860_v30 = vld [vmem:[%s14365_s1 + $0xa28] ss:$16 sps:$4 sm:$0xff]  }
 0x10c   :  { %6557 = vmatprep.subr.bf16.mxu0 %v9775_v31  ;;  %7245 = vmatprep.subr.bf16.mxu1 %v9778_v32  ;;  %v9865_v31 = vld [vmem:[%s14365_s1 + $0xa44] ss:$16 sps:$4 sm:$0xff]   ;;  %v9868_v32 = vld [vmem:[%s14365_s1 + $0xa4c] ss:$16 sps:$4 sm:$0xff]  }
 0x10f   :  { %6558 = vmatpush1.bf16.msra.mxu0 %v9773_v33  ;;  %7246 = vmatpush1.bf16.msra.mxu1 %v9776_v34  ;;  %v9863_v33 = vld [vmem:[%s14365_s1 + $0xa40] ss:$16 sps:$4 sm:$0xff]   ;;  %v9866_v34 = vld [vmem:[%s14365_s1 + $0xa48] ss:$16 sps:$4 sm:$0xff]  }
 0x110   :  { %6559 = vmatprep.subr.bf16.mxu0 %v9781_v35  ;;  %7247 = vmatprep.subr.bf16.mxu1 %v9784_v36  ;;  %v9871_v35 = vld [vmem:[%s14365_s1 + $0xa64] ss:$16 sps:$4 sm:$0xff]   ;;  %v9874_v36 = vld [vmem:[%s14365_s1 + $0xa6c] ss:$16 sps:$4 sm:$0xff]  }
 0x113   :  { %6560 = vmatpush1.bf16.msra.mxu0 %v9779_v37  ;;  %7248 = vmatpush1.bf16.msra.mxu1 %v9782_v38  ;;  %v9869_v37 = vld [vmem:[%s14365_s1 + $0xa60] ss:$16 sps:$4 sm:$0xff]   ;;  %v9872_v38 = vld [vmem:[%s14365_s1 + $0xa68] ss:$16 sps:$4 sm:$0xff]  }
 0x114   :  { %6561 = vmatprep.subr.bf16.mxu0 %v9787_v39  ;;  %7249 = vmatprep.subr.bf16.mxu1 %v9790_v40  ;;  %v9877_v39 = vld [vmem:[%s14365_s1 + $0xa84] ss:$16 sps:$4 sm:$0xff]   ;;  %v9880_v40 = vld [vmem:[%s14365_s1 + $0xa8c] ss:$16 sps:$4 sm:$0xff]  }
 0x117   :  { %6562 = vmatpush1.bf16.msra.mxu0 %v9785_v41  ;;  %7250 = vmatpush1.bf16.msra.mxu1 %v9788_v42  ;;  %v9875_v41 = vld [vmem:[%s14365_s1 + $0xa80] ss:$16 sps:$4 sm:$0xff]   ;;  %v9878_v42 = vld [vmem:[%s14365_s1 + $0xa88] ss:$16 sps:$4 sm:$0xff]  }
 0x118   :  { %6563 = vmatprep.subr.bf16.mxu0 %v9793_v43  ;;  %7251 = vmatprep.subr.bf16.mxu1 %v9796_v44  ;;  %v9883_v43 = vld [vmem:[%s14365_s1 + $0xaa4] ss:$16 sps:$4 sm:$0xff]   ;;  %v9886_v44 = vld [vmem:[%s14365_s1 + $0xaac] ss:$16 sps:$4 sm:$0xff]  }
 0x11b   :  { %6564 = vmatpush1.bf16.msra.mxu0 %v9791_v45  ;;  %7252 = vmatpush1.bf16.msra.mxu1 %v9794_v46  ;;  %v9881_v45 = vld [vmem:[%s14365_s1 + $0xaa0] ss:$16 sps:$4 sm:$0xff]   ;;  %v9884_v46 = vld [vmem:[%s14365_s1 + $0xaa8] ss:$16 sps:$4 sm:$0xff]  }
 0x11c   :  { %6565 = vmatprep.subr.bf16.mxu0 %v9799_v47  ;;  %7253 = vmatprep.subr.bf16.mxu1 %v9802_v48  ;;  %v9889_v47 = vld [vmem:[%s14365_s1 + $0xac4] ss:$16 sps:$4 sm:$0xff]   ;;  %v9892_v48 = vld [vmem:[%s14365_s1 + $0xacc] ss:$16 sps:$4 sm:$0xff]  }
 0x11f   :  { %6566 = vmatpush1.bf16.msra.mxu0 %v9797_v49  ;;  %7254 = vmatpush1.bf16.msra.mxu1 %v9800_v50  ;;  %v9887_v49 = vld [vmem:[%s14365_s1 + $0xac0] ss:$16 sps:$4 sm:$0xff]   ;;  %v9890_v50 = vld [vmem:[%s14365_s1 + $0xac8] ss:$16 sps:$4 sm:$0xff]  }
 0x120   :  { %6567 = vmatprep.subr.bf16.mxu0 %v9805_v51  ;;  %7255 = vmatprep.subr.bf16.mxu1 %v9808_v52  ;;  %v9895_v51 = vld [vmem:[%s14365_s1 + $0xae4] ss:$16 sps:$4 sm:$0xff]   ;;  %v9898_v52 = vld [vmem:[%s14365_s1 + $0xaec] ss:$16 sps:$4 sm:$0xff]  }
 0x123   :  { %6568 = vmatpush1.bf16.msra.mxu0 %v9803_v53  ;;  %7256 = vmatpush1.bf16.msra.mxu1 %v9806_v54  ;;  %v9893_v53 = vld [vmem:[%s14365_s1 + $0xae0] ss:$16 sps:$4 sm:$0xff]   ;;  %v9896_v54 = vld [vmem:[%s14365_s1 + $0xae8] ss:$16 sps:$4 sm:$0xff]  }
 0x124   :  { %6569 = vmatprep.subr.bf16.mxu0 %v9811_v55  ;;  %7257 = vmatprep.subr.bf16.mxu1 %v9814_v56  ;;  %v9901_v55 = vld [vmem:[%s14365_s1 + $0xb04] ss:$16 sps:$4 sm:$0xff]   ;;  %v9904_v56 = vld [vmem:[%s14365_s1 + $0xb0c] ss:$16 sps:$4 sm:$0xff]  }
 0x127   :  { %6570 = vmatpush1.bf16.msra.mxu0 %v9809_v57  ;;  %7258 = vmatpush1.bf16.msra.mxu1 %v9812_v58  ;;  %v9899_v57 = vld [vmem:[%s14365_s1 + $0xb00] ss:$16 sps:$4 sm:$0xff]   ;;  %v9902_v58 = vld [vmem:[%s14365_s1 + $0xb08] ss:$16 sps:$4 sm:$0xff]  }
 0x128   :  { %6571 = vmatprep.subr.bf16.mxu0 %v9817_v59  ;;  %7259 = vmatprep.subr.bf16.mxu1 %v9820_v60  ;;  %v9907_v59 = vld [vmem:[%s14365_s1 + $0xb24] ss:$16 sps:$4 sm:$0xff]   ;;  %v9910_v60 = vld [vmem:[%s14365_s1 + $0xb2c] ss:$16 sps:$4 sm:$0xff]  }
 0x12b   :  { %6572 = vmatpush1.bf16.msra.mxu0 %v9815_v61  ;;  %7260 = vmatpush1.bf16.msra.mxu1 %v9818_v62  ;;  %v9905_v61 = vld [vmem:[%s14365_s1 + $0xb20] ss:$16 sps:$4 sm:$0xff]   ;;  %v9908_v62 = vld [vmem:[%s14365_s1 + $0xb28] ss:$16 sps:$4 sm:$0xff]  }
 0x12c   :  { %6573 = vmatprep.subr.bf16.mxu0 %v9823_v63  ;;  %7261 = vmatprep.subr.bf16.mxu1 %v9826_v0  ;;  %v9913_v63 = vld [vmem:[%s14365_s1 + $0xb44] ss:$16 sps:$4 sm:$0xff]   ;;  %v9916_v0 = vld [vmem:[%s14365_s1 + $0xb4c] ss:$16 sps:$4 sm:$0xff]  }
 0x12f   :  { %6574 = vmatpush1.bf16.msra.mxu0 %v9821_v1  ;;  %7262 = vmatpush1.bf16.msra.mxu1 %v9824_v2  ;;  %v9911_v1 = vld [vmem:[%s14365_s1 + $0xb40] ss:$16 sps:$4 sm:$0xff]   ;;  %v9914_v2 = vld [vmem:[%s14365_s1 + $0xb48] ss:$16 sps:$4 sm:$0xff]  }
 0x130   :  { %6575 = vmatprep.subr.bf16.mxu0 %v9829_v3  ;;  %7263 = vmatprep.subr.bf16.mxu1 %v9832_v4  ;;  %v9919_v3 = vld [vmem:[%s14365_s1 + $0xb64] ss:$16 sps:$4 sm:$0xff]   ;;  %v9922_v4 = vld [vmem:[%s14365_s1 + $0xb6c] ss:$16 sps:$4 sm:$0xff]  }
 0x133   :  { %6576 = vmatpush1.bf16.msra.mxu0 %v9827_v5  ;;  %7264 = vmatpush1.bf16.msra.mxu1 %v9830_v6  ;;  %v9917_v5 = vld [vmem:[%s14365_s1 + $0xb60] ss:$16 sps:$4 sm:$0xff]   ;;  %v9920_v6 = vld [vmem:[%s14365_s1 + $0xb68] ss:$16 sps:$4 sm:$0xff]  }
 0x134   :  { %6577 = vmatprep.subr.bf16.mxu0 %v9835_v7  ;;  %7265 = vmatprep.subr.bf16.mxu1 %v9838_v8  ;;  %v9925_v7 = vld [vmem:[%s14365_s1 + $0xb84] ss:$16 sps:$4 sm:$0xff]   ;;  %v9928_v8 = vld [vmem:[%s14365_s1 + $0xb8c] ss:$16 sps:$4 sm:$0xff]  }
 0x137   :  { %6578 = vmatpush1.bf16.msra.mxu0 %v9833_v9  ;;  %7266 = vmatpush1.bf16.msra.mxu1 %v9836_v10  ;;  %v9923_v9 = vld [vmem:[%s14365_s1 + $0xb80] ss:$16 sps:$4 sm:$0xff]   ;;  %v9926_v10 = vld [vmem:[%s14365_s1 + $0xb88] ss:$16 sps:$4 sm:$0xff]  }
 0x138   :  { %6579 = vmatprep.subr.bf16.mxu0 %v9841_v11  ;;  %7267 = vmatprep.subr.bf16.mxu1 %v9844_v12  ;;  %v9931_v11 = vld [vmem:[%s14365_s1 + $0xba4] ss:$16 sps:$4 sm:$0xff]   ;;  %v9934_v12 = vld [vmem:[%s14365_s1 + $0xbac] ss:$16 sps:$4 sm:$0xff]  }
 0x13b   :  { %6580 = vmatpush1.bf16.msra.mxu0 %v9839_v13  ;;  %7268 = vmatpush1.bf16.msra.mxu1 %v9842_v16  ;;  %v9929_v13 = vld [vmem:[%s14365_s1 + $0xba0] ss:$16 sps:$4 sm:$0xff]   ;;  %v9932_v16 = vld [vmem:[%s14365_s1 + $0xba8] ss:$16 sps:$4 sm:$0xff]  }
 0x13c   :  { %6581 = vmatprep.subr.bf16.mxu0 %v9847_v17  ;;  %7269 = vmatprep.subr.bf16.mxu1 %v9850_v20  ;;  %v9937_v17 = vld [vmem:[%s14365_s1 + $0xbc4] ss:$16 sps:$4 sm:$0xff]   ;;  %v9940_v20 = vld [vmem:[%s14365_s1 + $0xbcc] ss:$16 sps:$4 sm:$0xff]  }
 0x13f   :  { %6582 = vmatpush1.bf16.msra.mxu0 %v9845_v15  ;;  %7270 = vmatpush1.bf16.msra.mxu1 %v9848_v22  ;;  %v9935_v15 = vld [vmem:[%s14365_s1 + $0xbc0] ss:$16 sps:$4 sm:$0xff]   ;;  %v9938_v22 = vld [vmem:[%s14365_s1 + $0xbc8] ss:$16 sps:$4 sm:$0xff]  }
 0x140   :  { %6594 = vmatprep.subr.bf16.mxu0 %v9853_v23  ;;  %7282 = vmatprep.subr.bf16.mxu1 %v9856_v18  ;;  %v9943_v23 = vld [vmem:[%s14365_s1 + $0xbe4] ss:$16 sps:$4 sm:$0xff]   ;;  %v9946_v18 = vld [vmem:[%s14365_s1 + $0xbec] ss:$16 sps:$4 sm:$0xff]  }
 0x142   :  { %6584 = vmatmul.mubr.bf16.vlgmr.msra.gmra.mrb[0].mxu0 %v8118_v25  ;;  %7272 = vmatmul.mubr.bf16.vlgmr.msra.gmra.mrb[0].mxu1 %v8118_v25  ;;  %v9941_v25 = vld [vmem:[%s14365_s1 + $0xbe0] ss:$16 sps:$4 sm:$0xff]  }
 0x143   :  { %6595 = vmatpush1.bf16.msra.mxu0 %v9851_v26  ;;  %7283 = vmatpush1.bf16.msra.mxu1 %v9854_v27  ;;  %v9944_v26 = vld [vmem:[%s14365_s1 + $0xbe8] ss:$16 sps:$4 sm:$0xff]   ;;  %v9949_v27 = vld [vmem:[%s14365_s1 + $0xc04] ss:$16 sps:$4 sm:$0xff]  }
 0x144   :  { %6596 = vmatprep.subr.bf16.mxu0 %v9859_v28  ;;  %7284 = vmatprep.subr.bf16.mxu1 %v9862_v14  ;;  %v9952_v28 = vld [vmem:[%s14365_s1 + $0xc0c] ss:$16 sps:$4 sm:$0xff]   ;;  %v12204_v14 = vld [vmem:[%s14366_s0 + $0x30] sm:$0xff] }
 0x145   :  { %6626 = vmatprep.mubr.bf16.mxu0 %v8121_v21  ;;  %7314 = vmatprep.mubr.bf16.mxu1 %v8121_v21  ;;  %v12209_v21 = vld [vmem:[%s14366_s0 + $0xb0] sm:$0xff] }
 0x147   :  { %6597 = vmatpush1.bf16.msra.mxu0 %v9857_v29  ;;  %7285 = vmatpush1.bf16.msra.mxu1 %v9860_v30  ;;  %v8120_v29 = vcombine.low %v11998_v19, %v12003_v24  ;;  %v9947_v30 = vld [vmem:[%s14365_s1 + $0xc00] ss:$16 sps:$4 sm:$0xff]   ;;  %v9958_v19 = vld [vmem:[%s14365_s1 + $0xc2c] ss:$16 sps:$4 sm:$0xff]   ;;  %v8123_v24 = vcombine.high %v12204_v14, %v12209_v21 }
 0x148   :  { %6598 = vmatprep.subr.bf16.mxu0 %v9865_v31  ;;  %7286 = vmatprep.subr.bf16.mxu1 %v9868_v32  ;;  %v9950_v31 = vld [vmem:[%s14365_s1 + $0xc08] ss:$16 sps:$4 sm:$0xff]   ;;  %v9955_v32 = vld [vmem:[%s14365_s1 + $0xc24] ss:$16 sps:$4 sm:$0xff]  }
 0x14b   :  { %6599 = vmatpush1.bf16.msra.mxu0 %v9863_v33  ;;  %7287 = vmatpush1.bf16.msra.mxu1 %v9866_v34  ;;  %v9953_v33 = vld [vmem:[%s14365_s1 + $0xc20] ss:$16 sps:$4 sm:$0xff]   ;;  %v9956_v34 = vld [vmem:[%s14365_s1 + $0xc28] ss:$16 sps:$4 sm:$0xff]  }
 0x14c   :  { %6600 = vmatprep.subr.bf16.mxu0 %v9871_v35  ;;  %7288 = vmatprep.subr.bf16.mxu1 %v9874_v36  ;;  %v9961_v35 = vld [vmem:[%s14365_s1 + $0xc44] ss:$16 sps:$4 sm:$0xff]   ;;  %v9964_v36 = vld [vmem:[%s14365_s1 + $0xc4c] ss:$16 sps:$4 sm:$0xff]  }
 0x14f   :  { %6601 = vmatpush1.bf16.msra.mxu0 %v9869_v37  ;;  %7289 = vmatpush1.bf16.msra.mxu1 %v9872_v38  ;;  %v9959_v37 = vld [vmem:[%s14365_s1 + $0xc40] ss:$16 sps:$4 sm:$0xff]   ;;  %v9962_v38 = vld [vmem:[%s14365_s1 + $0xc48] ss:$16 sps:$4 sm:$0xff]  }
 0x150   :  { %6602 = vmatprep.subr.bf16.mxu0 %v9877_v39  ;;  %7290 = vmatprep.subr.bf16.mxu1 %v9880_v40  ;;  %v9967_v39 = vld [vmem:[%s14365_s1 + $0xc64] ss:$16 sps:$4 sm:$0xff]   ;;  %v9970_v40 = vld [vmem:[%s14365_s1 + $0xc6c] ss:$16 sps:$4 sm:$0xff]  }
 0x153   :  { %6603 = vmatpush1.bf16.msra.mxu0 %v9875_v41  ;;  %7291 = vmatpush1.bf16.msra.mxu1 %v9878_v42  ;;  %v9965_v41 = vld [vmem:[%s14365_s1 + $0xc60] ss:$16 sps:$4 sm:$0xff]   ;;  %v9968_v42 = vld [vmem:[%s14365_s1 + $0xc68] ss:$16 sps:$4 sm:$0xff]  }
 0x154   :  { %6604 = vmatprep.subr.bf16.mxu0 %v9883_v43  ;;  %7292 = vmatprep.subr.bf16.mxu1 %v9886_v44  ;;  %v9973_v43 = vld [vmem:[%s14365_s1 + $0xc84] ss:$16 sps:$4 sm:$0xff]   ;;  %v9976_v44 = vld [vmem:[%s14365_s1 + $0xc8c] ss:$16 sps:$4 sm:$0xff]  }
 0x157   :  { %6605 = vmatpush1.bf16.msra.mxu0 %v9881_v45  ;;  %7293 = vmatpush1.bf16.msra.mxu1 %v9884_v46  ;;  %v9971_v45 = vld [vmem:[%s14365_s1 + $0xc80] ss:$16 sps:$4 sm:$0xff]   ;;  %v9974_v46 = vld [vmem:[%s14365_s1 + $0xc88] ss:$16 sps:$4 sm:$0xff]  }
 0x158   :  { %6606 = vmatprep.subr.bf16.mxu0 %v9889_v47  ;;  %7294 = vmatprep.subr.bf16.mxu1 %v9892_v48  ;;  %v9979_v47 = vld [vmem:[%s14365_s1 + $0xca4] ss:$16 sps:$4 sm:$0xff]   ;;  %v9982_v48 = vld [vmem:[%s14365_s1 + $0xcac] ss:$16 sps:$4 sm:$0xff]  }
 0x15b   :  { %6607 = vmatpush1.bf16.msra.mxu0 %v9887_v49  ;;  %7295 = vmatpush1.bf16.msra.mxu1 %v9890_v50  ;;  %v9977_v49 = vld [vmem:[%s14365_s1 + $0xca0] ss:$16 sps:$4 sm:$0xff]   ;;  %v9980_v50 = vld [vmem:[%s14365_s1 + $0xca8] ss:$16 sps:$4 sm:$0xff]  }
 0x15c   :  { %6608 = vmatprep.subr.bf16.mxu0 %v9895_v51  ;;  %7296 = vmatprep.subr.bf16.mxu1 %v9898_v52  ;;  %v9985_v51 = vld [vmem:[%s14365_s1 + $0xcc4] ss:$16 sps:$4 sm:$0xff]   ;;  %v9988_v52 = vld [vmem:[%s14365_s1 + $0xccc] ss:$16 sps:$4 sm:$0xff]  }
 0x15f   :  { %6609 = vmatpush1.bf16.msra.mxu0 %v9893_v53  ;;  %7297 = vmatpush1.bf16.msra.mxu1 %v9896_v54  ;;  %v9983_v53 = vld [vmem:[%s14365_s1 + $0xcc0] ss:$16 sps:$4 sm:$0xff]   ;;  %v9986_v54 = vld [vmem:[%s14365_s1 + $0xcc8] ss:$16 sps:$4 sm:$0xff]  }
 0x160   :  { %6610 = vmatprep.subr.bf16.mxu0 %v9901_v55  ;;  %7298 = vmatprep.subr.bf16.mxu1 %v9904_v56  ;;  %v9991_v55 = vld [vmem:[%s14365_s1 + $0xce4] ss:$16 sps:$4 sm:$0xff]   ;;  %v9994_v56 = vld [vmem:[%s14365_s1 + $0xcec] ss:$16 sps:$4 sm:$0xff]  }
 0x163   :  { %6611 = vmatpush1.bf16.msra.mxu0 %v9899_v57  ;;  %7299 = vmatpush1.bf16.msra.mxu1 %v9902_v58  ;;  %v9989_v57 = vld [vmem:[%s14365_s1 + $0xce0] ss:$16 sps:$4 sm:$0xff]   ;;  %v9992_v58 = vld [vmem:[%s14365_s1 + $0xce8] ss:$16 sps:$4 sm:$0xff]  }
 0x164   :  { %6612 = vmatprep.subr.bf16.mxu0 %v9907_v59  ;;  %7300 = vmatprep.subr.bf16.mxu1 %v9910_v60  ;;  %v9997_v59 = vld [vmem:[%s14365_s1 + $0xd04] ss:$16 sps:$4 sm:$0xff]   ;;  %v10000_v60 = vld [vmem:[%s14365_s1 + $0xd0c] ss:$16 sps:$4 sm:$0xff]  }
 0x167   :  { %6613 = vmatpush1.bf16.msra.mxu0 %v9905_v61  ;;  %7301 = vmatpush1.bf16.msra.mxu1 %v9908_v62  ;;  %v9995_v61 = vld [vmem:[%s14365_s1 + $0xd00] ss:$16 sps:$4 sm:$0xff]   ;;  %v9998_v62 = vld [vmem:[%s14365_s1 + $0xd08] ss:$16 sps:$4 sm:$0xff]  }
 0x168   :  { %6614 = vmatprep.subr.bf16.mxu0 %v9913_v63  ;;  %7302 = vmatprep.subr.bf16.mxu1 %v9916_v0  ;;  %v10003_v63 = vld [vmem:[%s14365_s1 + $0xd24] ss:$16 sps:$4 sm:$0xff]   ;;  %v10006_v0 = vld [vmem:[%s14365_s1 + $0xd2c] ss:$16 sps:$4 sm:$0xff]  }
 0x16b   :  { %6615 = vmatpush1.bf16.msra.mxu0 %v9911_v1  ;;  %7303 = vmatpush1.bf16.msra.mxu1 %v9914_v2  ;;  %v10001_v1 = vld [vmem:[%s14365_s1 + $0xd20] ss:$16 sps:$4 sm:$0xff]   ;;  %v10004_v2 = vld [vmem:[%s14365_s1 + $0xd28] ss:$16 sps:$4 sm:$0xff]  }
 0x16c   :  { %6616 = vmatprep.subr.bf16.mxu0 %v9919_v3  ;;  %7304 = vmatprep.subr.bf16.mxu1 %v9922_v4  ;;  %v10009_v3 = vld [vmem:[%s14365_s1 + $0xd44] ss:$16 sps:$4 sm:$0xff]   ;;  %v10012_v4 = vld [vmem:[%s14365_s1 + $0xd4c] ss:$16 sps:$4 sm:$0xff]  }
 0x16f   :  { %6617 = vmatpush1.bf16.msra.mxu0 %v9917_v5  ;;  %7305 = vmatpush1.bf16.msra.mxu1 %v9920_v6  ;;  %v10007_v5 = vld [vmem:[%s14365_s1 + $0xd40] ss:$16 sps:$4 sm:$0xff]   ;;  %v10010_v6 = vld [vmem:[%s14365_s1 + $0xd48] ss:$16 sps:$4 sm:$0xff]  }
 0x170   :  { %6618 = vmatprep.subr.bf16.mxu0 %v9925_v7  ;;  %7306 = vmatprep.subr.bf16.mxu1 %v9928_v8  ;;  %v10015_v7 = vld [vmem:[%s14365_s1 + $0xd64] ss:$16 sps:$4 sm:$0xff]   ;;  %v10018_v8 = vld [vmem:[%s14365_s1 + $0xd6c] ss:$16 sps:$4 sm:$0xff]  }
 0x173   :  { %6619 = vmatpush1.bf16.msra.mxu0 %v9923_v9  ;;  %7307 = vmatpush1.bf16.msra.mxu1 %v9926_v10  ;;  %v10013_v9 = vld [vmem:[%s14365_s1 + $0xd60] ss:$16 sps:$4 sm:$0xff]   ;;  %v10016_v10 = vld [vmem:[%s14365_s1 + $0xd68] ss:$16 sps:$4 sm:$0xff]  }
 0x174   :  { %6620 = vmatprep.subr.bf16.mxu0 %v9931_v11  ;;  %7308 = vmatprep.subr.bf16.mxu1 %v9934_v12  ;;  %v10021_v11 = vld [vmem:[%s14365_s1 + $0xd84] ss:$16 sps:$4 sm:$0xff]   ;;  %v10024_v12 = vld [vmem:[%s14365_s1 + $0xd8c] ss:$16 sps:$4 sm:$0xff]  }
 0x177   :  { %6621 = vmatpush1.bf16.msra.mxu0 %v9929_v13  ;;  %7309 = vmatpush1.bf16.msra.mxu1 %v9932_v16  ;;  %v10019_v13 = vld [vmem:[%s14365_s1 + $0xd80] ss:$16 sps:$4 sm:$0xff]   ;;  %v10022_v16 = vld [vmem:[%s14365_s1 + $0xd88] ss:$16 sps:$4 sm:$0xff]  }
 0x178   :  { %6622 = vmatprep.subr.bf16.mxu0 %v9937_v17  ;;  %7310 = vmatprep.subr.bf16.mxu1 %v9940_v20  ;;  %v10027_v17 = vld [vmem:[%s14365_s1 + $0xda4] ss:$16 sps:$4 sm:$0xff]   ;;  %v10030_v20 = vld [vmem:[%s14365_s1 + $0xdac] ss:$16 sps:$4 sm:$0xff]  }
 0x17b   :  { %6623 = vmatpush1.bf16.msra.mxu0 %v9935_v15  ;;  %7311 = vmatpush1.bf16.msra.mxu1 %v9938_v22  ;;  %v10025_v15 = vld [vmem:[%s14365_s1 + $0xda0] ss:$16 sps:$4 sm:$0xff]   ;;  %v10028_v22 = vld [vmem:[%s14365_s1 + $0xda8] ss:$16 sps:$4 sm:$0xff]  }
 0x17c   :  { %6624 = vmatprep.subr.bf16.mxu0 %v9943_v23  ;;  %7312 = vmatprep.subr.bf16.mxu1 %v9946_v18  ;;  %v10033_v23 = vld [vmem:[%s14365_s1 + $0xdc4] ss:$16 sps:$4 sm:$0xff]   ;;  %v10036_v18 = vld [vmem:[%s14365_s1 + $0xdcc] ss:$16 sps:$4 sm:$0xff]  }
 0x17f   :  { %6625 = vmatpush1.bf16.msra.mxu0 %v9941_v25  ;;  %7313 = vmatpush1.bf16.msra.mxu1 %v9944_v26  ;;  %v10031_v25 = vld [vmem:[%s14365_s1 + $0xdc0] ss:$16 sps:$4 sm:$0xff]   ;;  %v10034_v26 = vld [vmem:[%s14365_s1 + $0xdc8] ss:$16 sps:$4 sm:$0xff]  }
 0x180   :  { %6637 = vmatprep.subr.bf16.mxu0 %v9949_v27  ;;  %7325 = vmatprep.subr.bf16.mxu1 %v9952_v28  ;;  %v10039_v27 = vld [vmem:[%s14365_s1 + $0xde4] ss:$16 sps:$4 sm:$0xff]   ;;  %v10042_v28 = vld [vmem:[%s14365_s1 + $0xdec] ss:$16 sps:$4 sm:$0xff]  }
 0x182   :  { %6627 = vmatmul.mubr.bf16.vlgmr.msra.gmra.mrb[0].mxu0 %v8120_v29  ;;  %7315 = vmatmul.mubr.bf16.vlgmr.msra.gmra.mrb[0].mxu1 %v8120_v29  ;;  %v10037_v29 = vld [vmem:[%s14365_s1 + $0xde0] ss:$16 sps:$4 sm:$0xff]  }
 0x183   :  { %6638 = vmatpush1.bf16.msra.mxu0 %v9947_v30  ;;  %7326 = vmatpush1.bf16.msra.mxu1 %v9950_v31  ;;  %v10040_v30 = vld [vmem:[%s14365_s1 + $0xde8] ss:$16 sps:$4 sm:$0xff]   ;;  %v10045_v31 = vld [vmem:[%s14365_s1 + $0xe04] ss:$16 sps:$4 sm:$0xff]  }
 0x184   :  { %6639 = vmatprep.subr.bf16.mxu0 %v9955_v32  ;;  %7327 = vmatprep.subr.bf16.mxu1 %v9958_v19  ;;  %v10048_v32 = vld [vmem:[%s14365_s1 + $0xe0c] ss:$16 sps:$4 sm:$0xff]  }
 0x185   :  { %6669 = vmatprep.mubr.bf16.mxu0 %v8123_v24  ;;  %7357 = vmatprep.mubr.bf16.mxu1 %v8123_v24  ;;  %v12410_v19 = vld [vmem:[%s14366_s0 + $0x38] sm:$0xff] }
 0x186   :  { %v12415_v24 = vld [vmem:[%s14366_s0 + $0xb8] sm:$0xff] }
 0x187   :  { %6640 = vmatpush1.bf16.msra.mxu0 %v9953_v33  ;;  %7328 = vmatpush1.bf16.msra.mxu1 %v9956_v34  ;;  %v8122_v33 = vcombine.low %v12204_v14, %v12209_v21  ;;  %v10043_v34 = vld [vmem:[%s14365_s1 + $0xe00] ss:$16 sps:$4 sm:$0xff]   ;;  %v10054_v14 = vld [vmem:[%s14365_s1 + $0xe2c] ss:$16 sps:$4 sm:$0xff]   ;;  %v8125_v21 = vcombine.high %v12410_v19, %v12415_v24 }
 0x188   :  { %6641 = vmatprep.subr.bf16.mxu0 %v9961_v35  ;;  %7329 = vmatprep.subr.bf16.mxu1 %v9964_v36  ;;  %v10046_v35 = vld [vmem:[%s14365_s1 + $0xe08] ss:$16 sps:$4 sm:$0xff]   ;;  %v10051_v36 = vld [vmem:[%s14365_s1 + $0xe24] ss:$16 sps:$4 sm:$0xff]  }
 0x18b   :  { %6642 = vmatpush1.bf16.msra.mxu0 %v9959_v37  ;;  %7330 = vmatpush1.bf16.msra.mxu1 %v9962_v38  ;;  %v10049_v37 = vld [vmem:[%s14365_s1 + $0xe20] ss:$16 sps:$4 sm:$0xff]   ;;  %v10052_v38 = vld [vmem:[%s14365_s1 + $0xe28] ss:$16 sps:$4 sm:$0xff]  }
 0x18c   :  { %6643 = vmatprep.subr.bf16.mxu0 %v9967_v39  ;;  %7331 = vmatprep.subr.bf16.mxu1 %v9970_v40  ;;  %v10057_v39 = vld [vmem:[%s14365_s1 + $0xe44] ss:$16 sps:$4 sm:$0xff]   ;;  %v10060_v40 = vld [vmem:[%s14365_s1 + $0xe4c] ss:$16 sps:$4 sm:$0xff]  }
 0x18f   :  { %6644 = vmatpush1.bf16.msra.mxu0 %v9965_v41  ;;  %7332 = vmatpush1.bf16.msra.mxu1 %v9968_v42  ;;  %v10055_v41 = vld [vmem:[%s14365_s1 + $0xe40] ss:$16 sps:$4 sm:$0xff]   ;;  %v10058_v42 = vld [vmem:[%s14365_s1 + $0xe48] ss:$16 sps:$4 sm:$0xff]  }
 0x190   :  { %6645 = vmatprep.subr.bf16.mxu0 %v9973_v43  ;;  %7333 = vmatprep.subr.bf16.mxu1 %v9976_v44  ;;  %v10063_v43 = vld [vmem:[%s14365_s1 + $0xe64] ss:$16 sps:$4 sm:$0xff]   ;;  %v10066_v44 = vld [vmem:[%s14365_s1 + $0xe6c] ss:$16 sps:$4 sm:$0xff]  }
 0x193   :  { %6646 = vmatpush1.bf16.msra.mxu0 %v9971_v45  ;;  %7334 = vmatpush1.bf16.msra.mxu1 %v9974_v46  ;;  %v10061_v45 = vld [vmem:[%s14365_s1 + $0xe60] ss:$16 sps:$4 sm:$0xff]   ;;  %v10064_v46 = vld [vmem:[%s14365_s1 + $0xe68] ss:$16 sps:$4 sm:$0xff]  }
 0x194   :  { %6647 = vmatprep.subr.bf16.mxu0 %v9979_v47  ;;  %7335 = vmatprep.subr.bf16.mxu1 %v9982_v48  ;;  %v10069_v47 = vld [vmem:[%s14365_s1 + $0xe84] ss:$16 sps:$4 sm:$0xff]   ;;  %v10072_v48 = vld [vmem:[%s14365_s1 + $0xe8c] ss:$16 sps:$4 sm:$0xff]  }
 0x197   :  { %6648 = vmatpush1.bf16.msra.mxu0 %v9977_v49  ;;  %7336 = vmatpush1.bf16.msra.mxu1 %v9980_v50  ;;  %v10067_v49 = vld [vmem:[%s14365_s1 + $0xe80] ss:$16 sps:$4 sm:$0xff]   ;;  %v10070_v50 = vld [vmem:[%s14365_s1 + $0xe88] ss:$16 sps:$4 sm:$0xff]  }
 0x198   :  { %6649 = vmatprep.subr.bf16.mxu0 %v9985_v51  ;;  %7337 = vmatprep.subr.bf16.mxu1 %v9988_v52  ;;  %v10075_v51 = vld [vmem:[%s14365_s1 + $0xea4] ss:$16 sps:$4 sm:$0xff]   ;;  %v10078_v52 = vld [vmem:[%s14365_s1 + $0xeac] ss:$16 sps:$4 sm:$0xff]  }
 0x19b   :  { %6650 = vmatpush1.bf16.msra.mxu0 %v9983_v53  ;;  %7338 = vmatpush1.bf16.msra.mxu1 %v9986_v54  ;;  %v10073_v53 = vld [vmem:[%s14365_s1 + $0xea0] ss:$16 sps:$4 sm:$0xff]   ;;  %v10076_v54 = vld [vmem:[%s14365_s1 + $0xea8] ss:$16 sps:$4 sm:$0xff]  }
 0x19c   :  { %6651 = vmatprep.subr.bf16.mxu0 %v9991_v55  ;;  %7339 = vmatprep.subr.bf16.mxu1 %v9994_v56  ;;  %v10081_v55 = vld [vmem:[%s14365_s1 + $0xec4] ss:$16 sps:$4 sm:$0xff]   ;;  %v10084_v56 = vld [vmem:[%s14365_s1 + $0xecc] ss:$16 sps:$4 sm:$0xff]  }
 0x19f   :  { %6652 = vmatpush1.bf16.msra.mxu0 %v9989_v57  ;;  %7340 = vmatpush1.bf16.msra.mxu1 %v9992_v58  ;;  %v10079_v57 = vld [vmem:[%s14365_s1 + $0xec0] ss:$16 sps:$4 sm:$0xff]   ;;  %v10082_v58 = vld [vmem:[%s14365_s1 + $0xec8] ss:$16 sps:$4 sm:$0xff]  }
 0x1a0   :  { %6653 = vmatprep.subr.bf16.mxu0 %v9997_v59  ;;  %7341 = vmatprep.subr.bf16.mxu1 %v10000_v60  ;;  %v10087_v59 = vld [vmem:[%s14365_s1 + $0xee4] ss:$16 sps:$4 sm:$0xff]   ;;  %v10090_v60 = vld [vmem:[%s14365_s1 + $0xeec] ss:$16 sps:$4 sm:$0xff]  }
 0x1a3   :  { %6654 = vmatpush1.bf16.msra.mxu0 %v9995_v61  ;;  %7342 = vmatpush1.bf16.msra.mxu1 %v9998_v62  ;;  %v10085_v61 = vld [vmem:[%s14365_s1 + $0xee0] ss:$16 sps:$4 sm:$0xff]   ;;  %v10088_v62 = vld [vmem:[%s14365_s1 + $0xee8] ss:$16 sps:$4 sm:$0xff]  }
 0x1a4   :  { %6655 = vmatprep.subr.bf16.mxu0 %v10003_v63  ;;  %7343 = vmatprep.subr.bf16.mxu1 %v10006_v0  ;;  %v10093_v63 = vld [vmem:[%s14365_s1 + $0xf04] ss:$16 sps:$4 sm:$0xff]   ;;  %v10096_v0 = vld [vmem:[%s14365_s1 + $0xf0c] ss:$16 sps:$4 sm:$0xff]  }
 0x1a7   :  { %6656 = vmatpush1.bf16.msra.mxu0 %v10001_v1  ;;  %7344 = vmatpush1.bf16.msra.mxu1 %v10004_v2  ;;  %v10091_v1 = vld [vmem:[%s14365_s1 + $0xf00] ss:$16 sps:$4 sm:$0xff]   ;;  %v10094_v2 = vld [vmem:[%s14365_s1 + $0xf08] ss:$16 sps:$4 sm:$0xff]  }
 0x1a8   :  { %6657 = vmatprep.subr.bf16.mxu0 %v10009_v3  ;;  %7345 = vmatprep.subr.bf16.mxu1 %v10012_v4  ;;  %v10099_v3 = vld [vmem:[%s14365_s1 + $0xf24] ss:$16 sps:$4 sm:$0xff]   ;;  %v10102_v4 = vld [vmem:[%s14365_s1 + $0xf2c] ss:$16 sps:$4 sm:$0xff]  }
 0x1ab   :  { %6658 = vmatpush1.bf16.msra.mxu0 %v10007_v5  ;;  %7346 = vmatpush1.bf16.msra.mxu1 %v10010_v6  ;;  %v10097_v5 = vld [vmem:[%s14365_s1 + $0xf20] ss:$16 sps:$4 sm:$0xff]   ;;  %v10100_v6 = vld [vmem:[%s14365_s1 + $0xf28] ss:$16 sps:$4 sm:$0xff]  }
 0x1ac   :  { %6659 = vmatprep.subr.bf16.mxu0 %v10015_v7  ;;  %7347 = vmatprep.subr.bf16.mxu1 %v10018_v8  ;;  %v10105_v7 = vld [vmem:[%s14365_s1 + $0xf44] ss:$16 sps:$4 sm:$0xff]   ;;  %v10108_v8 = vld [vmem:[%s14365_s1 + $0xf4c] ss:$16 sps:$4 sm:$0xff]  }
 0x1af   :  { %6660 = vmatpush1.bf16.msra.mxu0 %v10013_v9  ;;  %7348 = vmatpush1.bf16.msra.mxu1 %v10016_v10  ;;  %v10103_v9 = vld [vmem:[%s14365_s1 + $0xf40] ss:$16 sps:$4 sm:$0xff]   ;;  %v10106_v10 = vld [vmem:[%s14365_s1 + $0xf48] ss:$16 sps:$4 sm:$0xff]  }
 0x1b0   :  { %6661 = vmatprep.subr.bf16.mxu0 %v10021_v11  ;;  %7349 = vmatprep.subr.bf16.mxu1 %v10024_v12  ;;  %v10111_v11 = vld [vmem:[%s14365_s1 + $0xf64] ss:$16 sps:$4 sm:$0xff]   ;;  %v10114_v12 = vld [vmem:[%s14365_s1 + $0xf6c] ss:$16 sps:$4 sm:$0xff]  }
 0x1b3   :  { %6662 = vmatpush1.bf16.msra.mxu0 %v10019_v13  ;;  %7350 = vmatpush1.bf16.msra.mxu1 %v10022_v16  ;;  %v10109_v13 = vld [vmem:[%s14365_s1 + $0xf60] ss:$16 sps:$4 sm:$0xff]   ;;  %v10112_v16 = vld [vmem:[%s14365_s1 + $0xf68] ss:$16 sps:$4 sm:$0xff]  }
 0x1b4   :  { %6663 = vmatprep.subr.bf16.mxu0 %v10027_v17  ;;  %7351 = vmatprep.subr.bf16.mxu1 %v10030_v20  ;;  %v10117_v17 = vld [vmem:[%s14365_s1 + $0xf84] ss:$16 sps:$4 sm:$0xff]   ;;  %v10120_v20 = vld [vmem:[%s14365_s1 + $0xf8c] ss:$16 sps:$4 sm:$0xff]  }
 0x1b7   :  { %6664 = vmatpush1.bf16.msra.mxu0 %v10025_v15  ;;  %7352 = vmatpush1.bf16.msra.mxu1 %v10028_v22  ;;  %v10115_v15 = vld [vmem:[%s14365_s1 + $0xf80] ss:$16 sps:$4 sm:$0xff]   ;;  %v10118_v22 = vld [vmem:[%s14365_s1 + $0xf88] ss:$16 sps:$4 sm:$0xff]  }
 0x1b8   :  { %6665 = vmatprep.subr.bf16.mxu0 %v10033_v23  ;;  %7353 = vmatprep.subr.bf16.mxu1 %v10036_v18  ;;  %v10123_v23 = vld [vmem:[%s14365_s1 + $0xfa4] ss:$16 sps:$4 sm:$0xff]   ;;  %v10126_v18 = vld [vmem:[%s14365_s1 + $0xfac] ss:$16 sps:$4 sm:$0xff]  }
 0x1bb   :  { %6666 = vmatpush1.bf16.msra.mxu0 %v10031_v25  ;;  %7354 = vmatpush1.bf16.msra.mxu1 %v10034_v26  ;;  %v10121_v25 = vld [vmem:[%s14365_s1 + $0xfa0] ss:$16 sps:$4 sm:$0xff]   ;;  %v10124_v26 = vld [vmem:[%s14365_s1 + $0xfa8] ss:$16 sps:$4 sm:$0xff]  }
 0x1bc   :  { %6667 = vmatprep.subr.bf16.mxu0 %v10039_v27  ;;  %7355 = vmatprep.subr.bf16.mxu1 %v10042_v28  ;;  %v10129_v27 = vld [vmem:[%s14365_s1 + $0xfc4] ss:$16 sps:$4 sm:$0xff]   ;;  %v10132_v28 = vld [vmem:[%s14365_s1 + $0xfcc] ss:$16 sps:$4 sm:$0xff]  }
 0x1bf   :  { %6668 = vmatpush1.bf16.msra.mxu0 %v10037_v29  ;;  %7356 = vmatpush1.bf16.msra.mxu1 %v10040_v30  ;;  %v10127_v29 = vld [vmem:[%s14365_s1 + $0xfc0] ss:$16 sps:$4 sm:$0xff]   ;;  %v10130_v30 = vld [vmem:[%s14365_s1 + $0xfc8] ss:$16 sps:$4 sm:$0xff]  }
 0x1c0   :  { %6680 = vmatprep.subr.bf16.mxu0 %v10045_v31  ;;  %7368 = vmatprep.subr.bf16.mxu1 %v10048_v32  ;;  %v10135_v31 = vld [vmem:[%s14365_s1 + $0xfe4] ss:$16 sps:$4 sm:$0xff]   ;;  %v10138_v32 = vld [vmem:[%s14365_s1 + $0xfec] ss:$16 sps:$4 sm:$0xff]  }
 0x1c2   :  { %6670 = vmatmul.mubr.bf16.vlgmr.msra.gmra.mrb[0].mxu0 %v8122_v33  ;;  %7358 = vmatmul.mubr.bf16.vlgmr.msra.gmra.mrb[0].mxu1 %v8122_v33  ;;  %v10133_v33 = vld [vmem:[%s14365_s1 + $0xfe0] ss:$16 sps:$4 sm:$0xff]  }
 0x1c3   :  { %6681 = vmatpush1.bf16.msra.mxu0 %v10043_v34  ;;  %7369 = vmatpush1.bf16.msra.mxu1 %v10046_v35  ;;  %v10136_v34 = vld [vmem:[%s14365_s1 + $0xfe8] ss:$16 sps:$4 sm:$0xff]   ;;  %v10141_v35 = vld [vmem:[%s14365_s1 + $0x1004] ss:$16 sps:$4 sm:$0xff]  }
 0x1c4   :  { %6682 = vmatprep.subr.bf16.mxu0 %v10051_v36  ;;  %7370 = vmatprep.subr.bf16.mxu1 %v10054_v14  ;;  %v10144_v36 = vld [vmem:[%s14365_s1 + $0x100c] ss:$16 sps:$4 sm:$0xff]   ;;  %v12616_v14 = vld [vmem:[%s14366_s0 + $0x40] sm:$0xff] }
 0x1c5   :  { %6712 = vmatprep.mubr.bf16.mxu0 %v8125_v21  ;;  %7400 = vmatprep.mubr.bf16.mxu1 %v8125_v21  ;;  %v12621_v21 = vld [vmem:[%s14366_s0 + $0xc0] sm:$0xff] }
 0x1c7   :  { %6683 = vmatpush1.bf16.msra.mxu0 %v10049_v37  ;;  %7371 = vmatpush1.bf16.msra.mxu1 %v10052_v38  ;;  %v8124_v37 = vcombine.low %v12410_v19, %v12415_v24  ;;  %v10139_v38 = vld [vmem:[%s14365_s1 + $0x1000] ss:$16 sps:$4 sm:$0xff]   ;;  %v10150_v19 = vld [vmem:[%s14365_s1 + $0x102c] ss:$16 sps:$4 sm:$0xff]   ;;  %v8127_v24 = vcombine.high %v12616_v14, %v12621_v21 }
 0x1c8   :  { %6684 = vmatprep.subr.bf16.mxu0 %v10057_v39  ;;  %7372 = vmatprep.subr.bf16.mxu1 %v10060_v40  ;;  %v10142_v39 = vld [vmem:[%s14365_s1 + $0x1008] ss:$16 sps:$4 sm:$0xff]   ;;  %v10147_v40 = vld [vmem:[%s14365_s1 + $0x1024] ss:$16 sps:$4 sm:$0xff]  }
 0x1cb   :  { %6685 = vmatpush1.bf16.msra.mxu0 %v10055_v41  ;;  %7373 = vmatpush1.bf16.msra.mxu1 %v10058_v42  ;;  %v10145_v41 = vld [vmem:[%s14365_s1 + $0x1020] ss:$16 sps:$4 sm:$0xff]   ;;  %v10148_v42 = vld [vmem:[%s14365_s1 + $0x1028] ss:$16 sps:$4 sm:$0xff]  }
 0x1cc   :  { %6686 = vmatprep.subr.bf16.mxu0 %v10063_v43  ;;  %7374 = vmatprep.subr.bf16.mxu1 %v10066_v44  ;;  %v10153_v43 = vld [vmem:[%s14365_s1 + $0x1044] ss:$16 sps:$4 sm:$0xff]   ;;  %v10156_v44 = vld [vmem:[%s14365_s1 + $0x104c] ss:$16 sps:$4 sm:$0xff]  }
 0x1cf   :  { %6687 = vmatpush1.bf16.msra.mxu0 %v10061_v45  ;;  %7375 = vmatpush1.bf16.msra.mxu1 %v10064_v46  ;;  %v10151_v45 = vld [vmem:[%s14365_s1 + $0x1040] ss:$16 sps:$4 sm:$0xff]   ;;  %v10154_v46 = vld [vmem:[%s14365_s1 + $0x1048] ss:$16 sps:$4 sm:$0xff]  }
 0x1d0   :  { %6688 = vmatprep.subr.bf16.mxu0 %v10069_v47  ;;  %7376 = vmatprep.subr.bf16.mxu1 %v10072_v48  ;;  %v10159_v47 = vld [vmem:[%s14365_s1 + $0x1064] ss:$16 sps:$4 sm:$0xff]   ;;  %v10162_v48 = vld [vmem:[%s14365_s1 + $0x106c] ss:$16 sps:$4 sm:$0xff]  }
 0x1d3   :  { %6689 = vmatpush1.bf16.msra.mxu0 %v10067_v49  ;;  %7377 = vmatpush1.bf16.msra.mxu1 %v10070_v50  ;;  %v10157_v49 = vld [vmem:[%s14365_s1 + $0x1060] ss:$16 sps:$4 sm:$0xff]   ;;  %v10160_v50 = vld [vmem:[%s14365_s1 + $0x1068] ss:$16 sps:$4 sm:$0xff]  }
 0x1d4   :  { %6690 = vmatprep.subr.bf16.mxu0 %v10075_v51  ;;  %7378 = vmatprep.subr.bf16.mxu1 %v10078_v52  ;;  %v10165_v51 = vld [vmem:[%s14365_s1 + $0x1084] ss:$16 sps:$4 sm:$0xff]   ;;  %v10168_v52 = vld [vmem:[%s14365_s1 + $0x108c] ss:$16 sps:$4 sm:$0xff]  }
 0x1d7   :  { %6691 = vmatpush1.bf16.msra.mxu0 %v10073_v53  ;;  %7379 = vmatpush1.bf16.msra.mxu1 %v10076_v54  ;;  %v10163_v53 = vld [vmem:[%s14365_s1 + $0x1080] ss:$16 sps:$4 sm:$0xff]   ;;  %v10166_v54 = vld [vmem:[%s14365_s1 + $0x1088] ss:$16 sps:$4 sm:$0xff]  }
 0x1d8   :  { %6692 = vmatprep.subr.bf16.mxu0 %v10081_v55  ;;  %7380 = vmatprep.subr.bf16.mxu1 %v10084_v56  ;;  %v10171_v55 = vld [vmem:[%s14365_s1 + $0x10a4] ss:$16 sps:$4 sm:$0xff]   ;;  %v10174_v56 = vld [vmem:[%s14365_s1 + $0x10ac] ss:$16 sps:$4 sm:$0xff]  }
 0x1db   :  { %6693 = vmatpush1.bf16.msra.mxu0 %v10079_v57  ;;  %7381 = vmatpush1.bf16.msra.mxu1 %v10082_v58  ;;  %v10169_v57 = vld [vmem:[%s14365_s1 + $0x10a0] ss:$16 sps:$4 sm:$0xff]   ;;  %v10172_v58 = vld [vmem:[%s14365_s1 + $0x10a8] ss:$16 sps:$4 sm:$0xff]  }
 0x1dc   :  { %6694 = vmatprep.subr.bf16.mxu0 %v10087_v59  ;;  %7382 = vmatprep.subr.bf16.mxu1 %v10090_v60  ;;  %v10177_v59 = vld [vmem:[%s14365_s1 + $0x10c4] ss:$16 sps:$4 sm:$0xff]   ;;  %v10180_v60 = vld [vmem:[%s14365_s1 + $0x10cc] ss:$16 sps:$4 sm:$0xff]  }
 0x1df   :  { %6695 = vmatpush1.bf16.msra.mxu0 %v10085_v61  ;;  %7383 = vmatpush1.bf16.msra.mxu1 %v10088_v62  ;;  %v10175_v61 = vld [vmem:[%s14365_s1 + $0x10c0] ss:$16 sps:$4 sm:$0xff]   ;;  %v10178_v62 = vld [vmem:[%s14365_s1 + $0x10c8] ss:$16 sps:$4 sm:$0xff]  }
 0x1e0   :  { %6696 = vmatprep.subr.bf16.mxu0 %v10093_v63  ;;  %7384 = vmatprep.subr.bf16.mxu1 %v10096_v0  ;;  %v10183_v63 = vld [vmem:[%s14365_s1 + $0x10e4] ss:$16 sps:$4 sm:$0xff]   ;;  %v10186_v0 = vld [vmem:[%s14365_s1 + $0x10ec] ss:$16 sps:$4 sm:$0xff]  }
 0x1e3   :  { %6697 = vmatpush1.bf16.msra.mxu0 %v10091_v1  ;;  %7385 = vmatpush1.bf16.msra.mxu1 %v10094_v2  ;;  %v10181_v1 = vld [vmem:[%s14365_s1 + $0x10e0] ss:$16 sps:$4 sm:$0xff]   ;;  %v10184_v2 = vld [vmem:[%s14365_s1 + $0x10e8] ss:$16 sps:$4 sm:$0xff]  }
 0x1e4   :  { %6698 = vmatprep.subr.bf16.mxu0 %v10099_v3  ;;  %7386 = vmatprep.subr.bf16.mxu1 %v10102_v4  ;;  %v10189_v3 = vld [vmem:[%s14365_s1 + $0x1104] ss:$16 sps:$4 sm:$0xff]   ;;  %v10192_v4 = vld [vmem:[%s14365_s1 + $0x110c] ss:$16 sps:$4 sm:$0xff]  }
 0x1e7   :  { %6699 = vmatpush1.bf16.msra.mxu0 %v10097_v5  ;;  %7387 = vmatpush1.bf16.msra.mxu1 %v10100_v6  ;;  %v10187_v5 = vld [vmem:[%s14365_s1 + $0x1100] ss:$16 sps:$4 sm:$0xff]   ;;  %v10190_v6 = vld [vmem:[%s14365_s1 + $0x1108] ss:$16 sps:$4 sm:$0xff]  }
 0x1e8   :  { %6700 = vmatprep.subr.bf16.mxu0 %v10105_v7  ;;  %7388 = vmatprep.subr.bf16.mxu1 %v10108_v8  ;;  %v10195_v7 = vld [vmem:[%s14365_s1 + $0x1124] ss:$16 sps:$4 sm:$0xff]   ;;  %v10198_v8 = vld [vmem:[%s14365_s1 + $0x112c] ss:$16 sps:$4 sm:$0xff]  }
 0x1eb   :  { %6701 = vmatpush1.bf16.msra.mxu0 %v10103_v9  ;;  %7389 = vmatpush1.bf16.msra.mxu1 %v10106_v10  ;;  %v10193_v9 = vld [vmem:[%s14365_s1 + $0x1120] ss:$16 sps:$4 sm:$0xff]   ;;  %v10196_v10 = vld [vmem:[%s14365_s1 + $0x1128] ss:$16 sps:$4 sm:$0xff]  }
 0x1ec   :  { %6702 = vmatprep.subr.bf16.mxu0 %v10111_v11  ;;  %7390 = vmatprep.subr.bf16.mxu1 %v10114_v12  ;;  %v10201_v11 = vld [vmem:[%s14365_s1 + $0x1144] ss:$16 sps:$4 sm:$0xff]   ;;  %v10204_v12 = vld [vmem:[%s14365_s1 + $0x114c] ss:$16 sps:$4 sm:$0xff]  }
 0x1ef   :  { %6703 = vmatpush1.bf16.msra.mxu0 %v10109_v13  ;;  %7391 = vmatpush1.bf16.msra.mxu1 %v10112_v16  ;;  %v10199_v13 = vld [vmem:[%s14365_s1 + $0x1140] ss:$16 sps:$4 sm:$0xff]   ;;  %v10202_v16 = vld [vmem:[%s14365_s1 + $0x1148] ss:$16 sps:$4 sm:$0xff]  }
 0x1f0   :  { %6704 = vmatprep.subr.bf16.mxu0 %v10117_v17  ;;  %7392 = vmatprep.subr.bf16.mxu1 %v10120_v20  ;;  %v10207_v17 = vld [vmem:[%s14365_s1 + $0x1164] ss:$16 sps:$4 sm:$0xff]   ;;  %v10210_v20 = vld [vmem:[%s14365_s1 + $0x116c] ss:$16 sps:$4 sm:$0xff]  }
 0x1f3   :  { %6705 = vmatpush1.bf16.msra.mxu0 %v10115_v15  ;;  %7393 = vmatpush1.bf16.msra.mxu1 %v10118_v22  ;;  %v10205_v15 = vld [vmem:[%s14365_s1 + $0x1160] ss:$16 sps:$4 sm:$0xff]   ;;  %v10208_v22 = vld [vmem:[%s14365_s1 + $0x1168] ss:$16 sps:$4 sm:$0xff]  }
 0x1f4   :  { %6706 = vmatprep.subr.bf16.mxu0 %v10123_v23  ;;  %7394 = vmatprep.subr.bf16.mxu1 %v10126_v18  ;;  %v10213_v23 = vld [vmem:[%s14365_s1 + $0x1184] ss:$16 sps:$4 sm:$0xff]   ;;  %v10216_v18 = vld [vmem:[%s14365_s1 + $0x118c] ss:$16 sps:$4 sm:$0xff]  }
 0x1f7   :  { %6707 = vmatpush1.bf16.msra.mxu0 %v10121_v25  ;;  %7395 = vmatpush1.bf16.msra.mxu1 %v10124_v26  ;;  %v10211_v25 = vld [vmem:[%s14365_s1 + $0x1180] ss:$16 sps:$4 sm:$0xff]   ;;  %v10214_v26 = vld [vmem:[%s14365_s1 + $0x1188] ss:$16 sps:$4 sm:$0xff]  }
 0x1f8   :  { %6708 = vmatprep.subr.bf16.mxu0 %v10129_v27  ;;  %7396 = vmatprep.subr.bf16.mxu1 %v10132_v28  ;;  %v10219_v27 = vld [vmem:[%s14365_s1 + $0x11a4] ss:$16 sps:$4 sm:$0xff]   ;;  %v10222_v28 = vld [vmem:[%s14365_s1 + $0x11ac] ss:$16 sps:$4 sm:$0xff]  }
 0x1fb   :  { %6709 = vmatpush1.bf16.msra.mxu0 %v10127_v29  ;;  %7397 = vmatpush1.bf16.msra.mxu1 %v10130_v30  ;;  %v10217_v29 = vld [vmem:[%s14365_s1 + $0x11a0] ss:$16 sps:$4 sm:$0xff]   ;;  %v10220_v30 = vld [vmem:[%s14365_s1 + $0x11a8] ss:$16 sps:$4 sm:$0xff]  }
 0x1fc   :  { %6710 = vmatprep.subr.bf16.mxu0 %v10135_v31  ;;  %7398 = vmatprep.subr.bf16.mxu1 %v10138_v32  ;;  %v10225_v31 = vld [vmem:[%s14365_s1 + $0x11c4] ss:$16 sps:$4 sm:$0xff]   ;;  %v10228_v32 = vld [vmem:[%s14365_s1 + $0x11cc] ss:$16 sps:$4 sm:$0xff]  }
 0x1ff   :  { %6711 = vmatpush1.bf16.msra.mxu0 %v10133_v33  ;;  %7399 = vmatpush1.bf16.msra.mxu1 %v10136_v34  ;;  %v10223_v33 = vld [vmem:[%s14365_s1 + $0x11c0] ss:$16 sps:$4 sm:$0xff]   ;;  %v10226_v34 = vld [vmem:[%s14365_s1 + $0x11c8] ss:$16 sps:$4 sm:$0xff]  }
 0x200   :  { %6723 = vmatprep.subr.bf16.mxu0 %v10141_v35  ;;  %7411 = vmatprep.subr.bf16.mxu1 %v10144_v36  ;;  %v10231_v35 = vld [vmem:[%s14365_s1 + $0x11e4] ss:$16 sps:$4 sm:$0xff]   ;;  %v10234_v36 = vld [vmem:[%s14365_s1 + $0x11ec] ss:$16 sps:$4 sm:$0xff]  }
 0x202   :  { %6713 = vmatmul.mubr.bf16.vlgmr.msra.gmra.mrb[0].mxu0 %v8124_v37  ;;  %7401 = vmatmul.mubr.bf16.vlgmr.msra.gmra.mrb[0].mxu1 %v8124_v37  ;;  %v10229_v37 = vld [vmem:[%s14365_s1 + $0x11e0] ss:$16 sps:$4 sm:$0xff]  }
 0x203   :  { %6724 = vmatpush1.bf16.msra.mxu0 %v10139_v38  ;;  %7412 = vmatpush1.bf16.msra.mxu1 %v10142_v39  ;;  %v10232_v38 = vld [vmem:[%s14365_s1 + $0x11e8] ss:$16 sps:$4 sm:$0xff]   ;;  %v10237_v39 = vld [vmem:[%s14365_s1 + $0x1204] ss:$16 sps:$4 sm:$0xff]  }
 0x204   :  { %6725 = vmatprep.subr.bf16.mxu0 %v10147_v40  ;;  %7413 = vmatprep.subr.bf16.mxu1 %v10150_v19  ;;  %v10240_v40 = vld [vmem:[%s14365_s1 + $0x120c] ss:$16 sps:$4 sm:$0xff]  }
 0x205   :  { %6755 = vmatprep.mubr.bf16.mxu0 %v8127_v24  ;;  %7443 = vmatprep.mubr.bf16.mxu1 %v8127_v24  ;;  %v12822_v19 = vld [vmem:[%s14366_s0 + $0x48] sm:$0xff] }
 0x206   :  { %v12827_v24 = vld [vmem:[%s14366_s0 + $0xc8] sm:$0xff] }
 0x207   :  { %6726 = vmatpush1.bf16.msra.mxu0 %v10145_v41  ;;  %7414 = vmatpush1.bf16.msra.mxu1 %v10148_v42  ;;  %v8126_v41 = vcombine.low %v12616_v14, %v12621_v21  ;;  %v10235_v42 = vld [vmem:[%s14365_s1 + $0x1200] ss:$16 sps:$4 sm:$0xff]   ;;  %v10246_v14 = vld [vmem:[%s14365_s1 + $0x122c] ss:$16 sps:$4 sm:$0xff]   ;;  %v8129_v21 = vcombine.high %v12822_v19, %v12827_v24 }
 0x208   :  { %6727 = vmatprep.subr.bf16.mxu0 %v10153_v43  ;;  %7415 = vmatprep.subr.bf16.mxu1 %v10156_v44  ;;  %v10238_v43 = vld [vmem:[%s14365_s1 + $0x1208] ss:$16 sps:$4 sm:$0xff]   ;;  %v10243_v44 = vld [vmem:[%s14365_s1 + $0x1224] ss:$16 sps:$4 sm:$0xff]  }
 0x20b   :  { %6728 = vmatpush1.bf16.msra.mxu0 %v10151_v45  ;;  %7416 = vmatpush1.bf16.msra.mxu1 %v10154_v46  ;;  %v10241_v45 = vld [vmem:[%s14365_s1 + $0x1220] ss:$16 sps:$4 sm:$0xff]   ;;  %v10244_v46 = vld [vmem:[%s14365_s1 + $0x1228] ss:$16 sps:$4 sm:$0xff]  }
 0x20c   :  { %6729 = vmatprep.subr.bf16.mxu0 %v10159_v47  ;;  %7417 = vmatprep.subr.bf16.mxu1 %v10162_v48  ;;  %v10249_v47 = vld [vmem:[%s14365_s1 + $0x1244] ss:$16 sps:$4 sm:$0xff]   ;;  %v10252_v48 = vld [vmem:[%s14365_s1 + $0x124c] ss:$16 sps:$4 sm:$0xff]  }
 0x20f   :  { %6730 = vmatpush1.bf16.msra.mxu0 %v10157_v49  ;;  %7418 = vmatpush1.bf16.msra.mxu1 %v10160_v50  ;;  %v10247_v49 = vld [vmem:[%s14365_s1 + $0x1240] ss:$16 sps:$4 sm:$0xff]   ;;  %v10250_v50 = vld [vmem:[%s14365_s1 + $0x1248] ss:$16 sps:$4 sm:$0xff]  }
 0x210   :  { %6731 = vmatprep.subr.bf16.mxu0 %v10165_v51  ;;  %7419 = vmatprep.subr.bf16.mxu1 %v10168_v52  ;;  %v10255_v51 = vld [vmem:[%s14365_s1 + $0x1264] ss:$16 sps:$4 sm:$0xff]   ;;  %v10258_v52 = vld [vmem:[%s14365_s1 + $0x126c] ss:$16 sps:$4 sm:$0xff]  }
 0x213   :  { %6732 = vmatpush1.bf16.msra.mxu0 %v10163_v53  ;;  %7420 = vmatpush1.bf16.msra.mxu1 %v10166_v54  ;;  %v10253_v53 = vld [vmem:[%s14365_s1 + $0x1260] ss:$16 sps:$4 sm:$0xff]   ;;  %v10256_v54 = vld [vmem:[%s14365_s1 + $0x1268] ss:$16 sps:$4 sm:$0xff]  }
 0x214   :  { %6733 = vmatprep.subr.bf16.mxu0 %v10171_v55  ;;  %7421 = vmatprep.subr.bf16.mxu1 %v10174_v56  ;;  %v10261_v55 = vld [vmem:[%s14365_s1 + $0x1284] ss:$16 sps:$4 sm:$0xff]   ;;  %v10264_v56 = vld [vmem:[%s14365_s1 + $0x128c] ss:$16 sps:$4 sm:$0xff]  }
 0x217   :  { %6734 = vmatpush1.bf16.msra.mxu0 %v10169_v57  ;;  %7422 = vmatpush1.bf16.msra.mxu1 %v10172_v58  ;;  %v10259_v57 = vld [vmem:[%s14365_s1 + $0x1280] ss:$16 sps:$4 sm:$0xff]   ;;  %v10262_v58 = vld [vmem:[%s14365_s1 + $0x1288] ss:$16 sps:$4 sm:$0xff]  }
 0x218   :  { %6735 = vmatprep.subr.bf16.mxu0 %v10177_v59  ;;  %7423 = vmatprep.subr.bf16.mxu1 %v10180_v60  ;;  %v10267_v59 = vld [vmem:[%s14365_s1 + $0x12a4] ss:$16 sps:$4 sm:$0xff]   ;;  %v10270_v60 = vld [vmem:[%s14365_s1 + $0x12ac] ss:$16 sps:$4 sm:$0xff]  }
 0x21b   :  { %6736 = vmatpush1.bf16.msra.mxu0 %v10175_v61  ;;  %7424 = vmatpush1.bf16.msra.mxu1 %v10178_v62  ;;  %v10265_v61 = vld [vmem:[%s14365_s1 + $0x12a0] ss:$16 sps:$4 sm:$0xff]   ;;  %v10268_v62 = vld [vmem:[%s14365_s1 + $0x12a8] ss:$16 sps:$4 sm:$0xff]  }
 0x21c   :  { %6737 = vmatprep.subr.bf16.mxu0 %v10183_v63  ;;  %7425 = vmatprep.subr.bf16.mxu1 %v10186_v0  ;;  %v10273_v63 = vld [vmem:[%s14365_s1 + $0x12c4] ss:$16 sps:$4 sm:$0xff]   ;;  %v10276_v0 = vld [vmem:[%s14365_s1 + $0x12cc] ss:$16 sps:$4 sm:$0xff]  }
 0x21f   :  { %6738 = vmatpush1.bf16.msra.mxu0 %v10181_v1  ;;  %7426 = vmatpush1.bf16.msra.mxu1 %v10184_v2  ;;  %v10271_v1 = vld [vmem:[%s14365_s1 + $0x12c0] ss:$16 sps:$4 sm:$0xff]   ;;  %v10274_v2 = vld [vmem:[%s14365_s1 + $0x12c8] ss:$16 sps:$4 sm:$0xff]  }
 0x220   :  { %6739 = vmatprep.subr.bf16.mxu0 %v10189_v3  ;;  %7427 = vmatprep.subr.bf16.mxu1 %v10192_v4  ;;  %v10279_v3 = vld [vmem:[%s14365_s1 + $0x12e4] ss:$16 sps:$4 sm:$0xff]   ;;  %v10282_v4 = vld [vmem:[%s14365_s1 + $0x12ec] ss:$16 sps:$4 sm:$0xff]  }
 0x223   :  { %6740 = vmatpush1.bf16.msra.mxu0 %v10187_v5  ;;  %7428 = vmatpush1.bf16.msra.mxu1 %v10190_v6  ;;  %v10277_v5 = vld [vmem:[%s14365_s1 + $0x12e0] ss:$16 sps:$4 sm:$0xff]   ;;  %v10280_v6 = vld [vmem:[%s14365_s1 + $0x12e8] ss:$16 sps:$4 sm:$0xff]  }
 0x224   :  { %6741 = vmatprep.subr.bf16.mxu0 %v10195_v7  ;;  %7429 = vmatprep.subr.bf16.mxu1 %v10198_v8  ;;  %v10285_v7 = vld [vmem:[%s14365_s1 + $0x1304] ss:$16 sps:$4 sm:$0xff]   ;;  %v10288_v8 = vld [vmem:[%s14365_s1 + $0x130c] ss:$16 sps:$4 sm:$0xff]  }
 0x227   :  { %6742 = vmatpush1.bf16.msra.mxu0 %v10193_v9  ;;  %7430 = vmatpush1.bf16.msra.mxu1 %v10196_v10  ;;  %v10283_v9 = vld [vmem:[%s14365_s1 + $0x1300] ss:$16 sps:$4 sm:$0xff]   ;;  %v10286_v10 = vld [vmem:[%s14365_s1 + $0x1308] ss:$16 sps:$4 sm:$0xff]  }
 0x228   :  { %6743 = vmatprep.subr.bf16.mxu0 %v10201_v11  ;;  %7431 = vmatprep.subr.bf16.mxu1 %v10204_v12  ;;  %v10291_v11 = vld [vmem:[%s14365_s1 + $0x1324] ss:$16 sps:$4 sm:$0xff]   ;;  %v10294_v12 = vld [vmem:[%s14365_s1 + $0x132c] ss:$16 sps:$4 sm:$0xff]  }
 0x22b   :  { %6744 = vmatpush1.bf16.msra.mxu0 %v10199_v13  ;;  %7432 = vmatpush1.bf16.msra.mxu1 %v10202_v16  ;;  %v10289_v13 = vld [vmem:[%s14365_s1 + $0x1320] ss:$16 sps:$4 sm:$0xff]   ;;  %v10292_v16 = vld [vmem:[%s14365_s1 + $0x1328] ss:$16 sps:$4 sm:$0xff]  }
 0x22c   :  { %6745 = vmatprep.subr.bf16.mxu0 %v10207_v17  ;;  %7433 = vmatprep.subr.bf16.mxu1 %v10210_v20  ;;  %v10297_v17 = vld [vmem:[%s14365_s1 + $0x1344] ss:$16 sps:$4 sm:$0xff]   ;;  %v10300_v20 = vld [vmem:[%s14365_s1 + $0x134c] ss:$16 sps:$4 sm:$0xff]  }
 0x22f   :  { %6746 = vmatpush1.bf16.msra.mxu0 %v10205_v15  ;;  %7434 = vmatpush1.bf16.msra.mxu1 %v10208_v22  ;;  %v10295_v15 = vld [vmem:[%s14365_s1 + $0x1340] ss:$16 sps:$4 sm:$0xff]   ;;  %v10298_v22 = vld [vmem:[%s14365_s1 + $0x1348] ss:$16 sps:$4 sm:$0xff]  }
 0x230   :  { %6747 = vmatprep.subr.bf16.mxu0 %v10213_v23  ;;  %7435 = vmatprep.subr.bf16.mxu1 %v10216_v18  ;;  %v10303_v23 = vld [vmem:[%s14365_s1 + $0x1364] ss:$16 sps:$4 sm:$0xff]   ;;  %v10306_v18 = vld [vmem:[%s14365_s1 + $0x136c] ss:$16 sps:$4 sm:$0xff]  }
 0x233   :  { %6748 = vmatpush1.bf16.msra.mxu0 %v10211_v25  ;;  %7436 = vmatpush1.bf16.msra.mxu1 %v10214_v26  ;;  %v10301_v25 = vld [vmem:[%s14365_s1 + $0x1360] ss:$16 sps:$4 sm:$0xff]   ;;  %v10304_v26 = vld [vmem:[%s14365_s1 + $0x1368] ss:$16 sps:$4 sm:$0xff]  }
 0x234   :  { %6749 = vmatprep.subr.bf16.mxu0 %v10219_v27  ;;  %7437 = vmatprep.subr.bf16.mxu1 %v10222_v28  ;;  %v10309_v27 = vld [vmem:[%s14365_s1 + $0x1384] ss:$16 sps:$4 sm:$0xff]   ;;  %v10312_v28 = vld [vmem:[%s14365_s1 + $0x138c] ss:$16 sps:$4 sm:$0xff]  }
 0x237   :  { %6750 = vmatpush1.bf16.msra.mxu0 %v10217_v29  ;;  %7438 = vmatpush1.bf16.msra.mxu1 %v10220_v30  ;;  %v10307_v29 = vld [vmem:[%s14365_s1 + $0x1380] ss:$16 sps:$4 sm:$0xff]   ;;  %v10310_v30 = vld [vmem:[%s14365_s1 + $0x1388] ss:$16 sps:$4 sm:$0xff]  }
 0x238   :  { %6751 = vmatprep.subr.bf16.mxu0 %v10225_v31  ;;  %7439 = vmatprep.subr.bf16.mxu1 %v10228_v32  ;;  %v10315_v31 = vld [vmem:[%s14365_s1 + $0x13a4] ss:$16 sps:$4 sm:$0xff]   ;;  %v10318_v32 = vld [vmem:[%s14365_s1 + $0x13ac] ss:$16 sps:$4 sm:$0xff]  }
 0x23b   :  { %6752 = vmatpush1.bf16.msra.mxu0 %v10223_v33  ;;  %7440 = vmatpush1.bf16.msra.mxu1 %v10226_v34  ;;  %v10313_v33 = vld [vmem:[%s14365_s1 + $0x13a0] ss:$16 sps:$4 sm:$0xff]   ;;  %v10316_v34 = vld [vmem:[%s14365_s1 + $0x13a8] ss:$16 sps:$4 sm:$0xff]  }
 0x23c   :  { %6753 = vmatprep.subr.bf16.mxu0 %v10231_v35  ;;  %7441 = vmatprep.subr.bf16.mxu1 %v10234_v36  ;;  %v10321_v35 = vld [vmem:[%s14365_s1 + $0x13c4] ss:$16 sps:$4 sm:$0xff]   ;;  %v10324_v36 = vld [vmem:[%s14365_s1 + $0x13cc] ss:$16 sps:$4 sm:$0xff]  }
 0x23f   :  { %6754 = vmatpush1.bf16.msra.mxu0 %v10229_v37  ;;  %7442 = vmatpush1.bf16.msra.mxu1 %v10232_v38  ;;  %v10319_v37 = vld [vmem:[%s14365_s1 + $0x13c0] ss:$16 sps:$4 sm:$0xff]   ;;  %v10322_v38 = vld [vmem:[%s14365_s1 + $0x13c8] ss:$16 sps:$4 sm:$0xff]  }
 0x240   :  { %6766 = vmatprep.subr.bf16.mxu0 %v10237_v39  ;;  %7454 = vmatprep.subr.bf16.mxu1 %v10240_v40  ;;  %v10327_v39 = vld [vmem:[%s14365_s1 + $0x13e4] ss:$16 sps:$4 sm:$0xff]   ;;  %v10330_v40 = vld [vmem:[%s14365_s1 + $0x13ec] ss:$16 sps:$4 sm:$0xff]  }
 0x242   :  { %6756 = vmatmul.mubr.bf16.vlgmr.msra.gmra.mrb[0].mxu0 %v8126_v41  ;;  %7444 = vmatmul.mubr.bf16.vlgmr.msra.gmra.mrb[0].mxu1 %v8126_v41  ;;  %v10325_v41 = vld [vmem:[%s14365_s1 + $0x13e0] ss:$16 sps:$4 sm:$0xff]  }
 0x243   :  { %6767 = vmatpush1.bf16.msra.mxu0 %v10235_v42  ;;  %7455 = vmatpush1.bf16.msra.mxu1 %v10238_v43  ;;  %v10328_v42 = vld [vmem:[%s14365_s1 + $0x13e8] ss:$16 sps:$4 sm:$0xff]   ;;  %v10333_v43 = vld [vmem:[%s14365_s1 + $0x1404] ss:$16 sps:$4 sm:$0xff]  }
 0x244   :  { %6768 = vmatprep.subr.bf16.mxu0 %v10243_v44  ;;  %7456 = vmatprep.subr.bf16.mxu1 %v10246_v14  ;;  %v10336_v44 = vld [vmem:[%s14365_s1 + $0x140c] ss:$16 sps:$4 sm:$0xff]   ;;  %v8128_v14 = vcombine.low %v12822_v19, %v12827_v24  ;;  %v10334_v19 = vld [vmem:[%s14365_s1 + $0x1408] ss:$16 sps:$4 sm:$0xff]   ;;  %v10339_v24 = vld [vmem:[%s14365_s1 + $0x1424] ss:$16 sps:$4 sm:$0xff]  }
 0x245   :  { %6798 = vmatprep.mubr.bf16.mxu0 %v8129_v21  ;;  %7486 = vmatprep.mubr.bf16.mxu1 %v8129_v21  ;;  %v13030_v21 = vld [vmem:[%s14366_s0 + $0x50] sm:$0xff] }
 0x247   :  { %6769 = vmatpush1.bf16.msra.mxu0 %v10241_v45  ;;  %7457 = vmatpush1.bf16.msra.mxu1 %v10244_v46  ;;  %v13035_v45 = vld [vmem:[%s14366_s0 + $0xd0] sm:$0xff] }
 0x248   :  { %6770 = vmatprep.subr.bf16.mxu0 %v10249_v47  ;;  %7458 = vmatprep.subr.bf16.mxu1 %v10252_v48  ;;  %v10331_v46 = vld [vmem:[%s14365_s1 + $0x1400] ss:$16 sps:$4 sm:$0xff]   ;;  %v10342_v47 = vld [vmem:[%s14365_s1 + $0x142c] ss:$16 sps:$4 sm:$0xff]   ;;  %v8131_v48 = vcombine.high %v13030_v21, %v13035_v45 }
 0x24b   :  { %6771 = vmatpush1.bf16.msra.mxu0 %v10247_v49  ;;  %7459 = vmatpush1.bf16.msra.mxu1 %v10250_v50  ;;  %v10337_v49 = vld [vmem:[%s14365_s1 + $0x1420] ss:$16 sps:$4 sm:$0xff]   ;;  %v10340_v50 = vld [vmem:[%s14365_s1 + $0x1428] ss:$16 sps:$4 sm:$0xff]  }
 0x24c   :  { %6772 = vmatprep.subr.bf16.mxu0 %v10255_v51  ;;  %7460 = vmatprep.subr.bf16.mxu1 %v10258_v52  ;;  %v10345_v51 = vld [vmem:[%s14365_s1 + $0x1444] ss:$16 sps:$4 sm:$0xff]   ;;  %v10348_v52 = vld [vmem:[%s14365_s1 + $0x144c] ss:$16 sps:$4 sm:$0xff]  }
 0x24f   :  { %6773 = vmatpush1.bf16.msra.mxu0 %v10253_v53  ;;  %7461 = vmatpush1.bf16.msra.mxu1 %v10256_v54  ;;  %v10343_v53 = vld [vmem:[%s14365_s1 + $0x1440] ss:$16 sps:$4 sm:$0xff]   ;;  %v10346_v54 = vld [vmem:[%s14365_s1 + $0x1448] ss:$16 sps:$4 sm:$0xff]  }
 0x250   :  { %6774 = vmatprep.subr.bf16.mxu0 %v10261_v55  ;;  %7462 = vmatprep.subr.bf16.mxu1 %v10264_v56  ;;  %v10351_v55 = vld [vmem:[%s14365_s1 + $0x1464] ss:$16 sps:$4 sm:$0xff]   ;;  %v10354_v56 = vld [vmem:[%s14365_s1 + $0x146c] ss:$16 sps:$4 sm:$0xff]  }
 0x253   :  { %6775 = vmatpush1.bf16.msra.mxu0 %v10259_v57  ;;  %7463 = vmatpush1.bf16.msra.mxu1 %v10262_v58  ;;  %v10349_v57 = vld [vmem:[%s14365_s1 + $0x1460] ss:$16 sps:$4 sm:$0xff]   ;;  %v10352_v58 = vld [vmem:[%s14365_s1 + $0x1468] ss:$16 sps:$4 sm:$0xff]  }
 0x254   :  { %6776 = vmatprep.subr.bf16.mxu0 %v10267_v59  ;;  %7464 = vmatprep.subr.bf16.mxu1 %v10270_v60  ;;  %v10357_v59 = vld [vmem:[%s14365_s1 + $0x1484] ss:$16 sps:$4 sm:$0xff]   ;;  %v10360_v60 = vld [vmem:[%s14365_s1 + $0x148c] ss:$16 sps:$4 sm:$0xff]  }
 0x257   :  { %6777 = vmatpush1.bf16.msra.mxu0 %v10265_v61  ;;  %7465 = vmatpush1.bf16.msra.mxu1 %v10268_v62  ;;  %v10355_v61 = vld [vmem:[%s14365_s1 + $0x1480] ss:$16 sps:$4 sm:$0xff]   ;;  %v10358_v62 = vld [vmem:[%s14365_s1 + $0x1488] ss:$16 sps:$4 sm:$0xff]  }
 0x258   :  { %6778 = vmatprep.subr.bf16.mxu0 %v10273_v63  ;;  %7466 = vmatprep.subr.bf16.mxu1 %v10276_v0  ;;  %v10363_v63 = vld [vmem:[%s14365_s1 + $0x14a4] ss:$16 sps:$4 sm:$0xff]   ;;  %v10366_v0 = vld [vmem:[%s14365_s1 + $0x14ac] ss:$16 sps:$4 sm:$0xff]  }
 0x25b   :  { %6779 = vmatpush1.bf16.msra.mxu0 %v10271_v1  ;;  %7467 = vmatpush1.bf16.msra.mxu1 %v10274_v2  ;;  %v10361_v1 = vld [vmem:[%s14365_s1 + $0x14a0] ss:$16 sps:$4 sm:$0xff]   ;;  %v10364_v2 = vld [vmem:[%s14365_s1 + $0x14a8] ss:$16 sps:$4 sm:$0xff]  }
 0x25c   :  { %6780 = vmatprep.subr.bf16.mxu0 %v10279_v3  ;;  %7468 = vmatprep.subr.bf16.mxu1 %v10282_v4  ;;  %v10369_v3 = vld [vmem:[%s14365_s1 + $0x14c4] ss:$16 sps:$4 sm:$0xff]   ;;  %v10372_v4 = vld [vmem:[%s14365_s1 + $0x14cc] ss:$16 sps:$4 sm:$0xff]  }
 0x25f   :  { %6781 = vmatpush1.bf16.msra.mxu0 %v10277_v5  ;;  %7469 = vmatpush1.bf16.msra.mxu1 %v10280_v6  ;;  %v10367_v5 = vld [vmem:[%s14365_s1 + $0x14c0] ss:$16 sps:$4 sm:$0xff]   ;;  %v10370_v6 = vld [vmem:[%s14365_s1 + $0x14c8] ss:$16 sps:$4 sm:$0xff]  }
 0x260   :  { %6782 = vmatprep.subr.bf16.mxu0 %v10285_v7  ;;  %7470 = vmatprep.subr.bf16.mxu1 %v10288_v8  ;;  %v10375_v7 = vld [vmem:[%s14365_s1 + $0x14e4] ss:$16 sps:$4 sm:$0xff]   ;;  %v10378_v8 = vld [vmem:[%s14365_s1 + $0x14ec] ss:$16 sps:$4 sm:$0xff]  }
 0x263   :  { %6783 = vmatpush1.bf16.msra.mxu0 %v10283_v9  ;;  %7471 = vmatpush1.bf16.msra.mxu1 %v10286_v10  ;;  %v10373_v9 = vld [vmem:[%s14365_s1 + $0x14e0] ss:$16 sps:$4 sm:$0xff]   ;;  %v10376_v10 = vld [vmem:[%s14365_s1 + $0x14e8] ss:$16 sps:$4 sm:$0xff]  }
 0x264   :  { %6784 = vmatprep.subr.bf16.mxu0 %v10291_v11  ;;  %7472 = vmatprep.subr.bf16.mxu1 %v10294_v12  ;;  %v10381_v11 = vld [vmem:[%s14365_s1 + $0x1504] ss:$16 sps:$4 sm:$0xff]   ;;  %v10384_v12 = vld [vmem:[%s14365_s1 + $0x150c] ss:$16 sps:$4 sm:$0xff]  }
 0x267   :  { %6785 = vmatpush1.bf16.msra.mxu0 %v10289_v13  ;;  %7473 = vmatpush1.bf16.msra.mxu1 %v10292_v16  ;;  %v10379_v13 = vld [vmem:[%s14365_s1 + $0x1500] ss:$16 sps:$4 sm:$0xff]   ;;  %v10382_v16 = vld [vmem:[%s14365_s1 + $0x1508] ss:$16 sps:$4 sm:$0xff]  }
 0x268   :  { %6786 = vmatprep.subr.bf16.mxu0 %v10297_v17  ;;  %7474 = vmatprep.subr.bf16.mxu1 %v10300_v20  ;;  %v10387_v17 = vld [vmem:[%s14365_s1 + $0x1524] ss:$16 sps:$4 sm:$0xff]   ;;  %v10390_v20 = vld [vmem:[%s14365_s1 + $0x152c] ss:$16 sps:$4 sm:$0xff]  }
 0x26b   :  { %6787 = vmatpush1.bf16.msra.mxu0 %v10295_v15  ;;  %7475 = vmatpush1.bf16.msra.mxu1 %v10298_v22  ;;  %v10385_v15 = vld [vmem:[%s14365_s1 + $0x1520] ss:$16 sps:$4 sm:$0xff]   ;;  %v10388_v22 = vld [vmem:[%s14365_s1 + $0x1528] ss:$16 sps:$4 sm:$0xff]  }
 0x26c   :  { %6788 = vmatprep.subr.bf16.mxu0 %v10303_v23  ;;  %7476 = vmatprep.subr.bf16.mxu1 %v10306_v18  ;;  %v10393_v23 = vld [vmem:[%s14365_s1 + $0x1544] ss:$16 sps:$4 sm:$0xff]   ;;  %v10396_v18 = vld [vmem:[%s14365_s1 + $0x154c] ss:$16 sps:$4 sm:$0xff]  }
 0x26f   :  { %6789 = vmatpush1.bf16.msra.mxu0 %v10301_v25  ;;  %7477 = vmatpush1.bf16.msra.mxu1 %v10304_v26  ;;  %v10391_v25 = vld [vmem:[%s14365_s1 + $0x1540] ss:$16 sps:$4 sm:$0xff]   ;;  %v10394_v26 = vld [vmem:[%s14365_s1 + $0x1548] ss:$16 sps:$4 sm:$0xff]  }
 0x270   :  { %6790 = vmatprep.subr.bf16.mxu0 %v10309_v27  ;;  %7478 = vmatprep.subr.bf16.mxu1 %v10312_v28  ;;  %v10399_v27 = vld [vmem:[%s14365_s1 + $0x1564] ss:$16 sps:$4 sm:$0xff]   ;;  %v10402_v28 = vld [vmem:[%s14365_s1 + $0x156c] ss:$16 sps:$4 sm:$0xff]  }
 0x273   :  { %6791 = vmatpush1.bf16.msra.mxu0 %v10307_v29  ;;  %7479 = vmatpush1.bf16.msra.mxu1 %v10310_v30  ;;  %v10397_v29 = vld [vmem:[%s14365_s1 + $0x1560] ss:$16 sps:$4 sm:$0xff]   ;;  %v10400_v30 = vld [vmem:[%s14365_s1 + $0x1568] ss:$16 sps:$4 sm:$0xff]  }
 0x274   :  { %6792 = vmatprep.subr.bf16.mxu0 %v10315_v31  ;;  %7480 = vmatprep.subr.bf16.mxu1 %v10318_v32  ;;  %v10405_v31 = vld [vmem:[%s14365_s1 + $0x1584] ss:$16 sps:$4 sm:$0xff]   ;;  %v10408_v32 = vld [vmem:[%s14365_s1 + $0x158c] ss:$16 sps:$4 sm:$0xff]  }
 0x277   :  { %6793 = vmatpush1.bf16.msra.mxu0 %v10313_v33  ;;  %7481 = vmatpush1.bf16.msra.mxu1 %v10316_v34  ;;  %v10403_v33 = vld [vmem:[%s14365_s1 + $0x1580] ss:$16 sps:$4 sm:$0xff]   ;;  %v10406_v34 = vld [vmem:[%s14365_s1 + $0x1588] ss:$16 sps:$4 sm:$0xff]  }
 0x278   :  { %6794 = vmatprep.subr.bf16.mxu0 %v10321_v35  ;;  %7482 = vmatprep.subr.bf16.mxu1 %v10324_v36  ;;  %v10411_v35 = vld [vmem:[%s14365_s1 + $0x15a4] ss:$16 sps:$4 sm:$0xff]   ;;  %v10414_v36 = vld [vmem:[%s14365_s1 + $0x15ac] ss:$16 sps:$4 sm:$0xff]  }
 0x27b   :  { %6795 = vmatpush1.bf16.msra.mxu0 %v10319_v37  ;;  %7483 = vmatpush1.bf16.msra.mxu1 %v10322_v38  ;;  %v10409_v37 = vld [vmem:[%s14365_s1 + $0x15a0] ss:$16 sps:$4 sm:$0xff]   ;;  %v10412_v38 = vld [vmem:[%s14365_s1 + $0x15a8] ss:$16 sps:$4 sm:$0xff]  }
 0x27c   :  { %6796 = vmatprep.subr.bf16.mxu0 %v10327_v39  ;;  %7484 = vmatprep.subr.bf16.mxu1 %v10330_v40  ;;  %v10417_v39 = vld [vmem:[%s14365_s1 + $0x15c4] ss:$16 sps:$4 sm:$0xff]   ;;  %v10420_v40 = vld [vmem:[%s14365_s1 + $0x15cc] ss:$16 sps:$4 sm:$0xff]  }
 0x27f   :  { %6797 = vmatpush1.bf16.msra.mxu0 %v10325_v41  ;;  %7485 = vmatpush1.bf16.msra.mxu1 %v10328_v42  ;;  %v10415_v41 = vld [vmem:[%s14365_s1 + $0x15c0] ss:$16 sps:$4 sm:$0xff]   ;;  %v10418_v42 = vld [vmem:[%s14365_s1 + $0x15c8] ss:$16 sps:$4 sm:$0xff]  }
 0x280   :  { %6809 = vmatprep.subr.bf16.mxu0 %v10333_v43  ;;  %7497 = vmatprep.subr.bf16.mxu1 %v10336_v44  ;;  %v10423_v43 = vld [vmem:[%s14365_s1 + $0x15e4] ss:$16 sps:$4 sm:$0xff]   ;;  %v10426_v44 = vld [vmem:[%s14365_s1 + $0x15ec] ss:$16 sps:$4 sm:$0xff]  }
 0x282   :  { %6799 = vmatmul.mubr.bf16.vlgmr.msra.gmra.mrb[0].mxu0 %v8128_v14  ;;  %7487 = vmatmul.mubr.bf16.vlgmr.msra.gmra.mrb[0].mxu1 %v8128_v14  ;;  %v10421_v14 = vld [vmem:[%s14365_s1 + $0x15e0] ss:$16 sps:$4 sm:$0xff]  }
 0x283   :  { %6810 = vmatpush1.bf16.msra.mxu0 %v10331_v46  ;;  %7498 = vmatpush1.bf16.msra.mxu1 %v10334_v19  ;;  %v10424_v46 = vld [vmem:[%s14365_s1 + $0x15e8] ss:$16 sps:$4 sm:$0xff]   ;;  %v10429_v19 = vld [vmem:[%s14365_s1 + $0x1604] ss:$16 sps:$4 sm:$0xff]  }
 0x284   :  { %6811 = vmatprep.subr.bf16.mxu0 %v10339_v24  ;;  %7499 = vmatprep.subr.bf16.mxu1 %v10342_v47  ;;  %v10432_v24 = vld [vmem:[%s14365_s1 + $0x160c] ss:$16 sps:$4 sm:$0xff]   ;;  %v8130_v47 = vcombine.low %v13030_v21, %v13035_v45  ;;  %v10430_v21 = vld [vmem:[%s14365_s1 + $0x1608] ss:$16 sps:$4 sm:$0xff]   ;;  %v10435_v45 = vld [vmem:[%s14365_s1 + $0x1624] ss:$16 sps:$4 sm:$0xff]  }
 0x285   :  { %6841 = vmatprep.mubr.bf16.mxu0 %v8131_v48  ;;  %7529 = vmatprep.mubr.bf16.mxu1 %v8131_v48  ;;  %v13236_v48 = vld [vmem:[%s14366_s0 + $0x58] sm:$0xff] }
 0x287   :  { %6812 = vmatpush1.bf16.msra.mxu0 %v10337_v49  ;;  %7500 = vmatpush1.bf16.msra.mxu1 %v10340_v50  ;;  %v13241_v49 = vld [vmem:[%s14366_s0 + $0xd8] sm:$0xff]  ;;  %v10427_v50 = vld [vmem:[%s14365_s1 + $0x1600] ss:$16 sps:$4 sm:$0xff]  }
 0x288   :  { %6813 = vmatprep.subr.bf16.mxu0 %v10345_v51  ;;  %7501 = vmatprep.subr.bf16.mxu1 %v10348_v52  ;;  %v10438_v51 = vld [vmem:[%s14365_s1 + $0x162c] ss:$16 sps:$4 sm:$0xff]   ;;  %v8133_v52 = vcombine.high %v13236_v48, %v13241_v49 }
 0x28b   :  { %6814 = vmatpush1.bf16.msra.mxu0 %v10343_v53  ;;  %7502 = vmatpush1.bf16.msra.mxu1 %v10346_v54  ;;  %v10433_v53 = vld [vmem:[%s14365_s1 + $0x1620] ss:$16 sps:$4 sm:$0xff]   ;;  %v10436_v54 = vld [vmem:[%s14365_s1 + $0x1628] ss:$16 sps:$4 sm:$0xff]  }
 0x28c   :  { %6815 = vmatprep.subr.bf16.mxu0 %v10351_v55  ;;  %7503 = vmatprep.subr.bf16.mxu1 %v10354_v56  ;;  %v10441_v55 = vld [vmem:[%s14365_s1 + $0x1644] ss:$16 sps:$4 sm:$0xff]   ;;  %v10444_v56 = vld [vmem:[%s14365_s1 + $0x164c] ss:$16 sps:$4 sm:$0xff]  }
 0x28f   :  { %6816 = vmatpush1.bf16.msra.mxu0 %v10349_v57  ;;  %7504 = vmatpush1.bf16.msra.mxu1 %v10352_v58  ;;  %v10439_v57 = vld [vmem:[%s14365_s1 + $0x1640] ss:$16 sps:$4 sm:$0xff]   ;;  %v10442_v58 = vld [vmem:[%s14365_s1 + $0x1648] ss:$16 sps:$4 sm:$0xff]  }
 0x290   :  { %6817 = vmatprep.subr.bf16.mxu0 %v10357_v59  ;;  %7505 = vmatprep.subr.bf16.mxu1 %v10360_v60  ;;  %v10447_v59 = vld [vmem:[%s14365_s1 + $0x1664] ss:$16 sps:$4 sm:$0xff]   ;;  %v10450_v60 = vld [vmem:[%s14365_s1 + $0x166c] ss:$16 sps:$4 sm:$0xff]  }
 0x293   :  { %6818 = vmatpush1.bf16.msra.mxu0 %v10355_v61  ;;  %7506 = vmatpush1.bf16.msra.mxu1 %v10358_v62  ;;  %v10445_v61 = vld [vmem:[%s14365_s1 + $0x1660] ss:$16 sps:$4 sm:$0xff]   ;;  %v10448_v62 = vld [vmem:[%s14365_s1 + $0x1668] ss:$16 sps:$4 sm:$0xff]  }
 0x294   :  { %6819 = vmatprep.subr.bf16.mxu0 %v10363_v63  ;;  %7507 = vmatprep.subr.bf16.mxu1 %v10366_v0  ;;  %v10453_v63 = vld [vmem:[%s14365_s1 + $0x1684] ss:$16 sps:$4 sm:$0xff]   ;;  %v10456_v0 = vld [vmem:[%s14365_s1 + $0x168c] ss:$16 sps:$4 sm:$0xff]  }
 0x297   :  { %6820 = vmatpush1.bf16.msra.mxu0 %v10361_v1  ;;  %7508 = vmatpush1.bf16.msra.mxu1 %v10364_v2  ;;  %v10451_v1 = vld [vmem:[%s14365_s1 + $0x1680] ss:$16 sps:$4 sm:$0xff]   ;;  %v10454_v2 = vld [vmem:[%s14365_s1 + $0x1688] ss:$16 sps:$4 sm:$0xff]  }
 0x298   :  { %6821 = vmatprep.subr.bf16.mxu0 %v10369_v3  ;;  %7509 = vmatprep.subr.bf16.mxu1 %v10372_v4  ;;  %v10459_v3 = vld [vmem:[%s14365_s1 + $0x16a4] ss:$16 sps:$4 sm:$0xff]   ;;  %v10462_v4 = vld [vmem:[%s14365_s1 + $0x16ac] ss:$16 sps:$4 sm:$0xff]  }
 0x29b   :  { %6822 = vmatpush1.bf16.msra.mxu0 %v10367_v5  ;;  %7510 = vmatpush1.bf16.msra.mxu1 %v10370_v6  ;;  %v10457_v5 = vld [vmem:[%s14365_s1 + $0x16a0] ss:$16 sps:$4 sm:$0xff]   ;;  %v10460_v6 = vld [vmem:[%s14365_s1 + $0x16a8] ss:$16 sps:$4 sm:$0xff]  }
 0x29c   :  { %6823 = vmatprep.subr.bf16.mxu0 %v10375_v7  ;;  %7511 = vmatprep.subr.bf16.mxu1 %v10378_v8  ;;  %v10465_v7 = vld [vmem:[%s14365_s1 + $0x16c4] ss:$16 sps:$4 sm:$0xff]   ;;  %v10468_v8 = vld [vmem:[%s14365_s1 + $0x16cc] ss:$16 sps:$4 sm:$0xff]  }
 0x29f   :  { %6824 = vmatpush1.bf16.msra.mxu0 %v10373_v9  ;;  %7512 = vmatpush1.bf16.msra.mxu1 %v10376_v10  ;;  %v10463_v9 = vld [vmem:[%s14365_s1 + $0x16c0] ss:$16 sps:$4 sm:$0xff]   ;;  %v10466_v10 = vld [vmem:[%s14365_s1 + $0x16c8] ss:$16 sps:$4 sm:$0xff]  }
 0x2a0   :  { %6825 = vmatprep.subr.bf16.mxu0 %v10381_v11  ;;  %7513 = vmatprep.subr.bf16.mxu1 %v10384_v12  ;;  %v10471_v11 = vld [vmem:[%s14365_s1 + $0x16e4] ss:$16 sps:$4 sm:$0xff]   ;;  %v10474_v12 = vld [vmem:[%s14365_s1 + $0x16ec] ss:$16 sps:$4 sm:$0xff]  }
 0x2a3   :  { %6826 = vmatpush1.bf16.msra.mxu0 %v10379_v13  ;;  %7514 = vmatpush1.bf16.msra.mxu1 %v10382_v16  ;;  %v10469_v13 = vld [vmem:[%s14365_s1 + $0x16e0] ss:$16 sps:$4 sm:$0xff]   ;;  %v10472_v16 = vld [vmem:[%s14365_s1 + $0x16e8] ss:$16 sps:$4 sm:$0xff]  }
 0x2a4   :  { %6827 = vmatprep.subr.bf16.mxu0 %v10387_v17  ;;  %7515 = vmatprep.subr.bf16.mxu1 %v10390_v20  ;;  %v10477_v17 = vld [vmem:[%s14365_s1 + $0x1704] ss:$16 sps:$4 sm:$0xff]   ;;  %v10480_v20 = vld [vmem:[%s14365_s1 + $0x170c] ss:$16 sps:$4 sm:$0xff]  }
 0x2a7   :  { %6828 = vmatpush1.bf16.msra.mxu0 %v10385_v15  ;;  %7516 = vmatpush1.bf16.msra.mxu1 %v10388_v22  ;;  %v10475_v15 = vld [vmem:[%s14365_s1 + $0x1700] ss:$16 sps:$4 sm:$0xff]   ;;  %v10478_v22 = vld [vmem:[%s14365_s1 + $0x1708] ss:$16 sps:$4 sm:$0xff]  }
 0x2a8   :  { %6829 = vmatprep.subr.bf16.mxu0 %v10393_v23  ;;  %7517 = vmatprep.subr.bf16.mxu1 %v10396_v18  ;;  %v10483_v23 = vld [vmem:[%s14365_s1 + $0x1724] ss:$16 sps:$4 sm:$0xff]   ;;  %v10486_v18 = vld [vmem:[%s14365_s1 + $0x172c] ss:$16 sps:$4 sm:$0xff]  }
 0x2ab   :  { %6830 = vmatpush1.bf16.msra.mxu0 %v10391_v25  ;;  %7518 = vmatpush1.bf16.msra.mxu1 %v10394_v26  ;;  %v10481_v25 = vld [vmem:[%s14365_s1 + $0x1720] ss:$16 sps:$4 sm:$0xff]   ;;  %v10484_v26 = vld [vmem:[%s14365_s1 + $0x1728] ss:$16 sps:$4 sm:$0xff]  }
 0x2ac   :  { %6831 = vmatprep.subr.bf16.mxu0 %v10399_v27  ;;  %7519 = vmatprep.subr.bf16.mxu1 %v10402_v28  ;;  %v10489_v27 = vld [vmem:[%s14365_s1 + $0x1744] ss:$16 sps:$4 sm:$0xff]   ;;  %v10492_v28 = vld [vmem:[%s14365_s1 + $0x174c] ss:$16 sps:$4 sm:$0xff]  }
 0x2af   :  { %6832 = vmatpush1.bf16.msra.mxu0 %v10397_v29  ;;  %7520 = vmatpush1.bf16.msra.mxu1 %v10400_v30  ;;  %v10487_v29 = vld [vmem:[%s14365_s1 + $0x1740] ss:$16 sps:$4 sm:$0xff]   ;;  %v10490_v30 = vld [vmem:[%s14365_s1 + $0x1748] ss:$16 sps:$4 sm:$0xff]  }
 0x2b0   :  { %6833 = vmatprep.subr.bf16.mxu0 %v10405_v31  ;;  %7521 = vmatprep.subr.bf16.mxu1 %v10408_v32  ;;  %v10495_v31 = vld [vmem:[%s14365_s1 + $0x1764] ss:$16 sps:$4 sm:$0xff]   ;;  %v10498_v32 = vld [vmem:[%s14365_s1 + $0x176c] ss:$16 sps:$4 sm:$0xff]  }
 0x2b3   :  { %6834 = vmatpush1.bf16.msra.mxu0 %v10403_v33  ;;  %7522 = vmatpush1.bf16.msra.mxu1 %v10406_v34  ;;  %v10493_v33 = vld [vmem:[%s14365_s1 + $0x1760] ss:$16 sps:$4 sm:$0xff]   ;;  %v10496_v34 = vld [vmem:[%s14365_s1 + $0x1768] ss:$16 sps:$4 sm:$0xff]  }
 0x2b4   :  { %6835 = vmatprep.subr.bf16.mxu0 %v10411_v35  ;;  %7523 = vmatprep.subr.bf16.mxu1 %v10414_v36  ;;  %v10501_v35 = vld [vmem:[%s14365_s1 + $0x1784] ss:$16 sps:$4 sm:$0xff]   ;;  %v10504_v36 = vld [vmem:[%s14365_s1 + $0x178c] ss:$16 sps:$4 sm:$0xff]  }
 0x2b7   :  { %6836 = vmatpush1.bf16.msra.mxu0 %v10409_v37  ;;  %7524 = vmatpush1.bf16.msra.mxu1 %v10412_v38  ;;  %v10499_v37 = vld [vmem:[%s14365_s1 + $0x1780] ss:$16 sps:$4 sm:$0xff]   ;;  %v10502_v38 = vld [vmem:[%s14365_s1 + $0x1788] ss:$16 sps:$4 sm:$0xff]  }
 0x2b8   :  { %6837 = vmatprep.subr.bf16.mxu0 %v10417_v39  ;;  %7525 = vmatprep.subr.bf16.mxu1 %v10420_v40  ;;  %v10507_v39 = vld [vmem:[%s14365_s1 + $0x17a4] ss:$16 sps:$4 sm:$0xff]   ;;  %v10510_v40 = vld [vmem:[%s14365_s1 + $0x17ac] ss:$16 sps:$4 sm:$0xff]  }
 0x2bb   :  { %6838 = vmatpush1.bf16.msra.mxu0 %v10415_v41  ;;  %7526 = vmatpush1.bf16.msra.mxu1 %v10418_v42  ;;  %v10505_v41 = vld [vmem:[%s14365_s1 + $0x17a0] ss:$16 sps:$4 sm:$0xff]   ;;  %v10508_v42 = vld [vmem:[%s14365_s1 + $0x17a8] ss:$16 sps:$4 sm:$0xff]  }
 0x2bc   :  { %6839 = vmatprep.subr.bf16.mxu0 %v10423_v43  ;;  %7527 = vmatprep.subr.bf16.mxu1 %v10426_v44  ;;  %v10513_v43 = vld [vmem:[%s14365_s1 + $0x17c4] ss:$16 sps:$4 sm:$0xff]   ;;  %v10516_v44 = vld [vmem:[%s14365_s1 + $0x17cc] ss:$16 sps:$4 sm:$0xff]  }
 0x2bf   :  { %6840 = vmatpush1.bf16.msra.mxu0 %v10421_v14  ;;  %7528 = vmatpush1.bf16.msra.mxu1 %v10424_v46  ;;  %v10511_v14 = vld [vmem:[%s14365_s1 + $0x17c0] ss:$16 sps:$4 sm:$0xff]   ;;  %v10514_v46 = vld [vmem:[%s14365_s1 + $0x17c8] ss:$16 sps:$4 sm:$0xff]  }
 0x2c0   :  { %6852 = vmatprep.subr.bf16.mxu0 %v10429_v19  ;;  %7540 = vmatprep.subr.bf16.mxu1 %v10432_v24  ;;  %v10519_v19 = vld [vmem:[%s14365_s1 + $0x17e4] ss:$16 sps:$4 sm:$0xff]   ;;  %v10522_v24 = vld [vmem:[%s14365_s1 + $0x17ec] ss:$16 sps:$4 sm:$0xff]  }
 0x2c2   :  { %6842 = vmatmul.mubr.bf16.vlgmr.msra.gmra.mrb[0].mxu0 %v8130_v47  ;;  %7530 = vmatmul.mubr.bf16.vlgmr.msra.gmra.mrb[0].mxu1 %v8130_v47  ;;  %v10517_v47 = vld [vmem:[%s14365_s1 + $0x17e0] ss:$16 sps:$4 sm:$0xff]  }
 0x2c3   :  { %6853 = vmatpush1.bf16.msra.mxu0 %v10427_v50  ;;  %7541 = vmatpush1.bf16.msra.mxu1 %v10430_v21  ;;  %v10520_v50 = vld [vmem:[%s14365_s1 + $0x17e8] ss:$16 sps:$4 sm:$0xff]   ;;  %v10525_v21 = vld [vmem:[%s14365_s1 + $0x1804] ss:$16 sps:$4 sm:$0xff]  }
 0x2c4   :  { %6854 = vmatprep.subr.bf16.mxu0 %v10435_v45  ;;  %7542 = vmatprep.subr.bf16.mxu1 %v10438_v51  ;;  %v10528_v45 = vld [vmem:[%s14365_s1 + $0x180c] ss:$16 sps:$4 sm:$0xff]   ;;  %v8132_v51 = vcombine.low %v13236_v48, %v13241_v49  ;;  %v10526_v48 = vld [vmem:[%s14365_s1 + $0x1808] ss:$16 sps:$4 sm:$0xff]   ;;  %v10531_v49 = vld [vmem:[%s14365_s1 + $0x1824] ss:$16 sps:$4 sm:$0xff]  }
 0x2c5   :  { %6884 = vmatprep.mubr.bf16.mxu0 %v8133_v52  ;;  %7572 = vmatprep.mubr.bf16.mxu1 %v8133_v52  ;;  %v13442_v52 = vld [vmem:[%s14366_s0 + $0x60] sm:$0xff] }
 0x2c7   :  { %6855 = vmatpush1.bf16.msra.mxu0 %v10433_v53  ;;  %7543 = vmatpush1.bf16.msra.mxu1 %v10436_v54  ;;  %v13447_v53 = vld [vmem:[%s14366_s0 + $0xe0] sm:$0xff] }
 0x2c8   :  { %6856 = vmatprep.subr.bf16.mxu0 %v10441_v55  ;;  %7544 = vmatprep.subr.bf16.mxu1 %v10444_v56  ;;  %v10523_v54 = vld [vmem:[%s14365_s1 + $0x1800] ss:$16 sps:$4 sm:$0xff]   ;;  %v10534_v55 = vld [vmem:[%s14365_s1 + $0x182c] ss:$16 sps:$4 sm:$0xff]   ;;  %v8135_v56 = vcombine.high %v13442_v52, %v13447_v53 }
 0x2cb   :  { %6857 = vmatpush1.bf16.msra.mxu0 %v10439_v57  ;;  %7545 = vmatpush1.bf16.msra.mxu1 %v10442_v58  ;;  %v10529_v57 = vld [vmem:[%s14365_s1 + $0x1820] ss:$16 sps:$4 sm:$0xff]   ;;  %v10532_v58 = vld [vmem:[%s14365_s1 + $0x1828] ss:$16 sps:$4 sm:$0xff]  }
 0x2cc   :  { %6858 = vmatprep.subr.bf16.mxu0 %v10447_v59  ;;  %7546 = vmatprep.subr.bf16.mxu1 %v10450_v60  ;;  %v10537_v59 = vld [vmem:[%s14365_s1 + $0x1844] ss:$16 sps:$4 sm:$0xff]   ;;  %v10540_v60 = vld [vmem:[%s14365_s1 + $0x184c] ss:$16 sps:$4 sm:$0xff]  }
 0x2cf   :  { %6859 = vmatpush1.bf16.msra.mxu0 %v10445_v61  ;;  %7547 = vmatpush1.bf16.msra.mxu1 %v10448_v62  ;;  %v10535_v61 = vld [vmem:[%s14365_s1 + $0x1840] ss:$16 sps:$4 sm:$0xff]   ;;  %v10538_v62 = vld [vmem:[%s14365_s1 + $0x1848] ss:$16 sps:$4 sm:$0xff]  }
 0x2d0   :  { %6860 = vmatprep.subr.bf16.mxu0 %v10453_v63  ;;  %7548 = vmatprep.subr.bf16.mxu1 %v10456_v0  ;;  %v10543_v63 = vld [vmem:[%s14365_s1 + $0x1864] ss:$16 sps:$4 sm:$0xff]   ;;  %v10546_v0 = vld [vmem:[%s14365_s1 + $0x186c] ss:$16 sps:$4 sm:$0xff]  }
 0x2d3   :  { %6861 = vmatpush1.bf16.msra.mxu0 %v10451_v1  ;;  %7549 = vmatpush1.bf16.msra.mxu1 %v10454_v2  ;;  %v10541_v1 = vld [vmem:[%s14365_s1 + $0x1860] ss:$16 sps:$4 sm:$0xff]   ;;  %v10544_v2 = vld [vmem:[%s14365_s1 + $0x1868] ss:$16 sps:$4 sm:$0xff]  }
 0x2d4   :  { %6862 = vmatprep.subr.bf16.mxu0 %v10459_v3  ;;  %7550 = vmatprep.subr.bf16.mxu1 %v10462_v4  ;;  %v10549_v3 = vld [vmem:[%s14365_s1 + $0x1884] ss:$16 sps:$4 sm:$0xff]   ;;  %v10552_v4 = vld [vmem:[%s14365_s1 + $0x188c] ss:$16 sps:$4 sm:$0xff]  }
 0x2d7   :  { %6863 = vmatpush1.bf16.msra.mxu0 %v10457_v5  ;;  %7551 = vmatpush1.bf16.msra.mxu1 %v10460_v6  ;;  %v10547_v5 = vld [vmem:[%s14365_s1 + $0x1880] ss:$16 sps:$4 sm:$0xff]   ;;  %v10550_v6 = vld [vmem:[%s14365_s1 + $0x1888] ss:$16 sps:$4 sm:$0xff]  }
 0x2d8   :  { %6864 = vmatprep.subr.bf16.mxu0 %v10465_v7  ;;  %7552 = vmatprep.subr.bf16.mxu1 %v10468_v8  ;;  %v10555_v7 = vld [vmem:[%s14365_s1 + $0x18a4] ss:$16 sps:$4 sm:$0xff]   ;;  %v10558_v8 = vld [vmem:[%s14365_s1 + $0x18ac] ss:$16 sps:$4 sm:$0xff]  }
 0x2db   :  { %6865 = vmatpush1.bf16.msra.mxu0 %v10463_v9  ;;  %7553 = vmatpush1.bf16.msra.mxu1 %v10466_v10  ;;  %v10553_v9 = vld [vmem:[%s14365_s1 + $0x18a0] ss:$16 sps:$4 sm:$0xff]   ;;  %v10556_v10 = vld [vmem:[%s14365_s1 + $0x18a8] ss:$16 sps:$4 sm:$0xff]  }
 0x2dc   :  { %6866 = vmatprep.subr.bf16.mxu0 %v10471_v11  ;;  %7554 = vmatprep.subr.bf16.mxu1 %v10474_v12  ;;  %v10561_v11 = vld [vmem:[%s14365_s1 + $0x18c4] ss:$16 sps:$4 sm:$0xff]   ;;  %v10564_v12 = vld [vmem:[%s14365_s1 + $0x18cc] ss:$16 sps:$4 sm:$0xff]  }
 0x2df   :  { %6867 = vmatpush1.bf16.msra.mxu0 %v10469_v13  ;;  %7555 = vmatpush1.bf16.msra.mxu1 %v10472_v16  ;;  %v10559_v13 = vld [vmem:[%s14365_s1 + $0x18c0] ss:$16 sps:$4 sm:$0xff]   ;;  %v10562_v16 = vld [vmem:[%s14365_s1 + $0x18c8] ss:$16 sps:$4 sm:$0xff]  }
 0x2e0   :  { %6868 = vmatprep.subr.bf16.mxu0 %v10477_v17  ;;  %7556 = vmatprep.subr.bf16.mxu1 %v10480_v20  ;;  %v10567_v17 = vld [vmem:[%s14365_s1 + $0x18e4] ss:$16 sps:$4 sm:$0xff]   ;;  %v10570_v20 = vld [vmem:[%s14365_s1 + $0x18ec] ss:$16 sps:$4 sm:$0xff]  }
 0x2e3   :  { %6869 = vmatpush1.bf16.msra.mxu0 %v10475_v15  ;;  %7557 = vmatpush1.bf16.msra.mxu1 %v10478_v22  ;;  %v10565_v15 = vld [vmem:[%s14365_s1 + $0x18e0] ss:$16 sps:$4 sm:$0xff]   ;;  %v10568_v22 = vld [vmem:[%s14365_s1 + $0x18e8] ss:$16 sps:$4 sm:$0xff]  }
 0x2e4   :  { %6870 = vmatprep.subr.bf16.mxu0 %v10483_v23  ;;  %7558 = vmatprep.subr.bf16.mxu1 %v10486_v18  ;;  %v10573_v23 = vld [vmem:[%s14365_s1 + $0x1904] ss:$16 sps:$4 sm:$0xff]   ;;  %v10576_v18 = vld [vmem:[%s14365_s1 + $0x190c] ss:$16 sps:$4 sm:$0xff]  }
 0x2e7   :  { %6871 = vmatpush1.bf16.msra.mxu0 %v10481_v25  ;;  %7559 = vmatpush1.bf16.msra.mxu1 %v10484_v26  ;;  %v10571_v25 = vld [vmem:[%s14365_s1 + $0x1900] ss:$16 sps:$4 sm:$0xff]   ;;  %v10574_v26 = vld [vmem:[%s14365_s1 + $0x1908] ss:$16 sps:$4 sm:$0xff]  }
 0x2e8   :  { %6872 = vmatprep.subr.bf16.mxu0 %v10489_v27  ;;  %7560 = vmatprep.subr.bf16.mxu1 %v10492_v28  ;;  %v10579_v27 = vld [vmem:[%s14365_s1 + $0x1924] ss:$16 sps:$4 sm:$0xff]   ;;  %v10582_v28 = vld [vmem:[%s14365_s1 + $0x192c] ss:$16 sps:$4 sm:$0xff]  }
 0x2eb   :  { %6873 = vmatpush1.bf16.msra.mxu0 %v10487_v29  ;;  %7561 = vmatpush1.bf16.msra.mxu1 %v10490_v30  ;;  %v10577_v29 = vld [vmem:[%s14365_s1 + $0x1920] ss:$16 sps:$4 sm:$0xff]   ;;  %v10580_v30 = vld [vmem:[%s14365_s1 + $0x1928] ss:$16 sps:$4 sm:$0xff]  }
 0x2ec   :  { %6874 = vmatprep.subr.bf16.mxu0 %v10495_v31  ;;  %7562 = vmatprep.subr.bf16.mxu1 %v10498_v32  ;;  %v10585_v31 = vld [vmem:[%s14365_s1 + $0x1944] ss:$16 sps:$4 sm:$0xff]   ;;  %v10588_v32 = vld [vmem:[%s14365_s1 + $0x194c] ss:$16 sps:$4 sm:$0xff]  }
 0x2ef   :  { %6875 = vmatpush1.bf16.msra.mxu0 %v10493_v33  ;;  %7563 = vmatpush1.bf16.msra.mxu1 %v10496_v34  ;;  %v10583_v33 = vld [vmem:[%s14365_s1 + $0x1940] ss:$16 sps:$4 sm:$0xff]   ;;  %v10586_v34 = vld [vmem:[%s14365_s1 + $0x1948] ss:$16 sps:$4 sm:$0xff]  }
 0x2f0   :  { %6876 = vmatprep.subr.bf16.mxu0 %v10501_v35  ;;  %7564 = vmatprep.subr.bf16.mxu1 %v10504_v36  ;;  %v10591_v35 = vld [vmem:[%s14365_s1 + $0x1964] ss:$16 sps:$4 sm:$0xff]   ;;  %v10594_v36 = vld [vmem:[%s14365_s1 + $0x196c] ss:$16 sps:$4 sm:$0xff]  }
 0x2f3   :  { %6877 = vmatpush1.bf16.msra.mxu0 %v10499_v37  ;;  %7565 = vmatpush1.bf16.msra.mxu1 %v10502_v38  ;;  %v10589_v37 = vld [vmem:[%s14365_s1 + $0x1960] ss:$16 sps:$4 sm:$0xff]   ;;  %v10592_v38 = vld [vmem:[%s14365_s1 + $0x1968] ss:$16 sps:$4 sm:$0xff]  }
 0x2f4   :  { %6878 = vmatprep.subr.bf16.mxu0 %v10507_v39  ;;  %7566 = vmatprep.subr.bf16.mxu1 %v10510_v40  ;;  %v10597_v39 = vld [vmem:[%s14365_s1 + $0x1984] ss:$16 sps:$4 sm:$0xff]   ;;  %v10600_v40 = vld [vmem:[%s14365_s1 + $0x198c] ss:$16 sps:$4 sm:$0xff]  }
 0x2f7   :  { %6879 = vmatpush1.bf16.msra.mxu0 %v10505_v41  ;;  %7567 = vmatpush1.bf16.msra.mxu1 %v10508_v42  ;;  %v10595_v41 = vld [vmem:[%s14365_s1 + $0x1980] ss:$16 sps:$4 sm:$0xff]   ;;  %v10598_v42 = vld [vmem:[%s14365_s1 + $0x1988] ss:$16 sps:$4 sm:$0xff]  }
 0x2f8   :  { %6880 = vmatprep.subr.bf16.mxu0 %v10513_v43  ;;  %7568 = vmatprep.subr.bf16.mxu1 %v10516_v44  ;;  %v10603_v43 = vld [vmem:[%s14365_s1 + $0x19a4] ss:$16 sps:$4 sm:$0xff]   ;;  %v10606_v44 = vld [vmem:[%s14365_s1 + $0x19ac] ss:$16 sps:$4 sm:$0xff]  }
 0x2fb   :  { %6881 = vmatpush1.bf16.msra.mxu0 %v10511_v14  ;;  %7569 = vmatpush1.bf16.msra.mxu1 %v10514_v46  ;;  %v10601_v14 = vld [vmem:[%s14365_s1 + $0x19a0] ss:$16 sps:$4 sm:$0xff]   ;;  %v10604_v46 = vld [vmem:[%s14365_s1 + $0x19a8] ss:$16 sps:$4 sm:$0xff]  }
 0x2fc   :  { %6882 = vmatprep.subr.bf16.mxu0 %v10519_v19  ;;  %7570 = vmatprep.subr.bf16.mxu1 %v10522_v24  ;;  %v10609_v19 = vld [vmem:[%s14365_s1 + $0x19c4] ss:$16 sps:$4 sm:$0xff]   ;;  %v10612_v24 = vld [vmem:[%s14365_s1 + $0x19cc] ss:$16 sps:$4 sm:$0xff]  }
 0x2ff   :  { %6883 = vmatpush1.bf16.msra.mxu0 %v10517_v47  ;;  %7571 = vmatpush1.bf16.msra.mxu1 %v10520_v50  ;;  %v10607_v47 = vld [vmem:[%s14365_s1 + $0x19c0] ss:$16 sps:$4 sm:$0xff]   ;;  %v10610_v50 = vld [vmem:[%s14365_s1 + $0x19c8] ss:$16 sps:$4 sm:$0xff]  }
 0x300   :  { %6895 = vmatprep.subr.bf16.mxu0 %v10525_v21  ;;  %7583 = vmatprep.subr.bf16.mxu1 %v10528_v45  ;;  %v10615_v21 = vld [vmem:[%s14365_s1 + $0x19e4] ss:$16 sps:$4 sm:$0xff]   ;;  %v10618_v45 = vld [vmem:[%s14365_s1 + $0x19ec] ss:$16 sps:$4 sm:$0xff]  }
 0x302   :  { %6885 = vmatmul.mubr.bf16.vlgmr.msra.gmra.mrb[0].mxu0 %v8132_v51  ;;  %7573 = vmatmul.mubr.bf16.vlgmr.msra.gmra.mrb[0].mxu1 %v8132_v51  ;;  %v10613_v51 = vld [vmem:[%s14365_s1 + $0x19e0] ss:$16 sps:$4 sm:$0xff]  }
 0x303   :  { %6896 = vmatpush1.bf16.msra.mxu0 %v10523_v54  ;;  %7584 = vmatpush1.bf16.msra.mxu1 %v10526_v48  ;;  %v10616_v54 = vld [vmem:[%s14365_s1 + $0x19e8] ss:$16 sps:$4 sm:$0xff]   ;;  %v10621_v48 = vld [vmem:[%s14365_s1 + $0x1a04] ss:$16 sps:$4 sm:$0xff]  }
 0x304   :  { %6897 = vmatprep.subr.bf16.mxu0 %v10531_v49  ;;  %7585 = vmatprep.subr.bf16.mxu1 %v10534_v55  ;;  %v10624_v49 = vld [vmem:[%s14365_s1 + $0x1a0c] ss:$16 sps:$4 sm:$0xff]   ;;  %v8134_v55 = vcombine.low %v13442_v52, %v13447_v53  ;;  %v10622_v52 = vld [vmem:[%s14365_s1 + $0x1a08] ss:$16 sps:$4 sm:$0xff]   ;;  %v10627_v53 = vld [vmem:[%s14365_s1 + $0x1a24] ss:$16 sps:$4 sm:$0xff]  }
 0x305   :  { %6927 = vmatprep.mubr.bf16.mxu0 %v8135_v56  ;;  %7615 = vmatprep.mubr.bf16.mxu1 %v8135_v56  ;;  %v13648_v56 = vld [vmem:[%s14366_s0 + $0x68] sm:$0xff] }
 0x307   :  { %6898 = vmatpush1.bf16.msra.mxu0 %v10529_v57  ;;  %7586 = vmatpush1.bf16.msra.mxu1 %v10532_v58  ;;  %v13653_v57 = vld [vmem:[%s14366_s0 + $0xe8] sm:$0xff]  ;;  %v10619_v58 = vld [vmem:[%s14365_s1 + $0x1a00] ss:$16 sps:$4 sm:$0xff]  }
 0x308   :  { %6899 = vmatprep.subr.bf16.mxu0 %v10537_v59  ;;  %7587 = vmatprep.subr.bf16.mxu1 %v10540_v60  ;;  %v10630_v59 = vld [vmem:[%s14365_s1 + $0x1a2c] ss:$16 sps:$4 sm:$0xff]   ;;  %v8137_v60 = vcombine.high %v13648_v56, %v13653_v57 }
 0x30b   :  { %6900 = vmatpush1.bf16.msra.mxu0 %v10535_v61  ;;  %7588 = vmatpush1.bf16.msra.mxu1 %v10538_v62  ;;  %v10625_v61 = vld [vmem:[%s14365_s1 + $0x1a20] ss:$16 sps:$4 sm:$0xff]   ;;  %v10628_v62 = vld [vmem:[%s14365_s1 + $0x1a28] ss:$16 sps:$4 sm:$0xff]  }
 0x30c   :  { %6901 = vmatprep.subr.bf16.mxu0 %v10543_v63  ;;  %7589 = vmatprep.subr.bf16.mxu1 %v10546_v0  ;;  %v10633_v63 = vld [vmem:[%s14365_s1 + $0x1a44] ss:$16 sps:$4 sm:$0xff]   ;;  %v10636_v0 = vld [vmem:[%s14365_s1 + $0x1a4c] ss:$16 sps:$4 sm:$0xff]  }
 0x30f   :  { %6902 = vmatpush1.bf16.msra.mxu0 %v10541_v1  ;;  %7590 = vmatpush1.bf16.msra.mxu1 %v10544_v2  ;;  %v10631_v1 = vld [vmem:[%s14365_s1 + $0x1a40] ss:$16 sps:$4 sm:$0xff]   ;;  %v10634_v2 = vld [vmem:[%s14365_s1 + $0x1a48] ss:$16 sps:$4 sm:$0xff]  }
 0x310   :  { %6903 = vmatprep.subr.bf16.mxu0 %v10549_v3  ;;  %7591 = vmatprep.subr.bf16.mxu1 %v10552_v4  ;;  %v10639_v3 = vld [vmem:[%s14365_s1 + $0x1a64] ss:$16 sps:$4 sm:$0xff]   ;;  %v10642_v4 = vld [vmem:[%s14365_s1 + $0x1a6c] ss:$16 sps:$4 sm:$0xff]  }
 0x313   :  { %6904 = vmatpush1.bf16.msra.mxu0 %v10547_v5  ;;  %7592 = vmatpush1.bf16.msra.mxu1 %v10550_v6  ;;  %v10637_v5 = vld [vmem:[%s14365_s1 + $0x1a60] ss:$16 sps:$4 sm:$0xff]   ;;  %v10640_v6 = vld [vmem:[%s14365_s1 + $0x1a68] ss:$16 sps:$4 sm:$0xff]  }
 0x314   :  { %6905 = vmatprep.subr.bf16.mxu0 %v10555_v7  ;;  %7593 = vmatprep.subr.bf16.mxu1 %v10558_v8  ;;  %v10645_v7 = vld [vmem:[%s14365_s1 + $0x1a84] ss:$16 sps:$4 sm:$0xff]   ;;  %v10648_v8 = vld [vmem:[%s14365_s1 + $0x1a8c] ss:$16 sps:$4 sm:$0xff]  }
 0x317   :  { %6906 = vmatpush1.bf16.msra.mxu0 %v10553_v9  ;;  %7594 = vmatpush1.bf16.msra.mxu1 %v10556_v10  ;;  %v10643_v9 = vld [vmem:[%s14365_s1 + $0x1a80] ss:$16 sps:$4 sm:$0xff]   ;;  %v10646_v10 = vld [vmem:[%s14365_s1 + $0x1a88] ss:$16 sps:$4 sm:$0xff]  }
 0x318   :  { %6907 = vmatprep.subr.bf16.mxu0 %v10561_v11  ;;  %7595 = vmatprep.subr.bf16.mxu1 %v10564_v12  ;;  %v10651_v11 = vld [vmem:[%s14365_s1 + $0x1aa4] ss:$16 sps:$4 sm:$0xff]   ;;  %v10654_v12 = vld [vmem:[%s14365_s1 + $0x1aac] ss:$16 sps:$4 sm:$0xff]  }
 0x31b   :  { %6908 = vmatpush1.bf16.msra.mxu0 %v10559_v13  ;;  %7596 = vmatpush1.bf16.msra.mxu1 %v10562_v16  ;;  %v10649_v13 = vld [vmem:[%s14365_s1 + $0x1aa0] ss:$16 sps:$4 sm:$0xff]   ;;  %v10652_v16 = vld [vmem:[%s14365_s1 + $0x1aa8] ss:$16 sps:$4 sm:$0xff]  }
 0x31c   :  { %6909 = vmatprep.subr.bf16.mxu0 %v10567_v17  ;;  %7597 = vmatprep.subr.bf16.mxu1 %v10570_v20  ;;  %v10657_v17 = vld [vmem:[%s14365_s1 + $0x1ac4] ss:$16 sps:$4 sm:$0xff]   ;;  %v10660_v20 = vld [vmem:[%s14365_s1 + $0x1acc] ss:$16 sps:$4 sm:$0xff]  }
 0x31f   :  { %6910 = vmatpush1.bf16.msra.mxu0 %v10565_v15  ;;  %7598 = vmatpush1.bf16.msra.mxu1 %v10568_v22  ;;  %v10655_v15 = vld [vmem:[%s14365_s1 + $0x1ac0] ss:$16 sps:$4 sm:$0xff]   ;;  %v10658_v22 = vld [vmem:[%s14365_s1 + $0x1ac8] ss:$16 sps:$4 sm:$0xff]  }
 0x320   :  { %6911 = vmatprep.subr.bf16.mxu0 %v10573_v23  ;;  %7599 = vmatprep.subr.bf16.mxu1 %v10576_v18  ;;  %v10663_v23 = vld [vmem:[%s14365_s1 + $0x1ae4] ss:$16 sps:$4 sm:$0xff]   ;;  %v10666_v18 = vld [vmem:[%s14365_s1 + $0x1aec] ss:$16 sps:$4 sm:$0xff]  }
 0x323   :  { %6912 = vmatpush1.bf16.msra.mxu0 %v10571_v25  ;;  %7600 = vmatpush1.bf16.msra.mxu1 %v10574_v26  ;;  %v10661_v25 = vld [vmem:[%s14365_s1 + $0x1ae0] ss:$16 sps:$4 sm:$0xff]   ;;  %v10664_v26 = vld [vmem:[%s14365_s1 + $0x1ae8] ss:$16 sps:$4 sm:$0xff]  }
 0x324   :  { %6913 = vmatprep.subr.bf16.mxu0 %v10579_v27  ;;  %7601 = vmatprep.subr.bf16.mxu1 %v10582_v28  ;;  %v10669_v27 = vld [vmem:[%s14365_s1 + $0x1b04] ss:$16 sps:$4 sm:$0xff]   ;;  %v10672_v28 = vld [vmem:[%s14365_s1 + $0x1b0c] ss:$16 sps:$4 sm:$0xff]  }
 0x327   :  { %6914 = vmatpush1.bf16.msra.mxu0 %v10577_v29  ;;  %7602 = vmatpush1.bf16.msra.mxu1 %v10580_v30  ;;  %v10667_v29 = vld [vmem:[%s14365_s1 + $0x1b00] ss:$16 sps:$4 sm:$0xff]   ;;  %v10670_v30 = vld [vmem:[%s14365_s1 + $0x1b08] ss:$16 sps:$4 sm:$0xff]  }
 0x328   :  { %6915 = vmatprep.subr.bf16.mxu0 %v10585_v31  ;;  %7603 = vmatprep.subr.bf16.mxu1 %v10588_v32  ;;  %v10675_v31 = vld [vmem:[%s14365_s1 + $0x1b24] ss:$16 sps:$4 sm:$0xff]   ;;  %v10678_v32 = vld [vmem:[%s14365_s1 + $0x1b2c] ss:$16 sps:$4 sm:$0xff]  }
 0x32b   :  { %6916 = vmatpush1.bf16.msra.mxu0 %v10583_v33  ;;  %7604 = vmatpush1.bf16.msra.mxu1 %v10586_v34  ;;  %v10673_v33 = vld [vmem:[%s14365_s1 + $0x1b20] ss:$16 sps:$4 sm:$0xff]   ;;  %v10676_v34 = vld [vmem:[%s14365_s1 + $0x1b28] ss:$16 sps:$4 sm:$0xff]  }
 0x32c   :  { %6917 = vmatprep.subr.bf16.mxu0 %v10591_v35  ;;  %7605 = vmatprep.subr.bf16.mxu1 %v10594_v36  ;;  %v10681_v35 = vld [vmem:[%s14365_s1 + $0x1b44] ss:$16 sps:$4 sm:$0xff]   ;;  %v10684_v36 = vld [vmem:[%s14365_s1 + $0x1b4c] ss:$16 sps:$4 sm:$0xff]  }
 0x32f   :  { %6918 = vmatpush1.bf16.msra.mxu0 %v10589_v37  ;;  %7606 = vmatpush1.bf16.msra.mxu1 %v10592_v38  ;;  %v10679_v37 = vld [vmem:[%s14365_s1 + $0x1b40] ss:$16 sps:$4 sm:$0xff]   ;;  %v10682_v38 = vld [vmem:[%s14365_s1 + $0x1b48] ss:$16 sps:$4 sm:$0xff]  }
 0x330   :  { %6919 = vmatprep.subr.bf16.mxu0 %v10597_v39  ;;  %7607 = vmatprep.subr.bf16.mxu1 %v10600_v40  ;;  %v10687_v39 = vld [vmem:[%s14365_s1 + $0x1b64] ss:$16 sps:$4 sm:$0xff]   ;;  %v10690_v40 = vld [vmem:[%s14365_s1 + $0x1b6c] ss:$16 sps:$4 sm:$0xff]  }
 0x333   :  { %6920 = vmatpush1.bf16.msra.mxu0 %v10595_v41  ;;  %7608 = vmatpush1.bf16.msra.mxu1 %v10598_v42  ;;  %v10685_v41 = vld [vmem:[%s14365_s1 + $0x1b60] ss:$16 sps:$4 sm:$0xff]   ;;  %v10688_v42 = vld [vmem:[%s14365_s1 + $0x1b68] ss:$16 sps:$4 sm:$0xff]  }
 0x334   :  { %6921 = vmatprep.subr.bf16.mxu0 %v10603_v43  ;;  %7609 = vmatprep.subr.bf16.mxu1 %v10606_v44  ;;  %v10693_v43 = vld [vmem:[%s14365_s1 + $0x1b84] ss:$16 sps:$4 sm:$0xff]   ;;  %v10696_v44 = vld [vmem:[%s14365_s1 + $0x1b8c] ss:$16 sps:$4 sm:$0xff]  }
 0x337   :  { %6922 = vmatpush1.bf16.msra.mxu0 %v10601_v14  ;;  %7610 = vmatpush1.bf16.msra.mxu1 %v10604_v46  ;;  %v10691_v14 = vld [vmem:[%s14365_s1 + $0x1b80] ss:$16 sps:$4 sm:$0xff]   ;;  %v10694_v46 = vld [vmem:[%s14365_s1 + $0x1b88] ss:$16 sps:$4 sm:$0xff]  }
 0x338   :  { %6923 = vmatprep.subr.bf16.mxu0 %v10609_v19  ;;  %7611 = vmatprep.subr.bf16.mxu1 %v10612_v24  ;;  %v10699_v19 = vld [vmem:[%s14365_s1 + $0x1ba4] ss:$16 sps:$4 sm:$0xff]   ;;  %v10702_v24 = vld [vmem:[%s14365_s1 + $0x1bac] ss:$16 sps:$4 sm:$0xff]  }
 0x33b   :  { %6924 = vmatpush1.bf16.msra.mxu0 %v10607_v47  ;;  %7612 = vmatpush1.bf16.msra.mxu1 %v10610_v50  ;;  %v10697_v47 = vld [vmem:[%s14365_s1 + $0x1ba0] ss:$16 sps:$4 sm:$0xff]   ;;  %v10700_v50 = vld [vmem:[%s14365_s1 + $0x1ba8] ss:$16 sps:$4 sm:$0xff]  }
 0x33c   :  { %6925 = vmatprep.subr.bf16.mxu0 %v10615_v21  ;;  %7613 = vmatprep.subr.bf16.mxu1 %v10618_v45  ;;  %v10705_v21 = vld [vmem:[%s14365_s1 + $0x1bc4] ss:$16 sps:$4 sm:$0xff]   ;;  %v10708_v45 = vld [vmem:[%s14365_s1 + $0x1bcc] ss:$16 sps:$4 sm:$0xff]  }
 0x33f   :  { %6926 = vmatpush1.bf16.msra.mxu0 %v10613_v51  ;;  %7614 = vmatpush1.bf16.msra.mxu1 %v10616_v54  ;;  %v10703_v51 = vld [vmem:[%s14365_s1 + $0x1bc0] ss:$16 sps:$4 sm:$0xff]   ;;  %v10706_v54 = vld [vmem:[%s14365_s1 + $0x1bc8] ss:$16 sps:$4 sm:$0xff]  }
 0x340   :  { %6938 = vmatprep.subr.bf16.mxu0 %v10621_v48  ;;  %7626 = vmatprep.subr.bf16.mxu1 %v10624_v49  ;;  %v10711_v48 = vld [vmem:[%s14365_s1 + $0x1be4] ss:$16 sps:$4 sm:$0xff]   ;;  %v10714_v49 = vld [vmem:[%s14365_s1 + $0x1bec] ss:$16 sps:$4 sm:$0xff]  }
 0x342   :  { %6928 = vmatmul.mubr.bf16.vlgmr.msra.gmra.mrb[0].mxu0 %v8134_v55  ;;  %7616 = vmatmul.mubr.bf16.vlgmr.msra.gmra.mrb[0].mxu1 %v8134_v55  ;;  %v10709_v55 = vld [vmem:[%s14365_s1 + $0x1be0] ss:$16 sps:$4 sm:$0xff]  }
 0x343   :  { %6939 = vmatpush1.bf16.msra.mxu0 %v10619_v58  ;;  %7627 = vmatpush1.bf16.msra.mxu1 %v10622_v52  ;;  %v10712_v58 = vld [vmem:[%s14365_s1 + $0x1be8] ss:$16 sps:$4 sm:$0xff]   ;;  %v10717_v52 = vld [vmem:[%s14365_s1 + $0x1c04] ss:$16 sps:$4 sm:$0xff]  }
 0x344   :  { %6940 = vmatprep.subr.bf16.mxu0 %v10627_v53  ;;  %7628 = vmatprep.subr.bf16.mxu1 %v10630_v59  ;;  %v10720_v53 = vld [vmem:[%s14365_s1 + $0x1c0c] ss:$16 sps:$4 sm:$0xff]   ;;  %v8136_v59 = vcombine.low %v13648_v56, %v13653_v57  ;;  %v10718_v56 = vld [vmem:[%s14365_s1 + $0x1c08] ss:$16 sps:$4 sm:$0xff]   ;;  %v10723_v57 = vld [vmem:[%s14365_s1 + $0x1c24] ss:$16 sps:$4 sm:$0xff]  }
 0x345   :  { %6970 = vmatprep.mubr.bf16.mxu0 %v8137_v60  ;;  %7658 = vmatprep.mubr.bf16.mxu1 %v8137_v60  ;;  %v13854_v60 = vld [vmem:[%s14366_s0 + $0x70] sm:$0xff] }
 0x347   :  { %6941 = vmatpush1.bf16.msra.mxu0 %v10625_v61  ;;  %7629 = vmatpush1.bf16.msra.mxu1 %v10628_v62  ;;  %v13859_v61 = vld [vmem:[%s14366_s0 + $0xf0] sm:$0xff] }
 0x348   :  { %6942 = vmatprep.subr.bf16.mxu0 %v10633_v63  ;;  %7630 = vmatprep.subr.bf16.mxu1 %v10636_v0  ;;  %v10715_v62 = vld [vmem:[%s14365_s1 + $0x1c00] ss:$16 sps:$4 sm:$0xff]   ;;  %v10726_v63 = vld [vmem:[%s14365_s1 + $0x1c2c] ss:$16 sps:$4 sm:$0xff]   ;;  %v8139_v0 = vcombine.high %v13854_v60, %v13859_v61 }
 0x34b   :  { %6943 = vmatpush1.bf16.msra.mxu0 %v10631_v1  ;;  %7631 = vmatpush1.bf16.msra.mxu1 %v10634_v2  ;;  %v10721_v1 = vld [vmem:[%s14365_s1 + $0x1c20] ss:$16 sps:$4 sm:$0xff]   ;;  %v10724_v2 = vld [vmem:[%s14365_s1 + $0x1c28] ss:$16 sps:$4 sm:$0xff]  }
 0x34c   :  { %6944 = vmatprep.subr.bf16.mxu0 %v10639_v3  ;;  %7632 = vmatprep.subr.bf16.mxu1 %v10642_v4  ;;  %v10729_v3 = vld [vmem:[%s14365_s1 + $0x1c44] ss:$16 sps:$4 sm:$0xff]   ;;  %v10732_v4 = vld [vmem:[%s14365_s1 + $0x1c4c] ss:$16 sps:$4 sm:$0xff]  }
 0x34f   :  { %6945 = vmatpush1.bf16.msra.mxu0 %v10637_v5  ;;  %7633 = vmatpush1.bf16.msra.mxu1 %v10640_v6  ;;  %v10727_v5 = vld [vmem:[%s14365_s1 + $0x1c40] ss:$16 sps:$4 sm:$0xff]   ;;  %v10730_v6 = vld [vmem:[%s14365_s1 + $0x1c48] ss:$16 sps:$4 sm:$0xff]  }
 0x350   :  { %6946 = vmatprep.subr.bf16.mxu0 %v10645_v7  ;;  %7634 = vmatprep.subr.bf16.mxu1 %v10648_v8  ;;  %v10735_v7 = vld [vmem:[%s14365_s1 + $0x1c64] ss:$16 sps:$4 sm:$0xff]   ;;  %v10738_v8 = vld [vmem:[%s14365_s1 + $0x1c6c] ss:$16 sps:$4 sm:$0xff]  }
 0x353   :  { %6947 = vmatpush1.bf16.msra.mxu0 %v10643_v9  ;;  %7635 = vmatpush1.bf16.msra.mxu1 %v10646_v10  ;;  %v10733_v9 = vld [vmem:[%s14365_s1 + $0x1c60] ss:$16 sps:$4 sm:$0xff]   ;;  %v10736_v10 = vld [vmem:[%s14365_s1 + $0x1c68] ss:$16 sps:$4 sm:$0xff]  }
 0x354   :  { %6948 = vmatprep.subr.bf16.mxu0 %v10651_v11  ;;  %7636 = vmatprep.subr.bf16.mxu1 %v10654_v12  ;;  %v10741_v11 = vld [vmem:[%s14365_s1 + $0x1c84] ss:$16 sps:$4 sm:$0xff]   ;;  %v10744_v12 = vld [vmem:[%s14365_s1 + $0x1c8c] ss:$16 sps:$4 sm:$0xff]  }
 0x357   :  { %6949 = vmatpush1.bf16.msra.mxu0 %v10649_v13  ;;  %7637 = vmatpush1.bf16.msra.mxu1 %v10652_v16  ;;  %v10739_v13 = vld [vmem:[%s14365_s1 + $0x1c80] ss:$16 sps:$4 sm:$0xff]   ;;  %v10742_v16 = vld [vmem:[%s14365_s1 + $0x1c88] ss:$16 sps:$4 sm:$0xff]  }
 0x358   :  { %6950 = vmatprep.subr.bf16.mxu0 %v10657_v17  ;;  %7638 = vmatprep.subr.bf16.mxu1 %v10660_v20  ;;  %v10747_v17 = vld [vmem:[%s14365_s1 + $0x1ca4] ss:$16 sps:$4 sm:$0xff]   ;;  %v10750_v20 = vld [vmem:[%s14365_s1 + $0x1cac] ss:$16 sps:$4 sm:$0xff]  }
 0x35b   :  { %6951 = vmatpush1.bf16.msra.mxu0 %v10655_v15  ;;  %7639 = vmatpush1.bf16.msra.mxu1 %v10658_v22  ;;  %v10745_v15 = vld [vmem:[%s14365_s1 + $0x1ca0] ss:$16 sps:$4 sm:$0xff]   ;;  %v10748_v22 = vld [vmem:[%s14365_s1 + $0x1ca8] ss:$16 sps:$4 sm:$0xff]  }
 0x35c   :  { %6952 = vmatprep.subr.bf16.mxu0 %v10663_v23  ;;  %7640 = vmatprep.subr.bf16.mxu1 %v10666_v18  ;;  %v10753_v23 = vld [vmem:[%s14365_s1 + $0x1cc4] ss:$16 sps:$4 sm:$0xff]   ;;  %v10756_v18 = vld [vmem:[%s14365_s1 + $0x1ccc] ss:$16 sps:$4 sm:$0xff]  }
 0x35f   :  { %6953 = vmatpush1.bf16.msra.mxu0 %v10661_v25  ;;  %7641 = vmatpush1.bf16.msra.mxu1 %v10664_v26  ;;  %v10751_v25 = vld [vmem:[%s14365_s1 + $0x1cc0] ss:$16 sps:$4 sm:$0xff]   ;;  %v10754_v26 = vld [vmem:[%s14365_s1 + $0x1cc8] ss:$16 sps:$4 sm:$0xff]  }
 0x360   :  { %6954 = vmatprep.subr.bf16.mxu0 %v10669_v27  ;;  %7642 = vmatprep.subr.bf16.mxu1 %v10672_v28  ;;  %v10759_v27 = vld [vmem:[%s14365_s1 + $0x1ce4] ss:$16 sps:$4 sm:$0xff]   ;;  %v10762_v28 = vld [vmem:[%s14365_s1 + $0x1cec] ss:$16 sps:$4 sm:$0xff]  }
 0x363   :  { %6955 = vmatpush1.bf16.msra.mxu0 %v10667_v29  ;;  %7643 = vmatpush1.bf16.msra.mxu1 %v10670_v30  ;;  %v10757_v29 = vld [vmem:[%s14365_s1 + $0x1ce0] ss:$16 sps:$4 sm:$0xff]   ;;  %v10760_v30 = vld [vmem:[%s14365_s1 + $0x1ce8] ss:$16 sps:$4 sm:$0xff]  }
 0x364   :  { %6956 = vmatprep.subr.bf16.mxu0 %v10675_v31  ;;  %7644 = vmatprep.subr.bf16.mxu1 %v10678_v32  ;;  %v10765_v31 = vld [vmem:[%s14365_s1 + $0x1d04] ss:$16 sps:$4 sm:$0xff]   ;;  %v10768_v32 = vld [vmem:[%s14365_s1 + $0x1d0c] ss:$16 sps:$4 sm:$0xff]  }
 0x367   :  { %6957 = vmatpush1.bf16.msra.mxu0 %v10673_v33  ;;  %7645 = vmatpush1.bf16.msra.mxu1 %v10676_v34  ;;  %v10763_v33 = vld [vmem:[%s14365_s1 + $0x1d00] ss:$16 sps:$4 sm:$0xff]   ;;  %v10766_v34 = vld [vmem:[%s14365_s1 + $0x1d08] ss:$16 sps:$4 sm:$0xff]  }
 0x368   :  { %6958 = vmatprep.subr.bf16.mxu0 %v10681_v35  ;;  %7646 = vmatprep.subr.bf16.mxu1 %v10684_v36  ;;  %v10771_v35 = vld [vmem:[%s14365_s1 + $0x1d24] ss:$16 sps:$4 sm:$0xff]   ;;  %v10774_v36 = vld [vmem:[%s14365_s1 + $0x1d2c] ss:$16 sps:$4 sm:$0xff]  }
 0x36b   :  { %6959 = vmatpush1.bf16.msra.mxu0 %v10679_v37  ;;  %7647 = vmatpush1.bf16.msra.mxu1 %v10682_v38  ;;  %v10769_v37 = vld [vmem:[%s14365_s1 + $0x1d20] ss:$16 sps:$4 sm:$0xff]   ;;  %v10772_v38 = vld [vmem:[%s14365_s1 + $0x1d28] ss:$16 sps:$4 sm:$0xff]  }
 0x36c   :  { %6960 = vmatprep.subr.bf16.mxu0 %v10687_v39  ;;  %7648 = vmatprep.subr.bf16.mxu1 %v10690_v40  ;;  %v10777_v39 = vld [vmem:[%s14365_s1 + $0x1d44] ss:$16 sps:$4 sm:$0xff]   ;;  %v10780_v40 = vld [vmem:[%s14365_s1 + $0x1d4c] ss:$16 sps:$4 sm:$0xff]  }
 0x36f   :  { %6961 = vmatpush1.bf16.msra.mxu0 %v10685_v41  ;;  %7649 = vmatpush1.bf16.msra.mxu1 %v10688_v42  ;;  %v10775_v41 = vld [vmem:[%s14365_s1 + $0x1d40] ss:$16 sps:$4 sm:$0xff]   ;;  %v10778_v42 = vld [vmem:[%s14365_s1 + $0x1d48] ss:$16 sps:$4 sm:$0xff]  }
 0x370   :  { %6962 = vmatprep.subr.bf16.mxu0 %v10693_v43  ;;  %7650 = vmatprep.subr.bf16.mxu1 %v10696_v44  ;;  %v10783_v43 = vld [vmem:[%s14365_s1 + $0x1d64] ss:$16 sps:$4 sm:$0xff]   ;;  %v10786_v44 = vld [vmem:[%s14365_s1 + $0x1d6c] ss:$16 sps:$4 sm:$0xff]  }
 0x373   :  { %6963 = vmatpush1.bf16.msra.mxu0 %v10691_v14  ;;  %7651 = vmatpush1.bf16.msra.mxu1 %v10694_v46  ;;  %v10781_v14 = vld [vmem:[%s14365_s1 + $0x1d60] ss:$16 sps:$4 sm:$0xff]   ;;  %v10784_v46 = vld [vmem:[%s14365_s1 + $0x1d68] ss:$16 sps:$4 sm:$0xff]  }
 0x374   :  { %6964 = vmatprep.subr.bf16.mxu0 %v10699_v19  ;;  %7652 = vmatprep.subr.bf16.mxu1 %v10702_v24  ;;  %v10789_v19 = vld [vmem:[%s14365_s1 + $0x1d84] ss:$16 sps:$4 sm:$0xff]   ;;  %v10792_v24 = vld [vmem:[%s14365_s1 + $0x1d8c] ss:$16 sps:$4 sm:$0xff]  }
 0x377   :  { %6965 = vmatpush1.bf16.msra.mxu0 %v10697_v47  ;;  %7653 = vmatpush1.bf16.msra.mxu1 %v10700_v50  ;;  %v10787_v47 = vld [vmem:[%s14365_s1 + $0x1d80] ss:$16 sps:$4 sm:$0xff]   ;;  %v10790_v50 = vld [vmem:[%s14365_s1 + $0x1d88] ss:$16 sps:$4 sm:$0xff]  }
 0x378   :  { %6966 = vmatprep.subr.bf16.mxu0 %v10705_v21  ;;  %7654 = vmatprep.subr.bf16.mxu1 %v10708_v45  ;;  %v10795_v21 = vld [vmem:[%s14365_s1 + $0x1da4] ss:$16 sps:$4 sm:$0xff]   ;;  %v10798_v45 = vld [vmem:[%s14365_s1 + $0x1dac] ss:$16 sps:$4 sm:$0xff]  }
 0x37b   :  { %6967 = vmatpush1.bf16.msra.mxu0 %v10703_v51  ;;  %7655 = vmatpush1.bf16.msra.mxu1 %v10706_v54  ;;  %v10793_v51 = vld [vmem:[%s14365_s1 + $0x1da0] ss:$16 sps:$4 sm:$0xff]   ;;  %v10796_v54 = vld [vmem:[%s14365_s1 + $0x1da8] ss:$16 sps:$4 sm:$0xff]  }
 0x37c   :  { %6968 = vmatprep.subr.bf16.mxu0 %v10711_v48  ;;  %7656 = vmatprep.subr.bf16.mxu1 %v10714_v49  ;;  %v10801_v48 = vld [vmem:[%s14365_s1 + $0x1dc4] ss:$16 sps:$4 sm:$0xff]   ;;  %v10804_v49 = vld [vmem:[%s14365_s1 + $0x1dcc] ss:$16 sps:$4 sm:$0xff]  }
 0x37f   :  { %6969 = vmatpush1.bf16.msra.mxu0 %v10709_v55  ;;  %7657 = vmatpush1.bf16.msra.mxu1 %v10712_v58  ;;  %v10799_v55 = vld [vmem:[%s14365_s1 + $0x1dc0] ss:$16 sps:$4 sm:$0xff]   ;;  %v10802_v58 = vld [vmem:[%s14365_s1 + $0x1dc8] ss:$16 sps:$4 sm:$0xff]  }
 0x380   :  { %6981 = vmatprep.subr.bf16.mxu0 %v10717_v52  ;;  %7669 = vmatprep.subr.bf16.mxu1 %v10720_v53  ;;  %v10807_v52 = vld [vmem:[%s14365_s1 + $0x1de4] ss:$16 sps:$4 sm:$0xff]   ;;  %v10810_v53 = vld [vmem:[%s14365_s1 + $0x1dec] ss:$16 sps:$4 sm:$0xff]  }
 0x382   :  { %6971 = vmatmul.mubr.bf16.vlgmr.msra.gmra.mrb[0].mxu0 %v8136_v59  ;;  %7659 = vmatmul.mubr.bf16.vlgmr.msra.gmra.mrb[0].mxu1 %v8136_v59  ;;  %v10805_v59 = vld [vmem:[%s14365_s1 + $0x1de0] ss:$16 sps:$4 sm:$0xff]  }
 0x383   :  { %6982 = vmatpush1.bf16.msra.mxu0 %v10715_v62  ;;  %7670 = vmatpush1.bf16.msra.mxu1 %v10718_v56  ;;  %v10808_v62 = vld [vmem:[%s14365_s1 + $0x1de8] ss:$16 sps:$4 sm:$0xff]   ;;  %v10813_v56 = vld [vmem:[%s14365_s1 + $0x1e04] ss:$16 sps:$4 sm:$0xff]  }
 0x384   :  { %6983 = vmatprep.subr.bf16.mxu0 %v10723_v57  ;;  %7671 = vmatprep.subr.bf16.mxu1 %v10726_v63  ;;  %v10816_v57 = vld [vmem:[%s14365_s1 + $0x1e0c] ss:$16 sps:$4 sm:$0xff]   ;;  %v8138_v63 = vcombine.low %v13854_v60, %v13859_v61  ;;  %v10814_v60 = vld [vmem:[%s14365_s1 + $0x1e08] ss:$16 sps:$4 sm:$0xff]   ;;  %v10819_v61 = vld [vmem:[%s14365_s1 + $0x1e24] ss:$16 sps:$4 sm:$0xff]  }
 0x385   :  { %7013 = vmatprep.mubr.bf16.mxu0 %v8139_v0  ;;  %7701 = vmatprep.mubr.bf16.mxu1 %v8139_v0  ;;  %v14060_v0 = vld [vmem:[%s14366_s0 + $0x78] sm:$0xff] }
 0x387   :  { %6984 = vmatpush1.bf16.msra.mxu0 %v10721_v1  ;;  %7672 = vmatpush1.bf16.msra.mxu1 %v10724_v2  ;;  %v14065_v1 = vld [vmem:[%s14366_s0 + $0xf8] sm:$0xff]  ;;  %v10811_v2 = vld [vmem:[%s14365_s1 + $0x1e00] ss:$16 sps:$4 sm:$0xff]  }
 0x388   :  { %6985 = vmatprep.subr.bf16.mxu0 %v10729_v3  ;;  %7673 = vmatprep.subr.bf16.mxu1 %v10732_v4  ;;  %v10822_v3 = vld [vmem:[%s14365_s1 + $0x1e2c] ss:$16 sps:$4 sm:$0xff]   ;;  %v8141_v4 = vcombine.high %v14060_v0, %v14065_v1 }
 0x38b   :  { %6986 = vmatpush1.bf16.msra.mxu0 %v10727_v5  ;;  %7674 = vmatpush1.bf16.msra.mxu1 %v10730_v6  ;;  %v10817_v5 = vld [vmem:[%s14365_s1 + $0x1e20] ss:$16 sps:$4 sm:$0xff]   ;;  %v10820_v6 = vld [vmem:[%s14365_s1 + $0x1e28] ss:$16 sps:$4 sm:$0xff]  }
 0x38c   :  { %6987 = vmatprep.subr.bf16.mxu0 %v10735_v7  ;;  %7675 = vmatprep.subr.bf16.mxu1 %v10738_v8  ;;  %v10825_v7 = vld [vmem:[%s14365_s1 + $0x1e44] ss:$16 sps:$4 sm:$0xff]   ;;  %v10828_v8 = vld [vmem:[%s14365_s1 + $0x1e4c] ss:$16 sps:$4 sm:$0xff]  }
 0x38f   :  { %6988 = vmatpush1.bf16.msra.mxu0 %v10733_v9  ;;  %7676 = vmatpush1.bf16.msra.mxu1 %v10736_v10  ;;  %v10823_v9 = vld [vmem:[%s14365_s1 + $0x1e40] ss:$16 sps:$4 sm:$0xff]   ;;  %v10826_v10 = vld [vmem:[%s14365_s1 + $0x1e48] ss:$16 sps:$4 sm:$0xff]  }
 0x390   :  { %6989 = vmatprep.subr.bf16.mxu0 %v10741_v11  ;;  %7677 = vmatprep.subr.bf16.mxu1 %v10744_v12  ;;  %v10831_v11 = vld [vmem:[%s14365_s1 + $0x1e64] ss:$16 sps:$4 sm:$0xff]   ;;  %v10834_v12 = vld [vmem:[%s14365_s1 + $0x1e6c] ss:$16 sps:$4 sm:$0xff]  }
 0x393   :  { %6990 = vmatpush1.bf16.msra.mxu0 %v10739_v13  ;;  %7678 = vmatpush1.bf16.msra.mxu1 %v10742_v16  ;;  %v10829_v13 = vld [vmem:[%s14365_s1 + $0x1e60] ss:$16 sps:$4 sm:$0xff]   ;;  %v10832_v16 = vld [vmem:[%s14365_s1 + $0x1e68] ss:$16 sps:$4 sm:$0xff]  }
 0x394   :  { %6991 = vmatprep.subr.bf16.mxu0 %v10747_v17  ;;  %7679 = vmatprep.subr.bf16.mxu1 %v10750_v20  ;;  %v10837_v17 = vld [vmem:[%s14365_s1 + $0x1e84] ss:$16 sps:$4 sm:$0xff]   ;;  %v10840_v20 = vld [vmem:[%s14365_s1 + $0x1e8c] ss:$16 sps:$4 sm:$0xff]  }
 0x397   :  { %6992 = vmatpush1.bf16.msra.mxu0 %v10745_v15  ;;  %7680 = vmatpush1.bf16.msra.mxu1 %v10748_v22  ;;  %v10835_v15 = vld [vmem:[%s14365_s1 + $0x1e80] ss:$16 sps:$4 sm:$0xff]   ;;  %v10838_v22 = vld [vmem:[%s14365_s1 + $0x1e88] ss:$16 sps:$4 sm:$0xff]  }
 0x398   :  { %6993 = vmatprep.subr.bf16.mxu0 %v10753_v23  ;;  %7681 = vmatprep.subr.bf16.mxu1 %v10756_v18  ;;  %v10843_v23 = vld [vmem:[%s14365_s1 + $0x1ea4] ss:$16 sps:$4 sm:$0xff]   ;;  %v10846_v18 = vld [vmem:[%s14365_s1 + $0x1eac] ss:$16 sps:$4 sm:$0xff]  }
 0x39b   :  { %6994 = vmatpush1.bf16.msra.mxu0 %v10751_v25  ;;  %7682 = vmatpush1.bf16.msra.mxu1 %v10754_v26  ;;  %v10841_v25 = vld [vmem:[%s14365_s1 + $0x1ea0] ss:$16 sps:$4 sm:$0xff]   ;;  %v10844_v26 = vld [vmem:[%s14365_s1 + $0x1ea8] ss:$16 sps:$4 sm:$0xff]  }
 0x39c   :  { %6995 = vmatprep.subr.bf16.mxu0 %v10759_v27  ;;  %7683 = vmatprep.subr.bf16.mxu1 %v10762_v28  ;;  %v10849_v27 = vld [vmem:[%s14365_s1 + $0x1ec4] ss:$16 sps:$4 sm:$0xff]   ;;  %v10852_v28 = vld [vmem:[%s14365_s1 + $0x1ecc] ss:$16 sps:$4 sm:$0xff]  }
 0x39f   :  { %6996 = vmatpush1.bf16.msra.mxu0 %v10757_v29  ;;  %7684 = vmatpush1.bf16.msra.mxu1 %v10760_v30  ;;  %v10847_v29 = vld [vmem:[%s14365_s1 + $0x1ec0] ss:$16 sps:$4 sm:$0xff]   ;;  %v10850_v30 = vld [vmem:[%s14365_s1 + $0x1ec8] ss:$16 sps:$4 sm:$0xff]  }
 0x3a0   :  { %6997 = vmatprep.subr.bf16.mxu0 %v10765_v31  ;;  %7685 = vmatprep.subr.bf16.mxu1 %v10768_v32  ;;  %v10855_v31 = vld [vmem:[%s14365_s1 + $0x1ee4] ss:$16 sps:$4 sm:$0xff]   ;;  %v10858_v32 = vld [vmem:[%s14365_s1 + $0x1eec] ss:$16 sps:$4 sm:$0xff]  }
 0x3a3   :  { %6998 = vmatpush1.bf16.msra.mxu0 %v10763_v33  ;;  %7686 = vmatpush1.bf16.msra.mxu1 %v10766_v34  ;;  %v10853_v33 = vld [vmem:[%s14365_s1 + $0x1ee0] ss:$16 sps:$4 sm:$0xff]   ;;  %v10856_v34 = vld [vmem:[%s14365_s1 + $0x1ee8] ss:$16 sps:$4 sm:$0xff]  }
 0x3a4   :  { %6999 = vmatprep.subr.bf16.mxu0 %v10771_v35  ;;  %7687 = vmatprep.subr.bf16.mxu1 %v10774_v36  ;;  %v10861_v35 = vld [vmem:[%s14365_s1 + $0x1f04] ss:$16 sps:$4 sm:$0xff]   ;;  %v10864_v36 = vld [vmem:[%s14365_s1 + $0x1f0c] ss:$16 sps:$4 sm:$0xff]  }
 0x3a7   :  { %7000 = vmatpush1.bf16.msra.mxu0 %v10769_v37  ;;  %7688 = vmatpush1.bf16.msra.mxu1 %v10772_v38  ;;  %v10859_v37 = vld [vmem:[%s14365_s1 + $0x1f00] ss:$16 sps:$4 sm:$0xff]   ;;  %v10862_v38 = vld [vmem:[%s14365_s1 + $0x1f08] ss:$16 sps:$4 sm:$0xff]  }
 0x3a8   :  { %7001 = vmatprep.subr.bf16.mxu0 %v10777_v39  ;;  %7689 = vmatprep.subr.bf16.mxu1 %v10780_v40  ;;  %v10867_v39 = vld [vmem:[%s14365_s1 + $0x1f24] ss:$16 sps:$4 sm:$0xff]   ;;  %v10870_v40 = vld [vmem:[%s14365_s1 + $0x1f2c] ss:$16 sps:$4 sm:$0xff]  }
 0x3ab   :  { %7002 = vmatpush1.bf16.msra.mxu0 %v10775_v41  ;;  %7690 = vmatpush1.bf16.msra.mxu1 %v10778_v42  ;;  %v10865_v41 = vld [vmem:[%s14365_s1 + $0x1f20] ss:$16 sps:$4 sm:$0xff]   ;;  %v10868_v42 = vld [vmem:[%s14365_s1 + $0x1f28] ss:$16 sps:$4 sm:$0xff]  }
 0x3ac   :  { %7003 = vmatprep.subr.bf16.mxu0 %v10783_v43  ;;  %7691 = vmatprep.subr.bf16.mxu1 %v10786_v44  ;;  %v10873_v43 = vld [vmem:[%s14365_s1 + $0x1f44] ss:$16 sps:$4 sm:$0xff]   ;;  %v10876_v44 = vld [vmem:[%s14365_s1 + $0x1f4c] ss:$16 sps:$4 sm:$0xff]  }
 0x3af   :  { %7004 = vmatpush1.bf16.msra.mxu0 %v10781_v14  ;;  %7692 = vmatpush1.bf16.msra.mxu1 %v10784_v46  ;;  %v10871_v14 = vld [vmem:[%s14365_s1 + $0x1f40] ss:$16 sps:$4 sm:$0xff]   ;;  %v10874_v46 = vld [vmem:[%s14365_s1 + $0x1f48] ss:$16 sps:$4 sm:$0xff]  }
 0x3b0   :  { %7005 = vmatprep.subr.bf16.mxu0 %v10789_v19  ;;  %7693 = vmatprep.subr.bf16.mxu1 %v10792_v24  ;;  %v10879_v19 = vld [vmem:[%s14365_s1 + $0x1f64] ss:$16 sps:$4 sm:$0xff]   ;;  %v10882_v24 = vld [vmem:[%s14365_s1 + $0x1f6c] ss:$16 sps:$4 sm:$0xff]  }
 0x3b3   :  { %7006 = vmatpush1.bf16.msra.mxu0 %v10787_v47  ;;  %7694 = vmatpush1.bf16.msra.mxu1 %v10790_v50  ;;  %v10877_v47 = vld [vmem:[%s14365_s1 + $0x1f60] ss:$16 sps:$4 sm:$0xff]   ;;  %v10880_v50 = vld [vmem:[%s14365_s1 + $0x1f68] ss:$16 sps:$4 sm:$0xff]  }
 0x3b4   :  { %7007 = vmatprep.subr.bf16.mxu0 %v10795_v21  ;;  %7695 = vmatprep.subr.bf16.mxu1 %v10798_v45  ;;  %v10885_v21 = vld [vmem:[%s14365_s1 + $0x1f84] ss:$16 sps:$4 sm:$0xff]   ;;  %v10888_v45 = vld [vmem:[%s14365_s1 + $0x1f8c] ss:$16 sps:$4 sm:$0xff]  }
 0x3b7   :  { %7008 = vmatpush1.bf16.msra.mxu0 %v10793_v51  ;;  %7696 = vmatpush1.bf16.msra.mxu1 %v10796_v54  ;;  %v10883_v51 = vld [vmem:[%s14365_s1 + $0x1f80] ss:$16 sps:$4 sm:$0xff]   ;;  %v10886_v54 = vld [vmem:[%s14365_s1 + $0x1f88] ss:$16 sps:$4 sm:$0xff]  }
 0x3b8   :  { %7009 = vmatprep.subr.bf16.mxu0 %v10801_v48  ;;  %7697 = vmatprep.subr.bf16.mxu1 %v10804_v49  ;;  %v10891_v48 = vld [vmem:[%s14365_s1 + $0x1fa4] ss:$16 sps:$4 sm:$0xff]   ;;  %v10894_v49 = vld [vmem:[%s14365_s1 + $0x1fac] ss:$16 sps:$4 sm:$0xff]  }
 0x3bb   :  { %7010 = vmatpush1.bf16.msra.mxu0 %v10799_v55  ;;  %7698 = vmatpush1.bf16.msra.mxu1 %v10802_v58  ;;  %v10889_v55 = vld [vmem:[%s14365_s1 + $0x1fa0] ss:$16 sps:$4 sm:$0xff]   ;;  %v10892_v58 = vld [vmem:[%s14365_s1 + $0x1fa8] ss:$16 sps:$4 sm:$0xff]  }
 0x3bc   :  { %7011 = vmatprep.subr.bf16.mxu0 %v10807_v52  ;;  %7699 = vmatprep.subr.bf16.mxu1 %v10810_v53  ;;  %v10897_v52 = vld [vmem:[%s14365_s1 + $0x1fc4] ss:$16 sps:$4 sm:$0xff]   ;;  %v10900_v53 = vld [vmem:[%s14365_s1 + $0x1fcc] ss:$16 sps:$4 sm:$0xff]  }
 0x3bf   :  { %7012 = vmatpush1.bf16.msra.mxu0 %v10805_v59  ;;  %7700 = vmatpush1.bf16.msra.mxu1 %v10808_v62  ;;  %v10895_v59 = vld [vmem:[%s14365_s1 + $0x1fc0] ss:$16 sps:$4 sm:$0xff]   ;;  %v10898_v62 = vld [vmem:[%s14365_s1 + $0x1fc8] ss:$16 sps:$4 sm:$0xff]  }
 0x3c0   :  { %7024 = vmatprep.subr.bf16.mxu0 %v10813_v56  ;;  %7712 = vmatprep.subr.bf16.mxu1 %v10816_v57  ;;  %v10903_v56 = vld [vmem:[%s14365_s1 + $0x1fe4] ss:$16 sps:$4 sm:$0xff]   ;;  %v10906_v57 = vld [vmem:[%s14365_s1 + $0x1fec] ss:$16 sps:$4 sm:$0xff]  }
 0x3c2   :  { %7014 = vmatmul.mubr.bf16.vlgmr.msra.gmra.mrb[0].mxu0 %v8138_v63  ;;  %7702 = vmatmul.mubr.bf16.vlgmr.msra.gmra.mrb[0].mxu1 %v8138_v63  ;;  %v10901_v63 = vld [vmem:[%s14365_s1 + $0x1fe0] ss:$16 sps:$4 sm:$0xff]  }
 0x3c3   :  { %7025 = vmatpush1.bf16.msra.mxu0 %v10811_v2  ;;  %7713 = vmatpush1.bf16.msra.mxu1 %v10814_v60  ;;  %v10904_v2 = vld [vmem:[%s14365_s1 + $0x1fe8] ss:$16 sps:$4 sm:$0xff]   ;;  %v10907_v60 = vld [vmem:[%s14367_s3 + $0x40] sm:$0xff]  }
 0x3c4   :  { %7026 = vmatprep.subr.bf16.mxu0 %v10819_v61  ;;  %7714 = vmatprep.subr.bf16.mxu1 %v10822_v3  ;;  %v10908_v61 = vld [vmem:[%s14367_s3 + $0xc0] sm:$0xff]   ;;  %v8140_v3 = vcombine.low %v14060_v0, %v14065_v1  ;;  %v10912_v0 = vld [vmem:[%s14367_s3 + $0xc8] sm:$0xff]  }
 0x3c5   :  { %7056 = vmatprep.mubr.bf16.mxu0 %v8141_v4  ;;  %7744 = vmatprep.mubr.bf16.mxu1 %v8141_v4  ;;  %v10909_v4 = vld [vmem:[%s14367_s3] sm:$0xff]   ;;  %v10913_v1 = vld [vmem:[%s14367_s3 + $0x8] sm:$0xff]  }
 0x3c7   :  { %7027 = vmatpush1.bf16.msra.mxu0 %v10817_v5  ;;  %7715 = vmatpush1.bf16.msra.mxu1 %v10820_v6  ;;  %v10910_v5 = vld [vmem:[%s14367_s3 + $0x80] sm:$0xff]   ;;  %v10911_v6 = vld [vmem:[%s14367_s3 + $0x48] sm:$0xff]  }
 0x3c8   :  { %7028 = vmatprep.subr.bf16.mxu0 %v10825_v7  ;;  %7716 = vmatprep.subr.bf16.mxu1 %v10828_v8  ;;  %v10914_v7 = vld [vmem:[%s14367_s3 + $0x88] sm:$0xff]   ;;  %v10915_v8 = vld [vmem:[%s14367_s3 + $0x50] sm:$0xff]  }
 0x3cb   :  { %7029 = vmatpush1.bf16.msra.mxu0 %v10823_v9  ;;  %7717 = vmatpush1.bf16.msra.mxu1 %v10826_v10  ;;  %v10916_v9 = vld [vmem:[%s14367_s3 + $0xd0] sm:$0xff]  }
 0x3cc   :  { %7030 = vmatprep.subr.bf16.mxu0 %v10831_v11  ;;  %7718 = vmatprep.subr.bf16.mxu1 %v10834_v12  ;;  %v10917_v10 = vld [vmem:[%s14367_s3 + $0x10] sm:$0xff]   ;;  %v10919_v12 = vld [vmem:[%s14367_s3 + $0x58] sm:$0xff]  }
 0x3cd   :  { %v10918_v11 = vld [vmem:[%s14367_s3 + $0x90] sm:$0xff]  }
 0x3cf   :  { %7031 = vmatpush1.bf16.msra.mxu0 %v10829_v13  ;;  %7719 = vmatpush1.bf16.msra.mxu1 %v10832_v16  ;;  %v10920_v13 = vld [vmem:[%s14367_s3 + $0xd8] sm:$0xff]  }
 0x3d0   :  { %7032 = vmatprep.subr.bf16.mxu0 %v10837_v17  ;;  %7720 = vmatprep.subr.bf16.mxu1 %v10840_v20  ;;  %v10921_v16 = vld [vmem:[%s14367_s3 + $0x18] sm:$0xff]   ;;  %v10923_v20 = vld [vmem:[%s14367_s3 + $0x60] sm:$0xff]  }
 0x3d1   :  { %v10922_v17 = vld [vmem:[%s14367_s3 + $0x98] sm:$0xff]  }
 0x3d3   :  { %7033 = vmatpush1.bf16.msra.mxu0 %v10835_v15  ;;  %7721 = vmatpush1.bf16.msra.mxu1 %v10838_v22  ;;  %v10924_v15 = vld [vmem:[%s14367_s3 + $0xe0] sm:$0xff]  }
 0x3d4   :  { %7034 = vmatprep.subr.bf16.mxu0 %v10843_v23  ;;  %7722 = vmatprep.subr.bf16.mxu1 %v10846_v18  ;;  %v10925_v22 = vld [vmem:[%s14367_s3 + $0x20] sm:$0xff]   ;;  %v10927_v18 = vld [vmem:[%s14367_s3 + $0x68] sm:$0xff]  }
 0x3d5   :  { %v10926_v23 = vld [vmem:[%s14367_s3 + $0xa0] sm:$0xff]  }
 0x3d7   :  { %7035 = vmatpush1.bf16.msra.mxu0 %v10841_v25  ;;  %7723 = vmatpush1.bf16.msra.mxu1 %v10844_v26  ;;  %v10928_v25 = vld [vmem:[%s14367_s3 + $0xe8] sm:$0xff]  }
 0x3d8   :  { %7036 = vmatprep.subr.bf16.mxu0 %v10849_v27  ;;  %7724 = vmatprep.subr.bf16.mxu1 %v10852_v28  ;;  %v10929_v26 = vld [vmem:[%s14367_s3 + $0x28] sm:$0xff]   ;;  %v10931_v28 = vld [vmem:[%s14367_s3 + $0x70] sm:$0xff]  }
 0x3d9   :  { %v10930_v27 = vld [vmem:[%s14367_s3 + $0xa8] sm:$0xff]  }
 0x3db   :  { %7037 = vmatpush1.bf16.msra.mxu0 %v10847_v29  ;;  %7725 = vmatpush1.bf16.msra.mxu1 %v10850_v30  ;;  %v10932_v29 = vld [vmem:[%s14367_s3 + $0xf0] sm:$0xff]  }
 0x3dc   :  { %7038 = vmatprep.subr.bf16.mxu0 %v10855_v31  ;;  %7726 = vmatprep.subr.bf16.mxu1 %v10858_v32  ;;  %v10933_v30 = vld [vmem:[%s14367_s3 + $0x30] sm:$0xff]   ;;  %v10935_v32 = vld [vmem:[%s14367_s3 + $0x78] sm:$0xff]  }
 0x3dd   :  { %v10934_v31 = vld [vmem:[%s14367_s3 + $0xb0] sm:$0xff]  }
 0x3df   :  { %7039 = vmatpush1.bf16.msra.mxu0 %v10853_v33  ;;  %7727 = vmatpush1.bf16.msra.mxu1 %v10856_v34  ;;  %v10936_v33 = vld [vmem:[%s14367_s3 + $0xf8] sm:$0xff]  }
 0x3e0   :  { %7040 = vmatprep.subr.bf16.mxu0 %v10861_v35  ;;  %7728 = vmatprep.subr.bf16.mxu1 %v10864_v36  ;;  %v10937_v34 = vld [vmem:[%s14367_s3 + $0x38] sm:$0xff]   ;;  %v1079_v36 = vlaneseq }
 0x3e1   :  { %v10938_v35 = vld [vmem:[%s14367_s3 + $0xb8] sm:$0xff]  }
 0x3e3   :  { %7041 = vmatpush1.bf16.msra.mxu0 %v10859_v37  ;;  %7729 = vmatpush1.bf16.msra.mxu1 %v10862_v38  ;;  %v1080_v37 = vshrl.u32 %v1079_v36, 7 }
 0x3e4   :  { %7042 = vmatprep.subr.bf16.mxu0 %v10867_v39  ;;  %7730 = vmatprep.subr.bf16.mxu1 %v10870_v40  ;;  %v1077_v40 = vld [vmem:[%s14368_s2] sm:$0xf] }
 0x3e5   :  { %v1081_v38 = vsub.s32 0, %v1080_v37  ;;  %v1089_v39 = vsub.s32 2, %v1080_v37 }
 0x3e7   :  { %7043 = vmatpush1.bf16.msra.mxu0 %v10865_v41  ;;  %7731 = vmatpush1.bf16.msra.mxu1 %v10868_v42  ;;  %v1085_v41 = vsub.s32 1, %v1080_v37  ;;  %v1093_v42 = vsub.s32 3, %v1080_v37 }
 0x3e8   :  { %7044 = vmatprep.subr.bf16.mxu0 %v10873_v43  ;;  %7732 = vmatprep.subr.bf16.mxu1 %v10876_v44  ;;  %v1082_v43 = vrot.slane %v1077_v40, %v1081_v38  ;;  %v1090_v44 = vrot.slane %v1077_v40, %v1089_v39 }
 0x3eb   :  { %7045 = vmatpush1.bf16.msra.mxu0 %v10871_v14  ;;  %7733 = vmatpush1.bf16.msra.mxu1 %v10874_v46 }
 0x3ec   :  { %7046 = vmatprep.subr.bf16.mxu0 %v10879_v19  ;;  %7734 = vmatprep.subr.bf16.mxu1 %v10882_v24  ;;  %v1086_v19 = vrot.slane %v1077_v40, %v1085_v41  ;;  %v1094_v24 = vrot.slane %v1077_v40, %v1093_v42 }
 0x3ef   :  { %7047 = vmatpush1.bf16.msra.mxu0 %v10877_v47  ;;  %7735 = vmatpush1.bf16.msra.mxu1 %v10880_v50 }
 0x3f0   :  { %7048 = vmatprep.subr.bf16.mxu0 %v10885_v21  ;;  %7736 = vmatprep.subr.bf16.mxu1 %v10888_v45 }
 0x3f3   :  { %7049 = vmatpush1.bf16.msra.mxu0 %v10883_v51  ;;  %7737 = vmatpush1.bf16.msra.mxu1 %v10886_v54 }
 0x3f4   :  { %7050 = vmatprep.subr.bf16.mxu0 %v10891_v48  ;;  %7738 = vmatprep.subr.bf16.mxu1 %v10894_v49 }
 0x3f7   :  { %7051 = vmatpush1.bf16.msra.mxu0 %v10889_v55  ;;  %7739 = vmatpush1.bf16.msra.mxu1 %v10892_v58 }
 0x3f8   :  { %7052 = vmatprep.subr.bf16.mxu0 %v10897_v52  ;;  %7740 = vmatprep.subr.bf16.mxu1 %v10900_v53 }
 0x3fb   :  { %7053 = vmatpush1.bf16.msra.mxu0 %v10895_v59  ;;  %7741 = vmatpush1.bf16.msra.mxu1 %v10898_v62 }
 0x3fc   :  { %7054 = vmatprep.subr.bf16.mxu0 %v10903_v56  ;;  %7742 = vmatprep.subr.bf16.mxu1 %v10906_v57 }
 0x3ff   :  { %7055 = vmatpush1.bf16.msra.mxu0 %v10901_v63  ;;  %7743 = vmatpush1.bf16.msra.mxu1 %v10904_v2 }
 0x400   :  { %9199 = vmatprep.subr.bf16.mxu0 %v10907_v60  ;;  %9221 = vmatprep.subr.bf16.mxu1 %v10908_v61 }
 0x402   :  { %7057 = vmatmul.mubr.bf16.vlgmr.msra.gmra.mrb[0].mxu0 %v8140_v3  ;;  %7745 = vmatmul.mubr.bf16.vlgmr.msra.gmra.mrb[0].mxu1 %v8140_v3  ;;  %v9166_v3 = vld [vmem:[%s14369_s4] ss:$0 sm:$0xff] }
 0x403   :  { %9200 = vmatpush3.bf16.msra.mxu0 %v10909_v4  ;;  %9222 = vmatpush3.bf16.msra.mxu1 %v10910_v5 }
 0x404   :  { %9201 = vmatprep.subr.bf16.mxu0 %v10911_v6  ;;  %9223 = vmatprep.subr.bf16.mxu1 %v10912_v0 }
 0x407   :  { %9202 = vmatpush3.bf16.msra.mxu0 %v10913_v1  ;;  %9224 = vmatpush3.bf16.msra.mxu1 %v10914_v7 }
 0x408   :  { %9203 = vmatprep.subr.bf16.mxu0 %v10915_v8  ;;  %9225 = vmatprep.subr.bf16.mxu1 %v10916_v9 }
 0x40b   :  { %9204 = vmatpush3.bf16.msra.mxu0 %v10917_v10  ;;  %9226 = vmatpush3.bf16.msra.mxu1 %v10918_v11 }
 0x40c   :  { %9205 = vmatprep.subr.bf16.mxu0 %v10919_v12  ;;  %9227 = vmatprep.subr.bf16.mxu1 %v10920_v13 }
 0x40f   :  { %9206 = vmatpush3.bf16.msra.mxu0 %v10921_v16  ;;  %9228 = vmatpush3.bf16.msra.mxu1 %v10922_v17 }
 0x410   :  { %9207 = vmatprep.subr.bf16.mxu0 %v10923_v20  ;;  %9229 = vmatprep.subr.bf16.mxu1 %v10924_v15 }
 0x413   :  { %9208 = vmatpush3.bf16.msra.mxu0 %v10925_v22  ;;  %9230 = vmatpush3.bf16.msra.mxu1 %v10926_v23 }
 0x414   :  { %9209 = vmatprep.subr.bf16.mxu0 %v10927_v18  ;;  %9231 = vmatprep.subr.bf16.mxu1 %v10928_v25 }
 0x417   :  { %9210 = vmatpush3.bf16.msra.mxu0 %v10929_v26  ;;  %9232 = vmatpush3.bf16.msra.mxu1 %v10930_v27 }
 0x418   :  { %9211 = vmatprep.subr.bf16.mxu0 %v10931_v28  ;;  %9233 = vmatprep.subr.bf16.mxu1 %v10932_v29 }
 0x41b   :  { %9212 = vmatpush3.bf16.msra.mxu0 %v10933_v30  ;;  %9234 = vmatpush3.bf16.msra.mxu1 %v10934_v31 }
 0x41c   :  { %9213 = vmatprep.subr.bf16.mxu0 %v10935_v32  ;;  %9235 = vmatprep.subr.bf16.mxu1 %v10936_v33 }
 0x41f   :  { %9214 = vmatpush3.bf16.msra.mxu0 %v10937_v34  ;;  %9236 = vmatpush3.bf16.msra.mxu1 %v10938_v35 }
 0x4d5   :  { %v7058_v14 = vpop.f32.mrb[0].mxu0  ;;  %v7746_v46 = vpop.f32.mrb[0].mxu1 }
 0x4d6   :  { %v7060_v47 = vpop.f32.mrb[1].mxu0  ;;  %v7748_v50 = vpop.f32.mrb[1].mxu1  ;;  %v9243_v51 = vadd.f32 %v7058_v14, %v1082_v43  ;;  %v9247_v54 = vadd.f32 %v7746_v46, %v1090_v44 }
 0x4d7   :  { %v7062_v21 = vpop.f32.mrb[2].mxu0  ;;  %v7750_v45 = vpop.f32.mrb[2].mxu1  ;;  %v9244_v52 = vadd.f32 %v7060_v47, %v1086_v19  ;;  %v9248_v53 = vadd.f32 %v7748_v50, %v1094_v24 }
 0x4d8   :  { %v9245_v48 = vadd.f32 %v7062_v21, %v1082_v43  ;;  %v9249_v49 = vadd.f32 %v7750_v45, %v1090_v44  ;;  %v7064_v55 = vpop.f32.mrb[3].mxu0  ;;  %v7752_v58 = vpop.f32.mrb[3].mxu1 }
 0x4d9   :  { %v9246_v59 = vadd.f32 %v7064_v55, %v1086_v19  ;;  %v9250_v62 = vadd.f32 %v7752_v58, %v1094_v24 }
 0x4da   :  { %v7755_v56 = vpack.c.bf16 %v9245_v48, %v9243_v51  ;;  %v7757_v57 = vpack.c.bf16 %v9249_v49, %v9247_v54 }
 0x4db   :  { %v7756_v63 = vpack.c.bf16 %v9246_v59, %v9244_v52  ;;  %v7758_v2 = vpack.c.bf16 %v9250_v62, %v9248_v53 }
 0x4dd   :  { %8054 = vmatprep.mubr.bf16.mxu0 %v7756_v63  ;;  %8095 = vmatprep.mubr.bf16.mxu1 %v7758_v2 }
 0x4de   :  { %8055 = vmatmul.mubr.bf16.vlgmr.msra.gmra.mrb[4].mxu0 %v7755_v56  ;;  %8096 = vmatmul.mubr.bf16.vlgmr.msra.gmra.mrb[4].mxu1 %v7757_v57 }
 0x5b1   :  { %v9215_v60 = vpop.f32.mrb[4].mxu0  ;;  %v9237_v61 = vpop.f32.mrb[4].mxu1 }
 0x5b2   :  { %v9216_v4 = vpop.f32.mrb[5].mxu0  ;;  %v9238_v5 = vpop.f32.mrb[5].mxu1 }
 0x5b3   :  { %v9217_v6 = vadd.f32 %v9216_v4, %v9215_v60  ;;  %v9239_v0 = vadd.f32 %v9238_v5, %v9237_v61  ;;  %v9218_v1 = vpop.f32.mrb[6].mxu0  ;;  %v9240_v7 = vpop.f32.mrb[6].mxu1 }
 0x5b4   :  { %v9219_v8 = vpop.f32.mrb[7].mxu0  ;;  %v9241_v9 = vpop.f32.mrb[7].mxu1 }
 0x5b5   :  { %v8057_v10 = vadd.f32 %v9217_v6, %v9166_v3  ;;  %v9220_v11 = vadd.f32 %v9219_v8, %v9218_v1  ;;  %v9242_v12 = vadd.f32 %v9241_v9, %v9240_v7 }
 0x5b7   :  { %v8098_v13 = vadd.f32 %v9239_v0, %v8057_v10  ;;  %v8060_v16 = vadd.f32 %v9220_v11, %v9166_v3 }
 0x5b9   :  { %8104 = vst [vmem:[%s14370_s5] sm:$0xff] %v8098_v13  ;;  %v8101_v17 = vadd.f32 %v9242_v12, %v8060_v16 }
 0x5bb   :  { %8105 = vst [vmem:[%s14370_s5 + $0x8] sm:$0xff] %v8101_v17 }

</bundles_post_ra>
